<compile_context>
chip_gen: v7x
topology: tpu7x:2x2x1
jax: 0.10.0
libtpu: 0.0.40
codegen_flags: <defaults>
</compile_context>

<pallas_src>
import math
import jax
import jax.numpy as jnp
from jax.experimental import pallas as pl
from jax.experimental.pallas import tpu as pltpu


def _round_up(x, m):
    return ((x + m - 1) // m) * m


def make_siren_kernel(apply_sine):
    """apply_sine: tuple of bool per layer (True => Sine, False => Identity).
    Kernel works on transposed (features, batch_tile) activations."""

    def kernel(*refs):
        x_ref = refs[0]
        o_ref = refs[-1]
        param_refs = refs[1:-1]              # alternating (W, bias) refs
        n_layers = len(param_refs) // 2

        h = x_ref[...].astype(jnp.float32)   # (din, Bt), batch on lanes

        for li in range(n_layers):
            w = param_refs[2 * li][...]      # (dout, din), w0 already folded in
            b = param_refs[2 * li + 1][...]  # (dout, 1)
            din = w.shape[1]
            if li == 0 and din <= 4:
                # Tiny contraction dim: broadcast-multiply-adds on the VPU
                # instead of a padded (near-empty) MXU pass.
                acc = b + w[:, 0:1] * h[0:1, :]
                for k in range(1, din):
                    acc = acc + w[:, k:k + 1] * h[k:k + 1, :]
                z = acc
            else:
                z = jnp.dot(w, h, preferred_element_type=jnp.float32) + b
            h = jnp.sin(z) if apply_sine[li] else z
            # dropout=0.0 and mods=None -> no-op in forward

        o_ref[...] = h.astype(o_ref.dtype)

    return kernel


def siren_net_forward(x, params, layer_cfg, tile_n=512):
    """x: (N, dim_in). params: list of (W, b) with W (dout, din), b (dout,).
    layer_cfg: tuple of (w0, apply_sine) per layer (incl. last layer)."""
    N, dim_in = x.shape
    dim_out = params[-1][0].shape[0]
    dtype = x.dtype

    # Batch tile: multiple of 256 (v6e/v7x MXU aligned; also 128-aligned for
    # v5e), never larger than needed for small N.
    tile_n = max(256, _round_up(min(tile_n, N), 256))
    n_pad = _round_up(N, tile_n)

    # Lane-dense layout: batch on the 128-lane axis (layout plumbing only).
    x_t = jnp.pad(x.T.astype(dtype), ((0, 0), (0, n_pad - N)))   # (dim_in, n_pad)

    inputs = [x_t]
    in_specs = [pl.BlockSpec((dim_in, tile_n), lambda i: (0, i))]
    apply_sine = []
    for (W, b), (w0, sine) in zip(params, layer_cfg):
        if sine:
            # Fold w0 into the affine params (parameter fold, done once).
            W = w0 * W
            b = w0 * b
        Wf = W.astype(jnp.float32)                      # (dout, din)
        b2 = b.reshape(-1, 1).astype(jnp.float32)       # (dout, 1)
        inputs.append(Wf)
        inputs.append(b2)
        in_specs.append(pl.BlockSpec(Wf.shape, lambda i: (0, 0)))
        in_specs.append(pl.BlockSpec(b2.shape, lambda i: (0, 0)))
        apply_sine.append(bool(sine))

    kernel = make_siren_kernel(tuple(apply_sine))

    out_t = pl.pallas_call(
        kernel,
        out_shape=jax.ShapeDtypeStruct((dim_out, n_pad), dtype),
        grid=(n_pad // tile_n,),
        in_specs=in_specs,
        out_specs=pl.BlockSpec((dim_out, tile_n), lambda i: (0, i)),
        compiler_params=pltpu.CompilerParams(
            dimension_semantics=("parallel",)),
    )(*inputs)

    return out_t[:, :N].T                                # back to (N, dim_out)


def init_siren_params(key, dim_in, dim_hidden, dim_out, num_layers,
                      w0=1.0, w0_initial=30.0, c=6.0):
    """Deterministic init matching Siren.init_ (uniform(-w_std, w_std))."""
    params = []
    layer_cfg = []
    din = dim_in
    for ind in range(num_layers):
        is_first = ind == 0
        layer_w0 = w0_initial if is_first else w0
        w_std = (1.0 / din) if is_first else (math.sqrt(c / din) / layer_w0)
        key, k_w, k_b = jax.random.split(key, 3)
        W = jax.random.uniform(k_w, (dim_hidden, din),
                               minval=-w_std, maxval=w_std, dtype=jnp.float32)
        b = jax.random.uniform(k_b, (dim_hidden,),
                               minval=-w_std, maxval=w_std, dtype=jnp.float32)
        params.append((W, b))
        layer_cfg.append((layer_w0, True))     # hidden layer: Sine(w0)
        din = dim_hidden

    # last layer (activation = Identity since final_activation is None)
    w_std = math.sqrt(c / din) / w0
    key, k_w, k_b = jax.random.split(key, 3)
    W = jax.random.uniform(k_w, (dim_out, din),
                           minval=-w_std, maxval=w_std, dtype=jnp.float32)
    b = jax.random.uniform(k_b, (dim_out,),
                           minval=-w_std, maxval=w_std, dtype=jnp.float32)
    params.append((W, b))
    layer_cfg.append((w0, False))

    return params, tuple(layer_cfg)


def siren_net_reference(x, params, layer_cfg):
    """Pure-JAX reference identical to the PyTorch forward (eval mode)."""
    h = x
    for (W, b), (w0, apply_sine) in zip(params, layer_cfg):
        h = h @ W.T + b
        if apply_sine:
            h = jnp.sin(w0 * h)
    return h


if __name__ == "__main__":
    # Coordinates (N, dim_in) -> (N, dim_out).  N chosen so the batch grid
    # has >= 4 steps at tile_n=512 (keeps both v7x TensorCores busy) while
    # staying small.
    dim_in, dim_hidden, dim_out, num_layers = 2, 32, 3, 3
    N = 2048

    key = jax.random.PRNGKey(0)
    key, kx = jax.random.split(key)
    x = jax.random.uniform(kx, (N, dim_in), minval=-1.0, maxval=1.0,
                           dtype=jnp.float32)

    params, layer_cfg = init_siren_params(
        key, dim_in, dim_hidden, dim_out, num_layers,
        w0=1.0, w0_initial=30.0)

    out = siren_net_forward(x, params, layer_cfg, tile_n=512)
    out = jax.block_until_ready(out)

    ref = siren_net_reference(x, params, layer_cfg)
    assert out.shape == (N, dim_out)
    assert jnp.allclose(out, ref, atol=1e-4, rtol=1e-4), "mismatch vs reference"

    # Also exercise a non-tile-multiple N to validate the cdiv/pad path.
    out_odd = siren_net_forward(x[:300], params, layer_cfg, tile_n=512)
    out_odd = jax.block_until_ready(out_odd)
    assert out_odd.shape == (300, dim_out)
    assert jnp.allclose(out_odd, ref[:300], atol=1e-4, rtol=1e-4)

    print("KERNEL_OK")
</pallas_src>

<mosaic_0001>
module attributes {stable_mosaic.version = 11 : i64} {
  func.func @kernel(%arg0: i32, %arg1: memref<2x512xf32, #tpu.memory_space<vmem>>, %arg2: memref<32x2xf32, #tpu.memory_space<vmem>>, %arg3: memref<32x1xf32, #tpu.memory_space<vmem>>, %arg4: memref<32x32xf32, #tpu.memory_space<vmem>>, %arg5: memref<32x1xf32, #tpu.memory_space<vmem>>, %arg6: memref<32x32xf32, #tpu.memory_space<vmem>>, %arg7: memref<32x1xf32, #tpu.memory_space<vmem>>, %arg8: memref<3x32xf32, #tpu.memory_space<vmem>>, %arg9: memref<3x1xf32, #tpu.memory_space<vmem>>, %arg10: memref<3x512xf32, #tpu.memory_space<vmem>>) attributes {dimension_semantics = [#tpu.dimension_semantics<parallel>], iteration_bounds = array<i64: 4>, scalar_prefetch = 0 : i64, scratch_operands = 0 : i64, tpu.core_type = #tpu.core_type<tc>, window_params = [{transform_indices = @transform_0, window_bounds = array<i64: 2, 512>}, {pipeline_mode = #tpu.pipeline_mode<synchronous>, transform_indices = @transform_1, window_bounds = array<i64: 32, 2>}, {pipeline_mode = #tpu.pipeline_mode<synchronous>, transform_indices = @transform_2, window_bounds = array<i64: 32, 1>}, {pipeline_mode = #tpu.pipeline_mode<synchronous>, transform_indices = @transform_3, window_bounds = array<i64: 32, 32>}, {pipeline_mode = #tpu.pipeline_mode<synchronous>, transform_indices = @transform_4, window_bounds = array<i64: 32, 1>}, {pipeline_mode = #tpu.pipeline_mode<synchronous>, transform_indices = @transform_5, window_bounds = array<i64: 32, 32>}, {pipeline_mode = #tpu.pipeline_mode<synchronous>, transform_indices = @transform_6, window_bounds = array<i64: 32, 1>}, {pipeline_mode = #tpu.pipeline_mode<synchronous>, transform_indices = @transform_7, window_bounds = array<i64: 3, 32>}, {pipeline_mode = #tpu.pipeline_mode<synchronous>, transform_indices = @transform_8, window_bounds = array<i64: 3, 1>}, {transform_indices = @transform_9, window_bounds = array<i64: 3, 512>}]} {
    %c0 = arith.constant 0 : index
    %c0_0 = arith.constant 0 : index
    %0 = vector.load %arg1[%c0, %c0_0] : memref<2x512xf32, #tpu.memory_space<vmem>>, vector<2x512xf32>
    %c0_1 = arith.constant 0 : index
    %c0_2 = arith.constant 0 : index
    %1 = vector.load %arg2[%c0_1, %c0_2] : memref<32x2xf32, #tpu.memory_space<vmem>>, vector<32x2xf32>
    %c0_3 = arith.constant 0 : index
    %c0_4 = arith.constant 0 : index
    %2 = vector.load %arg3[%c0_3, %c0_4] : memref<32x1xf32, #tpu.memory_space<vmem>>, vector<32x1xf32>
    %3 = vector.extract_strided_slice %1 {offsets = [0, 0], sizes = [32, 1], strides = [1, 1]} : vector<32x2xf32> to vector<32x1xf32>
    %4 = vector.extract_strided_slice %0 {offsets = [0, 0], sizes = [1, 512], strides = [1, 1]} : vector<2x512xf32> to vector<1x512xf32>
    %5 = vector.broadcast %3 : vector<32x1xf32> to vector<32x512xf32>
    %6 = vector.broadcast %4 : vector<1x512xf32> to vector<32x512xf32>
    %7 = arith.mulf %5, %6 : vector<32x512xf32>
    %8 = vector.broadcast %2 : vector<32x1xf32> to vector<32x512xf32>
    %9 = arith.addf %8, %7 : vector<32x512xf32>
    %10 = vector.extract_strided_slice %1 {offsets = [0, 1], sizes = [32, 1], strides = [1, 1]} : vector<32x2xf32> to vector<32x1xf32>
    %11 = vector.extract_strided_slice %0 {offsets = [1, 0], sizes = [1, 512], strides = [1, 1]} : vector<2x512xf32> to vector<1x512xf32>
    %12 = vector.broadcast %10 : vector<32x1xf32> to vector<32x512xf32>
    %13 = vector.broadcast %11 : vector<1x512xf32> to vector<32x512xf32>
    %14 = arith.mulf %12, %13 : vector<32x512xf32>
    %15 = arith.addf %9, %14 : vector<32x512xf32>
    %16 = math.sin %15 : vector<32x512xf32>
    %c0_5 = arith.constant 0 : index
    %c0_6 = arith.constant 0 : index
    %17 = vector.load %arg4[%c0_5, %c0_6] : memref<32x32xf32, #tpu.memory_space<vmem>>, vector<32x32xf32>
    %c0_7 = arith.constant 0 : index
    %c0_8 = arith.constant 0 : index
    %18 = vector.load %arg5[%c0_7, %c0_8] : memref<32x1xf32, #tpu.memory_space<vmem>>, vector<32x1xf32>
    %cst = arith.constant dense<0.000000e+00> : vector<32x512xf32>
    %19 = tpu.matmul %17, %16, %cst {dimension_numbers = #tpu.dot_dimension_numbers<[1], [0], [0], [1], [0, 0, 1, 1], [], []>} : vector<32x32xf32>, vector<32x512xf32>, vector<32x512xf32> -> vector<32x512xf32>
    %20 = vector.broadcast %18 : vector<32x1xf32> to vector<32x512xf32>
    %21 = arith.addf %19, %20 : vector<32x512xf32>
    %22 = math.sin %21 : vector<32x512xf32>
    %c0_9 = arith.constant 0 : index
    %c0_10 = arith.constant 0 : index
    %23 = vector.load %arg6[%c0_9, %c0_10] : memref<32x32xf32, #tpu.memory_space<vmem>>, vector<32x32xf32>
    %c0_11 = arith.constant 0 : index
    %c0_12 = arith.constant 0 : index
    %24 = vector.load %arg7[%c0_11, %c0_12] : memref<32x1xf32, #tpu.memory_space<vmem>>, vector<32x1xf32>
    %cst_13 = arith.constant dense<0.000000e+00> : vector<32x512xf32>
    %25 = tpu.matmul %23, %22, %cst_13 {dimension_numbers = #tpu.dot_dimension_numbers<[1], [0], [0], [1], [0, 0, 1, 1], [], []>} : vector<32x32xf32>, vector<32x512xf32>, vector<32x512xf32> -> vector<32x512xf32>
    %26 = vector.broadcast %24 : vector<32x1xf32> to vector<32x512xf32>
    %27 = arith.addf %25, %26 : vector<32x512xf32>
    %28 = math.sin %27 : vector<32x512xf32>
    %c0_14 = arith.constant 0 : index
    %c0_15 = arith.constant 0 : index
    %29 = vector.load %arg8[%c0_14, %c0_15] : memref<3x32xf32, #tpu.memory_space<vmem>>, vector<3x32xf32>
    %c0_16 = arith.constant 0 : index
    %c0_17 = arith.constant 0 : index
    %30 = vector.load %arg9[%c0_16, %c0_17] : memref<3x1xf32, #tpu.memory_space<vmem>>, vector<3x1xf32>
    %cst_18 = arith.constant dense<0.000000e+00> : vector<3x512xf32>
    %31 = tpu.matmul %29, %28, %cst_18 {dimension_numbers = #tpu.dot_dimension_numbers<[1], [0], [0], [1], [0, 0, 1, 1], [], []>} : vector<3x32xf32>, vector<32x512xf32>, vector<3x512xf32> -> vector<3x512xf32>
    %32 = vector.broadcast %30 : vector<3x1xf32> to vector<3x512xf32>
    %33 = arith.addf %31, %32 : vector<3x512xf32>
    %c0_19 = arith.constant 0 : index
    %c0_20 = arith.constant 0 : index
    %34 = vector.load %arg10[%c0_19, %c0_20] : memref<3x512xf32, #tpu.memory_space<vmem>>, vector<3x512xf32>
    tpu.vector_store %arg10[%c0_19, %c0_20], %33 {strides = array<i32>} : memref<3x512xf32, #tpu.memory_space<vmem>>, vector<3x512xf32>,
    return
  }
  func.func @transform_0(%arg0: i32) -> (i32, i32) {
    %c0_i32 = arith.constant 0 : i32
    %c0_i32_0 = arith.constant 0 : i32
    return %c0_i32, %arg0 : i32, i32
  }
  func.func @transform_1(%arg0: i32) -> (i32, i32) {
    %c0_i32 = arith.constant 0 : i32
    %c0_i32_0 = arith.constant 0 : i32
    %c0_i32_1 = arith.constant 0 : i32
    return %c0_i32, %c0_i32_0 : i32, i32
  }
  func.func @transform_2(%arg0: i32) -> (i32, i32) {
    %c0_i32 = arith.constant 0 : i32
    %c0_i32_0 = arith.constant 0 : i32
    %c0_i32_1 = arith.constant 0 : i32
    return %c0_i32, %c0_i32_0 : i32, i32
  }
  func.func @transform_3(%arg0: i32) -> (i32, i32) {
    %c0_i32 = arith.constant 0 : i32
    %c0_i32_0 = arith.constant 0 : i32
    %c0_i32_1 = arith.constant 0 : i32
    return %c0_i32, %c0_i32_0 : i32, i32
  }
  func.func @transform_4(%arg0: i32) -> (i32, i32) {
    %c0_i32 = arith.constant 0 : i32
    %c0_i32_0 = arith.constant 0 : i32
    %c0_i32_1 = arith.constant 0 : i32
    return %c0_i32, %c0_i32_0 : i32, i32
  }
  func.func @transform_5(%arg0: i32) -> (i32, i32) {
    %c0_i32 = arith.constant 0 : i32
    %c0_i32_0 = arith.constant 0 : i32
    %c0_i32_1 = arith.constant 0 : i32
    return %c0_i32, %c0_i32_0 : i32, i32
  }
  func.func @transform_6(%arg0: i32) -> (i32, i32) {
    %c0_i32 = arith.constant 0 : i32
    %c0_i32_0 = arith.constant 0 : i32
    %c0_i32_1 = arith.constant 0 : i32
    return %c0_i32, %c0_i32_0 : i32, i32
  }
  func.func @transform_7(%arg0: i32) -> (i32, i32) {
    %c0_i32 = arith.constant 0 : i32
    %c0_i32_0 = arith.constant 0 : i32
    %c0_i32_1 = arith.constant 0 : i32
    return %c0_i32, %c0_i32_0 : i32, i32
  }
  func.func @transform_8(%arg0: i32) -> (i32, i32) {
    %c0_i32 = arith.constant 0 : i32
    %c0_i32_0 = arith.constant 0 : i32
    %c0_i32_1 = arith.constant 0 : i32
    return %c0_i32, %c0_i32_0 : i32, i32
  }
  func.func @transform_9(%arg0: i32) -> (i32, i32) {
    %c0_i32 = arith.constant 0 : i32
    %c0_i32_0 = arith.constant 0 : i32
    return %c0_i32, %arg0 : i32, i32
  }
}

</mosaic_0001>

<bundles_post_ra>
// kernel: tpu_custom_call.1
= control target key start
LH: loop header
LB: loop body
LE: loop exit
PB: predicated region body
PF: predicated region fallthrough
CT: control target
= control target key end

     0   :  { %14 = vsyncpa [#allocation3], 0  ;;  %s12068_s0 = inlined_call_operand.vmem [shape: f32[2,2048], index: 0, kind: input, shape index: {}]   ;;  %s12069_s1 = inlined_call_operand.vmem [shape: f32[32,2], index: 1, kind: input, shape index: {}]   ;;  %s12070_s2 = inlined_call_operand.vmem [shape: f32[32,1], index: 2, kind: input, shape index: {}]   ;;  %s12071_s3 = inlined_call_operand.vmem [shape: f32[32,32], index: 3, kind: input, shape index: {}]   ;;  %s12072_s4 = inlined_call_operand.vmem [shape: f32[32,1], index: 4, kind: input, shape index: {}]   ;;  %s12073_s5 = inlined_call_operand.vmem [shape: f32[32,32], index: 5, kind: input, shape index: {}]   ;;  %s12074_s6 = inlined_call_operand.vmem [shape: f32[32,1], index: 6, kind: input, shape index: {}]   ;;  %s12075_s7 = inlined_call_operand.vmem [shape: f32[3,32], index: 7, kind: input, shape index: {}]   ;;  %s12076_s8 = inlined_call_operand.vmem [shape: f32[3,1], index: 8, kind: input, shape index: {}]   ;;  %s12077_s9 = inlined_call_operand.hbm [shape: f32[3,2048], index: 9, kind: output, shape index: {}]  }
   0x1   :  { %16 = vsyncpa [#allocation3 + $0x1], 0  ;;  %s7036_s30 = smov 0   ;;  %s7038_s10 = smov 0  }
   0x2   :  { %s7040_s11 = smov 0   ;;  %s7042_s12 = smov 0  }
   0x3 LB: > { %s7057_s13 = sadd.s32 4294967295, %s6974_s12   ;;  %s6201_s14 = sadd.s32 4294967294, %s6974_s12   ;;  %s6974_s12 = sphi %s7042_s12, %s12573_s12   ;;  %s6970_s11 = sphi %s7040_s11, %s12572_s11   ;;  %s6966_s10 = sphi %s7038_s10, %s12571_s10   ;;  %s6962_s30 = sphi %s7036_s30, %s12570_s30  }
   0x4   : > { %s7061_s15 = sadd.s32 1, %s6974_s12   ;;  %s223_s16 = sadd.s32 1, %s6970_s11 }
   0x5   : > { %s220_s17 = ssub.s32 %s6974_s12, %s7061_s15  ;;  %p233_p0 = scmp.ne.s32.totalorder %s6970_s11, %s6966_s10 }
   0x6   : > { %p221_p1 = scmp.eq.s32.totalorder %s220_s17, 0  ;;  %p234_p2 = scmp.eq.s32.totalorder %s7057_s13, 3 }
   0x7   : > { %p239_p3 = scmp.ne.s32.totalorder %s6966_s10, %s6962_s30  ;;  %p240_p4 = scmp.eq.s32.totalorder %s6201_s14, 3 }
   0x8   : > { %s7072_s18 = scalar_select %p221_p1, %s6970_s11, %s223_s16  }
   0x9   : > { %p7074_p5 = por %p234_p2, %p233_p0  ;;  %p7078_p6 = por %p240_p4, %p239_p3 }
   0xa   : > { %p6204_p7 = scmp.ge.s32.totalorder %s6974_s12, 1  ;;  %p291_p8 = scmp.lt.s32.totalorder %s6974_s12, 5 }
   0xc   : > { %p292_p9 = pnand %p6204_p7, %p291_p8 }
   0xe   : > { %295 = sbr.rel (%p292_p9) target bundleno = 2044 (0x7fc), region = 56 }
  0x15   : > { %v339_v0 = vld [vmem:[%s12070_s2] sm:$0xff]  ;;  %v364_v2 = vlaneseq  ;;  %s6206_s25 = sshll.u32 %s7057_s13, 2  ;;  %v6976_v3 = vmov 0   ;;  %v340_v5 = vld [vmem:[%s12070_s2 + $0x8] sm:$0xff]  ;;  %v338_v11 = vld [vmem:[%s12069_s1 + $0x18] sm:$0xff]  ;;  %v6977_v17 = vmov 1  }
  0x16   : > { %v335_v1 = vld [vmem:[%s12069_s1] sm:$0xff]  ;;  %6713 = vset.pattern.permute.xlu1 %v6976_v3  ;;  %6712 = vset.pattern.permute.xlu0 %v6976_v3  ;;  %p328_p10 = scmp.lt.s32.totalorder %s6206_s25, 15  ;;  %v336_v6 = vld [vmem:[%s12069_s1 + $0x8] sm:$0xff]  ;;  %v337_v22 = vld [vmem:[%s12069_s1 + $0x10] sm:$0xff] }
  0x17   : > { %418 = vperm.xlu1 %6713, %v339_v0   ;;  %345 = vperm.xlu0 %6712, %v335_v1   ;;  %v7091_v4 = vshrl.u32 %v364_v2, 7  ;;  %v341_v23 = vld [vmem:[%s12070_s2 + $0x10] sm:$0xff]  ;;  %v342_v24 = vld [vmem:[%s12070_s2 + $0x18] sm:$0xff] }
  0x18   : > { %s12575_s25 = smov (!%p328_p10, %s6206_s25), 15 }
  0x19   : > { %v366_v7 = vsub.s32 0, %v7091_v4  ;;  %v374_v8 = vsub.s32 4, %v7091_v4  ;;  %s6207_s14 = sshll.u32 %s12575_s25, 1  ;;  %v7102_v9 = vsub.s32 1, %v7091_v4  ;;  %v478_v10 = vsub.s32 5, %v7091_v4 }
  0x1a   : > { %s331_s21 = scalar_lea.vmem %s12068_s0, %s6207_s14  ;;  %v370_v25 = vsub.s32 2, %v7091_v4  ;;  %v378_v26 = vsub.s32 6, %v7091_v4  ;;  %v474_v39 = vsub.s32 3, %v7091_v4  ;;  %v482_v40 = vsub.s32 7, %v7091_v4  ;;  %s324_s14 = sand.u32 1, %s6966_s10  }
  0x1b   : > { %423 = vperm.xlu1 %6713, %v340_v5   ;;  %350 = vperm.xlu0 %6712, %v336_v6   ;;  %v334_v12 = vld [vmem:[%s331_s21] sm:$0xff]  ;;  %s6205_s16 = sshll.u32 %s324_s14, 4  ;;  %s6423_s21 = sshll.u32 %s7057_s13, 8 }
  0x1c   : > { %v367_v13 = vrot.slane %v334_v12, %v366_v7  ;;  %v375_v14 = vrot.slane %v334_v12, %v374_v8  ;;  %v471_v15 = vrot.slane %v334_v12, %v7102_v9  ;;  %v479_v16 = vrot.slane %v334_v12, %v478_v10  ;;  %s326_s17 = scalar_lea.vmem [#allocation2], %s6205_s16  ;;  %s12026_s25 = scalar_lea.hbm %s12077_s9, %s6423_s21 }
  0x1d   : > { %v371_v31 = vrot.slane %v334_v12, %v370_v25  ;;  %v379_v32 = vrot.slane %v334_v12, %v378_v26  ;;  %v475_v51 = vrot.slane %v334_v12, %v474_v39  ;;  %v483_v54 = vrot.slane %v334_v12, %v482_v40  ;;  %s6142_s22 = sshll.u32 %s326_s17, 4  ;;  %s6128_s26 = scalar_lea.sflag [#allocation3], %s324_s14  ;;  %s12028_s22 = int_to_ptr.vmem [resolvable:$true] %s6142_s22 }
  0x1e   : > { %v7112_v18 = vrot.slane %v367_v13, %v366_v7  ;;  %v7114_v19 = vrot.slane %v375_v14, %v366_v7  ;;  %v7117_v20 = vrot.slane %v471_v15, %v7102_v9  ;;  %v7120_v21 = vrot.slane %v479_v16, %v7102_v9  ;;  %s6912_s27 = scalar_lea.vmem %s12028_s22, 256  ;;  %s6985_s13 = smov [#allocation2]  }
  0x1f   : > { %6714 = vset.pattern.permute.xlu1 %v6977_v17  ;;  %360 = vperm.xlu0 %6712, %v338_v11   ;;  %v391_v41 = vrot.slane %v371_v31, %v366_v7  ;;  %v399_v42 = vrot.slane %v379_v32, %v366_v7  ;;  %v7160_v58 = vrot.slane %v475_v51, %v7102_v9  ;;  %p6913_p11 = scmp.ne.s32.totalorder %s12028_s22, %s6912_s27  ;;  %s6916_s28 = sshll.u32 %s6985_s13, 4  ;;  %s6917_s28 = int_to_ptr.vmem [resolvable:$false] %s6916_s28 }
  0x20   : > { %457 = vperm.xlu1 %6714, %v336_v6   ;;  %v7163_v59 = vrot.slane %v483_v54, %v7102_v9  ;;  %s6918_s29 = scalar_lea.vmem %s6917_s28, 512  ;;  %p6919_p0 = scmp.lt.s32.totalorder %s12028_s22, %s6917_s28 }
  0x21   : > { %p6914_p12 = pnand %p6913_p11, %p7074_p5  ;;  %p6920_p1 = scmp.lt.s32.totalorder %s6918_s29, %s6912_s27 }
  0x23   : > { %6716 = vset.pattern.permute.xlu0 %v6977_v17  ;;  %p6915_p13 = pneg %p6914_p12  ;;  %p6921_p2 = por %p6920_p1, %p6919_p0 }
  0x24   : > { %6715 = vset.pattern.permute.xlu1 %v6976_v3  ;;  %453 = vperm.xlu0 %6716, %v335_v1  }
  0x25   : > { %355 = vperm.xlu1 %6715, %v337_v22   ;;  %p6922_p3 = pnand %p6921_p2, %p6915_p13 }
  0x28   : > { %461 = vperm.xlu0 %6716, %v337_v22  }
  0x29   : > { %428 = vperm.xlu1 %6715, %v341_v23  }
  0x2c   : > { %6719 = vset.pattern.permute.xlu0 %v6976_v3 }
  0x2d   : > { %433 = vperm.xlu1 %6715, %v342_v24  }
  0x31   : > { %6717 = vset.pattern.permute.xlu1 %v6977_v17 }
  0x32   : > { %465 = vperm.xlu1 %6717, %v338_v11  }
  0x36   : > { %6718 = vset.pattern.permute.xlu1 %v6976_v3 }
  0x96   : > { %v7133_v27 = vpop.permute.xlu1 %418  ;;  %v346_v28 = vpop.permute.xlu0 %345 }
  0x97   : > { %v400_v29 = vmul.f32 %v7112_v18, %v346_v28  ;;  %v402_v30 = vmul.f32 %v7114_v19, %v346_v28  ;;  %v401_v2 = vmul.f32 %v391_v41, %v346_v28  ;;  %v403_v17 = vmul.f32 %v399_v42, %v346_v28 }
  0x99   : > { %v436_v33 = vadd.f32 %v7133_v27, %v400_v29  ;;  %v438_v34 = vadd.f32 %v7133_v27, %v402_v30  ;;  %v437_v9 = vadd.f32 %v7133_v27, %v401_v2 }
  0x9a   : > { %v424_v35 = vpop.permute.xlu1 %423  ;;  %v351_v36 = vpop.permute.xlu0 %350 }
  0x9b   : > { %v404_v37 = vmul.f32 %v7112_v18, %v351_v36  ;;  %v406_v38 = vmul.f32 %v7114_v19, %v351_v36  ;;  %v405_v62 = vmul.f32 %v391_v41, %v351_v36  ;;  %v407_v63 = vmul.f32 %v399_v42, %v351_v36 }
  0x9d   : > { %v440_v43 = vadd.f32 %v424_v35, %v404_v37  ;;  %v442_v44 = vadd.f32 %v424_v35, %v406_v38  ;;  %v441_v6 = vadd.f32 %v424_v35, %v405_v62  ;;  %v443_v8 = vadd.f32 %v424_v35, %v407_v63 }
  0x9e   : > { %v361_v45 = vpop.permute.xlu0 %360 }
  0x9f   : > { %v458_v46 = vpop.permute.xlu1 %457  ;;  %v7144_v47 = vmul.f32 %v7112_v18, %v361_v45  ;;  %v7146_v48 = vmul.f32 %v391_v41, %v361_v45  ;;  %v7149_v49 = vmul.f32 %v7114_v19, %v361_v45  ;;  %v7151_v50 = vmul.f32 %v399_v42, %v361_v45 }
  0xa0   : > { %v508_v52 = vmul.f32 %v7117_v20, %v458_v46  ;;  %v510_v53 = vmul.f32 %v7120_v21, %v458_v46  ;;  %v509_v3 = vmul.f32 %v7160_v58, %v458_v46  ;;  %v511_v5 = vmul.f32 %v7163_v59, %v458_v46 }
  0xa2   : > { %v7155_v55 = vadd.f32 %v508_v52, %v440_v43  ;;  %v7157_v56 = vadd.f32 %v510_v53, %v442_v44  ;;  %v7175_v10 = vadd.f32 %v509_v3, %v441_v6  ;;  %v7177_v11 = vadd.f32 %v511_v5, %v443_v8 }
  0xa3   : > { %v454_v57 = vpop.permute.xlu0 %453 }
  0xa4   : > { %12222 = vst [vmem:[#allocation5_spill] sm:$0xff] %v7157_v56  ;;  %v504_v60 = vmul.f32 %v7117_v20, %v454_v57  ;;  %v506_v61 = vmul.f32 %v7120_v21, %v454_v57  ;;  %v356_v4 = vpop.permute.xlu1 %355  ;;  %v505_v7 = vmul.f32 %v7160_v58, %v454_v57  ;;  %v955_v14 = vand.u32 2139095040, %v7155_v55 }
  0xa5   : > { %v1059_v15 = vand.u32 2139095040, %v7175_v10  ;;  %v1163_v16 = vand.u32 2139095040, %v7157_v56  ;;  %v1267_v22 = vand.u32 2139095040, %v7177_v11  ;;  %v408_v24 = vmul.f32 %v7112_v18, %v356_v4 }
  0xa6   : > { %v7167_v0 = vadd.f32 %v504_v60, %v436_v33  ;;  %v7169_v1 = vadd.f32 %v506_v61, %v438_v34  ;;  %v7179_v12 = vadd.f32 %v505_v7, %v437_v9  ;;  %v507_v25 = vmul.f32 %v7163_v59, %v454_v57 }
  0xa7   : > { %v410_v26 = vmul.f32 %v7114_v19, %v356_v4  ;;  %v956_v29 = vshrl.u32 %v955_v14, 23  ;;  %v1060_v30 = vshrl.u32 %v1059_v15, 23  ;;  %v1164_v31 = vshrl.u32 %v1163_v16, 23  ;;  %v462_v38 = vpop.permute.xlu0 %461 }
  0xa8   : > { %12223 = vst [vmem:[#allocation6_spill] sm:$0xff] %v7169_v1  ;;  %v429_v13 = vpop.permute.xlu1 %428  ;;  %v643_v23 = vand.u32 2139095040, %v7179_v12  ;;  %v439_v34 = vadd.f32 %v7133_v27, %v403_v17  ;;  %v1268_v35 = vshrl.u32 %v1267_v22, 23  ;;  %v409_v36 = vmul.f32 %v391_v41, %v356_v4 }
  0xa9   : > { %v444_v32 = vadd.f32 %v429_v13, %v408_v24  ;;  %v411_v37 = vmul.f32 %v399_v42, %v356_v4  ;;  %v539_v18 = vand.u32 2139095040, %v7167_v0  ;;  %v446_v43 = vadd.f32 %v429_v13, %v410_v26 }
  0xaa   : > { %v644_v28 = vshrl.u32 %v643_v23, 23  ;;  %v7190_v39 = vadd.f32 %v507_v25, %v439_v34  ;;  %v445_v40 = vadd.f32 %v429_v13, %v409_v36  ;;  %v6224_v44 = vadd.s32 4294967169, %v956_v29 }
  0xab   : > { %v6228_v19 = vadd.s32 4294967169, %v1060_v30  ;;  %v6232_v45 = vadd.s32 4294967169, %v1164_v31  ;;  %v447_v46 = vadd.f32 %v429_v13, %v411_v37  ;;  %v6236_v51 = vadd.s32 4294967169, %v1268_v35 }
  0xac   : > { %v434_v33 = vpop.permute.xlu1 %433  ;;  %v747_v52 = vand.u32 2139095040, %v7169_v1  ;;  %v512_v27 = vmul.f32 %v7117_v20, %v462_v38  ;;  %v513_v41 = vmul.f32 %v7160_v58, %v462_v38  ;;  %v6212_v53 = vadd.s32 4294967169, %v644_v28 }
  0xad   : > { %v514_v42 = vmul.f32 %v7120_v21, %v462_v38  ;;  %v515_v54 = vmul.f32 %v7163_v59, %v462_v38  ;;  %v448_v57 = vadd.f32 %v434_v33, %v7144_v47  ;;  %v540_v61 = vshrl.u32 %v539_v18, 23 }
  0xae   : > { %v851_v62 = vand.u32 2139095040, %v7190_v39  ;;  %v7200_v63 = vadd.f32 %v512_v27, %v444_v32  ;;  %v7202_v2 = vadd.f32 %v513_v41, %v445_v40  ;;  %v962_v3 = vadd.s32 1, %v6224_v44 }
  0xaf   : > { %v7204_v4 = vadd.f32 %v514_v42, %v446_v43  ;;  %v7206_v5 = vadd.f32 %v515_v54, %v447_v46  ;;  %v450_v6 = vadd.f32 %v434_v33, %v7149_v49  ;;  %v1066_v7 = vadd.s32 1, %v6228_v19 }
  0xb0   : > { %12224 = vst [vmem:[#allocation7_spill] sm:$0xff] %v7200_v63  ;;  %12225 = vst [vmem:[#allocation8_spill] sm:$0xff] %v7202_v2  ;;  %v449_v8 = vadd.f32 %v434_v33, %v7146_v48  ;;  %v650_v13 = vadd.s32 1, %v6212_v53  ;;  %v451_v14 = vadd.f32 %v434_v33, %v7151_v50  ;;  %v1170_v17 = vadd.s32 1, %v6232_v45 }
  0xb1   : > { %v466_v60 = vpop.permute.xlu1 %465  ;;  %12226 = vst [vmem:[#allocation9_spill] sm:$0xff] %v7204_v4  ;;  %12227 = vst [vmem:[#allocation10_spill] sm:$0xff] %v7206_v5  ;;  %v6208_v22 = vadd.s32 4294967169, %v540_v61  ;;  %v748_v49 = vshrl.u32 %v747_v52, 23  ;;  %v852_v25 = vshrl.u32 %v851_v62, 23  ;;  %vm963_vm1 = vcmp.gt.s32.totalorder %v962_v3, 0 }
  0xb2   : > { %v516_v47 = vmul.f32 %v7117_v20, %v466_v60  ;;  %v517_v9 = vmul.f32 %v7160_v58, %v466_v60  ;;  %v518_v15 = vmul.f32 %v7120_v21, %v466_v60  ;;  %v519_v16 = vmul.f32 %v7163_v59, %v466_v60 }
  0xb3   : > { %v1274_v58 = vadd.s32 1, %v6236_v51  ;;  %vm651_vm0 = vcmp.gt.s32.totalorder %v650_v13, 0  ;;  %v546_v50 = vadd.s32 1, %v6208_v22  ;;  %vm1067_vm2 = vcmp.gt.s32.totalorder %v1066_v7, 0 }
  0xb4   : > { %v7215_v23 = vadd.f32 %v516_v47, %v448_v57  ;;  %v7217_v24 = vadd.f32 %v517_v9, %v449_v8  ;;  %v7219_v48 = vadd.f32 %v518_v15, %v450_v6  ;;  %v7221_v20 = vadd.f32 %v519_v16, %v451_v14 }
  0xb5   : > { %vm1171_vm3 = vcmp.gt.s32.totalorder %v1170_v17, 0  ;;  %v6216_v21 = vadd.s32 4294967169, %v748_v49  ;;  %v6220_v59 = vadd.s32 4294967169, %v852_v25  ;;  %vm1275_vm4 = vcmp.gt.s32.totalorder %v1274_v58, 0 }
  0xb6   : > { %v652_v26 = vsel %vm651_vm0, %v650_v13, 0  ;;  %v964_v29 = vsel %vm963_vm1, %v962_v3, 0  ;;  %v1068_v30 = vsel %vm1067_vm2, %v1066_v7, 0  ;;  %v1172_v31 = vsel %vm1171_vm3, %v1170_v17, 0 }
  0xb7   : > { %vm547_vm5 = vcmp.gt.s32.totalorder %v546_v50, 0  ;;  %v1276_v32 = vsel %vm1275_vm4, %v1274_v58, 0  ;;  %v654_v33 = vand.u32 31, %v652_v26  ;;  %v754_v34 = vadd.s32 1, %v6216_v21 }
  0xb8   : > { %v858_v35 = vadd.s32 1, %v6220_v59  ;;  %v7223_v36 = vand.u32 31, %v964_v29  ;;  %v7225_v28 = vand.u32 31, %v1068_v30  ;;  %v548_v37 = vsel %vm547_vm5, %v546_v50, 0 }
  0xb9   : > { %v7227_v38 = vand.u32 31, %v1172_v31  ;;  %v7229_v18 = vand.u32 31, %v1276_v32  ;;  %v655_v40 = vsub.s32 32, %v654_v33  ;;  %vm755_vm6 = vcmp.gt.s32.totalorder %v754_v34, 0 }
  0xba   : > { %12228 = vst [vmem:[#allocation11_spill] sm:$0xff] %v7223_v36  ;;  %vm859_vm7 = vcmp.gt.s32.totalorder %v858_v35, 0  ;;  %v7231_v43 = vshrl.u32 %v964_v29, 5  ;;  %v7233_v44 = vshrl.u32 %v1068_v30, 5  ;;  %v7235_v19 = vand.u32 31, %v548_v37 }
  0xbb   : > { %12229 = vst [vmem:[#allocation12_spill] sm:$0xff] %v7227_v38  ;;  %v12078_v45 = vand.u32 2147483647, %v7179_v12  ;;  %v7239_v46 = vsub.s32 32, %v7223_v36  ;;  %v7242_v51 = vsub.s32 32, %v7225_v28  ;;  %v7244_v52 = vshrl.u32 %v1172_v31, 5 }
  0xbc   : > { %12230 = vst [vmem:[#allocation13_spill] sm:$0xff] %v7231_v43  ;;  %v7246_v27 = vshrl.u32 %v1276_v32, 5  ;;  %v7249_v41 = vsub.s32 32, %v7227_v38  ;;  %v7252_v53 = vsub.s32 32, %v7229_v18  ;;  %v756_v42 = vsel %vm755_vm6, %v754_v34, 0 }
  0xbd   : > { %12231 = vst [vmem:[#allocation14_spill] sm:$0xff] %v7244_v52  ;;  %v7254_v54 = vsel %vm859_vm7, %v858_v35, 0  ;;  %v7256_v57 = vshrl.u32 %v548_v37, 5  ;;  %v653_v60 = vshrl.u32 %v652_v26, 5  ;;  %v647_v61 = vand.u32 8388607, %v12078_v45 }
  0xbe   : > { %12232 = vst [vmem:[#allocation15_spill] sm:$0xff] %v7249_v41  ;;  %v12086_v62 = vmov 2475754826   ;;  %v7262_v6 = vsub.s32 32, %v7235_v19  ;;  %v12088_v7 = vmov 683565275  }
  0xbf   : > { %v658_v3 = vshrl.u32 %v12086_v62, %v655_v40  ;;  %v657_v8 = vshll.u32 %v12088_v7, %v654_v33  ;;  %v660_v47 = vshll.u32 %v12086_v62, %v654_v33  ;;  %v12081_v9 = vmov 2131351028  }
  0xc0   : > { %v661_v13 = vshrl.u32 %v12081_v9, %v655_v40  ;;  %v7267_v14 = vshrl.u32 %v756_v42, 5  ;;  %v7269_v15 = vand.u32 31, %v756_v42  ;;  %v7272_v16 = vand.u32 31, %v7254_v54 }
  0xc1   : > { %v1371_v17 = vand.u32 2139095040, %v7200_v63  ;;  %v1475_v22 = vand.u32 2139095040, %v7202_v2  ;;  %v648_v49 = vor.u32 8388608, %v647_v61  ;;  %v659_v25 = vor.u32 %v658_v3, %v657_v8 }
  0xc2   : > { %12233 = vst [vmem:[#allocation16_spill] sm:$0xff] %v7267_v14  ;;  %12234 = vst [vmem:[#allocation17_spill] sm:$0xff] %v7269_v15  ;;  %v662_v58 = vor.u32 %v661_v13, %v660_v47  ;;  %v663_v50 = vshll.u32 %v12081_v9, %v654_v33  ;;  %v12079_v21 = vmov 2102212464   ;;  %v12083_v29 = vmov 920167782  }
  0xc3   : > { %v664_v59 = vshrl.u32 %v12079_v21, %v655_v40  ;;  %v666_v26 = vshll.u32 %v12079_v21, %v654_v33  ;;  %v667_v30 = vshrl.u32 %v12083_v29, %v655_v40  ;;  %v656_v31 = vshrl.u32 %v12088_v7, %v655_v40 }
  0xc4   : > { %v669_v32 = vshll.u32 %v12083_v29, %v654_v33  ;;  %v12094_v34 = vmov 1326507024   ;;  %vm672_vm8 = vcmp.lt.s32.totalorder %v653_v60, 1  ;;  %vm673_vm9 = vcmp.lt.s32.totalorder %v653_v60, 2 }
  0xc5   : > { %v670_v35 = vshrl.u32 %v12094_v34, %v655_v40  ;;  %v665_v37 = vor.u32 %v664_v59, %v663_v50  ;;  %v668_v42 = vor.u32 %v667_v30, %v666_v26  ;;  %vm674_vm10 = vcmp.lt.s32.totalorder %v653_v60, 3 }
  0xc6   : > { %vm675_vm11 = vcmp.lt.s32.totalorder %v653_v60, 4  ;;  %v676_v3 = vsel %vm672_vm8, %v656_v31, %v659_v25  ;;  %v680_v8 = vsel %vm672_vm8, %v659_v25, %v662_v58  ;;  %v688_v21 = vshll.u32 %v648_v49, 8 }
  0xc7   : > { %v671_v61 = vor.u32 %v670_v35, %v669_v32  ;;  %v677_v47 = vsel %vm675_vm11, %v665_v37, 2102212464  ;;  %v681_v13 = vsel %vm675_vm11, %v668_v42, 920167782  ;;  %v684_v45 = vsel %vm672_vm8, %v662_v58, %v665_v37 }
  0xc8   : > { %v678_v9 = vsel %vm674_vm10, %v662_v58, %v677_v47  ;;  %v682_v33 = vsel %vm674_vm10, %v665_v37, %v681_v13  ;;  %v12085_v40 = vand.u32 2147483647, %v7175_v10  ;;  %v1579_v50 = vand.u32 2139095040, %v7204_v4 }
  0xc9   : > { %v685_v29 = vsel %vm675_vm11, %v671_v61, 1326507024  ;;  %v679_v59 = vsel %vm673_vm9, %v676_v3, %v678_v9  ;;  %v683_v26 = vsel %vm673_vm9, %v680_v8, %v682_v33  ;;  %v1683_v25 = vand.u32 2139095040, %v7206_v5 }
  0xca   : > { %v686_v30 = vsel %vm674_vm10, %v668_v42, %v685_v29  ;;  %v7292_v49 = vmul.u32.u64.low %v688_v21, %v683_v26  ;;  %v7293_v32 = vmul.u32.u64.high %v688_v21, %v683_v26, %v7292_v49  ;;  %v1372_v58 = vshrl.u32 %v1371_v17, 23 }
  0xcb   : > { %v687_v31 = vsel %vm673_vm9, %v684_v45, %v686_v30  ;;  %v1063_v61 = vand.u32 8388607, %v12085_v40  ;;  %v1476_v9 = vshrl.u32 %v1475_v22, 23  ;;  %v695_v3 = vmul.u32 %v688_v21, %v679_v59 }
  0xcc   : > { %v7296_v35 = vmul.u32.u64.low %v688_v21, %v687_v31  ;;  %v7297_v37 = vmul.u32.u64.high %v688_v21, %v687_v31, %v7296_v35  ;;  %v1073_v29 = vshll.u32 %v12088_v7, %v7225_v28  ;;  %v1074_v60 = vshrl.u32 %v12086_v62, %v7242_v51 }
  0xcd   : > { %v1076_v45 = vshll.u32 %v12086_v62, %v7225_v28  ;;  %v12235_v42 = vmov 2131351028   ;;  %v12236_v47 = vmov 2102212464   ;;  %v698_v22 = vadd.s32 1, %v7293_v32 }
  0xce   : > { %v1077_v17 = vshrl.u32 %v12235_v42, %v7242_v51  ;;  %v1079_v8 = vshll.u32 %v12235_v42, %v7225_v28  ;;  %v1080_v13 = vshrl.u32 %v12236_v47, %v7242_v51  ;;  %v1075_v21 = vor.u32 %v1074_v60, %v1073_v29 }
  0xcf   : > { %v1082_v33 = vshll.u32 %v12236_v47, %v7225_v28  ;;  %v12237_v59 = vmov 920167782   ;;  %vm697_vm12 = vc.u32 %v7297_v37, %v7292_v49  ;;  %v1064_v30 = vor.u32 8388608, %v1063_v61 }
  0xd0   : > { %v1083_v26 = vshrl.u32 %v12237_v59, %v7242_v51  ;;  %v1078_v31 = vor.u32 %v1077_v17, %v1076_v45  ;;  %v1081_v35 = vor.u32 %v1080_v13, %v1079_v8  ;;  %v699_v40 = vsel %vm697_vm12, %v698_v22, %v7293_v32 }
  0xd1   : > { %v1085_v7 = vshll.u32 %v12237_v59, %v7225_v28  ;;  %v1086_v29 = vshrl.u32 %v12094_v34, %v7242_v51  ;;  %v700_v60 = vadd.s32 %v699_v40, %v695_v3  ;;  %v12238_v4 = vmov 683565275  }
  0xd2   : > { %v1084_v62 = vor.u32 %v1083_v26, %v1082_v33  ;;  %v1072_v63 = vshrl.u32 %v12238_v4, %v7242_v51  ;;  %vm1088_vm13 = vcmp.lt.s32.totalorder %v7233_v44, 1  ;;  %vm1089_vm14 = vcmp.lt.s32.totalorder %v7233_v44, 2 }
  0xd3   : > { %v1087_v61 = vor.u32 %v1086_v29, %v1085_v7  ;;  %vm1090_vm15 = vcmp.lt.s32.totalorder %v7233_v44, 3  ;;  %vm1091_vm0 = vcmp.lt.s32.totalorder %v7233_v44, 4  ;;  %v1096_v32 = vsel %vm1088_vm13, %v1075_v21, %v1078_v31 }
  0xd4   : > { %v701_v45 = vadd.s32 536870912, %v700_v60  ;;  %v1093_v17 = vsel %vm1091_vm0, %v1081_v35, 2102212464  ;;  %v1097_v28 = vsel %vm1091_vm0, %v1084_v62, 920167782  ;;  %v1100_v8 = vsel %vm1088_vm13, %v1078_v31, %v1081_v35 }
  0xd5   : > { %v1092_v13 = vsel %vm1088_vm13, %v1072_v63, %v1075_v21  ;;  %v1098_v22 = vsel %vm1090_vm15, %v1081_v35, %v1097_v28  ;;  %v1101_v40 = vsel %vm1091_vm0, %v1087_v61, 1326507024  ;;  %v1104_v3 = vshll.u32 %v1064_v30, 8 }
  0xd6   : > { %v702_v33 = vshrl.u32 %v701_v45, 30  ;;  %v1094_v51 = vsel %vm1090_vm15, %v1078_v31, %v1093_v17  ;;  %v1099_v26 = vsel %vm1089_vm14, %v1096_v32, %v1098_v22  ;;  %v1102_v34 = vsel %vm1090_vm15, %v1084_v62, %v1101_v40 }
  0xd7   : > { %v7334_v7 = vshrl.u32 %v7254_v54, 5  ;;  %v1103_v29 = vsel %vm1089_vm14, %v1100_v8, %v1102_v34  ;;  %v7338_v5 = vmul.u32.u64.low %v1104_v3, %v1099_v26  ;;  %v7339_v2 = vmul.u32.u64.high %v1104_v3, %v1099_v26, %v7338_v5 }
  0xd8   : > { %v1580_v63 = vshrl.u32 %v1579_v50, 23  ;;  %v703_v21 = vshll.u32 %v702_v33, 30  ;;  %v7342_v35 = vmul.u32.u64.low %v1104_v3, %v1103_v29  ;;  %v7343_v30 = vmul.u32.u64.high %v1104_v3, %v1103_v29, %v7342_v35 }
  0xd9   : > { %v7346_v31 = vsub.s32 32, %v7269_v15  ;;  %v863_v62 = vsub.s32 32, %v7272_v16  ;;  %v1684_v61 = vshrl.u32 %v1683_v25, 23  ;;  %v1095_v54 = vsel %vm1089_vm14, %v1092_v13, %v1094_v51 }
  0xda   : > { %v7351_v32 = vadd.s32 4294967169, %v1372_v58  ;;  %v7353_v34 = vadd.s32 4294967169, %v1476_v9  ;;  %v7356_v50 = vsub.s32 %v700_v60, %v703_v21  ;;  %v726_v28 = vsub.s32 4, %v702_v33 }
  0xdb   : > { %12239 = vst [vmem:[#allocation18_spill] sm:$0xff] %v7346_v31  ;;  %v1114_v8 = vadd.s32 1, %v7339_v2  ;;  %v12100_v22 = vand.u32 2147483647, %v7190_v39  ;;  %v7361_v40 = vadd.s32 4294967169, %v1580_v63  ;;  %v1111_v25 = vmul.u32 %v1104_v3, %v1095_v54 }
  0xdc   : > { %v706_v44 = vsub.s32 0, %v7356_v50  ;;  %vm1113_vm1 = vc.u32 %v7343_v30, %v7338_v5  ;;  %v7366_v58 = vadd.s32 4294967169, %v1684_v61  ;;  %v12240_v51 = vand.u32 2147483647, %v7179_v12 }
  0xdd   : > { %v1115_v13 = vsel %vm1113_vm1, %v1114_v8, %v7339_v2  ;;  %vm642_vm3 = vcmp.lt.s32.totalorder %v7179_v12, 0  ;;  %v696_v63 = vadd.s32 %v7292_v49, %v7297_v37  ;;  %vm1058_vm4 = vcmp.lt.s32.totalorder %v7175_v10, 0 }
  0xde   : > { %vm7373_vm2 = vcmp.le.f32.partialorder %v12240_v51, 0.7853982  ;;  %v6213_v3 = vmin.u32 %v706_v44, %v7356_v50  ;;  %v1116_v29 = vadd.s32 %v1115_v13, %v1111_v25  ;;  %v727_v21 = vsel %vm642_vm3, %v726_v28, %v702_v33 }
  0xdf   : > { %v855_v2 = vand.u32 8388607, %v12100_v22  ;;  %v875_v35 = vshrl.u32 %v12237_v59, %v863_v62  ;;  %v864_v54 = vshrl.u32 %v12238_v4, %v863_v62  ;;  %v12243_v8 = vmov 2475754826  }
  0xe0   : > { %v708_v61 = vclz %v6213_v3  ;;  %v866_v51 = vshrl.u32 %v12243_v8, %v863_v62  ;;  %v869_v44 = vshrl.u32 %v12235_v42, %v863_v62  ;;  %v1117_v25 = vadd.s32 536870912, %v1116_v29 }
  0xe1   : > { %v865_v49 = vshll.u32 %v12238_v4, %v7272_v16  ;;  %v872_v37 = vshrl.u32 %v12236_v47, %v863_v62  ;;  %v874_v33 = vshll.u32 %v12236_v47, %v7272_v16  ;;  %v729_v13 = vsel %vm7373_vm2, 0, %v727_v21 }
  0xe2   : > { %v6214_v28 = vadd.s32 4294967294, %v708_v61  ;;  %v12244_v3 = vand.u32 2147483647, %v7175_v10  ;;  %v868_v9 = vshll.u32 %v12243_v8, %v7272_v16  ;;  %v12247_v17 = vmov 1326507024  }
  0xe3   : > { %v878_v22 = vshrl.u32 %v12247_v17, %v863_v62  ;;  %v1118_v45 = vshrl.u32 %v1117_v25, 30  ;;  %v856_v52 = vor.u32 8388608, %v855_v2  ;;  %v871_v38 = vshll.u32 %v12235_v42, %v7272_v16 }
  0xe4   : > { %vm7399_vm5 = vcmp.le.f32.partialorder %v12244_v3, 0.7853982  ;;  %v876_v61 = vor.u32 %v875_v35, %v874_v33  ;;  %vm6215_vm6 = vcmp.lt.s32.totalorder %v6214_v28, 0  ;;  %v867_v41 = vor.u32 %v866_v51, %v865_v49 }
  0xe5   : > { %v870_v21 = vor.u32 %v869_v44, %v868_v9  ;;  %v877_v3 = vshll.u32 %v12237_v59, %v7272_v16  ;;  %v711_v56 = vsel %vm6215_vm6, 0, %v6214_v28  ;;  %v1119_v14 = vshll.u32 %v1118_v45, 30 }
  0xe6   : > { %v1142_v15 = vsub.s32 4, %v1118_v45  ;;  %v873_v31 = vor.u32 %v872_v37, %v871_v38  ;;  %v712_v1 = vsub.s32 32, %v711_v56  ;;  %v716_v43 = vsub.s32 4294967266, %v711_v56 }
  0xe7   : > { %v879_v36 = vor.u32 %v878_v22, %v877_v3  ;;  %vm883_vm7 = vcmp.lt.s32.totalorder %v7334_v7, 4  ;;  %v7411_v62 = vsub.s32 %v1116_v29, %v1119_v14  ;;  %vm880_vm8 = vcmp.lt.s32.totalorder %v7334_v7, 1 }
  0xe8   : > { %vm882_vm9 = vcmp.lt.s32.totalorder %v7334_v7, 3  ;;  %v889_v9 = vsel %vm883_vm7, %v876_v61, 920167782  ;;  %v713_v16 = vshll.u32 %v7356_v50, %v711_v56  ;;  %v714_v2 = vshrl.u32 %v696_v63, %v712_v1 }
  0xe9   : > { %v717_v35 = vadd.s32 127, %v716_v43  ;;  %v1143_v38 = vsel %vm1058_vm4, %v1142_v15, %v1118_v45  ;;  %v1122_v22 = vsub.s32 0, %v7411_v62  ;;  %v888_v14 = vsel %vm880_vm8, %v867_v41, %v870_v21 }
  0xea   : > { %v890_v29 = vsel %vm882_vm9, %v873_v31, %v889_v9  ;;  %v892_v51 = vsel %vm880_vm8, %v870_v21, %v873_v31  ;;  %v715_v44 = vor.u32 %v714_v2, %v713_v16  ;;  %v885_v56 = vsel %vm883_vm7, %v873_v31, 2102212464 }
  0xeb   : > { %v718_v25 = vshll.u32 %v717_v35, 23  ;;  %v893_v1 = vsel %vm883_vm7, %v879_v36, 1326507024  ;;  %v6229_v43 = vmin.u32 %v1122_v22, %v7411_v62  ;;  %v1145_v15 = vsel %vm7399_vm5, 0, %v1143_v38 }
  0xec   : > { %vm881_vm10 = vcmp.lt.s32.totalorder %v7334_v7, 2  ;;  %v894_v45 = vsel %vm882_vm9, %v876_v61, %v893_v1  ;;  %v896_v49 = vshll.u32 %v856_v52, 8  ;;  %v733_v37 = vadd.s32 3, %v729_v13 }
  0xed   : > { %v719_v50 = vor.u32 4788187, %v718_v25  ;;  %v891_v63 = vsel %vm881_vm10, %v888_v14, %v890_v29  ;;  %v895_v31 = vsel %vm881_vm10, %v892_v51, %v894_v45  ;;  %v1124_v36 = vclz %v6229_v43 }
  0xee   : > { %v884_v33 = vsel %vm880_vm8, %v864_v54, %v867_v41  ;;  %v886_v28 = vsel %vm882_vm9, %v870_v21, %v885_v56  ;;  %v722_v9 = vcvt.s32.f32 %v715_v44  ;;  %v1149_v35 = vadd.s32 3, %v1145_v15 }
  0xef   : > { %v720_v3 = vand.u32 2147483647, %v719_v50  ;;  %v7445_v16 = vmul.u32.u64.low %v896_v49, %v895_v31  ;;  %v7446_v61 = vmul.u32.u64.high %v896_v49, %v895_v31, %v7445_v16  ;;  %v6230_v2 = vadd.s32 4294967294, %v1124_v36 }
  0xf0   : > { %v7448_v38 = vmul.u32.u64.low %v896_v49, %v891_v63  ;;  %v7449_v22 = vmul.u32.u64.high %v896_v49, %v891_v63, %v7448_v38  ;;  %v7453_v52 = vadd.s32 1, %v7351_v32  ;;  %v7456_v13 = vadd.s32 1, %v7353_v34 }
  0xf1   : > { %v723_v41 = vmul.f32 %v722_v9, %v720_v3  ;;  %v1264_v54 = vand.u32 2147483647, %v7177_v11  ;;  %v12248_v21 = vand.u32 2139095040, %v7215_v23  ;;  %v1112_v29 = vadd.s32 %v7338_v5, %v7343_v30 }
  0xf2   : > { %vm6231_vm11 = vcmp.lt.s32.totalorder %v6230_v2, 0  ;;  %v887_v51 = vsel %vm881_vm10, %v884_v33, %v886_v28  ;;  %v7467_v32 = vand.u32 3, %v733_v37  ;;  %vm905_vm12 = vc.u32 %v7446_v61, %v7448_v38 }
  0xf3   : > { %v7461_v14 = vshrl.u32 %v12248_v21, 23  ;;  %v724_v44 = vxor.u32 2147483648, %v723_v41  ;;  %v1127_v25 = vsel %vm6231_vm11, 0, %v6230_v2  ;;  %v7471_v1 = vand.u32 3, %v1149_v35 }
  0xf4   : > { %v1128_v34 = vsub.s32 32, %v1127_v25  ;;  %v1132_v56 = vsub.s32 4294967266, %v1127_v25  ;;  %v906_v43 = vadd.s32 1, %v7449_v22  ;;  %v1129_v30 = vshll.u32 %v7411_v62, %v1127_v25 }
  0xf5   : > { %v725_v5 = vsel %vm642_vm3, %v724_v44, %v723_v41  ;;  %v903_v7 = vmul.u32 %v896_v49, %v887_v51  ;;  %v7479_v15 = vand.u32 8388607, %v1264_v54  ;;  %v1282_v36 = vshrl.u32 %v12243_v8, %v7252_v53 }
  0xf6   : > { %v728_v45 = vsel %vm7373_vm2, %v7179_v12, %v725_v5  ;;  %v1130_v50 = vshrl.u32 %v1112_v29, %v1128_v34  ;;  %v1133_v63 = vadd.s32 127, %v1132_v56  ;;  %v907_v31 = vsel %vm905_vm12, %v906_v43, %v7449_v22 }
  0xf7   : > { %6720 = vcosq.f32 %v728_v45  ;;  %v908_v37 = vadd.s32 %v907_v31, %v903_v7  ;;  %v1285_v62 = vshrl.u32 %v12235_v42, %v7252_v53  ;;  %v1288_v28 = vshrl.u32 %v12236_v47, %v7252_v53 }
  0xf8   : > { %6722 = vsinq.f32 %v728_v45  ;;  %v1131_v49 = vor.u32 %v1130_v50, %v1129_v30  ;;  %v1134_v33 = vshll.u32 %v1133_v63, 23  ;;  %v1287_v3 = vshll.u32 %v12235_v42, %v7229_v18 }
  0xf9   : > { %v909_v26 = vadd.s32 536870912, %v908_v37  ;;  %v1290_v9 = vshll.u32 %v12236_v47, %v7229_v18  ;;  %v1291_v16 = vshrl.u32 %v12237_v59, %v7252_v53  ;;  %vm850_vm13 = vcmp.lt.s32.totalorder %v7190_v39, 0 }
  0xfa   : > { %v1135_v2 = vor.u32 4788187, %v1134_v33  ;;  %v1281_v35 = vshll.u32 %v12238_v4, %v7229_v18  ;;  %v1284_v22 = vshll.u32 %v12243_v8, %v7229_v18  ;;  %v1294_v41 = vshrl.u32 %v12247_v17, %v7252_v53 }
  0xfb   : > { %vm739_vm14 = vcmp.eq.s32.totalorder %v7467_v32, 2  ;;  %v910_v21 = vshrl.u32 %v909_v26, 30  ;;  %v1289_v29 = vor.u32 %v1288_v28, %v1287_v3  ;;  %v1292_v51 = vor.u32 %v1291_v16, %v1290_v9 }
  0xfc   : > { %v1293_v44 = vshll.u32 %v12237_v59, %v7229_v18  ;;  %vm736_vm15 = vcmp.eq.s32.totalorder %v7467_v32, 0  ;;  %v1136_v25 = vand.u32 2147483647, %v1135_v2  ;;  %v1138_v34 = vcvt.s32.f32 %v1131_v49 }
  0xfd   : > { %v1283_v56 = vor.u32 %v1282_v36, %v1281_v35  ;;  %v1286_v43 = vor.u32 %v1285_v62, %v1284_v22  ;;  %vm735_vm0 = vcmp.lt.s32.totalorder %v7467_v32, 2  ;;  %v12249_v5 = vand.u32 2147483647, %v7190_v39 }
  0xfe   : > { %v911_v7 = vshll.u32 %v910_v21, 30  ;;  %v1280_v45 = vshrl.u32 %v12238_v4, %v7252_v53  ;;  %v1295_v50 = vor.u32 %v1294_v41, %v1293_v44  ;;  %vm1299_vm2 = vcmp.lt.s32.totalorder %v7246_v27, 4 }
  0xff   : > { %vm7511_vm1 = vcmp.le.f32.partialorder %v12249_v5, 0.7853982  ;;  %v1139_v18 = vmul.f32 %v1138_v34, %v1136_v25  ;;  %v1272_v63 = vor.u32 8388608, %v7479_v15  ;;  %vm1296_vm3 = vcmp.lt.s32.totalorder %v7246_v27, 1 }
 0x100   : > { %v1305_v31 = vsel %vm1299_vm2, %v1292_v51, 920167782  ;;  %v7522_v36 = vsub.s32 %v908_v37, %v911_v7  ;;  %v934_v62 = vsub.s32 4, %v910_v21  ;;  %vm1297_vm6 = vcmp.lt.s32.totalorder %v7246_v27, 2 }
 0x101   : > { %v1301_v49 = vsel %vm1299_vm2, %v1289_v29, 2102212464  ;;  %v1140_v53 = vxor.u32 2147483648, %v1139_v18  ;;  %vm1298_vm7 = vcmp.lt.s32.totalorder %v7246_v27, 3  ;;  %v1300_v33 = vsel %vm1296_vm3, %v1280_v45, %v1283_v56  ;;  %v6721_v26 = vpop.eup %6720 }
 0x102   : > { %v1304_v28 = vsel %vm1296_vm3, %v1283_v56, %v1286_v43  ;;  %v914_v15 = vsub.s32 0, %v7522_v36  ;;  %v1306_v3 = vsel %vm1298_vm7, %v1289_v29, %v1305_v31  ;;  %v1308_v9 = vsel %vm1296_vm3, %v1286_v43, %v1289_v29  ;;  %v6723_v16 = vpop.eup %6722 }
 0x103   : > { %v1309_v37 = vsel %vm1299_vm2, %v1295_v50, 1326507024  ;;  %v740_v2 = vxor.u32 2147483648, %v6721_v26  ;;  %v1141_v35 = vsel %vm1058_vm4, %v1140_v53, %v1139_v18  ;;  %v1302_v22 = vsel %vm1298_vm7, %v1286_v43, %v1301_v49 }
 0x104   : > { %v1310_v41 = vsel %vm1298_vm7, %v1292_v51, %v1309_v37  ;;  %v737_v44 = vxor.u32 2147483648, %v6723_v16  ;;  %v1144_v25 = vsel %vm7399_vm5, %v7175_v10, %v1141_v35  ;;  %v6221_v34 = vmin.u32 %v914_v15, %v7522_v36 }
 0x105   : > { %v935_v29 = vsel %vm850_vm13, %v934_v62, %v910_v21  ;;  %v741_v56 = vsel %vm739_vm14, %v740_v2, %v6723_v16  ;;  %6724 = vcosq.f32 %v1144_v25  ;;  %v1307_v5 = vsel %vm1297_vm6, %v1304_v28, %v1306_v3 }
 0x106   : > { %v1311_v51 = vsel %vm1297_vm6, %v1308_v9, %v1310_v41  ;;  %v738_v43 = vsel %vm736_vm15, %v6721_v26, %v737_v44  ;;  %6726 = vsinq.f32 %v1144_v25  ;;  %v916_v60 = vclz %v6221_v34 }
 0x107   : > { %v1312_v7 = vshll.u32 %v1272_v63, 8  ;;  %v12252_v45 = vand.u32 2139095040, %v7217_v24  ;;  %v742_v21 = vsel %vm735_vm0, %v738_v43, %v741_v56  ;;  %v937_v18 = vsel %vm7511_vm1, 0, %v935_v29 }
 0x108   : > { %v1303_v31 = vsel %vm1297_vm6, %v1300_v33, %v1302_v22  ;;  %v6222_v62 = vadd.s32 4294967294, %v916_v60  ;;  %v536_v28 = vand.u32 2147483647, %v7167_v0  ;;  %v7562_v63 = vadd.s32 1, %v7361_v40 }
 0x109   : > { %v7549_v50 = vshrl.u32 %v12252_v45, 23  ;;  %v7557_v49 = vmul.u32.u64.low %v1312_v7, %v1311_v51  ;;  %v7558_v53 = vmul.u32.u64.high %v1312_v7, %v1311_v51, %v7557_v49  ;;  %vm732_vm4 = vweird.f32 %v7179_v12 }
 0x10a   : > { %v7565_v26 = vmul.u32.u64.low %v1312_v7, %v1307_v5  ;;  %v7566_v32 = vmul.u32.u64.high %v1312_v7, %v1307_v5, %v7565_v26  ;;  %vm1152_vm5 = vcmp.eq.s32.totalorder %v7471_v1, 0  ;;  %vm1155_vm8 = vcmp.eq.s32.totalorder %v7471_v1, 2 }
 0x10b   : > { %v904_v27 = vadd.s32 %v7448_v38, %v7446_v61  ;;  %vm6223_vm9 = vcmp.lt.s32.totalorder %v6222_v62, 0  ;;  %v743_v33 = vsel %vm732_vm4, nan, %v742_v21  ;;  %vm1151_vm10 = vcmp.lt.s32.totalorder %v7471_v1, 2 }
 0x10c   : > { %v919_v15 = vsel %vm6223_vm9, 0, %v6222_v62  ;;  %v7574_v40 = vadd.s32 3, %v937_v18  ;;  %v1319_v3 = vmul.u32 %v1312_v7, %v1303_v31  ;;  %vm1148_vm11 = vweird.f32 %v7175_v10 }
 0x10d   : > { %v920_v12 = vsub.s32 32, %v919_v15  ;;  %v924_v9 = vsub.s32 4294967266, %v919_v15  ;;  %v7579_v37 = vand.u32 8388607, %v536_v28  ;;  %v552_v16 = vshrl.u32 %v12238_v4, %v7262_v6 }
 0x10e   : > { %vm1321_vm12 = vc.u32 %v7558_v53, %v7565_v26  ;;  %v1322_v61 = vadd.s32 1, %v7566_v32  ;;  %v553_v38 = vshll.u32 %v12238_v4, %v7235_v19  ;;  %v554_v2 = vshrl.u32 %v12243_v8, %v7262_v6 }
 0x10f   : > { %v921_v35 = vshll.u32 %v7522_v36, %v919_v15  ;;  %v922_v22 = vshrl.u32 %v904_v27, %v920_v12  ;;  %v925_v41 = vadd.s32 127, %v924_v9  ;;  %v556_v44 = vshll.u32 %v12243_v8, %v7235_v19  ;;  %v6725_v25 = vpop.eup %6724 }
 0x110   : > { %v1323_v34 = vsel %vm1321_vm12, %v1322_v61, %v7566_v32  ;;  %v559_v29 = vshll.u32 %v12235_v42, %v7235_v19  ;;  %v560_v56 = vshrl.u32 %v12236_v47, %v7262_v6  ;;  %v563_v5 = vshrl.u32 %v12237_v59, %v7262_v6  ;;  %v6727_v51 = vpop.eup %6726 }
 0x111   : > { %v1156_v43 = vxor.u32 2147483648, %v6725_v25  ;;  %v923_v36 = vor.u32 %v922_v22, %v921_v35  ;;  %v926_v60 = vshll.u32 %v925_v41, 23  ;;  %v1324_v7 = vadd.s32 %v1323_v34, %v1319_v3 }
 0x112   : > { %v1153_v45 = vxor.u32 2147483648, %v6727_v51  ;;  %vm1266_vm14 = vcmp.lt.s32.totalorder %v7177_v11, 0  ;;  %v555_v21 = vor.u32 %v554_v2, %v553_v38  ;;  %v557_v18 = vshrl.u32 %v12235_v42, %v7262_v6 }
 0x113   : > { %v562_v31 = vshll.u32 %v12236_v47, %v7235_v19  ;;  %v1157_v62 = vsel %vm1155_vm8, %v1156_v43, %v6727_v51  ;;  %v927_v49 = vor.u32 4788187, %v926_v60  ;;  %v1325_v32 = vadd.s32 536870912, %v1324_v7 }
 0x114   : > { %v561_v27 = vor.u32 %v560_v56, %v559_v29  ;;  %v1154_v15 = vsel %vm1152_vm5, %v6725_v25, %v1153_v45  ;;  %v565_v12 = vshll.u32 %v12237_v59, %v7235_v19  ;;  %v566_v9 = vshrl.u32 %v12247_v17, %v7262_v6 }
 0x115   : > { %v564_v3 = vor.u32 %v563_v5, %v562_v31  ;;  %v1158_v61 = vsel %vm1151_vm10, %v1154_v15, %v1157_v62  ;;  %v928_v38 = vand.u32 2147483647, %v927_v49  ;;  %v930_v2 = vcvt.s32.f32 %v923_v36 }
 0x116   : > { %v1326_v35 = vshrl.u32 %v1325_v32, 30  ;;  %v1159_v22 = vsel %vm1148_vm11, nan, %v1158_v61  ;;  %v558_v41 = vor.u32 %v557_v18, %v556_v44  ;;  %v567_v34 = vor.u32 %v566_v9, %v565_v12 }
 0x117   : > { %vm571_vm15 = vcmp.lt.s32.totalorder %v7256_v57, 4  ;;  %v6424_v25 = vpack.c.bf16 %v1159_v22, %v743_v33  ;;  %v931_v29 = vmul.f32 %v930_v2, %v928_v38  ;;  %v544_v5 = vor.u32 8388608, %v7579_v37 }
 0x118   : > { %v1327_v56 = vshll.u32 %v1326_v35, 30  ;;  %v1350_v19 = vsub.s32 4, %v1326_v35  ;;  %vm568_vm0 = vcmp.lt.s32.totalorder %v7256_v57, 1  ;;  %vm569_vm2 = vcmp.lt.s32.totalorder %v7256_v57, 2 }
 0x119   : > { %v577_v6 = vsel %vm571_vm15, %v564_v3, 920167782  ;;  %6425 = vmatprep.subr.bf16.mxu0 %v6424_v25  ;;  %v932_v10 = vxor.u32 2147483648, %v931_v29  ;;  %vm570_vm3 = vcmp.lt.s32.totalorder %v7256_v57, 3  ;;  %v573_v33 = vsel %vm571_vm15, %v561_v27, 2102212464 }
 0x11a   : > { %v7623_v1 = vsub.s32 %v1324_v7, %v1327_v56  ;;  %v576_v44 = vsel %vm568_vm0, %v555_v21, %v558_v41  ;;  %v578_v51 = vsel %vm570_vm3, %v561_v27, %v577_v6  ;;  %v580_v43 = vsel %vm568_vm0, %v558_v41, %v561_v27 }
 0x11b   : > { %v581_v37 = vsel %vm571_vm15, %v567_v34, 1326507024  ;;  %v933_v36 = vsel %vm850_vm13, %v932_v10, %v931_v29  ;;  %v1351_v7 = vsel %vm1266_vm14, %v1350_v19, %v1326_v35  ;;  %v572_v45 = vsel %vm568_vm0, %v552_v16, %v555_v21 }
 0x11c   : > { %v1330_v60 = vsub.s32 0, %v7623_v1  ;;  %v936_v18 = vsel %vm7511_vm1, %v7190_v39, %v933_v36  ;;  %v574_v31 = vsel %vm570_vm3, %v558_v41, %v573_v33  ;;  %v582_v62 = vsel %vm570_vm3, %v564_v3, %v581_v37 }
 0x11d   : > { %v584_v49 = vshll.u32 %v544_v5, 8  ;;  %6728 = vcosq.f32 %v936_v18  ;;  %v579_v27 = vsel %vm569_vm2, %v576_v44, %v578_v51  ;;  %v583_v15 = vsel %vm569_vm2, %v580_v43, %v582_v62 }
 0x11e   : > { %v6237_v32 = vmin.u32 %v1330_v60, %v7623_v1  ;;  %vm1379_vm13 = vcmp.gt.s32.totalorder %v7453_v52, 0  ;;  %v7645_v16 = vadd.s32 1, %v7366_v58  ;;  %6730 = vsinq.f32 %v936_v18 }
 0x11f   : > { %v7647_v21 = vmul.u32.u64.low %v584_v49, %v583_v15  ;;  %v7648_v30 = vmul.u32.u64.high %v584_v49, %v583_v15, %v7647_v21  ;;  %v7651_v3 = vand.u32 3, %v7574_v40  ;;  %vm7655_vm1 = vcmp.le.f32.partialorder %v1264_v54, 0.7853982 }
 0x120   : > { %v1332_v9 = vclz %v6237_v32  ;;  %v1353_v61 = vsel %vm7655_vm1, 0, %v1351_v7  ;;  %v575_v58 = vsel %vm569_vm2, %v572_v45, %v574_v31  ;;  %v12255_v40 = vand.u32 2139095040, %v7219_v48 }
 0x121   : > { %v7663_v38 = vmul.u32.u64.low %v584_v49, %v579_v27  ;;  %v7664_v2 = vmul.u32.u64.high %v584_v49, %v579_v27, %v7663_v38  ;;  %v12256_v54 = vand.u32 2139095040, %v7221_v20  ;;  %v952_v34 = vand.u32 2147483647, %v7155_v55 }
 0x122   : > { %v7669_v35 = vshrl.u32 %v12255_v40, 23  ;;  %v6238_v41 = vadd.s32 4294967294, %v1332_v9  ;;  %v7677_v25 = vsel %vm1379_vm13, %v7453_v52, 0  ;;  %v7680_v57 = vadd.s32 4294967169, %v7461_v14 }
 0x123   : > { %v7673_v22 = vshrl.u32 %v12256_v54, 23  ;;  %v7683_v29 = vadd.s32 4294967169, %v7549_v50  ;;  %v1320_v56 = vadd.s32 %v7565_v26, %v7558_v53  ;;  %vm947_vm6 = vcmp.eq.s32.totalorder %v7651_v3, 2  ;;  %v12257_v50 = vld [vmem:[#allocation11_spill] sm:$0xff] }
 0x124   : > { %vm6239_vm7 = vcmp.lt.s32.totalorder %v6238_v41, 0  ;;  %v7688_v19 = vadd.s32 3, %v1353_v61  ;;  %v591_v5 = vmul.u32 %v584_v49, %v575_v58  ;;  %vm593_vm4 = vc.u32 %v7648_v30, %v7663_v38 }
 0x125   : > { %v1335_v52 = vsel %vm6239_vm7, 0, %v6238_v41  ;;  %v594_v6 = vadd.s32 1, %v7664_v2  ;;  %v968_v14 = vshrl.u32 %v12238_v4, %v7239_v46  ;;  %v969_v10 = vshll.u32 %v12238_v4, %v12257_v50 }
 0x126   : > { %v1336_v33 = vsub.s32 32, %v1335_v52  ;;  %v1340_v53 = vsub.s32 4294967266, %v1335_v52  ;;  %v959_v26 = vand.u32 8388607, %v952_v34  ;;  %v970_v44 = vshrl.u32 %v12243_v8, %v7239_v46 }
 0x127   : > { %v1337_v51 = vshll.u32 %v7623_v1, %v1335_v52  ;;  %v595_v43 = vsel %vm593_vm4, %v594_v6, %v7664_v2  ;;  %v973_v37 = vshrl.u32 %v12235_v42, %v7239_v46  ;;  %v979_v36 = vshrl.u32 %v12237_v59, %v7239_v46  ;;  %v6729_v60 = vpop.eup %6728 }
 0x128   : > { %vm944_vm5 = vcmp.eq.s32.totalorder %v7651_v3, 0  ;;  %v1338_v7 = vshrl.u32 %v1320_v56, %v1336_v33  ;;  %v1341_v45 = vadd.s32 127, %v1340_v53  ;;  %v596_v18 = vadd.s32 %v595_v43, %v591_v5  ;;  %v6731_v27 = vpop.eup %6730 }
 0x129   : > { %v976_v31 = vshrl.u32 %v12236_v47, %v7239_v46  ;;  %v948_v62 = vxor.u32 2147483648, %v6729_v60  ;;  %vm538_vm8 = vcmp.lt.s32.totalorder %v7167_v0, 0  ;;  %v972_v1 = vshll.u32 %v12243_v8, %v12257_v50 }
 0x12a   : > { %v978_v49 = vshll.u32 %v12236_v47, %v12257_v50  ;;  %v982_v32 = vshrl.u32 %v12247_v17, %v7239_v46  ;;  %v1339_v15 = vor.u32 %v1338_v7, %v1337_v51  ;;  %v1342_v21 = vshll.u32 %v1341_v45, 23  ;;  %v12260_v51 = vld [vmem:[#allocation13_spill] sm:$0xff] }
 0x12b   : > { %v597_v9 = vadd.s32 536870912, %v596_v18  ;;  %v975_v61 = vshll.u32 %v12235_v42, %v12257_v50  ;;  %v960_v58 = vor.u32 8388608, %v959_v26  ;;  %v971_v2 = vor.u32 %v970_v44, %v969_v10 }
 0x12c   : > { %v980_v40 = vor.u32 %v979_v36, %v978_v49  ;;  %v981_v54 = vshll.u32 %v12237_v59, %v12257_v50  ;;  %v1343_v41 = vor.u32 4788187, %v1342_v21  ;;  %v974_v5 = vor.u32 %v973_v37, %v972_v1 }
 0x12d   : > { %v598_v56 = vshrl.u32 %v597_v9, 30  ;;  %v977_v52 = vor.u32 %v976_v31, %v975_v61  ;;  %vm1483_vm9 = vcmp.gt.s32.totalorder %v7456_v13, 0  ;;  %vm943_vm10 = vcmp.lt.s32.totalorder %v7651_v3, 2 }
 0x12e   : > { %v945_v46 = vxor.u32 2147483648, %v6731_v27  ;;  %v949_v6 = vsel %vm947_vm6, %v948_v62, %v6731_v27  ;;  %v1346_v33 = vcvt.s32.f32 %v1339_v15  ;;  %vm7727_vm11 = vcmp.le.f32.partialorder %v536_v28, 0.7853982 }
 0x12f   : > { %v983_v50 = vor.u32 %v982_v32, %v981_v54  ;;  %v1344_v53 = vand.u32 2147483647, %v1343_v41  ;;  %v599_v26 = vshll.u32 %v598_v56, 30  ;;  %v622_v44 = vsub.s32 4, %v598_v56 }
 0x130   : > { %vm987_vm12 = vcmp.lt.s32.totalorder %v12260_v51, 4  ;;  %vm984_vm15 = vcmp.lt.s32.totalorder %v12260_v51, 1  ;;  %vm985_vm0 = vcmp.lt.s32.totalorder %v12260_v51, 2  ;;  %vm986_vm2 = vcmp.lt.s32.totalorder %v12260_v51, 3 }
 0x131   : > { %v993_v43 = vsel %vm987_vm12, %v980_v40, 920167782  ;;  %v1347_v37 = vmul.f32 %v1346_v33, %v1344_v53  ;;  %v7735_v36 = vsub.s32 %v596_v18, %v599_v26  ;;  %v989_v28 = vsel %vm987_vm12, %v977_v52, 2102212464 }
 0x132   : > { %v992_v7 = vsel %vm984_vm15, %v971_v2, %v974_v5  ;;  %v946_v45 = vsel %vm944_vm5, %v6729_v60, %v945_v46  ;;  %v994_v31 = vsel %vm986_vm2, %v977_v52, %v993_v43  ;;  %v996_v62 = vsel %vm984_vm15, %v974_v5, %v977_v52 }
 0x133   : > { %v997_v1 = vsel %vm987_vm12, %v983_v50, 1326507024  ;;  %v1348_v49 = vxor.u32 2147483648, %v1347_v37  ;;  %v602_v32 = vsub.s32 0, %v7735_v36  ;;  %v623_v27 = vsel %vm538_vm8, %v622_v44, %v598_v56  ;;  %v12261_v56 = vld [vmem:[#allocation6_spill] sm:$0xff] }
 0x134   : > { %v988_v15 = vsel %vm984_vm15, %v968_v14, %v971_v2  ;;  %v990_v18 = vsel %vm986_vm2, %v974_v5, %v989_v28  ;;  %v995_v21 = vsel %vm985_vm0, %v992_v7, %v994_v31  ;;  %v998_v60 = vsel %vm986_vm2, %v980_v40, %v997_v1  ;;  %v12262_v28 = vld [vmem:[#allocation18_spill] sm:$0xff] }
 0x135   : > { %v1000_v9 = vshll.u32 %v960_v58, 8  ;;  %v1349_v61 = vsel %vm1266_vm14, %v1348_v49, %v1347_v37  ;;  %v6209_v54 = vmin.u32 %v602_v32, %v7735_v36  ;;  %v999_v41 = vsel %vm985_vm0, %v996_v62, %v998_v60 }
 0x136   : > { %v744_v14 = vand.u32 2147483647, %v12261_v56  ;;  %v1352_v2 = vsel %vm7655_vm1, %v7177_v11, %v1349_v61  ;;  %v7760_v5 = vand.u32 3, %v7688_v19  ;;  %v950_v58 = vsel %vm943_vm10, %v946_v45, %v949_v6  ;;  %v12263_v45 = vld [vmem:[#allocation17_spill] sm:$0xff] }
 0x137   : > { %v7762_v52 = vmul.u32.u64.low %v1000_v9, %v999_v41  ;;  %v7763_v40 = vmul.u32.u64.high %v1000_v9, %v999_v41, %v7762_v52  ;;  %6732 = vcosq.f32 %v1352_v2  ;;  %v604_v46 = vclz %v6209_v54 }
 0x138   : > { %v625_v33 = vsel %vm7727_vm11, 0, %v623_v27  ;;  %6734 = vsinq.f32 %v1352_v2  ;;  %v991_v50 = vsel %vm985_vm0, %v988_v15, %v990_v18  ;;  %v7778_v19 = vsel %vm1483_vm9, %v7456_v13, 0 }
 0x139   : > { %v7771_v12 = vmul.u32.u64.low %v1000_v9, %v995_v21  ;;  %v7772_v53 = vmul.u32.u64.high %v1000_v9, %v995_v21, %v7771_v12  ;;  %vm940_vm14 = vweird.f32 %v7190_v39  ;;  %v6210_v3 = vadd.s32 4294967294, %v604_v46 }
 0x13a   : > { %v7783_v6 = vand.u32 8388607, %v744_v14  ;;  %v7786_v26 = vshrl.u32 %v7677_v25, 5  ;;  %v7789_v44 = vadd.s32 1, %v7683_v29  ;;  %v7791_v51 = vsel %vm940_vm14, nan, %v950_v58 }
 0x13b   : > { %v592_v43 = vadd.s32 %v7663_v38, %v7648_v30  ;;  %vm1363_vm3 = vcmp.eq.s32.totalorder %v7760_v5, 2  ;;  %vm6211_vm13 = vcmp.lt.s32.totalorder %v6210_v3, 0  ;;  %v7796_v39 = vadd.s32 3, %v625_v33 }
 0x13c   : > { %v1007_v13 = vmul.u32 %v1000_v9, %v991_v50  ;;  %vm1009_vm1 = vc.u32 %v7763_v40, %v7771_v12  ;;  %vm1360_vm6 = vcmp.eq.s32.totalorder %v7760_v5, 0  ;;  %v607_v37 = vsel %vm6211_vm13, 0, %v6210_v3 }
 0x13d   : > { %v1010_v29 = vadd.s32 1, %v7772_v53  ;;  %v760_v7 = vshrl.u32 %v12238_v4, %v12262_v28  ;;  %v761_v30 = vshll.u32 %v12238_v4, %v12263_v45  ;;  %vm1359_vm7 = vcmp.lt.s32.totalorder %v7760_v5, 2 }
 0x13e   : > { %v608_v38 = vsub.s32 32, %v607_v37  ;;  %v612_v31 = vsub.s32 4294967266, %v607_v37  ;;  %v752_v62 = vor.u32 8388608, %v7783_v6  ;;  %v762_v1 = vshrl.u32 %v12243_v8, %v12262_v28 }
 0x13f   : > { %vm1356_vm4 = vweird.f32 %v7177_v11  ;;  %v609_v49 = vshll.u32 %v7735_v36, %v607_v37  ;;  %v1011_v32 = vsel %vm1009_vm1, %v1010_v29, %v7772_v53  ;;  %v765_v27 = vshrl.u32 %v12235_v42, %v12262_v28 }
 0x140   : > { %v768_v15 = vshrl.u32 %v12236_v47, %v12262_v28  ;;  %v610_v18 = vshrl.u32 %v592_v43, %v608_v38  ;;  %v613_v21 = vadd.s32 127, %v612_v31  ;;  %v1012_v60 = vadd.s32 %v1011_v32, %v1007_v13 }
 0x141   : > { %v771_v9 = vshrl.u32 %v12237_v59, %v12262_v28  ;;  %v764_v61 = vshll.u32 %v12243_v8, %v12263_v45  ;;  %v767_v36 = vshll.u32 %v12235_v42, %v12263_v45  ;;  %v770_v54 = vshll.u32 %v12236_v47, %v12263_v45  ;;  %v6733_v2 = vpop.eup %6732 }
 0x142   : > { %v774_v41 = vshrl.u32 %v12247_v17, %v12262_v28  ;;  %v611_v52 = vor.u32 %v610_v18, %v609_v49  ;;  %v614_v58 = vshll.u32 %v613_v21, 23  ;;  %vm954_vm5 = vcmp.lt.s32.totalorder %v7155_v55, 0  ;;  %v6735_v50 = vpop.eup %6734  ;;  %v12266_v49 = vld [vmem:[#allocation16_spill] sm:$0xff] }
 0x143   : > { %v1013_v46 = vadd.s32 536870912, %v1012_v60  ;;  %v763_v33 = vor.u32 %v762_v1, %v761_v30  ;;  %v1364_v53 = vxor.u32 2147483648, %v6733_v2  ;;  %v766_v3 = vor.u32 %v765_v27, %v764_v61 }
 0x144   : > { %v772_v6 = vor.u32 %v771_v9, %v770_v54  ;;  %v773_v43 = vshll.u32 %v12237_v59, %v12263_v45  ;;  %vm1691_vm9 = vcmp.gt.s32.totalorder %v7645_v16, 0  ;;  %v1361_v13 = vxor.u32 2147483648, %v6735_v50 }
 0x145   : > { %v615_v37 = vor.u32 4788187, %v614_v58  ;;  %v1014_v29 = vshrl.u32 %v1013_v46, 30  ;;  %v769_v28 = vor.u32 %v768_v15, %v767_v36  ;;  %v1365_v38 = vsel %vm1363_vm3, %v1364_v53, %v6735_v50 }
 0x146   : > { %v618_v31 = vcvt.s32.f32 %v611_v52  ;;  %vm7835_vm10 = vcmp.le.f32.partialorder %v952_v34, 0.7853982  ;;  %v775_v1 = vor.u32 %v774_v41, %v773_v43  ;;  %vm776_vm12 = vcmp.lt.s32.totalorder %v12266_v49, 1 }
 0x147   : > { %v1362_v45 = vsel %vm1360_vm6, %v6733_v2, %v1361_v13  ;;  %v616_v32 = vand.u32 2147483647, %v615_v37  ;;  %v1015_v27 = vshll.u32 %v1014_v29, 30  ;;  %vm779_vm15 = vcmp.lt.s32.totalorder %v12266_v49, 4 }
 0x148   : > { %v1366_v15 = vsel %vm1359_vm7, %v1362_v45, %v1365_v38  ;;  %v1038_v18 = vsub.s32 4, %v1014_v29  ;;  %vm778_vm0 = vcmp.lt.s32.totalorder %v12266_v49, 3  ;;  %v785_v34 = vsel %vm779_vm15, %v772_v6, 920167782 }
 0x149   : > { %v1367_v21 = vsel %vm1356_vm4, nan, %v1366_v15  ;;  %v619_v9 = vmul.f32 %v618_v31, %v616_v32  ;;  %v7850_v61 = vsub.s32 %v1012_v60, %v1015_v27  ;;  %v784_v36 = vsel %vm776_vm12, %v763_v33, %v766_v3 }
 0x14a   : > { %v6432_v54 = vpack.c.bf16 %v1367_v21, %v7791_v51  ;;  %vm777_vm2 = vcmp.lt.s32.totalorder %v12266_v49, 2  ;;  %v781_v5 = vsel %vm779_vm15, %v769_v28, 2102212464  ;;  %v786_v41 = vsel %vm778_vm0, %v769_v28, %v785_v34 }
 0x14b   : > { %v620_v2 = vxor.u32 2147483648, %v619_v9  ;;  %v1018_v11 = vsub.s32 0, %v7850_v61  ;;  %v780_v60 = vsel %vm776_vm12, %v760_v7, %v763_v33  ;;  %v788_v52 = vsel %vm776_vm12, %v766_v3, %v769_v28 }
 0x14c   : > { %6433 = vmatprep.subr.bf16.mxu1 %v6432_v54  ;;  %v1039_v51 = vsel %vm954_vm5, %v1038_v18, %v1014_v29  ;;  %v787_v58 = vsel %vm777_vm2, %v784_v36, %v786_v41  ;;  %v789_v46 = vsel %vm779_vm15, %v775_v1, 1326507024  ;;  %v792_v50 = vshll.u32 %v752_v62, 8 }
 0x14d   : > { %v621_v53 = vsel %vm538_vm8, %v620_v2, %v619_v9  ;;  %v6225_v43 = vmin.u32 %v1018_v11, %v7850_v61  ;;  %v782_v7 = vsel %vm778_vm0, %v766_v3, %v781_v5  ;;  %v790_v33 = vsel %vm778_vm0, %v772_v6, %v789_v46  ;;  %v12267_v2 = vld [vmem:[#allocation5_spill] sm:$0xff] }
 0x14e   : > { %v624_v13 = vsel %vm7727_vm11, %v7167_v0, %v621_v53  ;;  %v791_v37 = vsel %vm777_vm2, %v788_v52, %v790_v33  ;;  %v7883_v29 = vmul.u32.u64.low %v792_v50, %v787_v58  ;;  %v7884_v62 = vmul.u32.u64.high %v792_v50, %v787_v58, %v7883_v29 }
 0x14f   : > { %v7888_v28 = vand.u32 31, %v7778_v19  ;;  %6736 = vcosq.f32 %v624_v13  ;;  %v1020_v38 = vclz %v6225_v43  ;;  %v1041_v3 = vsel %vm7835_vm10, 0, %v1039_v51  ;;  %v12268_v51 = vld [vmem:[#allocation15_spill] sm:$0xff] }
 0x150   : > { %v7895_v10 = vsel %vm1691_vm9, %v7645_v16, 0  ;;  %vm1899_vm8 = vcmp.gt.s32.totalorder %v7789_v44, 0  ;;  %v7898_v6 = vmul.u32.u64.low %v792_v50, %v791_v37  ;;  %v7899_v31 = vmul.u32.u64.high %v792_v50, %v791_v37, %v7898_v6 }
 0x151   : > { %v7902_v1 = vand.u32 31, %v7677_v25  ;;  %v7905_v45 = vshrl.u32 %v7778_v19, 5  ;;  %v6226_v32 = vadd.s32 4294967294, %v1020_v38  ;;  %v783_v27 = vsel %vm777_vm2, %v780_v60, %v782_v7 }
 0x152   : > { %6738 = vsinq.f32 %v624_v13  ;;  %v7910_v15 = vand.u32 3, %v7796_v39  ;;  %v1045_v16 = vadd.s32 3, %v1041_v3  ;;  %v802_v18 = vadd.s32 1, %v7884_v62 }
 0x153   : > { %v7914_v34 = vsub.s32 32, %v7888_v28  ;;  %v7917_v25 = vand.u32 31, %v7895_v10  ;;  %v7920_v19 = vsel %vm1899_vm8, %v7789_v44, 0  ;;  %vm6227_vm11 = vcmp.lt.s32.totalorder %v6226_v32, 0 }
 0x154   : > { %v7923_v49 = vadd.s32 4294967169, %v7673_v22  ;;  %v1023_v21 = vsel %vm6227_vm11, 0, %v6226_v32  ;;  %v799_v9 = vmul.u32 %v792_v50, %v783_v27  ;;  %vm801_vm14 = vc.u32 %v7899_v31, %v7883_v29 }
 0x155   : > { %v1008_v39 = vadd.s32 %v7771_v12, %v7763_v40  ;;  %v1024_v36 = vsub.s32 32, %v1023_v21  ;;  %v1028_v54 = vsub.s32 4294967266, %v1023_v21  ;;  %v803_v5 = vsel %vm801_vm14, %v802_v18, %v7884_v62  ;;  %v12269_v40 = vld [vmem:[#allocation12_spill] sm:$0xff] }
 0x156   : > { %vm635_vm3 = vcmp.eq.s32.totalorder %v7910_v15, 2  ;;  %v7931_v44 = vand.u32 3, %v1045_v16  ;;  %v804_v41 = vadd.s32 %v803_v5, %v799_v9  ;;  %v12116_v22 = vand.u32 2147483647, %v12267_v2 }
 0x157   : > { %v1025_v11 = vshll.u32 %v7850_v61, %v1023_v21  ;;  %v1026_v60 = vshrl.u32 %v1008_v39, %v1024_v36  ;;  %v1029_v52 = vadd.s32 127, %v1028_v54  ;;  %v1176_v58 = vshrl.u32 %v12238_v4, %v12268_v51 }
 0x158   : > { %v805_v46 = vadd.s32 536870912, %v804_v41  ;;  %v1177_v12 = vshll.u32 %v12238_v4, %v12269_v40  ;;  %v1178_v50 = vshrl.u32 %v12243_v8, %v12268_v51  ;;  %v1181_v53 = vshrl.u32 %v12235_v42, %v12268_v51 }
 0x159   : > { %v6737_v43 = vpop.eup %6736  ;;  %v1027_v7 = vor.u32 %v1026_v60, %v1025_v11  ;;  %v1030_v33 = vshll.u32 %v1029_v52, 23  ;;  %v1184_v61 = vshrl.u32 %v12236_v47, %v12268_v51  ;;  %v1187_v13 = vshrl.u32 %v12237_v59, %v12268_v51 }
 0x15a   : > { %vm632_vm13 = vcmp.eq.s32.totalorder %v7910_v15, 0  ;;  %vm746_vm1 = vcmp.lt.s32.totalorder %v12261_v56, 0  ;;  %v806_v37 = vshrl.u32 %v805_v46, 30  ;;  %v1167_v62 = vand.u32 8388607, %v12116_v22 }
 0x15b   : > { %v1180_v38 = vshll.u32 %v12243_v8, %v12269_v40  ;;  %v1190_v3 = vshrl.u32 %v12247_v17, %v12268_v51  ;;  %v636_v6 = vxor.u32 2147483648, %v6737_v43  ;;  %v1031_v32 = vor.u32 4788187, %v1030_v33  ;;  %v12270_v33 = vld [vmem:[#allocation14_spill] sm:$0xff] }
 0x15c   : > { %v1183_v27 = vshll.u32 %v12235_v42, %v12269_v40  ;;  %v1186_v16 = vshll.u32 %v12236_v47, %v12269_v40  ;;  %v6739_v18 = vpop.eup %6738  ;;  %v807_v21 = vshll.u32 %v806_v37, 30  ;;  %v1179_v9 = vor.u32 %v1178_v50, %v1177_v12 }
 0x15d   : > { %v1182_v39 = vor.u32 %v1181_v53, %v1180_v38  ;;  %v1189_v36 = vshll.u32 %v12237_v59, %v12269_v40  ;;  %v1032_v54 = vand.u32 2147483647, %v1031_v32  ;;  %v1034_v5 = vcvt.s32.f32 %v1027_v7 }
 0x15e   : > { %v1185_v11 = vor.u32 %v1184_v61, %v1183_v27  ;;  %v1188_v60 = vor.u32 %v1187_v13, %v1186_v16  ;;  %vm631_vm6 = vcmp.lt.s32.totalorder %v7910_v15, 2  ;;  %v7962_v52 = vsub.s32 %v804_v41, %v807_v21 }
 0x15f   : > { %v1168_v51 = vor.u32 8388608, %v1167_v62  ;;  %v1191_v46 = vor.u32 %v1190_v3, %v1189_v36  ;;  %vm1192_vm7 = vcmp.lt.s32.totalorder %v12270_v33, 1  ;;  %v633_v22 = vxor.u32 2147483648, %v6739_v18 }
 0x160   : > { %v637_v12 = vsel %vm635_vm3, %v636_v6, %v6739_v18  ;;  %v1035_v50 = vmul.f32 %v1034_v5, %v1032_v54  ;;  %v830_v53 = vsub.s32 4, %v806_v37  ;;  %v810_v40 = vsub.s32 0, %v7962_v52 }
 0x161   : > { %vm1193_vm4 = vcmp.lt.s32.totalorder %v12270_v33, 2  ;;  %vm1194_vm9 = vcmp.lt.s32.totalorder %v12270_v33, 3  ;;  %vm1195_vm12 = vcmp.lt.s32.totalorder %v12270_v33, 4  ;;  %v1200_v61 = vsel %vm1192_vm7, %v1179_v9, %v1182_v39 }
 0x162   : > { %v1036_v41 = vxor.u32 2147483648, %v1035_v50  ;;  %v1197_v7 = vsel %vm1195_vm12, %v1185_v11, 2102212464  ;;  %v1201_v13 = vsel %vm1195_vm12, %v1188_v60, 920167782  ;;  %v6217_v62 = vmin.u32 %v810_v40, %v7962_v52 }
 0x163   : > { %v1202_v38 = vsel %vm1194_vm9, %v1185_v11, %v1201_v13  ;;  %v1204_v3 = vsel %vm1192_vm7, %v1182_v39, %v1185_v11  ;;  %v1205_v6 = vsel %vm1195_vm12, %v1191_v46, 1326507024  ;;  %v634_v32 = vsel %vm632_vm13, %v6737_v43, %v633_v22 }
 0x164   : > { %v1037_v27 = vsel %vm954_vm5, %v1036_v41, %v1035_v50  ;;  %v831_v16 = vsel %vm746_vm1, %v830_v53, %v806_v37  ;;  %v1206_v18 = vsel %vm1194_vm9, %v1188_v60, %v1205_v6  ;;  %v812_v36 = vclz %v6217_v62  ;;  %v12273_v50 = vld [vmem:[#allocation8_spill] sm:$0xff] }
 0x165   : > { %v1040_v21 = vsel %vm7835_vm10, %v7155_v55, %v1037_v27  ;;  %v1203_v54 = vsel %vm1193_vm4, %v1200_v61, %v1202_v38  ;;  %v1208_v5 = vshll.u32 %v1168_v51, 8  ;;  %v1196_v22 = vsel %vm1192_vm7, %v1176_v58, %v1179_v9 }
 0x166   : > { %6740 = vcosq.f32 %v1040_v21  ;;  %v1198_v43 = vsel %vm1194_vm9, %v1182_v39, %v1197_v7  ;;  %v1207_v37 = vsel %vm1193_vm4, %v1204_v3, %v1206_v18  ;;  %v6218_v11 = vadd.s32 4294967294, %v812_v36 }
 0x167   : > { %6742 = vsinq.f32 %v1040_v21  ;;  %v7997_v60 = vmul.u32.u64.low %v1208_v5, %v1207_v37  ;;  %v7998_v30 = vmul.u32.u64.high %v1208_v5, %v1207_v37, %v7997_v60  ;;  %v638_v46 = vsel %vm631_vm6, %v634_v32, %v637_v12 }
 0x168   : > { %vm8004_vm5 = vcmp.le.f32.partialorder %v744_v14, 0.7853982  ;;  %v8008_v58 = vmul.u32.u64.low %v1208_v5, %v1203_v54  ;;  %v8009_v9 = vmul.u32.u64.high %v1208_v5, %v1203_v54, %v8008_v58  ;;  %v8013_v39 = vadd.s32 1, %v7923_v49 }
 0x169   : > { %vm628_vm10 = vweird.f32 %v7167_v0  ;;  %vm6219_vm15 = vcmp.lt.s32.totalorder %v6218_v11, 0  ;;  %v833_v15 = vsel %vm8004_vm5, 0, %v831_v16  ;;  %vm1051_vm0 = vcmp.eq.s32.totalorder %v7931_v44, 2 }
 0x16a   : > { %v815_v12 = vsel %vm6219_vm15, 0, %v6218_v11  ;;  %v1199_v14 = vsel %vm1193_vm4, %v1196_v22, %v1198_v43  ;;  %v1472_v53 = vand.u32 2147483647, %v12273_v50  ;;  %v1490_v40 = vshrl.u32 %v12243_v8, %v7914_v34 }
 0x16b   : > { %v639_v41 = vsel %vm628_vm10, nan, %v638_v46  ;;  %vm1048_vm2 = vcmp.eq.s32.totalorder %v7931_v44, 0  ;;  %v800_v0 = vadd.s32 %v7883_v29, %v7899_v31  ;;  %v816_v49 = vsub.s32 32, %v815_v12 }
 0x16c   : > { %v820_v7 = vsub.s32 4294967266, %v815_v12  ;;  %vm1047_vm8 = vcmp.lt.s32.totalorder %v7931_v44, 2  ;;  %v8028_v61 = vadd.s32 3, %v833_v15  ;;  %vm1217_vm11 = vc.u32 %v7998_v30, %v8008_v58 }
 0x16d   : > { %v1218_v33 = vadd.s32 1, %v8009_v9  ;;  %v1489_v13 = vshll.u32 %v12238_v4, %v7888_v28  ;;  %vm1044_vm14 = vweird.f32 %v7155_v55  ;;  %v817_v62 = vshll.u32 %v7962_v52, %v815_v12 }
 0x16e   : > { %v818_v38 = vshrl.u32 %v800_v0, %v816_v49  ;;  %v821_v29 = vadd.s32 127, %v820_v7  ;;  %v1215_v31 = vmul.u32 %v1208_v5, %v1199_v14  ;;  %v1479_v6 = vand.u32 8388607, %v1472_v53 }
 0x16f   : > { %v1219_v3 = vsel %vm1217_vm11, %v1218_v33, %v8009_v9  ;;  %v1491_v32 = vor.u32 %v1490_v40, %v1489_v13  ;;  %v1493_v27 = vshrl.u32 %v12235_v42, %v7914_v34  ;;  %v1492_v36 = vshll.u32 %v12243_v8, %v7888_v28 }
 0x170   : > { %v819_v16 = vor.u32 %v818_v38, %v817_v62  ;;  %v822_v18 = vshll.u32 %v821_v29, 23  ;;  %v1220_v21 = vadd.s32 %v1219_v3, %v1215_v31  ;;  %v6741_v54 = vpop.eup %6740  ;;  %v1496_v52 = vshrl.u32 %v12236_v47, %v7914_v34 }
 0x171   : > { %v1498_v5 = vshll.u32 %v12236_v47, %v7888_v28  ;;  %v1499_v22 = vshrl.u32 %v12237_v59, %v7914_v34  ;;  %v1502_v43 = vshrl.u32 %v12247_v17, %v7914_v34  ;;  %v6743_v37 = vpop.eup %6742  ;;  %v1052_v11 = vxor.u32 2147483648, %v6741_v54 }
 0x172   : > { %v823_v60 = vor.u32 4788187, %v822_v18  ;;  %v1221_v46 = vadd.s32 536870912, %v1220_v21  ;;  %v1495_v9 = vshll.u32 %v12235_v42, %v7888_v28  ;;  %v1049_v15 = vxor.u32 2147483648, %v6743_v37 }
 0x173   : > { %v1494_v12 = vor.u32 %v1493_v27, %v1492_v36  ;;  %v1500_v14 = vor.u32 %v1499_v22, %v1498_v5  ;;  %v1501_v40 = vshll.u32 %v12237_v59, %v7888_v28  ;;  %v1053_v0 = vsel %vm1051_vm0, %v1052_v11, %v6743_v37 }
 0x174   : > { %v824_v49 = vand.u32 2147483647, %v823_v60  ;;  %v826_v7 = vcvt.s32.f32 %v819_v16  ;;  %v1222_v33 = vshrl.u32 %v1221_v46, 30  ;;  %v1050_v13 = vsel %vm1048_vm2, %v6741_v54, %v1049_v15 }
 0x175   : > { %v1480_v62 = vor.u32 8388608, %v1479_v6  ;;  %v1497_v38 = vor.u32 %v1496_v52, %v1495_v9  ;;  %v1503_v29 = vor.u32 %v1502_v43, %v1501_v40  ;;  %v1054_v31 = vsel %vm1047_vm8, %v1050_v13, %v1053_v0 }
 0x176   : > { %v827_v3 = vmul.f32 %v826_v7, %v824_v49  ;;  %v1223_v27 = vshll.u32 %v1222_v33, 30  ;;  %vm1507_vm3 = vcmp.lt.s32.totalorder %v7905_v45, 4  ;;  %v1055_v28 = vsel %vm1044_vm14, nan, %v1054_v31 }
 0x177   : > { %vm1504_vm13 = vcmp.lt.s32.totalorder %v7905_v45, 1  ;;  %vm1506_vm6 = vcmp.lt.s32.totalorder %v7905_v45, 3  ;;  %v1513_v16 = vsel %vm1507_vm3, %v1500_v14, 920167782  ;;  %v6426_v6 = vpack.c.bf16 %v1055_v28, %v639_v41 }
 0x178   : > { %v828_v18 = vxor.u32 2147483648, %v827_v3  ;;  %v8069_v36 = vsub.s32 %v1220_v21, %v1223_v27  ;;  %v1512_v44 = vsel %vm1504_vm13, %v1491_v32, %v1494_v12  ;;  %v1488_v54 = vshrl.u32 %v12238_v4, %v7914_v34 }
 0x179   : > { %vm1505_vm7 = vcmp.lt.s32.totalorder %v7905_v45, 2  ;;  %v1509_v55 = vsel %vm1507_vm3, %v1497_v38, 2102212464  ;;  %v1514_v52 = vsel %vm1506_vm6, %v1497_v38, %v1513_v16  ;;  %6427 = vmatpush1.bf16.msra.mxu0 %v6426_v6  ;;  %v1246_v5 = vsub.s32 4, %v1222_v33 }
 0x17a   : > { %v829_v41 = vsel %vm746_vm1, %v828_v18, %v827_v3  ;;  %v1226_v21 = vsub.s32 0, %v8069_v36  ;;  %v1516_v22 = vsel %vm1504_vm13, %v1494_v12, %v1497_v38  ;;  %v1515_v43 = vsel %vm1505_vm7, %v1512_v44, %v1514_v52 }
 0x17b   : > { %v832_v34 = vsel %vm8004_vm5, %v12261_v56, %v829_v41  ;;  %v1517_v37 = vsel %vm1507_vm3, %v1503_v29, 1326507024  ;;  %v1520_v11 = vshll.u32 %v1480_v62, 8  ;;  %v1508_v46 = vsel %vm1504_vm13, %v1488_v54, %v1491_v32 }
 0x17c   : > { %v6233_v60 = vmin.u32 %v1226_v21, %v8069_v36  ;;  %v1510_v9 = vsel %vm1506_vm6, %v1494_v12, %v1509_v55  ;;  %v1518_v15 = vsel %vm1506_vm6, %v1500_v14, %v1517_v37  ;;  %6744 = vcosq.f32 %v832_v34 }
 0x17d   : > { %v1519_v51 = vsel %vm1505_vm7, %v1516_v22, %v1518_v15  ;;  %v8101_v40 = vmul.u32.u64.low %v1520_v11, %v1515_v43  ;;  %v8102_v0 = vmul.u32.u64.high %v1520_v11, %v1515_v43, %v8101_v40  ;;  %v8106_v49 = vadd.s32 1, %v7680_v57 }
 0x17e   : > { %v1902_v7 = vand.u32 31, %v7920_v19  ;;  %vm1162_vm1 = vcmp.lt.s32.totalorder %v12267_v2, 0  ;;  %v1228_v32 = vclz %v6233_v60  ;;  %6746 = vsinq.f32 %v832_v34 }
 0x17f   : > { %v1247_v12 = vsel %vm1162_vm1, %v1246_v5, %v1222_v33  ;;  %v8112_v14 = vmul.u32.u64.low %v1520_v11, %v1519_v51  ;;  %v8113_v13 = vmul.u32.u64.high %v1520_v11, %v1519_v51, %v8112_v14  ;;  %v8116_v62 = vshrl.u32 %v7895_v10, 5 }
 0x180   : > { %vm2107_vm4 = vcmp.gt.s32.totalorder %v8013_v39, 0  ;;  %v6234_v38 = vadd.s32 4294967294, %v1228_v32  ;;  %v1511_v57 = vsel %vm1505_vm7, %v1508_v46, %v1510_v9  ;;  %v8122_v29 = vsub.s32 32, %v7917_v25 }
 0x181   : > { %v8125_v31 = vand.u32 3, %v8028_v61  ;;  %v12274_v33 = vand.u32 2147483647, %v12267_v2  ;;  %v1530_v10 = vadd.s32 1, %v8102_v0  ;;  %v8135_v27 = vshrl.u32 %v7920_v19, 5 }
 0x182   : > { %v1903_v28 = vsub.s32 32, %v1902_v7  ;;  %vm6235_vm12 = vcmp.lt.s32.totalorder %v6234_v38, 0  ;;  %v8140_v16 = vsel %vm2107_vm4, %v8013_v39, 0  ;;  %v1527_v6 = vmul.u32 %v1520_v11, %v1511_v57 }
 0x183   : > { %vm8129_vm9 = vcmp.le.f32.partialorder %v12274_v33, 0.7853982  ;;  %v1231_v61 = vsel %vm6235_vm12, 0, %v6234_v38  ;;  %vm1529_vm5 = vc.u32 %v8113_v13, %v8101_v40  ;;  %v1216_v18 = vadd.s32 %v8008_v58, %v7998_v30 }
 0x184   : > { %v1249_v45 = vsel %vm8129_vm9, 0, %v1247_v12  ;;  %v1232_v44 = vsub.s32 32, %v1231_v61  ;;  %v1236_v54 = vsub.s32 4294967266, %v1231_v61  ;;  %v1531_v19 = vsel %vm1529_vm5, %v1530_v10, %v8102_v0 }
 0x185   : > { %vm843_vm10 = vcmp.eq.s32.totalorder %v8125_v31, 2  ;;  %v1253_v55 = vadd.s32 3, %v1249_v45  ;;  %v1532_v52 = vadd.s32 %v1531_v19, %v1527_v6  ;;  %v1888_v41 = vand.u32 2147483647, %v7217_v24 }
 0x186   : > { %v1233_v39 = vshll.u32 %v8069_v36, %v1231_v61  ;;  %v1234_v21 = vshrl.u32 %v1216_v18, %v1232_v44  ;;  %v1237_v5 = vadd.s32 127, %v1236_v54  ;;  %v1906_v22 = vshrl.u32 %v12243_v8, %v1903_v28  ;;  %v6745_v34 = vpop.eup %6744 }
 0x187   : > { %vm840_vm15 = vcmp.eq.s32.totalorder %v8125_v31, 0  ;;  %v1533_v30 = vadd.s32 536870912, %v1532_v52  ;;  %v1905_v58 = vshll.u32 %v12238_v4, %v1902_v7  ;;  %v1909_v43 = vshrl.u32 %v12235_v42, %v1903_v28 }
 0x188   : > { %v1915_v37 = vshrl.u32 %v12237_v59, %v1903_v28  ;;  %v1235_v11 = vor.u32 %v1234_v21, %v1233_v39  ;;  %v1238_v60 = vshll.u32 %v1237_v5, 23  ;;  %v1908_v46 = vshll.u32 %v12243_v8, %v1902_v7  ;;  %v6747_v9 = vpop.eup %6746 }
 0x189   : > { %v1912_v36 = vshrl.u32 %v12236_v47, %v1903_v28  ;;  %v8157_v15 = vshrl.u32 %v1533_v30, 30  ;;  %v1895_v51 = vand.u32 8388607, %v1888_v41  ;;  %v1914_v0 = vshll.u32 %v12236_v47, %v1902_v7 }
 0x18a   : > { %v1918_v32 = vshrl.u32 %v12247_v17, %v1903_v28  ;;  %v844_v12 = vxor.u32 2147483648, %v6745_v34  ;;  %v1239_v14 = vor.u32 4788187, %v1238_v60  ;;  %v1907_v38 = vor.u32 %v1906_v22, %v1905_v58 }
 0x18b   : > { %v1911_v57 = vshll.u32 %v12235_v42, %v1902_v7  ;;  %v1535_v33 = vshll.u32 %v8157_v15, 30  ;;  %v1910_v10 = vor.u32 %v1909_v43, %v1908_v46  ;;  %v1916_v45 = vor.u32 %v1915_v37, %v1914_v0 }
 0x18c   : > { %v1917_v61 = vshll.u32 %v12237_v59, %v1902_v7  ;;  %v841_v6 = vxor.u32 2147483648, %v6747_v9  ;;  %v1240_v18 = vand.u32 2147483647, %v1239_v14  ;;  %v1242_v44 = vcvt.s32.f32 %v1235_v11 }
 0x18d   : > { %v1913_v54 = vor.u32 %v1912_v36, %v1911_v57  ;;  %vm839_vm0 = vcmp.lt.s32.totalorder %v8125_v31, 2  ;;  %v8167_v19 = vand.u32 3, %v1253_v55  ;;  %v8169_v39 = vsub.s32 %v1532_v52, %v1535_v33  ;;  %v12277_v31 = vld [vmem:[#allocation10_spill] sm:$0xff] }
 0x18e   : > { %v1904_v21 = vshrl.u32 %v12238_v4, %v1903_v28  ;;  %v1919_v5 = vor.u32 %v1918_v32, %v1917_v61  ;;  %v845_v22 = vsel %vm843_vm10, %v844_v12, %v6747_v9  ;;  %v1243_v30 = vmul.f32 %v1242_v44, %v1240_v18 }
 0x18f   : > { %v1896_v58 = vor.u32 8388608, %v1895_v51  ;;  %vm1923_vm2 = vcmp.lt.s32.totalorder %v8135_v27, 4  ;;  %v1538_v7 = vsub.s32 0, %v8169_v39  ;;  %vm1920_vm8 = vcmp.lt.s32.totalorder %v8135_v27, 1 }
 0x190   : > { %vm1922_vm11 = vcmp.lt.s32.totalorder %v8135_v27, 3  ;;  %v1929_v55 = vsel %vm1923_vm2, %v1916_v45, 920167782  ;;  %v842_v52 = vsel %vm840_vm15, %v6745_v34, %v841_v6  ;;  %v1244_v43 = vxor.u32 2147483648, %v1243_v30 }
 0x191   : > { %v1928_v28 = vsel %vm1920_vm8, %v1907_v38, %v1910_v10  ;;  %v1930_v37 = vsel %vm1922_vm11, %v1913_v54, %v1929_v55  ;;  %v6245_v11 = vmin.u32 %v1538_v7, %v8169_v39  ;;  %v1925_v60 = vsel %vm1923_vm2, %v1913_v54, 2102212464 }
 0x192   : > { %v1932_v46 = vsel %vm1920_vm8, %v1910_v10, %v1913_v54  ;;  %v1933_v36 = vsel %vm1923_vm2, %v1919_v5, 1326507024  ;;  %v1245_v9 = vsel %vm1162_vm1, %v1244_v43, %v1243_v30  ;;  %v1558_v51 = vsub.s32 4, %v8157_v15 }
 0x193   : > { %vm1921_vm14 = vcmp.lt.s32.totalorder %v8135_v27, 2  ;;  %v1934_v34 = vsel %vm1922_vm11, %v1916_v45, %v1933_v36  ;;  %v1248_v0 = vsel %vm8129_vm9, %v12267_v2, %v1245_v9  ;;  %v1540_v32 = vclz %v6245_v11 }
 0x194   : > { %v1931_v12 = vsel %vm1921_vm14, %v1928_v28, %v1930_v37  ;;  %v1936_v14 = vshll.u32 %v1896_v58, 8  ;;  %6748 = vcosq.f32 %v1248_v0  ;;  %v1924_v57 = vsel %vm1920_vm8, %v1904_v21, %v1907_v38 }
 0x195   : > { %v1926_v33 = vsel %vm1922_vm11, %v1910_v10, %v1925_v60  ;;  %v1935_v61 = vsel %vm1921_vm14, %v1932_v46, %v1934_v34  ;;  %6750 = vsinq.f32 %v1248_v0  ;;  %v6246_v45 = vadd.s32 4294967294, %v1540_v32 }
 0x196   : > { %v8204_v6 = vmul.u32.u64.low %v1936_v14, %v1935_v61  ;;  %v8205_v3 = vmul.u32.u64.high %v1936_v14, %v1935_v61, %v8204_v6  ;;  %v8208_v18 = vand.u32 31, %v8140_v16  ;;  %v846_v44 = vsel %vm839_vm0, %v842_v52, %v845_v22 }
 0x197   : > { %v8212_v54 = vmul.u32.u64.low %v1936_v14, %v1931_v12  ;;  %v8213_v5 = vmul.u32.u64.high %v1936_v14, %v1931_v12, %v8212_v54  ;;  %vm836_vm3 = vweird.f32 %v12261_v56  ;;  %vm1474_vm13 = vcmp.lt.s32.totalorder %v12273_v50, 0 }
 0x198   : > { %vm6247_vm6 = vcmp.lt.s32.totalorder %v6246_v45, 0  ;;  %v1927_v38 = vsel %vm1921_vm14, %v1924_v57, %v1926_v33  ;;  %vm1259_vm7 = vcmp.eq.s32.totalorder %v8167_v19, 2  ;;  %v1528_v10 = vadd.s32 %v8101_v40, %v8113_v13 }
 0x199   : > { %v1543_v21 = vsel %vm6247_vm6, 0, %v6246_v45  ;;  %v1680_v22 = vand.u32 2147483647, %v12277_v31  ;;  %v8224_v30 = vsel %vm836_vm3, nan, %v846_v44  ;;  %vm1256_vm1 = vcmp.eq.s32.totalorder %v8167_v19, 0 }
 0x19a   : > { %v1544_v58 = vsub.s32 32, %v1543_v21  ;;  %v1548_v56 = vsub.s32 4294967266, %v1543_v21  ;;  %v8230_v7 = vsel %vm1474_vm13, %v1558_v51, %v8157_v15  ;;  %vm1255_vm4 = vcmp.lt.s32.totalorder %v8167_v19, 2 }
 0x19b   : > { %v1943_v27 = vmul.u32 %v1936_v14, %v1927_v38  ;;  %vm1945_vm9 = vc.u32 %v8205_v3, %v8212_v54  ;;  %v1946_v40 = vadd.s32 1, %v8213_v5  ;;  %v1698_v13 = vshrl.u32 %v12243_v8, %v8122_v29 }
 0x19c   : > { %vm1252_vm12 = vweird.f32 %v12267_v2  ;;  %v1545_v55 = vshll.u32 %v8169_v39, %v1543_v21  ;;  %v1546_v52 = vshrl.u32 %v1528_v10, %v1544_v58  ;;  %v1549_v43 = vadd.s32 127, %v1548_v56 }
 0x19d   : > { %v1697_v15 = vshll.u32 %v12238_v4, %v7917_v25  ;;  %v1947_v28 = vsel %vm1945_vm9, %v1946_v40, %v8213_v5  ;;  %v1687_v37 = vand.u32 8388607, %v1680_v22  ;;  %v1701_v11 = vshrl.u32 %v12235_v42, %v8122_v29 }
 0x19e   : > { %v1707_v60 = vshrl.u32 %v12237_v59, %v8122_v29  ;;  %v1547_v46 = vor.u32 %v1546_v52, %v1545_v55  ;;  %v1550_v36 = vshll.u32 %v1549_v43, 23  ;;  %v1948_v9 = vadd.s32 %v1947_v28, %v1943_v27  ;;  %v6749_v51 = vpop.eup %6748 }
 0x19f   : > { %v1700_v39 = vshll.u32 %v12243_v8, %v7917_v25  ;;  %vm8253_vm5 = vcmp.le.f32.partialorder %v1472_v53, 0.7853982  ;;  %v1699_v0 = vor.u32 %v1698_v13, %v1697_v15  ;;  %v1704_v32 = vshrl.u32 %v12236_v47, %v8122_v29  ;;  %v6751_v57 = vpop.eup %6750 }
 0x1a0   : > { %v1706_v12 = vshll.u32 %v12236_v47, %v7917_v25  ;;  %v1710_v14 = vshrl.u32 %v12247_v17, %v8122_v29  ;;  %v1260_v33 = vxor.u32 2147483648, %v6749_v51  ;;  %v1551_v61 = vor.u32 4788187, %v1550_v36 }
 0x1a1   : > { %v1949_v45 = vadd.s32 536870912, %v1948_v9  ;;  %v1703_v53 = vshll.u32 %v12235_v42, %v7917_v25  ;;  %v1257_v6 = vxor.u32 2147483648, %v6751_v57  ;;  %v1702_v44 = vor.u32 %v1701_v11, %v1700_v39 }
 0x1a2   : > { %v1708_v5 = vor.u32 %v1707_v60, %v1706_v12  ;;  %v1709_v38 = vshll.u32 %v12237_v59, %v7917_v25  ;;  %vm1587_vm10 = vcmp.gt.s32.totalorder %v7562_v63, 0  ;;  %v1261_v10 = vsel %vm1259_vm7, %v1260_v33, %v6751_v57 }
 0x1a3   : > { %v1552_v21 = vand.u32 2147483647, %v1551_v61  ;;  %v1554_v58 = vcvt.s32.f32 %v1547_v46  ;;  %v1950_v56 = vshrl.u32 %v1949_v45, 30  ;;  %v1258_v27 = vsel %vm1256_vm1, %v6749_v51, %v1257_v6 }
 0x1a4   : > { %v1688_v40 = vor.u32 8388608, %v1687_v37  ;;  %v1705_v13 = vor.u32 %v1704_v32, %v1703_v53  ;;  %v1711_v55 = vor.u32 %v1710_v14, %v1709_v38  ;;  %v1262_v52 = vsel %vm1255_vm4, %v1258_v27, %v1261_v10 }
 0x1a5   : > { %v1555_v43 = vmul.f32 %v1554_v58, %v1552_v21  ;;  %v1951_v15 = vshll.u32 %v1950_v56, 30  ;;  %vm1715_vm15 = vcmp.lt.s32.totalorder %v8116_v62, 4  ;;  %v1263_v25 = vsel %vm1252_vm12, nan, %v1262_v52 }
 0x1a6   : > { %vm1712_vm0 = vcmp.lt.s32.totalorder %v8116_v62, 1  ;;  %vm1714_vm2 = vcmp.lt.s32.totalorder %v8116_v62, 3  ;;  %v1721_v28 = vsel %vm1715_vm15, %v1708_v5, 920167782  ;;  %v6434_v37 = vpack.c.bf16 %v1263_v25, %v8224_v30 }
 0x1a7   : > { %v1556_v11 = vxor.u32 2147483648, %v1555_v43  ;;  %v8282_v60 = vsub.s32 %v1948_v9, %v1951_v15  ;;  %v1720_v19 = vsel %vm1712_vm0, %v1699_v0, %v1702_v44  ;;  %v1974_v46 = vsub.s32 4, %v1950_v56 }
 0x1a8   : > { %v1722_v2 = vsel %vm1714_vm2, %v1705_v13, %v1721_v28  ;;  %v1724_v36 = vsel %vm1712_vm0, %v1702_v44, %v1705_v13  ;;  %v1725_v39 = vsel %vm1715_vm15, %v1711_v55, 1326507024  ;;  %6435 = vmatpush1.bf16.msra.mxu1 %v6434_v37  ;;  %v1561_v30 = vsel %vm8253_vm5, 0, %v8230_v7 }
 0x1a9   : > { %vm1890_vm8 = vcmp.lt.s32.totalorder %v7217_v24, 0  ;;  %v1954_v9 = vsub.s32 0, %v8282_v60  ;;  %vm1713_vm11 = vcmp.lt.s32.totalorder %v8116_v62, 2  ;;  %v1557_v51 = vsel %vm1474_vm13, %v1556_v11, %v1555_v43 }
 0x1aa   : > { %v1717_v32 = vsel %vm1715_vm15, %v1705_v13, 2102212464  ;;  %v1726_v12 = vsel %vm1714_vm2, %v1708_v5, %v1725_v39  ;;  %v1728_v14 = vshll.u32 %v1688_v40, 8  ;;  %v1696_v7 = vshrl.u32 %v12238_v4, %v8122_v29 }
 0x1ab   : > { %v6261_v57 = vmin.u32 %v1954_v9, %v8282_v60  ;;  %v1723_v33 = vsel %vm1713_vm11, %v1720_v19, %v1722_v2  ;;  %v1727_v61 = vsel %vm1713_vm11, %v1724_v36, %v1726_v12  ;;  %v1565_v45 = vadd.s32 3, %v1561_v30 }
 0x1ac   : > { %v1975_v53 = vsel %vm1890_vm8, %v1974_v46, %v1950_v56  ;;  %v8313_v6 = vmul.u32.u64.low %v1728_v14, %v1727_v61  ;;  %v8314_v38 = vmul.u32.u64.high %v1728_v14, %v1727_v61, %v8313_v6  ;;  %v1560_v5 = vsel %vm8253_vm5, %v12273_v50, %v1557_v51 }
 0x1ad   : > { %v1956_v10 = vclz %v6261_v57  ;;  %v1716_v29 = vsel %vm1712_vm0, %v1696_v7, %v1699_v0  ;;  %v1718_v21 = vsel %vm1714_vm2, %v1702_v44, %v1717_v32  ;;  %v8326_v58 = vsel %vm1587_vm10, %v7562_v63, 0 }
 0x1ae   : > { %vm8330_vm14 = vcmp.le.f32.partialorder %v1888_v41, 0.7853982  ;;  %v8334_v34 = vmul.u32.u64.low %v1728_v14, %v1723_v33  ;;  %v8335_v27 = vmul.u32.u64.high %v1728_v14, %v1723_v33, %v8334_v34  ;;  %vm1795_vm3 = vcmp.gt.s32.totalorder %v8106_v49, 0 }
 0x1af   : > { %v8340_v0 = vshrl.u32 %v8140_v16, 5  ;;  %v6262_v44 = vadd.s32 4294967294, %v1956_v10  ;;  %v1977_v63 = vsel %vm8330_vm14, 0, %v1975_v53  ;;  %v2111_v40 = vsub.s32 32, %v8208_v18 }
 0x1b0   : > { %6752 = vcosq.f32 %v1560_v5  ;;  %v8345_v41 = vand.u32 3, %v1565_v45  ;;  %v1719_v13 = vsel %vm1713_vm11, %v1716_v29, %v1718_v21  ;;  %v1944_v55 = vadd.s32 %v8212_v54, %v8205_v3 }
 0x1b1   : > { %6754 = vsinq.f32 %v1560_v5  ;;  %vm6263_vm13 = vcmp.lt.s32.totalorder %v6262_v44, 0  ;;  %vm1737_vm6 = vc.u32 %v8314_v38, %v8334_v34  ;;  %v1981_v52 = vadd.s32 3, %v1977_v63 }
 0x1b2   : > { %v1959_v16 = vsel %vm6263_vm13, 0, %v6262_v44  ;;  %v1738_v43 = vadd.s32 1, %v8335_v27  ;;  %v2096_v15 = vand.u32 2147483647, %v7221_v20  ;;  %v1735_v37 = vmul.u32 %v1728_v14, %v1719_v13 }
 0x1b3   : > { %v1960_v25 = vsub.s32 32, %v1959_v16  ;;  %v1964_v28 = vsub.s32 4294967266, %v1959_v16  ;;  %v2113_v62 = vshll.u32 %v12238_v4, %v8208_v18  ;;  %v1961_v11 = vshll.u32 %v8282_v60, %v1959_v16 }
 0x1b4   : > { %v1739_v3 = vsel %vm1737_vm6, %v1738_v43, %v8335_v27  ;;  %v2114_v54 = vshrl.u32 %v12243_v8, %v2111_v40  ;;  %v2117_v19 = vshrl.u32 %v12235_v42, %v2111_v40  ;;  %v2123_v39 = vshrl.u32 %v12237_v59, %v2111_v40 }
 0x1b5   : > { %v1962_v46 = vshrl.u32 %v1944_v55, %v1960_v25  ;;  %v1965_v2 = vadd.s32 127, %v1964_v28  ;;  %v1740_v36 = vadd.s32 %v1739_v3, %v1735_v37  ;;  %v2103_v30 = vand.u32 8388607, %v2096_v15 }
 0x1b6   : > { %v2116_v9 = vshll.u32 %v12243_v8, %v8208_v18  ;;  %v2120_v51 = vshrl.u32 %v12236_v47, %v2111_v40  ;;  %v2122_v60 = vshll.u32 %v12236_v47, %v8208_v18  ;;  %v2119_v57 = vshll.u32 %v12235_v42, %v8208_v18 }
 0x1b7   : > { %v1963_v32 = vor.u32 %v1962_v46, %v1961_v11  ;;  %v1966_v12 = vshll.u32 %v1965_v2, 23  ;;  %v1741_v14 = vadd.s32 536870912, %v1740_v36  ;;  %v2115_v7 = vor.u32 %v2114_v54, %v2113_v62 }
 0x1b8   : > { %v2118_v33 = vor.u32 %v2117_v19, %v2116_v9  ;;  %v2124_v61 = vor.u32 %v2123_v39, %v2122_v60  ;;  %v2126_v45 = vshrl.u32 %v12247_v17, %v2111_v40  ;;  %v8375_v53 = vsel %vm1795_vm3, %v8106_v49, 0 }
 0x1b9   : > { %v1967_v6 = vor.u32 4788187, %v1966_v12  ;;  %v8377_v5 = vand.u32 3, %v1981_v52  ;;  %v1742_v10 = vshrl.u32 %v1741_v14, 30  ;;  %vm1568_vm7 = vcmp.eq.s32.totalorder %v8345_v41, 0 }
 0x1ba   : > { %v6753_v29 = vpop.eup %6752  ;;  %vm1571_vm1 = vcmp.eq.s32.totalorder %v8345_v41, 2  ;;  %v2112_v21 = vshrl.u32 %v12238_v4, %v2111_v40  ;;  %v2121_v27 = vor.u32 %v2120_v51, %v2119_v57  ;;  %v2125_v44 = vshll.u32 %v12237_v59, %v8208_v18 }
 0x1bb   : > { %vm2128_vm4 = vcmp.lt.s32.totalorder %v8340_v0, 1  ;;  %v6755_v63 = vpop.eup %6754  ;;  %v1968_v49 = vand.u32 2147483647, %v1967_v6  ;;  %v1970_v13 = vcvt.s32.f32 %v1963_v32  ;;  %vm1682_vm9 = vcmp.lt.s32.totalorder %v12277_v31, 0 }
 0x1bc   : > { %v1743_v55 = vshll.u32 %v1742_v10, 30  ;;  %vm2131_vm12 = vcmp.lt.s32.totalorder %v8340_v0, 4  ;;  %v2104_v16 = vor.u32 8388608, %v2103_v30  ;;  %v2127_v52 = vor.u32 %v2126_v45, %v2125_v44 }
 0x1bd   : > { %v2136_v43 = vsel %vm2128_vm4, %v2115_v7, %v2118_v33  ;;  %v2137_v40 = vsel %vm2131_vm12, %v2124_v61, 920167782  ;;  %v1572_v25 = vxor.u32 2147483648, %v6753_v29  ;;  %v1971_v18 = vmul.f32 %v1970_v13, %v1968_v49 }
 0x1be   : > { %v8391_v28 = vsub.s32 %v1740_v36, %v1743_v55  ;;  %vm2130_vm5 = vcmp.lt.s32.totalorder %v8340_v0, 3  ;;  %v1569_v37 = vxor.u32 2147483648, %v6755_v63  ;;  %vm2129_vm10 = vcmp.lt.s32.totalorder %v8340_v0, 2 }
 0x1bf   : > { %v2133_v62 = vsel %vm2131_vm12, %v2121_v27, 2102212464  ;;  %v2138_v11 = vsel %vm2130_vm5, %v2121_v27, %v2137_v40  ;;  %v1972_v3 = vxor.u32 2147483648, %v1971_v18  ;;  %v2140_v46 = vsel %vm2128_vm4, %v2118_v33, %v2121_v27 }
 0x1c0   : > { %v1746_v54 = vsub.s32 0, %v8391_v28  ;;  %v2139_v19 = vsel %vm2129_vm10, %v2136_v43, %v2138_v11  ;;  %v1766_v2 = vsub.s32 4, %v1742_v10  ;;  %v2132_v36 = vsel %vm2128_vm4, %v2112_v21, %v2115_v7 }
 0x1c1   : > { %v2141_v39 = vsel %vm2131_vm12, %v2127_v52, 1326507024  ;;  %v2144_v30 = vshll.u32 %v2104_v16, 8  ;;  %v1973_v9 = vsel %vm1890_vm8, %v1972_v3, %v1971_v18  ;;  %v2134_v60 = vsel %vm2130_vm5, %v2118_v33, %v2133_v62 }
 0x1c2   : > { %v6253_v51 = vmin.u32 %v1746_v54, %v8391_v28  ;;  %v2142_v32 = vsel %vm2130_vm5, %v2124_v61, %v2141_v39  ;;  %v1976_v12 = vsel %vm8330_vm14, %v7217_v24, %v1973_v9  ;;  %v1570_v45 = vsel %vm1568_vm7, %v6753_v29, %v1569_v37 }
 0x1c3   : > { %v2143_v14 = vsel %vm2129_vm10, %v2140_v46, %v2142_v32  ;;  %v8420_v57 = vmul.u32.u64.low %v2144_v30, %v2139_v19  ;;  %v8421_v7 = vmul.u32.u64.high %v2144_v30, %v2139_v19, %v8420_v57  ;;  %v1573_v33 = vsel %vm1571_vm1, %v1572_v25, %v6755_v63 }
 0x1c4   : > { %6756 = vcosq.f32 %v1976_v12  ;;  %v1748_v6 = vclz %v6253_v51  ;;  %v1767_v56 = vsel %vm1682_vm9, %v1766_v2, %v1742_v10  ;;  %v1383_v27 = vsub.s32 32, %v7902_v1 }
 0x1c5   : > { %6758 = vsinq.f32 %v1976_v12  ;;  %v8430_v61 = vmul.u32.u64.low %v2144_v30, %v2143_v14  ;;  %v8431_v21 = vmul.u32.u64.high %v2144_v30, %v2143_v14, %v8430_v61  ;;  %v8435_v44 = vand.u32 31, %v8375_v53 }
 0x1c6   : > { %v6254_v49 = vadd.s32 4294967294, %v1748_v6  ;;  %v2135_v29 = vsel %vm2129_vm10, %v2132_v36, %v2134_v60  ;;  %vm1564_vm15 = vweird.f32 %v12273_v50  ;;  %vm1567_vm0 = vcmp.lt.s32.totalorder %v8345_v41, 2 }
 0x1c7   : > { %vm8443_vm2 = vcmp.le.f32.partialorder %v1680_v22, 0.7853982  ;;  %v2154_v63 = vadd.s32 1, %v8421_v7  ;;  %v1574_v13 = vsel %vm1567_vm0, %v1570_v45, %v1573_v33  ;;  %vm1987_vm8 = vcmp.eq.s32.totalorder %v8377_v5, 2  ;;  %v12284_v22 = vld [vmem:[#allocation7_spill] sm:$0xff] }
 0x1c8   : > { %v1736_v55 = vadd.s32 %v8334_v34, %v8314_v38  ;;  %vm6255_vm11 = vcmp.lt.s32.totalorder %v6254_v49, 0  ;;  %v1769_v0 = vsel %vm8443_vm2, 0, %v1767_v56  ;;  %vm1984_vm14 = vcmp.eq.s32.totalorder %v8377_v5, 0 }
 0x1c9   : > { %v1751_v41 = vsel %vm6255_vm11, 0, %v6254_v49  ;;  %v2151_v16 = vmul.u32 %v2144_v30, %v2135_v29  ;;  %vm2153_vm3 = vc.u32 %v8431_v21, %v8420_v57  ;;  %v1368_v52 = vand.u32 2147483647, %v12284_v22 }
 0x1ca   : > { %vm1983_vm13 = vcmp.lt.s32.totalorder %v8377_v5, 2  ;;  %v1752_v43 = vsub.s32 32, %v1751_v41  ;;  %v1756_v40 = vsub.s32 4294967266, %v1751_v41  ;;  %v2155_v25 = vsel %vm2153_vm3, %v2154_v63, %v8421_v7 }
 0x1cb   : > { %v1386_v38 = vshrl.u32 %v12243_v8, %v1383_v27  ;;  %v1575_v34 = vsel %vm1564_vm15, nan, %v1574_v13  ;;  %vm1980_vm6 = vweird.f32 %v7217_v24  ;;  %v8463_v18 = vadd.s32 3, %v1769_v0 }
 0x1cc   : > { %v2156_v37 = vadd.s32 %v2155_v25, %v2151_v16  ;;  %v1385_v62 = vshll.u32 %v12238_v4, %v7902_v1  ;;  %v1753_v11 = vshll.u32 %v8391_v28, %v1751_v41  ;;  %v1754_v3 = vshrl.u32 %v1736_v55, %v1752_v43 }
 0x1cd   : > { %v1757_v54 = vadd.s32 127, %v1756_v40  ;;  %v1389_v19 = vshrl.u32 %v12235_v42, %v1383_v27  ;;  %v1375_v2 = vand.u32 8388607, %v1368_v52  ;;  %v1388_v50 = vshll.u32 %v12243_v8, %v7902_v1 }
 0x1ce   : > { %v2157_v46 = vadd.s32 536870912, %v2156_v37  ;;  %v1392_v36 = vshrl.u32 %v12236_v47, %v1383_v27  ;;  %v6757_v39 = vpop.eup %6756  ;;  %v1755_v30 = vor.u32 %v1754_v3, %v1753_v11  ;;  %v1387_v51 = vor.u32 %v1386_v38, %v1385_v62 }
 0x1cf   : > { %v1758_v9 = vshll.u32 %v1757_v54, 23  ;;  %v1395_v60 = vshrl.u32 %v12237_v59, %v1383_v27  ;;  %v6759_v28 = vpop.eup %6758  ;;  %v1988_v32 = vxor.u32 2147483648, %v6757_v39  ;;  %v1391_v14 = vshll.u32 %v12235_v42, %v7902_v1 }
 0x1d0   : > { %v2158_v12 = vshrl.u32 %v2157_v46, 30  ;;  %v1398_v7 = vshrl.u32 %v12247_v17, %v1383_v27  ;;  %v1985_v45 = vxor.u32 2147483648, %v6759_v28  ;;  %v1390_v6 = vor.u32 %v1389_v19, %v1388_v50 }
 0x1d1   : > { %v1759_v33 = vor.u32 4788187, %v1758_v9  ;;  %v1394_v56 = vshll.u32 %v12236_v47, %v7902_v1  ;;  %v1989_v61 = vsel %vm1987_vm8, %v1988_v32, %v6759_v28  ;;  %v1393_v29 = vor.u32 %v1392_v36, %v1391_v14 }
 0x1d2   : > { %v2159_v49 = vshll.u32 %v2158_v12, 30  ;;  %v1397_v63 = vshll.u32 %v12237_v59, %v7902_v1  ;;  %v1986_v13 = vsel %vm1984_vm14, %v6757_v39, %v1985_v45  ;;  %v1762_v0 = vcvt.s32.f32 %v1755_v30 }
 0x1d3   : > { %v1760_v55 = vand.u32 2147483647, %v1759_v33  ;;  %v1396_v41 = vor.u32 %v1395_v60, %v1394_v56  ;;  %v1990_v16 = vsel %vm1983_vm13, %v1986_v13, %v1989_v61  ;;  %vm2098_vm7 = vcmp.lt.s32.totalorder %v7221_v20, 0 }
 0x1d4   : > { %v8489_v43 = vsub.s32 %v2156_v37, %v2159_v49  ;;  %v1384_v40 = vshrl.u32 %v12238_v4, %v1383_v27  ;;  %v1399_v25 = vor.u32 %v1398_v7, %v1397_v63  ;;  %v1991_v38 = vsel %vm1980_vm6, nan, %v1990_v16 }
 0x1d5   : > { %v1763_v1 = vmul.f32 %v1762_v0, %v1760_v55  ;;  %v1376_v62 = vor.u32 8388608, %v1375_v2  ;;  %vm1400_vm1 = vcmp.lt.s32.totalorder %v7786_v26, 1  ;;  %v6428_v11 = vpack.c.bf16 %v1991_v38, %v1575_v34 }
 0x1d6   : > { %v2162_v3 = vsub.s32 0, %v8489_v43  ;;  %vm1402_vm4 = vcmp.lt.s32.totalorder %v7786_v26, 3  ;;  %vm1403_vm12 = vcmp.lt.s32.totalorder %v7786_v26, 4  ;;  %v1408_v27 = vsel %vm1400_vm1, %v1387_v51, %v1390_v6 }
 0x1d7   : > { %v1764_v5 = vxor.u32 2147483648, %v1763_v1  ;;  %v1405_v37 = vsel %vm1403_vm12, %v1393_v29, 2102212464  ;;  %v1409_v54 = vsel %vm1403_vm12, %v1396_v41, 920167782  ;;  %6429 = vmatprep.subr.bf16.mxu0 %v6428_v11  ;;  %v1412_v34 = vsel %vm1400_vm1, %v1390_v6, %v1393_v29 }
 0x1d8   : > { %v6269_v24 = vmin.u32 %v2162_v3, %v8489_v43  ;;  %v1410_v19 = vsel %vm1402_vm4, %v1393_v29, %v1409_v54  ;;  %v1413_v46 = vsel %vm1403_vm12, %v1399_v25, 1326507024  ;;  %v2182_v50 = vsub.s32 4, %v2158_v12 }
 0x1d9   : > { %v1765_v2 = vsel %vm1682_vm9, %v1764_v5, %v1763_v1  ;;  %vm1401_vm5 = vcmp.lt.s32.totalorder %v7786_v26, 2  ;;  %v1414_v36 = vsel %vm1402_vm4, %v1396_v41, %v1413_v46  ;;  %v1416_v60 = vshll.u32 %v1376_v62, 8 }
 0x1da   : > { %v1768_v39 = vsel %vm8443_vm2, %v12277_v31, %v1765_v2  ;;  %v2164_v30 = vclz %v6269_v24  ;;  %v1411_v9 = vsel %vm1401_vm5, %v1408_v27, %v1410_v19  ;;  %v1404_v28 = vsel %vm1400_vm1, %v1384_v40, %v1387_v51 }
 0x1db   : > { %6760 = vcosq.f32 %v1768_v39  ;;  %v1406_v32 = vsel %vm1402_vm4, %v1390_v6, %v1405_v37  ;;  %v1415_v14 = vsel %vm1401_vm5, %v1412_v34, %v1414_v36  ;;  %v8525_v33 = vand.u32 31, %v8326_v58 }
 0x1dc   : > { %6762 = vsinq.f32 %v1768_v39  ;;  %v6270_v7 = vadd.s32 4294967294, %v2164_v30  ;;  %v8521_v45 = vmul.u32.u64.low %v1416_v60, %v1415_v14  ;;  %v8522_v10 = vmul.u32.u64.high %v1416_v60, %v1415_v14, %v8521_v45 }
 0x1dd   : > { %v2183_v56 = vsel %vm2098_vm7, %v2182_v50, %v2158_v12  ;;  %v8529_v61 = vmul.u32.u64.low %v1416_v60, %v1411_v9  ;;  %v8530_v49 = vmul.u32.u64.high %v1416_v60, %v1411_v9, %v8529_v61  ;;  %v1799_v51 = vsub.s32 32, %v8435_v44 }
 0x1de   : > { %v8535_v6 = vadd.s32 4294967169, %v7669_v35  ;;  %vm6271_vm9 = vcmp.lt.s32.totalorder %v6270_v7, 0  ;;  %v1407_v29 = vsel %vm1401_vm5, %v1404_v28, %v1406_v32  ;;  %v8540_v63 = vshrl.u32 %v8375_v53, 5 }
 0x1df   : > { %v8543_v13 = vand.u32 3, %v8463_v18  ;;  %vm8547_vm10 = vcmp.le.f32.partialorder %v2096_v15, 0.7853982  ;;  %v2167_v55 = vsel %vm6271_vm9, 0, %v6270_v7  ;;  %v2152_v35 = vadd.s32 %v8420_v57, %v8431_v21 }
 0x1e0   : > { %v2168_v0 = vsub.s32 32, %v2167_v55  ;;  %v2172_v41 = vsub.s32 4294967266, %v2167_v55  ;;  %v2185_v26 = vsel %vm8547_vm10, 0, %v2183_v56  ;;  %v1423_v53 = vmul.u32 %v1416_v60, %v1407_v29 }
 0x1e1   : > { %vm1425_vm15 = vc.u32 %v8522_v10, %v8529_v61  ;;  %v1426_v18 = vadd.s32 1, %v8530_v49  ;;  %v1784_v15 = vand.u32 2147483647, %v7215_v23  ;;  %v2169_v16 = vshll.u32 %v8489_v43, %v2167_v55 }
 0x1e2   : > { %v2170_v40 = vshrl.u32 %v2152_v35, %v2168_v0  ;;  %v2173_v25 = vadd.s32 127, %v2172_v41  ;;  %v1802_v38 = vshrl.u32 %v12243_v8, %v1799_v51  ;;  %vm1779_vm0 = vcmp.eq.s32.totalorder %v8543_v13, 2 }
 0x1e3   : > { %v8562_v57 = vadd.s32 3, %v2185_v26  ;;  %v1427_v21 = vsel %vm1425_vm15, %v1426_v18, %v8530_v49  ;;  %v1805_v1 = vshrl.u32 %v12235_v42, %v1799_v51  ;;  %vm1776_vm2 = vcmp.eq.s32.totalorder %v8543_v13, 0 }
 0x1e4   : > { %v2171_v62 = vor.u32 %v2170_v40, %v2169_v16  ;;  %v2174_v11 = vshll.u32 %v2173_v25, 23  ;;  %v1428_v3 = vadd.s32 %v1427_v21, %v1423_v53  ;;  %v1801_v43 = vshll.u32 %v12238_v4, %v8435_v44  ;;  %v2204_v25 = vld [vmem:[%s12072_s4] sm:$0xff] }
 0x1e5   : > { %v6761_v5 = vpop.eup %6760  ;;  %v1804_v37 = vshll.u32 %v12243_v8, %v8435_v44  ;;  %v1808_v27 = vshrl.u32 %v12236_v47, %v1799_v51  ;;  %v1810_v54 = vshll.u32 %v12236_v47, %v8435_v44  ;;  %v1811_v24 = vshrl.u32 %v12237_v59, %v1799_v51  ;;  %2210 = vperm.xlu1 %6718, %v2204_v25  }
 0x1e6   : > { %v6763_v19 = vpop.eup %6762  ;;  %v2175_v34 = vor.u32 4788187, %v2174_v11  ;;  %v1429_v46 = vadd.s32 536870912, %v1428_v3  ;;  %v1791_v2 = vand.u32 8388607, %v1784_v15  ;;  %v1803_v50 = vor.u32 %v1802_v38, %v1801_v43  ;;  %v2205_v38 = vld [vmem:[%s12072_s4 + $0x8] sm:$0xff] }
 0x1e7   : > { %v1806_v36 = vor.u32 %v1805_v1, %v1804_v37  ;;  %v1807_v39 = vshll.u32 %v12235_v42, %v8435_v44  ;;  %v1812_v30 = vor.u32 %v1811_v24, %v1810_v54  ;;  %v1814_v9 = vshrl.u32 %v12247_v17, %v1799_v51  ;;  %2215 = vperm.xlu0 %6719, %v2205_v38   ;;  %v4087_v54 = vld [vmem:[%s12074_s6] sm:$0xff] }
 0x1e8   : > { %v1780_v60 = vxor.u32 2147483648, %v6761_v5  ;;  %v2176_v28 = vand.u32 2147483647, %v2175_v34  ;;  %v2178_v32 = vcvt.s32.f32 %v2171_v62  ;;  %v8580_v14 = vshrl.u32 %v1429_v46, 30 }
 0x1e9   : > { %v1777_v7 = vxor.u32 2147483648, %v6763_v19  ;;  %v1800_v45 = vshrl.u32 %v12238_v4, %v1799_v51  ;;  %v1809_v56 = vor.u32 %v1808_v27, %v1807_v39  ;;  %v1813_v49 = vshll.u32 %v12237_v59, %v8435_v44  ;;  %v2206_v27 = vld [vmem:[%s12072_s4 + $0x10] sm:$0xff] }
 0x1ea   : > { %v2179_v29 = vmul.f32 %v2178_v32, %v2176_v28  ;;  %v1431_v55 = vshll.u32 %v8580_v14, 30  ;;  %vm1816_vm8 = vcmp.lt.s32.totalorder %v8540_v63, 1  ;;  %vm1819_vm11 = vcmp.lt.s32.totalorder %v8540_v63, 4  ;;  %2220 = vperm.xlu1 %6718, %v2206_v27  }
 0x1eb   : > { %v1792_v35 = vor.u32 8388608, %v1791_v2  ;;  %v1815_v0 = vor.u32 %v1814_v9, %v1813_v49  ;;  %v1824_v41 = vsel %vm1816_vm8, %v1803_v50, %v1806_v36  ;;  %v1825_v26 = vsel %vm1819_vm11, %v1812_v30, 920167782  ;;  %4093 = vperm.xlu0 %6719, %v4087_v54  }
 0x1ec   : > { %v1781_v51 = vsel %vm1779_vm0, %v1780_v60, %v6763_v19  ;;  %v2180_v53 = vxor.u32 2147483648, %v2179_v29  ;;  %v8594_v44 = vsub.s32 %v1428_v3, %v1431_v55  ;;  %vm1818_vm14 = vcmp.lt.s32.totalorder %v8540_v63, 3  ;;  %v2207_v60 = vld [vmem:[%s12072_s4 + $0x18] sm:$0xff]  ;;  %v4088_v55 = vld [vmem:[%s12074_s6 + $0x8] sm:$0xff] }
 0x1ed   : > { %v1778_v18 = vsel %vm1776_vm2, %v6761_v5, %v1777_v7  ;;  %vm1817_vm3 = vcmp.lt.s32.totalorder %v8540_v63, 2  ;;  %v1821_v16 = vsel %vm1819_vm11, %v1809_v56, 2102212464  ;;  %v1826_v40 = vsel %vm1818_vm14, %v1809_v56, %v1825_v26 }
 0x1ee   : > { %v2181_v21 = vsel %vm2098_vm7, %v2180_v53, %v2179_v29  ;;  %v1434_v1 = vsub.s32 0, %v8594_v44  ;;  %v1827_v62 = vsel %vm1817_vm3, %v1824_v41, %v1826_v40  ;;  %v1828_v11 = vsel %vm1816_vm8, %v1806_v36, %v1809_v56  ;;  %v12287_v56 = vld [vmem:[#allocation9_spill] sm:$0xff]  ;;  %2225 = vperm.xlu1 %6718, %v2207_v60  }
 0x1ef   : > { %v2184_v3 = vsel %vm8547_vm10, %v7221_v20, %v2181_v21  ;;  %v1820_v43 = vsel %vm1816_vm8, %v1800_v45, %v1803_v50  ;;  %v1829_v5 = vsel %vm1819_vm11, %v1815_v0, 1326507024  ;;  %v1832_v37 = vshll.u32 %v1792_v35, 8  ;;  %v5966_v35 = vld [vmem:[%s12076_s8] sm:$0x7] }
 0x1f0   : > { %6764 = vcosq.f32 %v2184_v3  ;;  %v6241_v24 = vmin.u32 %v1434_v1, %v8594_v44  ;;  %v1822_v12 = vsel %vm1818_vm14, %v1806_v36, %v1821_v16  ;;  %v1830_v19 = vsel %vm1818_vm14, %v1812_v30, %v1829_v5 }
 0x1f1   : > { %6766 = vsinq.f32 %v2184_v3  ;;  %v1831_v34 = vsel %vm1817_vm3, %v1828_v11, %v1830_v19  ;;  %v8637_v46 = vmul.u32.u64.low %v1832_v37, %v1827_v62  ;;  %v8638_v2 = vmul.u32.u64.high %v1832_v37, %v1827_v62, %v8637_v46 }
 0x1f2   : > { %v8642_v50 = vadd.s32 1, %v8535_v6  ;;  %v8645_v39 = vand.u32 3, %v8562_v57  ;;  %v1436_v9 = vclz %v6241_v24  ;;  %vm1775_vm13 = vcmp.lt.s32.totalorder %v8543_v13, 2  ;;  %v4089_v6 = vld [vmem:[%s12074_s6 + $0x10] sm:$0xff]  ;;  %4098 = vperm.xlu1 %6718, %v4088_v55  }
 0x1f3   : > { %v8648_v36 = vmul.u32.u64.low %v1832_v37, %v1831_v34  ;;  %v8649_v30 = vmul.u32.u64.high %v1832_v37, %v1831_v34, %v8648_v36  ;;  %v8658_v28 = vshrl.u32 %v8326_v58, 5  ;;  %v1782_v57 = vsel %vm1775_vm13, %v1778_v18, %v1781_v51  ;;  %4103 = vperm.xlu0 %6719, %v4089_v6  }
 0x1f4   : > { %v6242_v32 = vadd.s32 4294967294, %v1436_v9  ;;  %v1823_v7 = vsel %vm1817_vm3, %v1820_v43, %v1822_v12  ;;  %v8663_v13 = vsub.s32 32, %v8525_v33  ;;  %vm1772_vm6 = vweird.f32 %v12277_v31 }
 0x1f5   : > { %v1842_v45 = vadd.s32 1, %v8638_v2  ;;  %v1576_v49 = vand.u32 2147483647, %v12287_v56  ;;  %vm2003_vm7 = vcmp.gt.s32.totalorder %v8642_v50, 0  ;;  %vm2191_vm1 = vcmp.lt.s32.totalorder %v8645_v39, 2 }
 0x1f6   : > { %vm2192_vm4 = vcmp.eq.s32.totalorder %v8645_v39, 0  ;;  %vm2195_vm12 = vcmp.eq.s32.totalorder %v8645_v39, 2  ;;  %v1424_v58 = vadd.s32 %v8529_v61, %v8522_v10  ;;  %vm6243_vm5 = vcmp.lt.s32.totalorder %v6242_v32, 0 }
 0x1f7   : > { %v1783_v63 = vsel %vm1772_vm6, nan, %v1782_v57  ;;  %vm2188_vm9 = vweird.f32 %v7221_v20  ;;  %v1439_v31 = vsel %vm6243_vm5, 0, %v6242_v32  ;;  %v1839_v29 = vmul.u32 %v1832_v37, %v1823_v7  ;;  %5969 = vperm.xlu0 %6719, %v5966_v35  }
 0x1f8   : > { %vm1841_vm10 = vc.u32 %v8649_v30, %v8637_v46  ;;  %v1440_v10 = vsub.s32 32, %v1439_v31  ;;  %v1444_v61 = vsub.s32 4294967266, %v1439_v31  ;;  %v1593_v41 = vshll.u32 %v12238_v4, %v8525_v33 }
 0x1f9   : > { %v1843_v0 = vsel %vm1841_vm10, %v1842_v45, %v8638_v2  ;;  %v8688_v51 = vand.u32 8388607, %v1576_v49  ;;  %v1594_v53 = vshrl.u32 %v12243_v8, %v8663_v13  ;;  %v1596_v18 = vshll.u32 %v12243_v8, %v8525_v33 }
 0x1fa   : > { %v1844_v26 = vadd.s32 %v1843_v0, %v1839_v29  ;;  %v6765_v16 = vpop.eup %6764  ;;  %v1441_v40 = vshll.u32 %v8594_v44, %v1439_v31  ;;  %v1442_v25 = vshrl.u32 %v1424_v58, %v1440_v10  ;;  %v1445_v38 = vadd.s32 127, %v1444_v61  ;;  %v4090_v44 = vld [vmem:[%s12074_s6 + $0x18] sm:$0xff] }
 0x1fb   : > { %v1597_v21 = vshrl.u32 %v12235_v42, %v8663_v13  ;;  %v6767_v1 = vpop.eup %6766  ;;  %v2196_v62 = vxor.u32 2147483648, %v6765_v16  ;;  %v1599_v3 = vshll.u32 %v12235_v42, %v8525_v33  ;;  %v1603_v43 = vshrl.u32 %v12237_v59, %v8663_v13  ;;  %4108 = vperm.xlu1 %6718, %v4090_v44  }
 0x1fc   : > { %v1845_v11 = vadd.s32 536870912, %v1844_v26  ;;  %v2193_v5 = vxor.u32 2147483648, %v6767_v1  ;;  %v1443_v37 = vor.u32 %v1442_v25, %v1441_v40  ;;  %v1446_v27 = vshll.u32 %v1445_v38, 23 }
 0x1fd   : > { %v1600_v54 = vshrl.u32 %v12236_v47, %v8663_v13  ;;  %v2197_v24 = vsel %vm2195_vm12, %v2196_v62, %v6767_v1  ;;  %v1602_v19 = vshll.u32 %v12236_v47, %v8525_v33  ;;  %v1606_v34 = vshrl.u32 %v12247_v17, %v8663_v13 }
 0x1fe   : > { %v8708_v12 = vshrl.u32 %v1845_v11, 30  ;;  %v2194_v2 = vsel %vm2192_vm4, %v6765_v16, %v2193_v5  ;;  %v1447_v9 = vor.u32 4788187, %v1446_v27  ;;  %v1595_v36 = vor.u32 %v1594_v53, %v1593_v41 }
 0x1ff   : > { %v1598_v60 = vor.u32 %v1597_v21, %v1596_v18  ;;  %v2198_v6 = vsel %vm2191_vm1, %v2194_v2, %v2197_v24  ;;  %v1604_v32 = vor.u32 %v1603_v43, %v1602_v19  ;;  %v1605_v7 = vshll.u32 %v12237_v59, %v8525_v33 }
 0x200   : > { %v1847_v57 = vshll.u32 %v8708_v12, 30  ;;  %v2199_v45 = vsel %vm2188_vm9, nan, %v2198_v6  ;;  %v1448_v58 = vand.u32 2147483647, %v1447_v9  ;;  %v1450_v31 = vcvt.s32.f32 %v1443_v37 }
 0x201   : > { %v1601_v29 = vor.u32 %v1600_v54, %v1599_v3  ;;  %v2004_v55 = vsel %vm2003_vm7, %v8642_v50, 0  ;;  %v6436_v35 = vpack.c.bf16 %v2199_v45, %v1783_v63  ;;  %v1607_v39 = vor.u32 %v1606_v34, %v1605_v7 }
 0x202   : > { %v1848_v10 = vsub.s32 %v1844_v26, %v1847_v57  ;;  %v1451_v61 = vmul.f32 %v1450_v31, %v1448_v58  ;;  %v1584_v0 = vor.u32 8388608, %v8688_v51  ;;  %vm1611_vm15 = vcmp.lt.s32.totalorder %v8658_v28, 4 }
 0x203   : > { %6437 = vmatprep.subr.bf16.mxu1 %v6436_v35  ;;  %vm1608_vm0 = vcmp.lt.s32.totalorder %v8658_v28, 1  ;;  %vm1610_vm2 = vcmp.lt.s32.totalorder %v8658_v28, 3  ;;  %v1617_v20 = vsel %vm1611_vm15, %v1604_v32, 920167782  ;;  %v8730_v41 = vand.u32 31, %v2004_v55 }
 0x204   : > { %v1850_v33 = vsub.s32 0, %v1848_v10  ;;  %v1616_v50 = vsel %vm1608_vm0, %v1595_v36, %v1598_v60  ;;  %v1618_v63 = vsel %vm1610_vm2, %v1601_v29, %v1617_v20  ;;  %v1613_v53 = vsel %vm1611_vm15, %v1601_v29, 2102212464 }
 0x205   : > { %v1620_v51 = vsel %vm1608_vm0, %v1598_v60, %v1601_v29  ;;  %v1621_v18 = vsel %vm1611_vm15, %v1607_v39, 1326507024  ;;  %v1452_v16 = vxor.u32 2147483648, %v1451_v61  ;;  %v1592_v40 = vshrl.u32 %v12238_v4, %v8663_v13 }
 0x206   : > { %v6257_v26 = vmin.u32 %v1850_v33, %v1848_v10  ;;  %vm1609_vm8 = vcmp.lt.s32.totalorder %v8658_v28, 2  ;;  %v1622_v25 = vsel %vm1610_vm2, %v1604_v32, %v1621_v18  ;;  %v1454_v38 = vsub.s32 4, %v8580_v14 }
 0x207   : > { %v1619_v1 = vsel %vm1609_vm8, %v1616_v50, %v1618_v63  ;;  %v1624_v62 = vshll.u32 %v1584_v0, 8  ;;  %v1612_v11 = vsel %vm1608_vm0, %v1592_v40, %v1595_v36  ;;  %v1614_v3 = vsel %vm1610_vm2, %v1598_v60, %v1613_v53 }
 0x208   : > { %v1852_v21 = vclz %v6257_v26  ;;  %v1623_v13 = vsel %vm1609_vm8, %v1620_v51, %v1622_v25  ;;  %vm1370_vm11 = vcmp.lt.s32.totalorder %v12284_v22, 0  ;;  %v8756_v37 = vshrl.u32 %v2004_v55, 5 }
 0x209   : > { %v8753_v44 = vmul.u32.u64.low %v1624_v62, %v1623_v13  ;;  %v8754_v5 = vmul.u32.u64.high %v1624_v62, %v1623_v13, %v8753_v44  ;;  %v1453_v27 = vsel %vm1370_vm11, %v1452_v16, %v1451_v61  ;;  %v8763_v19 = vsub.s32 32, %v8730_v41 }
 0x20a   : > { %v6258_v43 = vadd.s32 4294967294, %v1852_v21  ;;  %v8758_v54 = vmul.u32.u64.low %v1624_v62, %v1619_v1  ;;  %v8759_v24 = vmul.u32.u64.high %v1624_v62, %v1619_v1, %v8758_v54  ;;  %v1455_v34 = vsel %vm1370_vm11, %v1454_v38, %v8580_v14 }
 0x20b   : > { %v1615_v2 = vsel %vm1609_vm8, %v1612_v11, %v1614_v3  ;;  %vm8770_vm3 = vcmp.le.f32.partialorder %v1368_v52, 0.7853982  ;;  %vm1786_vm13 = vcmp.lt.s32.totalorder %v7215_v23, 0  ;;  %v1870_v60 = vsub.s32 4, %v8708_v12 }
 0x20c   : > { %vm6259_vm14 = vcmp.lt.s32.totalorder %v6258_v43, 0  ;;  %v1456_v6 = vsel %vm8770_vm3, %v12284_v22, %v1453_v27  ;;  %v1840_v14 = vadd.s32 %v8637_v46, %v8649_v30  ;;  %v1457_v52 = vsel %vm8770_vm3, 0, %v1455_v34 }
 0x20d   : > { %v1855_v36 = vsel %vm6259_vm14, 0, %v6258_v43  ;;  %v1631_v32 = vmul.u32 %v1624_v62, %v1615_v2  ;;  %vm1633_vm6 = vc.u32 %v8754_v5, %v8758_v54  ;;  %v1634_v7 = vadd.s32 1, %v8759_v24 }
 0x20e   : > { %v1856_v28 = vsub.s32 32, %v1855_v36  ;;  %v1860_v57 = vsub.s32 4294967266, %v1855_v36  ;;  %v1857_v45 = vshll.u32 %v1848_v10, %v1855_v36  ;;  %v1992_v29 = vand.u32 2147483647, %v7219_v48 }
 0x20f   : > { %6768 = vcosq.f32 %v1456_v6  ;;  %v8790_v46 = vsel %vm1786_vm13, %v1870_v60, %v8708_v12  ;;  %v1635_v30 = vsel %vm1633_vm6, %v1634_v7, %v8759_v24  ;;  %v2019_v55 = vshrl.u32 %v12237_v59, %v8763_v19 }
 0x210   : > { %v1858_v58 = vshrl.u32 %v1840_v14, %v1856_v28  ;;  %v1861_v31 = vadd.s32 127, %v1860_v57  ;;  %v1636_v61 = vadd.s32 %v1635_v30, %v1631_v32  ;;  %v2010_v10 = vshrl.u32 %v12243_v8, %v8763_v19 }
 0x211   : > { %v2013_v0 = vshrl.u32 %v12235_v42, %v8763_v19  ;;  %v2016_v33 = vshrl.u32 %v12236_v47, %v8763_v19  ;;  %v2018_v12 = vshll.u32 %v12236_v47, %v8730_v41  ;;  %v2022_v20 = vshrl.u32 %v12247_v17, %v8763_v19 }
 0x212   : > { %v1859_v35 = vor.u32 %v1858_v58, %v1857_v45  ;;  %v1862_v39 = vshll.u32 %v1861_v31, 23  ;;  %v1637_v63 = vadd.s32 536870912, %v1636_v61  ;;  %v1999_v26 = vand.u32 8388607, %v1992_v29 }
 0x213   : > { %v2009_v53 = vshll.u32 %v12238_v4, %v8730_v41  ;;  %v2012_v51 = vshll.u32 %v12243_v8, %v8730_v41  ;;  %v2015_v18 = vshll.u32 %v12235_v42, %v8730_v41  ;;  %v2020_v16 = vor.u32 %v2019_v55, %v2018_v12 }
 0x214   : > { %v1863_v50 = vor.u32 4788187, %v1862_v39  ;;  %v2021_v40 = vshll.u32 %v12237_v59, %v8730_v41  ;;  %6770 = vsinq.f32 %v1456_v6  ;;  %v1866_v38 = vcvt.s32.f32 %v1859_v35 }
 0x215   : > { %v8815_v21 = vshrl.u32 %v1637_v63, 30  ;;  %v2011_v1 = vor.u32 %v2010_v10, %v2009_v53  ;;  %v2014_v62 = vor.u32 %v2013_v0, %v2012_v51  ;;  %v2017_v11 = vor.u32 %v2016_v33, %v2015_v18 }
 0x216   : > { %v1864_v25 = vand.u32 2147483647, %v1863_v50  ;;  %v2023_v3 = vor.u32 %v2022_v20, %v2021_v40  ;;  %vm8819_vm7 = vcmp.le.f32.partialorder %v1784_v15, 0.7853982  ;;  %vm2027_vm1 = vcmp.lt.s32.totalorder %v8756_v37, 4 }
 0x217   : > { %v1639_v44 = vshll.u32 %v8815_v21, 30  ;;  %v1461_v41 = vadd.s32 3, %v1457_v52  ;;  %v1873_v27 = vsel %vm8819_vm7, 0, %v8790_v46  ;;  %v2000_v24 = vor.u32 8388608, %v1999_v26 }
 0x218   : > { %v1867_v43 = vmul.f32 %v1866_v38, %v1864_v25  ;;  %v2033_v34 = vsel %vm2027_vm1, %v2020_v16, 920167782  ;;  %vm2024_vm4 = vcmp.lt.s32.totalorder %v8756_v37, 1  ;;  %vm2026_vm12 = vcmp.lt.s32.totalorder %v8756_v37, 3 }
 0x219   : > { %v8830_v9 = vsub.s32 %v1636_v61, %v1639_v44  ;;  %v6769_v15 = vpop.eup %6768  ;;  %v2032_v36 = vsel %vm2024_vm4, %v2011_v1, %v2014_v62  ;;  %v2034_v60 = vsel %vm2026_vm12, %v2017_v11, %v2033_v34  ;;  %v2036_v6 = vsel %vm2024_vm4, %v2014_v62, %v2017_v11 }
 0x21a   : > { %v1868_v2 = vxor.u32 2147483648, %v1867_v43  ;;  %v2037_v14 = vsel %vm2027_vm1, %v2023_v3, 1326507024  ;;  %v2008_v52 = vshrl.u32 %v12238_v4, %v8763_v19  ;;  %vm2025_vm5 = vcmp.lt.s32.totalorder %v8756_v37, 2 }
 0x21b   : > { %v1642_v57 = vsub.s32 0, %v8830_v9  ;;  %v2029_v7 = vsel %vm2027_vm1, %v2017_v11, 2102212464  ;;  %v2038_v45 = vsel %vm2026_vm12, %v2020_v16, %v2037_v14  ;;  %v2040_v58 = vshll.u32 %v2000_v24, 8 }
 0x21c   : > { %v1869_v28 = vsel %vm1786_vm13, %v1868_v2, %v1867_v43  ;;  %v2035_v46 = vsel %vm2025_vm5, %v2032_v36, %v2034_v60  ;;  %v2039_v19 = vsel %vm2025_vm5, %v2036_v6, %v2038_v45  ;;  %v2028_v61 = vsel %vm2024_vm4, %v2008_v52, %v2011_v1 }
 0x21d   : > { %v1872_v32 = vsel %vm8819_vm7, %v7215_v23, %v1869_v28  ;;  %v6249_v31 = vmin.u32 %v1642_v57, %v8830_v9  ;;  %v8860_v30 = vmul.u32.u64.low %v2040_v58, %v2039_v19  ;;  %v8861_v55 = vmul.u32.u64.high %v2040_v58, %v2039_v19, %v8860_v30 }
 0x21e   : > { %6772 = vcosq.f32 %v1872_v32  ;;  %v6771_v35 = vpop.eup %6770  ;;  %v2030_v10 = vsel %vm2026_vm12, %v2014_v62, %v2029_v7  ;;  %v1877_v0 = vadd.s32 3, %v1873_v27  ;;  %v1462_v20 = vand.u32 3, %v1461_v41 }
 0x21f   : > { %6774 = vsinq.f32 %v1872_v32  ;;  %v1644_v39 = vclz %v6249_v31  ;;  %v8867_v33 = vmul.u32.u64.low %v2040_v58, %v2035_v46  ;;  %v8868_v12 = vmul.u32.u64.high %v2040_v58, %v2035_v46, %v8867_v33 }
 0x220   : > { %v12117_v63 = vmov 0.0   ;;  %v1465_v26 = vxor.u32 2147483648, %v6771_v35  ;;  %v1468_v53 = vxor.u32 2147483648, %v6769_v15  ;;  %v2031_v51 = vsel %vm2025_vm5, %v2028_v61, %v2030_v10  ;;  %v8903_v61 = vld [vmem:[%s12071_s3 + $0x10] sm:$0xff] }
 0x221   : > { %v6250_v50 = vadd.s32 4294967294, %v1644_v39  ;;  %2305 = vmatprep.mubr.f32.mxu0 %v12117_v63  ;;  %2394 = vmatprep.mubr.f32.mxu1 %v12117_v63  ;;  %vm2049_vm10 = vc.u32 %v8861_v55, %v8867_v33  ;;  %v1878_v18 = vand.u32 3, %v1877_v0  ;;  %v2050_v40 = vadd.s32 1, %v8868_v12 }
 0x222   : > { %vm1464_vm15 = vcmp.eq.s32.totalorder %v1462_v20, 0  ;;  %vm1467_vm0 = vcmp.eq.s32.totalorder %v1462_v20, 2  ;;  %v2047_v38 = vmul.u32 %v2040_v58, %v2031_v51  ;;  %vm1463_vm2 = vcmp.lt.s32.totalorder %v1462_v20, 2 }
 0x223   : > { %vm6251_vm9 = vcmp.lt.s32.totalorder %v6250_v50, 0  ;;  %v1466_v1 = vsel %vm1464_vm15, %v6769_v15, %v1465_v26  ;;  %v1469_v62 = vsel %vm1467_vm0, %v1468_v53, %v6771_v35  ;;  %v2051_v11 = vsel %vm2049_vm10, %v2050_v40, %v8868_v12  ;;  %v8914_v26 = vld [vmem:[%s12071_s3 + $0x18] sm:$0xff] }
 0x224   : > { %v1647_v16 = vsel %vm6251_vm9, 0, %v6250_v50  ;;  %v2052_v43 = vadd.s32 %v2051_v11, %v2047_v38  ;;  %vm1883_vm8 = vcmp.eq.s32.totalorder %v1878_v18, 2  ;;  %v1632_v27 = vadd.s32 %v8758_v54, %v8754_v5 }
 0x225   : > { %v1652_v25 = vsub.s32 4294967266, %v1647_v16  ;;  %v1648_v13 = vsub.s32 32, %v1647_v16  ;;  %v1470_v24 = vsel %vm1463_vm2, %v1466_v1, %v1469_v62  ;;  %vm1460_vm11 = vweird.f32 %v12284_v22  ;;  %v8887_v22 = vld [vmem:[%s12071_s3] sm:$0xff] }
 0x226   : > { %v2053_v36 = vadd.s32 536870912, %v2052_v43  ;;  %vm1880_vm14 = vcmp.eq.s32.totalorder %v1878_v18, 0  ;;  %vm1879_vm3 = vcmp.lt.s32.totalorder %v1878_v18, 2  ;;  %v1471_v28 = vsel %vm1460_vm11, nan, %v1470_v24 }
 0x227   : > { %v1653_v37 = vadd.s32 127, %v1652_v25  ;;  %v1650_v6 = vshrl.u32 %v1632_v27, %v1648_v13  ;;  %vm1876_vm13 = vweird.f32 %v7215_v23  ;;  %v1649_v32 = vshll.u32 %v8830_v9, %v1647_v16  ;;  %v8895_v9 = vld [vmem:[%s12071_s3 + $0x8] sm:$0xff] }
 0x228   : > { %v6773_v3 = vpop.eup %6772  ;;  %v2054_v14 = vshrl.u32 %v2053_v36, 30  ;;  %vm12157_vm6 = vcmask 261120   ;;  %v2048_v12 = vadd.s32 %v8867_v33, %v8861_v55  ;;  %vm1578_vm1 = vcmp.lt.s32.totalorder %v12287_v56, 0 }
 0x229   : > { %v6775_v44 = vpop.eup %6774  ;;  %v1884_v41 = vxor.u32 2147483648, %v6773_v3  ;;  %v1654_v2 = vshll.u32 %v1653_v37, 23  ;;  %v1651_v45 = vor.u32 %v1650_v6, %v1649_v32  ;;  %vm8920_vm4 = vcmp.le.f32.partialorder %v1576_v49, 0.7853982 }
 0x22a   : > { %v1881_v34 = vxor.u32 2147483648, %v6775_v44  ;;  %v2055_v54 = vshll.u32 %v2054_v14, 30  ;;  %v1662_v1 = vsub.s32 4, %v8815_v21  ;;  %vm1994_vm12 = vcmp.lt.s32.totalorder %v7219_v48, 0 }
 0x22b   : > { %v1885_v15 = vsel %vm1883_vm8, %v1884_v41, %v6775_v44  ;;  %v1655_v5 = vor.u32 4788187, %v1654_v2  ;;  %v1658_v19 = vcvt.s32.f32 %v1651_v45  ;;  %vm1993_vm5 = vcmp.le.f32.partialorder %v1992_v29, 0.7853982 }
 0x22c   : > { %v1882_v60 = vsel %vm1880_vm14, %v6773_v3, %v1881_v34  ;;  %v2056_v58 = vsub.s32 %v2052_v43, %v2055_v54  ;;  %v2078_v3 = vsub.s32 4, %v2054_v14  ;;  %v1663_v13 = vsel %vm1578_vm1, %v1662_v1, %v8815_v21 }
 0x22d   : > { %v1886_v57 = vsel %vm1879_vm3, %v1882_v60, %v1885_v15  ;;  %v1656_v31 = vand.u32 2147483647, %v1655_v5  ;;  %v1665_v43 = vsel %vm8920_vm4, 0, %v1663_v13  ;;  %vm1668_vm11 = vweird.f32 %v12287_v56 }
 0x22e   : > { %v1887_v52 = vsel %vm1876_vm13, nan, %v1886_v57  ;;  %v2058_v46 = vsub.s32 0, %v2056_v58  ;;  %v2079_v41 = vsel %vm1994_vm12, %v2078_v3, %v2054_v14  ;;  %v1669_v24 = vadd.s32 3, %v1665_v43 }
 0x22f   : > { %v6430_v7 = vpack.c.bf16 %v1887_v52, %v1471_v28  ;;  %v1659_v30 = vmul.f32 %v1658_v19, %v1656_v31  ;;  %v2081_v34 = vsel %vm1993_vm5, 0, %v2079_v41  ;;  %vm2084_vm14 = vweird.f32 %v7219_v48 }
 0x230   : > { %v6265_v23 = vmin.u32 %v2058_v46, %v2056_v58  ;;  %v2085_v21 = vadd.s32 3, %v2081_v34  ;;  %v1670_v15 = vand.u32 3, %v1669_v24 }
 0x231   : > { %6431 = vmatpush1.bf16.msra.mxu0 %v6430_v7  ;;  %v1660_v10 = vxor.u32 2147483648, %v1659_v30 }
 0x232   : > { %v2060_v35 = vclz %v6265_v23  ;;  %v2086_v28 = vand.u32 3, %v2085_v21  ;;  %vm1672_vm9 = vcmp.eq.s32.totalorder %v1670_v15, 0  ;;  %vm1675_vm10 = vcmp.eq.s32.totalorder %v1670_v15, 2 }
 0x233   : > { %v1661_v53 = vsel %vm1578_vm1, %v1660_v10, %v1659_v30  ;;  %vm1671_vm15 = vcmp.lt.s32.totalorder %v1670_v15, 2 }
 0x234   : > { %6272 = vmatmul.mubr.msk.f32.vlgmr.msra.gmra.mrb[0].mxu0 %vm12157_vm6, %v8887_v22  ;;  %v6266_v39 = vadd.s32 4294967294, %v2060_v35  ;;  %v1664_v25 = vsel %vm8920_vm4, %v12287_v56, %v1661_v53  ;;  %vm2091_vm0 = vcmp.eq.s32.totalorder %v2086_v28, 2  ;;  %vm2088_vm2 = vcmp.eq.s32.totalorder %v2086_v28, 0 }
 0x235   : > { %2311 = vmatprep.mubr.f32.mxu0 %v12117_v63  ;;  %6776 = vcosq.f32 %v1664_v25  ;;  %vm2087_vm8 = vcmp.lt.s32.totalorder %v2086_v28, 2 }
 0x236   : > { %vm6267_vm7 = vcmp.lt.s32.totalorder %v6266_v39, 0  ;;  %6778 = vsinq.f32 %v1664_v25 }
 0x237   : > { %v2063_v0 = vsel %vm6267_vm7, 0, %v6266_v39 }
 0x238   : > { %6273 = vmatmul.mubr.msk.f32.gmra.mrb[2].mxu0 %vm12157_vm6, %v8895_v9  ;;  %v2064_v20 = vsub.s32 32, %v2063_v0  ;;  %v2068_v50 = vsub.s32 4294967266, %v2063_v0  ;;  %v2065_v51 = vshll.u32 %v2056_v58, %v2063_v0 }
 0x239   : > { %2317 = vmatprep.mubr.f32.mxu0 %v12117_v63 }
 0x23a   : > { %v2066_v18 = vshrl.u32 %v2048_v12, %v2064_v20  ;;  %v2069_v55 = vadd.s32 127, %v2068_v50 }
 0x23c   : > { %6274 = vmatmul.mubr.msk.f32.gmra.mrb[4].mxu0 %vm12157_vm6, %v8903_v61  ;;  %v2067_v16 = vor.u32 %v2066_v18, %v2065_v51  ;;  %v2070_v40 = vshll.u32 %v2069_v55, 23 }
 0x23d   : > { %2323 = vmatprep.mubr.f32.mxu0 %v12117_v63 }
 0x23e   : > { %v2071_v38 = vor.u32 4788187, %v2070_v40  ;;  %v2074_v49 = vcvt.s32.f32 %v2067_v16 }
 0x23f   : > { %v6777_v2 = vpop.eup %6776 }
 0x240   : > { %6275 = vmatmul.mubr.msk.f32.gmra.mrb[6].mxu0 %vm12157_vm6, %v8914_v26  ;;  %v2072_v62 = vand.u32 2147483647, %v2071_v38  ;;  %v6779_v36 = vpop.eup %6778  ;;  %v1676_v6 = vxor.u32 2147483648, %v6777_v2 }
 0x241   : > { %4187 = vmatprep.mubr.f32.mxu0 %v12117_v63  ;;  %v1673_v60 = vxor.u32 2147483648, %v6779_v36 }
 0x242   : > { %v2075_v11 = vmul.f32 %v2074_v49, %v2072_v62  ;;  %v1677_v29 = vsel %vm1675_vm10, %v1676_v6, %v6779_v36 }
 0x243   : > { %v1674_v52 = vsel %vm1672_vm9, %v6777_v2, %v1673_v60 }
 0x244   : > { %v2076_v37 = vxor.u32 2147483648, %v2075_v11  ;;  %v1678_v54 = vsel %vm1671_vm15, %v1674_v52, %v1677_v29 }
 0x245   : > { %v1679_v31 = vsel %vm1668_vm11, nan, %v1678_v54 }
 0x246   : > { %v2077_v44 = vsel %vm1994_vm12, %v2076_v37, %v2075_v11 }
 0x247   : > { %v2080_v27 = vsel %vm1993_vm5, %v7219_v48, %v2077_v44 }
 0x248   : > { %6780 = vcosq.f32 %v2080_v27 }
 0x249   : > { %6782 = vsinq.f32 %v2080_v27 }
 0x252   : > { %v6781_v57 = vpop.eup %6780 }
 0x253   : > { %v6783_v32 = vpop.eup %6782  ;;  %v2092_v14 = vxor.u32 2147483648, %v6781_v57 }
 0x254   : > { %v2089_v5 = vxor.u32 2147483648, %v6783_v32 }
 0x255   : > { %v2093_v7 = vsel %vm2091_vm0, %v2092_v14, %v6783_v32 }
 0x256   : > { %v2090_v45 = vsel %vm2088_vm2, %v6781_v57, %v2089_v5 }
 0x257   : > { %v2094_v58 = vsel %vm2087_vm8, %v2090_v45, %v2093_v7 }
 0x258   : > { %v2095_v46 = vsel %vm2084_vm14, nan, %v2094_v58 }
 0x259   : > { %v6438_v19 = vpack.c.bf16 %v2095_v46, %v1679_v31 }
 0x25b   : > { %6439 = vmatpush1.bf16.msra.mxu1 %v6438_v19 }
 0x25e   : > { %6276 = vmatmul.mubr.msk.f32.vlgmr.msra.gmra.mrb[0].mxu1 %vm12157_vm6, %v8887_v22 }
 0x25f   : > { %2400 = vmatprep.mubr.f32.mxu1 %v12117_v63 }
 0x262   : > { %6277 = vmatmul.mubr.msk.f32.gmra.mrb[2].mxu1 %vm12157_vm6, %v8895_v9 }
 0x263   : > { %2406 = vmatprep.mubr.f32.mxu1 %v12117_v63 }
 0x264   : > { %v8954_v48 = vpop.permute.xlu1 %2210 }
 0x266   : > { %6278 = vmatmul.mubr.msk.f32.gmra.mrb[4].mxu1 %vm12157_vm6, %v8903_v61  ;;  %v8964_v39 = vpop.permute.xlu0 %2215 }
 0x267   : > { %2412 = vmatprep.mubr.f32.mxu1 %v12117_v63 }
 0x26a   : > { %6279 = vmatmul.mubr.msk.f32.gmra.mrb[6].mxu1 %vm12157_vm6, %v8914_v26 }
 0x26b   : > { %4276 = vmatprep.mubr.f32.mxu1 %v12117_v63 }
 0x307   : > { %v2307_v56 = vpop.f32.mrb[0].mxu0 }
 0x308   : > { %v8957_v22 = vadd.f32 %v2307_v56, %v8954_v48  ;;  %v2309_v23 = vpop.f32.mrb[1].mxu0 }
 0x309   : > { %v8960_v9 = vadd.f32 %v2309_v23, %v8954_v48 }
 0x30a   : > { %12294 = vst [vmem:[#allocation11_spill] sm:$0xff] %v8957_v22  ;;  %v12123_v30 = vand.u32 2147483647, %v8957_v22  ;;  %v2422_v35 = vand.u32 2139095040, %v8957_v22 }
 0x30b   : > { %v12122_v61 = vand.u32 2147483647, %v8960_v9  ;;  %v2526_v10 = vand.u32 2139095040, %v8960_v9  ;;  %v2313_v0 = vpop.f32.mrb[2].mxu0 }
 0x30c   : > { %v2423_v12 = vshrl.u32 %v2422_v35, 23  ;;  %v8969_v20 = vadd.f32 %v2313_v0, %v8964_v39  ;;  %v8971_v50 = vpop.f32.mrb[3].mxu0  ;;  %v2426_v26 = vand.u32 8388607, %v12123_v30 }
 0x30d   : > { %v2527_v53 = vshrl.u32 %v2526_v10, 23  ;;  %v2530_v51 = vand.u32 8388607, %v12122_v61 }
 0x30e   : > { %12295 = vst [vmem:[#allocation13_spill] sm:$0xff] %v8969_v20  ;;  %v6280_v18 = vadd.s32 4294967169, %v2423_v12  ;;  %v2838_v33 = vand.u32 2139095040, %v8969_v20  ;;  %v2427_v40 = vor.u32 8388608, %v2426_v26 }
 0x30f   : > { %v6284_v55 = vadd.s32 4294967169, %v2527_v53  ;;  %v2531_v25 = vor.u32 8388608, %v2530_v51  ;;  %v8999_v10 = vpop.f32.mrb[4].mxu0 }
 0x310   : > { %v2429_v16 = vadd.s32 1, %v6280_v18  ;;  %v2839_v1 = vshrl.u32 %v2838_v33, 23  ;;  %v8978_v13 = vshll.u32 %v2427_v40, 8 }
 0x311   : > { %v2533_v38 = vadd.s32 1, %v6284_v55  ;;  %v8980_v37 = vshll.u32 %v2531_v25, 8 }
 0x312   : > { %vm2430_vm3 = vcmp.gt.s32.totalorder %v2429_v16, 0  ;;  %v6296_v43 = vadd.s32 4294967169, %v2839_v1 }
 0x313   : > { %v2431_v62 = vsel %vm2430_vm3, %v2429_v16, 0  ;;  %vm2534_vm13 = vcmp.gt.s32.totalorder %v2533_v38, 0 }
 0x314   : > { %v2432_v49 = vshrl.u32 %v2431_v62, 5  ;;  %v2433_v11 = vand.u32 31, %v2431_v62  ;;  %v2535_v3 = vsel %vm2534_vm13, %v2533_v38, 0 }
 0x315   : > { %v8983_v27 = vshrl.u32 %v2535_v3, 5  ;;  %v2537_v24 = vand.u32 31, %v2535_v3 }
 0x316   : > { %v2434_v44 = vsub.s32 32, %v2433_v11  ;;  %v2436_v41 = vshll.u32 %v12238_v4, %v2433_v11  ;;  %v2439_v34 = vshll.u32 %v12243_v8, %v2433_v11  ;;  %v2442_v2 = vshll.u32 %v12235_v42, %v2433_v11 }
 0x317   : > { %v2445_v36 = vshll.u32 %v12236_v47, %v2433_v11  ;;  %v2448_v21 = vshll.u32 %v12237_v59, %v2433_v11  ;;  %vm2451_vm7 = vcmp.lt.s32.totalorder %v2432_v49, 1  ;;  %vm2452_vm1 = vcmp.lt.s32.totalorder %v2432_v49, 2 }
 0x318   : > { %v2437_v15 = vshrl.u32 %v12243_v8, %v2434_v44  ;;  %v2440_v60 = vshrl.u32 %v12235_v42, %v2434_v44  ;;  %v2443_v6 = vshrl.u32 %v12236_v47, %v2434_v44  ;;  %v2435_v28 = vshrl.u32 %v12238_v4, %v2434_v44 }
 0x319   : > { %v2446_v57 = vshrl.u32 %v12237_v59, %v2434_v44  ;;  %v2449_v52 = vshrl.u32 %v12247_v17, %v2434_v44  ;;  %v2538_v5 = vsub.s32 32, %v2537_v24  ;;  %vm2453_vm4 = vcmp.lt.s32.totalorder %v2432_v49, 3 }
 0x31a   : > { %v2438_v29 = vor.u32 %v2437_v15, %v2436_v41  ;;  %v2441_v32 = vor.u32 %v2440_v60, %v2439_v34  ;;  %v2444_v14 = vor.u32 %v2443_v6, %v2442_v2  ;;  %vm2454_vm12 = vcmp.lt.s32.totalorder %v2432_v49, 4 }
 0x31b   : > { %v2447_v54 = vor.u32 %v2446_v57, %v2445_v36  ;;  %v2450_v7 = vor.u32 %v2449_v52, %v2448_v21  ;;  %v2540_v35 = vshll.u32 %v12238_v4, %v2537_v24  ;;  %v2541_v26 = vshrl.u32 %v12243_v8, %v2538_v5 }
 0x31c   : > { %v2455_v45 = vsel %vm2451_vm7, %v2435_v28, %v2438_v29  ;;  %v2456_v58 = vsel %vm2454_vm12, %v2444_v14, 2102212464  ;;  %v2459_v31 = vsel %vm2451_vm7, %v2438_v29, %v2441_v32  ;;  %v2463_v46 = vsel %vm2451_vm7, %v2441_v32, %v2444_v14 }
 0x31d   : > { %v2457_v19 = vsel %vm2453_vm4, %v2441_v32, %v2456_v58  ;;  %v2460_v56 = vsel %vm2454_vm12, %v2447_v54, 920167782  ;;  %v2464_v23 = vsel %vm2454_vm12, %v2450_v7, 1326507024  ;;  %v2543_v53 = vshll.u32 %v12243_v8, %v2537_v24 }
 0x31e   : > { %v2461_v0 = vsel %vm2453_vm4, %v2444_v14, %v2460_v56  ;;  %v2465_v12 = vsel %vm2453_vm4, %v2447_v54, %v2464_v23  ;;  %v2458_v51 = vsel %vm2452_vm1, %v2455_v45, %v2457_v19  ;;  %v2544_v33 = vshrl.u32 %v12235_v42, %v2538_v5 }
 0x31f   : > { %v2462_v18 = vsel %vm2452_vm1, %v2459_v31, %v2461_v0  ;;  %v2466_v55 = vsel %vm2452_vm1, %v2463_v46, %v2465_v12  ;;  %v2542_v1 = vor.u32 %v2541_v26, %v2540_v35  ;;  %v2546_v11 = vshll.u32 %v12235_v42, %v2537_v24 }
 0x320   : > { %v9008_v16 = vmul.u32.u64.low %v8978_v13, %v2466_v55  ;;  %v9009_v40 = vmul.u32.u64.high %v8978_v13, %v2466_v55, %v9008_v16  ;;  %v9012_v25 = vmul.u32.u64.low %v8978_v13, %v2462_v18  ;;  %v9013_v38 = vmul.u32.u64.high %v8978_v13, %v2462_v18, %v9012_v25 }
 0x321   : > { %v2545_v62 = vor.u32 %v2544_v33, %v2543_v53  ;;  %v2547_v3 = vshrl.u32 %v12236_v47, %v2538_v5  ;;  %v2549_v49 = vshll.u32 %v12236_v47, %v2537_v24  ;;  %v2550_v44 = vshrl.u32 %v12237_v59, %v2538_v5 }
 0x322   : > { %v2553_v41 = vshrl.u32 %v12247_v17, %v2538_v5  ;;  %v2845_v34 = vadd.s32 1, %v6296_v43  ;;  %v2474_v2 = vmul.u32 %v8978_v13, %v2458_v51  ;;  %v2539_v36 = vshrl.u32 %v12238_v4, %v2538_v5 }
 0x323   : > { %v2548_v21 = vor.u32 %v2547_v3, %v2546_v11  ;;  %v2552_v15 = vshll.u32 %v12237_v59, %v2537_v24  ;;  %vm2476_vm5 = vc.u32 %v9009_v40, %v9012_v25  ;;  %v2477_v60 = vadd.s32 1, %v9013_v38 }
 0x324   : > { %v2551_v6 = vor.u32 %v2550_v44, %v2549_v49  ;;  %vm2555_vm9 = vcmp.lt.s32.totalorder %v8983_v27, 1  ;;  %vm2557_vm10 = vcmp.lt.s32.totalorder %v8983_v27, 3  ;;  %vm2558_vm15 = vcmp.lt.s32.totalorder %v8983_v27, 4 }
 0x325   : > { %v2554_v28 = vor.u32 %v2553_v41, %v2552_v15  ;;  %v2563_v43 = vsel %vm2555_vm9, %v2542_v1, %v2545_v62  ;;  %v2478_v13 = vsel %vm2476_vm5, %v2477_v60, %v9013_v38  ;;  %v2560_v57 = vsel %vm2558_vm15, %v2548_v21, 2102212464 }
 0x326   : > { %v2564_v52 = vsel %vm2558_vm15, %v2551_v6, 920167782  ;;  %v2567_v29 = vsel %vm2555_vm9, %v2545_v62, %v2548_v21  ;;  %v2479_v24 = vadd.s32 %v2478_v13, %v2474_v2  ;;  %vm2556_vm0 = vcmp.lt.s32.totalorder %v8983_v27, 2 }
 0x327   : > { %v2565_v32 = vsel %vm2557_vm10, %v2548_v21, %v2564_v52  ;;  %v2568_v14 = vsel %vm2558_vm15, %v2554_v28, 1326507024  ;;  %v2559_v5 = vsel %vm2555_vm9, %v2539_v36, %v2542_v1  ;;  %v2561_v54 = vsel %vm2557_vm10, %v2545_v62, %v2560_v57 }
 0x328   : > { %v2566_v7 = vsel %vm2556_vm0, %v2563_v43, %v2565_v32  ;;  %v2569_v45 = vsel %vm2557_vm10, %v2551_v6, %v2568_v14  ;;  %v2480_v58 = vadd.s32 536870912, %v2479_v24  ;;  %v2562_v0 = vsel %vm2556_vm0, %v2559_v5, %v2561_v54 }
 0x329   : > { %v2570_v31 = vsel %vm2556_vm0, %v2567_v29, %v2569_v45  ;;  %v9033_v46 = vmul.u32.u64.low %v8980_v37, %v2566_v7  ;;  %v9034_v19 = vmul.u32.u64.high %v8980_v37, %v2566_v7, %v9033_v46  ;;  %vm2846_vm2 = vcmp.gt.s32.totalorder %v2845_v34, 0 }
 0x32a   : > { %v9037_v56 = vmul.u32.u64.low %v8980_v37, %v2570_v31  ;;  %v9038_v23 = vmul.u32.u64.high %v8980_v37, %v2570_v31, %v9037_v56  ;;  %v9040_v35 = vshrl.u32 %v2480_v58, 30  ;;  %v12119_v27 = vand.u32 2147483647, %v8969_v20 }
 0x32b   : > { %v2581_v26 = vadd.s32 1, %v9034_v19  ;;  %v2578_v53 = vmul.u32 %v8980_v37, %v2562_v0  ;;  %v2847_v51 = vsel %vm2846_vm2, %v2845_v34, 0  ;;  %v9049_v18 = vadd.f32 %v8971_v50, %v8964_v39 }
 0x32c   : > { %v2482_v12 = vshll.u32 %v9040_v35, 30  ;;  %vm2580_vm8 = vc.u32 %v9038_v23, %v9033_v46  ;;  %v2842_v38 = vand.u32 8388607, %v12119_v27  ;;  %v2849_v62 = vand.u32 31, %v2847_v51 }
 0x32d   : > { %v2582_v33 = vsel %vm2580_vm8, %v2581_v26, %v9034_v19  ;;  %v2942_v37 = vand.u32 2139095040, %v9049_v18  ;;  %v2475_v43 = vadd.s32 %v9012_v25, %v9009_v40  ;;  %v9072_v57 = vshrl.u32 %v2847_v51, 5 }
 0x32e   : > { %v9051_v55 = vsub.s32 %v2479_v24, %v2482_v12  ;;  %v2583_v16 = vadd.s32 %v2582_v33, %v2578_v53  ;;  %v2843_v50 = vor.u32 8388608, %v2842_v38  ;;  %v2850_v34 = vsub.s32 32, %v2849_v62 }
 0x32f   : > { %v2943_v15 = vshrl.u32 %v2942_v37, 23  ;;  %v9088_v7 = vadd.s32 %v9033_v46, %v9038_v23  ;;  %v2852_v45 = vshll.u32 %v12238_v4, %v2849_v62  ;;  %v2855_v12 = vshll.u32 %v12243_v8, %v2849_v62 }
 0x330   : > { %v2485_v1 = vsub.s32 0, %v9051_v55  ;;  %v2584_v11 = vadd.s32 536870912, %v2583_v16  ;;  %v9074_v52 = vshll.u32 %v2843_v50, 8  ;;  %v2853_v32 = vshrl.u32 %v12243_v8, %v2850_v34 }
 0x331   : > { %v2396_v41 = vpop.f32.mrb[0].mxu1  ;;  %v2856_v40 = vshrl.u32 %v12235_v42, %v2850_v34  ;;  %v9084_v25 = vadd.s32 4294967169, %v2943_v15  ;;  %v2859_v58 = vshrl.u32 %v12236_v47, %v2850_v34  ;;  %v2851_v53 = vshrl.u32 %v12238_v4, %v2850_v34 }
 0x332   : > { %v6281_v3 = vmin.u32 %v2485_v1, %v9051_v55  ;;  %v9059_v49 = vshrl.u32 %v2584_v11, 30  ;;  %v9062_v2 = vadd.f32 %v2396_v41, %v8954_v48  ;;  %v2398_v21 = vpop.f32.mrb[1].mxu1  ;;  %v9099_v51 = vor.u32 %v2853_v32, %v2852_v45 }
 0x333   : > { %v9066_v6 = vadd.f32 %v2398_v21, %v8954_v48  ;;  %v2858_v46 = vshll.u32 %v12235_v42, %v2849_v62  ;;  %v2861_v38 = vshll.u32 %v12236_v47, %v2849_v62  ;;  %v2862_v1 = vshrl.u32 %v12237_v59, %v2850_v34 }
 0x334   : > { %12296 = vst [vmem:[#allocation6_spill] sm:$0xff] %v9059_v49  ;;  %v2487_v44 = vclz %v6281_v3  ;;  %12297 = vst [vmem:[#allocation18_spill] sm:$0xff] %v9062_v2  ;;  %v2586_v36 = vshll.u32 %v9059_v49, 30  ;;  %v2630_v13 = vand.u32 2139095040, %v9062_v2  ;;  %v12121_v54 = vand.u32 2147483647, %v9062_v2 }
 0x335   : > { %v2734_v24 = vand.u32 2139095040, %v9066_v6  ;;  %v9080_v48 = vpop.f32.mrb[2].mxu1  ;;  %v9111_v3 = vor.u32 %v2859_v58, %v2858_v46  ;;  %v9114_v50 = vshll.u32 %v12237_v59, %v2849_v62  ;;  %v12120_v41 = vand.u32 2147483647, %v9066_v6 }
 0x336   : > { %v6282_v60 = vadd.s32 4294967294, %v2487_v44  ;;  %v9076_v29 = vsub.s32 %v2583_v16, %v2586_v36  ;;  %v2631_v5 = vshrl.u32 %v2630_v13, 23  ;;  %v9092_v31 = vpop.f32.mrb[3].mxu1  ;;  %v9104_v16 = vor.u32 %v2856_v40, %v2855_v12 }
 0x337   : > { %v2735_v0 = vshrl.u32 %v2734_v24, 23  ;;  %v2634_v37 = vand.u32 8388607, %v12121_v54  ;;  %vm2867_vm3 = vcmp.lt.s32.totalorder %v9072_v57, 1  ;;  %v9123_v24 = vor.u32 %v2862_v1, %v2861_v38 }
 0x338   : > { %vm6283_vm11 = vcmp.lt.s32.totalorder %v6282_v60, 0  ;;  %v6288_v56 = vadd.s32 4294967169, %v2631_v5  ;;  %v2589_v26 = vsub.s32 0, %v9076_v29  ;;  %vm2870_vm13 = vcmp.lt.s32.totalorder %v9072_v57, 4 }
 0x339   : > { %v9094_v19 = vsel %vm6283_vm11, 0, %v6282_v60  ;;  %v9102_v23 = vpop.f32.mrb[4].mxu1  ;;  %v6292_v36 = vadd.s32 4294967169, %v2735_v0  ;;  %v9120_v60 = vshrl.u32 %v12247_v17, %v2850_v34  ;;  %v9129_v62 = vsel %vm2867_vm3, %v2851_v53, %v9099_v51 }
 0x33a   : > { %v2637_v33 = vadd.s32 1, %v6288_v56  ;;  %v2491_v11 = vsub.s32 32, %v9094_v19  ;;  %v2495_v44 = vsub.s32 4294967266, %v9094_v19  ;;  %v6285_v15 = vmin.u32 %v2589_v26, %v9076_v29 }
 0x33b   : > { %v2492_v32 = vshll.u32 %v9051_v55, %v9094_v19  ;;  %v2635_v40 = vor.u32 8388608, %v2634_v37  ;;  %v2872_v34 = vsel %vm2870_vm13, %v9111_v3, 2102212464  ;;  %v9140_v56 = vand.u32 8388607, %v12120_v41 }
 0x33c   : > { %vm2638_vm14 = vcmp.gt.s32.totalorder %v2637_v33, 0  ;;  %v2493_v5 = vshrl.u32 %v2475_v43, %v2491_v11  ;;  %v9136_v45 = vadd.s32 127, %v2495_v44  ;;  %v2741_v0 = vadd.s32 1, %v6292_v36  ;;  %v9144_v43 = vpop.f32.mrb[5].mxu0 }
 0x33d   : > { %v2639_v21 = vsel %vm2638_vm14, %v2637_v33, 0  ;;  %v2591_v55 = vclz %v6285_v15  ;;  %12298 = vst [vmem:[#allocation17_spill] sm:$0xff] %v9144_v43  ;;  %vm2869_vm7 = vcmp.lt.s32.totalorder %v9072_v57, 3  ;;  %v2675_v61 = vshll.u32 %v2635_v40, 8 }
 0x33e   : > { %v2641_v13 = vand.u32 31, %v2639_v21  ;;  %v2640_v12 = vshrl.u32 %v2639_v21, 5  ;;  %vm2742_vm1 = vcmp.gt.s32.totalorder %v2741_v0, 0  ;;  %v2497_v40 = vshll.u32 %v9136_v45, 23 }
 0x33f   : > { %v6286_v14 = vadd.s32 4294967294, %v2591_v55  ;;  %vm2868_vm15 = vcmp.lt.s32.totalorder %v9072_v57, 2 }
 0x340   : > { %v2642_v58 = vsub.s32 32, %v2641_v13  ;;  %v2644_v26 = vshll.u32 %v12238_v4, %v2641_v13  ;;  %v2647_v53 = vshll.u32 %v12243_v8, %v2641_v13  ;;  %v2650_v33 = vshll.u32 %v12235_v42, %v2641_v13 }
 0x341   : > { %v2653_v1 = vshll.u32 %v12236_v47, %v2641_v13  ;;  %v2656_v37 = vshll.u32 %v12237_v59, %v2641_v13  ;;  %vm2659_vm4 = vcmp.lt.s32.totalorder %v2640_v12, 1  ;;  %vm2662_vm12 = vcmp.lt.s32.totalorder %v2640_v12, 4 }
 0x342   : > { %v2645_v19 = vshrl.u32 %v12243_v8, %v2642_v58  ;;  %v2648_v46 = vshrl.u32 %v12235_v42, %v2642_v58  ;;  %v2651_v38 = vshrl.u32 %v12236_v47, %v2642_v58  ;;  %v2654_v11 = vshrl.u32 %v12237_v59, %v2642_v58 }
 0x343   : > { %v2657_v44 = vshrl.u32 %v12247_v17, %v2642_v58  ;;  %v2643_v28 = vshrl.u32 %v12238_v4, %v2642_v58  ;;  %vm2661_vm5 = vcmp.lt.s32.totalorder %v2640_v12, 3  ;;  %vm2660_vm9 = vcmp.lt.s32.totalorder %v2640_v12, 2 }
 0x344   : > { %v2646_v36 = vor.u32 %v2645_v19, %v2644_v26  ;;  %v2649_v21 = vor.u32 %v2648_v46, %v2647_v53  ;;  %v2652_v15 = vor.u32 %v2651_v38, %v2650_v33  ;;  %v2655_v63 = vor.u32 %v2654_v11, %v2653_v1 }
 0x345   : > { %v2658_v27 = vor.u32 %v2657_v44, %v2656_v37  ;;  %v2743_v26 = vsel %vm2742_vm1, %v2741_v0, 0  ;;  %vm6287_vm10 = vcmp.lt.s32.totalorder %v6286_v14, 0  ;;  %v2739_v0 = vor.u32 8388608, %v9140_v56 }
 0x346   : > { %v2664_v41 = vsel %vm2662_vm12, %v2652_v15, 2102212464  ;;  %v2667_v54 = vsel %vm2659_vm4, %v2646_v36, %v2649_v21  ;;  %v2668_v30 = vsel %vm2662_vm12, %v2655_v63, 920167782  ;;  %v2671_v49 = vsel %vm2659_vm4, %v2649_v21, %v2652_v15 }
 0x347   : > { %v2669_v13 = vsel %vm2661_vm5, %v2652_v15, %v2668_v30  ;;  %v2672_v43 = vsel %vm2662_vm12, %v2658_v27, 1326507024  ;;  %v2663_v53 = vsel %vm2659_vm4, %v2643_v28, %v2646_v36  ;;  %v2665_v19 = vsel %vm2661_vm5, %v2649_v21, %v2664_v41  ;;  %v9202_v36 = vpop.f32.mrb[5].mxu1 }
 0x348   : > { %v2670_v46 = vsel %vm2660_vm9, %v2667_v54, %v2669_v13  ;;  %v2673_v33 = vsel %vm2661_vm5, %v2655_v63, %v2672_v43  ;;  %v2873_v30 = vsel %vm2869_vm7, %v9104_v16, %v2872_v34  ;;  %v2666_v27 = vsel %vm2660_vm9, %v2663_v53, %v2665_v19 }
 0x349   : > { %v2674_v38 = vsel %vm2660_vm9, %v2671_v49, %v2673_v33  ;;  %v9157_v1 = vmul.u32.u64.low %v2675_v61, %v2670_v46  ;;  %v9158_v11 = vmul.u32.u64.high %v2675_v61, %v2670_v46, %v9157_v1  ;;  %v2745_v28 = vand.u32 31, %v2743_v26 }
 0x34a   : > { %v9162_v58 = vmul.u32.u64.low %v2675_v61, %v2674_v38  ;;  %v9163_v55 = vmul.u32.u64.high %v2675_v61, %v2674_v38, %v9162_v58  ;;  %v2876_v63 = vsel %vm2870_vm13, %v9123_v24, 920167782  ;;  %v9172_v49 = vor.u32 %v2493_v5, %v2492_v32 }
 0x34b   : > { %v9174_v54 = vsel %vm6287_vm10, 0, %v6286_v14  ;;  %v2866_v41 = vor.u32 %v9120_v60, %v9114_v50  ;;  %v2875_v34 = vsel %vm2867_vm3, %v9099_v51, %v9104_v16  ;;  %v2685_v45 = vadd.s32 1, %v9158_v11 }
 0x34c   : > { %v2746_v12 = vsub.s32 32, %v2745_v28  ;;  %v9187_v32 = vsel %vm2868_vm15, %v9129_v62, %v2873_v30  ;;  %v9189_v14 = vor.u32 4788187, %v2497_v40  ;;  %v2682_v5 = vmul.u32 %v2675_v61, %v2666_v27 }
 0x34d   : > { %vm2684_vm0 = vc.u32 %v9163_v55, %v9157_v1  ;;  %v2877_v51 = vsel %vm2869_vm7, %v9111_v3, %v2876_v63  ;;  %v2595_v60 = vsub.s32 32, %v9174_v54  ;;  %v2744_v56 = vshrl.u32 %v2743_v26, 5 }
 0x34e   : > { %v2686_v50 = vsel %vm2684_vm0, %v2685_v45, %v9158_v11  ;;  %v2749_v43 = vshrl.u32 %v12243_v8, %v2746_v12  ;;  %v2748_v62 = vshll.u32 %v12238_v4, %v2745_v28  ;;  %v2751_v44 = vshll.u32 %v12243_v8, %v2745_v28 }
 0x34f   : > { %v2687_v37 = vadd.s32 %v2686_v50, %v2682_v5  ;;  %v2752_v61 = vshrl.u32 %v12235_v42, %v2746_v12  ;;  %v2754_v21 = vshll.u32 %v12235_v42, %v2745_v28  ;;  %v2755_v15 = vshrl.u32 %v12236_v47, %v2746_v12 }
 0x350   : > { %v2757_v13 = vshll.u32 %v12236_v47, %v2745_v28  ;;  %v2758_v53 = vshrl.u32 %v12237_v59, %v2746_v12  ;;  %v2599_v19 = vsub.s32 4294967266, %v9174_v54  ;;  %v2750_v46 = vor.u32 %v2749_v43, %v2748_v62 }
 0x351   : > { %v2688_v26 = vadd.s32 536870912, %v2687_v37  ;;  %v2753_v33 = vor.u32 %v2752_v61, %v2751_v44  ;;  %v2756_v38 = vor.u32 %v2755_v15, %v2754_v21  ;;  %v2760_v40 = vshll.u32 %v12237_v59, %v2745_v28 }
 0x352   : > { %v2759_v11 = vor.u32 %v2758_v53, %v2757_v13  ;;  %v2761_v58 = vshrl.u32 %v12247_v17, %v2746_v12  ;;  %v2499_v30 = vand.u32 2147483647, %v9189_v14  ;;  %v2501_v27 = vcvt.s32.f32 %v9172_v49 }
 0x353   : > { %v9213_v63 = vshrl.u32 %v2688_v26, 30  ;;  %v2779_v45 = vshll.u32 %v2739_v0, 8  ;;  %v2597_v5 = vshrl.u32 %v9088_v7, %v2595_v60  ;;  %vm2766_vm2 = vcmp.lt.s32.totalorder %v2744_v56, 4 }
 0x354   : > { %v2762_v50 = vor.u32 %v2761_v58, %v2760_v40  ;;  %v2878_v43 = vsel %vm2868_vm15, %v2875_v34, %v2877_v51  ;;  %v2600_v44 = vadd.s32 127, %v2599_v19  ;;  %vm2763_vm8 = vcmp.lt.s32.totalorder %v2744_v56, 1 }
 0x355   : > { %v2690_v62 = vshll.u32 %v9213_v63, 30  ;;  %v2768_v28 = vsel %vm2766_vm2, %v2756_v38, 2102212464  ;;  %v2747_v61 = vshrl.u32 %v12238_v4, %v2746_v12  ;;  %v2771_v14 = vsel %vm2763_vm8, %v2750_v46, %v2753_v33 }
 0x356   : > { %v2772_v21 = vsel %vm2766_vm2, %v2759_v11, 920167782  ;;  %v2776_v49 = vsel %vm2766_vm2, %v2762_v50, 1326507024  ;;  %vm2764_vm11 = vcmp.lt.s32.totalorder %v2744_v56, 2  ;;  %vm2765_vm14 = vcmp.lt.s32.totalorder %v2744_v56, 3 }
 0x357   : > { %v9220_v15 = vsub.s32 %v2687_v37, %v2690_v62  ;;  %v2775_v7 = vsel %vm2763_vm8, %v2753_v33, %v2756_v38  ;;  %v2767_v0 = vsel %vm2763_vm8, %v2747_v61, %v2750_v46  ;;  %v2769_v60 = vsel %vm2765_vm14, %v2753_v33, %v2768_v28 }
 0x358   : > { %v2773_v13 = vsel %vm2765_vm14, %v2756_v38, %v2772_v21  ;;  %v2777_v53 = vsel %vm2765_vm14, %v2759_v11, %v2776_v49  ;;  %v2879_v12 = vsel %vm2867_vm3, %v9104_v16, %v9111_v3  ;;  %v2880_v37 = vsel %vm2870_vm13, %v2866_v41, 1326507024 }
 0x359   : > { %v2693_v34 = vsub.s32 0, %v9220_v15  ;;  %v2774_v51 = vsel %vm2764_vm11, %v2771_v14, %v2773_v13  ;;  %vm2421_vm1 = vcmp.lt.s32.totalorder %v8957_v22, 0  ;;  %v2601_v26 = vshll.u32 %v2600_v44, 23 }
 0x35a   : > { %v2778_v19 = vsel %vm2764_vm11, %v2775_v7, %v2777_v53  ;;  %v9232_v46 = vmul.u32.u64.low %v2779_v45, %v2774_v51  ;;  %v9233_v33 = vmul.u32.u64.high %v2779_v45, %v2774_v51, %v9232_v46  ;;  %v2770_v11 = vsel %vm2764_vm11, %v2767_v0, %v2769_v60 }
 0x35b   : > { %v6289_v38 = vmin.u32 %v2693_v34, %v9220_v15  ;;  %v9238_v40 = vmul.u32.u64.low %v2779_v45, %v2778_v19  ;;  %v9239_v58 = vmul.u32.u64.high %v2779_v45, %v2778_v19, %v9238_v40  ;;  %v2881_v16 = vsel %vm2869_vm7, %v9123_v24, %v2880_v37 }
 0x35c   : > { %v9245_v3 = vmul.u32.u64.low %v9074_v52, %v2878_v43  ;;  %v9246_v41 = vmul.u32.u64.high %v9074_v52, %v2878_v43, %v9245_v3  ;;  %v9251_v50 = vadd.f32 %v9080_v48, %v8964_v39  ;;  %v2502_v62 = vmul.f32 %v2501_v27, %v2499_v30 }
 0x35d   : > { %v2695_v44 = vclz %v6289_v38  ;;  %v2596_v56 = vshll.u32 %v9076_v29, %v9174_v54  ;;  %v2882_v28 = vsel %vm2868_vm15, %v2879_v12, %v2881_v16  ;;  %v12300_v61 = vand.u32 2147483647, %v8957_v22 }
 0x35e   : > { %12299 = vst [vmem:[#allocation16_spill] sm:$0xff] %v9251_v50  ;;  %v2602_v43 = vor.u32 4788187, %v2601_v26  ;;  %v2789_v14 = vadd.s32 1, %v9233_v33  ;;  %v9265_v48 = vmul.u32.u64.low %v9074_v52, %v2882_v28  ;;  %v9266_v21 = vmul.u32.u64.high %v9074_v52, %v2882_v28, %v9265_v48 }
 0x35f   : > { %vm9259_vm3 = vcmp.le.f32.partialorder %v12300_v61, 0.7853982  ;;  %v6290_v30 = vadd.s32 4294967294, %v2695_v44  ;;  %v2598_v27 = vor.u32 %v2597_v5, %v2596_v56  ;;  %v2786_v49 = vmul.u32 %v2779_v45, %v2770_v11 }
 0x360   : > { %vm2788_vm13 = vc.u32 %v9239_v58, %v9232_v46  ;;  %v2893_v29 = vadd.s32 1, %v9246_v41  ;;  %v3046_v54 = vand.u32 2139095040, %v9251_v50  ;;  %v2949_v7 = vadd.s32 1, %v9084_v25 }
 0x361   : > { %v2790_v57 = vsel %vm2788_vm13, %v2789_v14, %v9233_v33  ;;  %v2503_v0 = vxor.u32 2147483648, %v2502_v62  ;;  %vm6291_vm7 = vcmp.lt.s32.totalorder %v6290_v30, 0  ;;  %v12303_v13 = vand.u32 2147483647, %v9049_v18  ;;  %v9295_v14 = vpop.permute.xlu1 %2220 }
 0x362   : > { %v2791_v60 = vadd.s32 %v2790_v57, %v2786_v49  ;;  %v2698_v34 = vsel %vm6291_vm7, 0, %v6290_v30  ;;  %v2603_v5 = vand.u32 2147483647, %v2602_v43  ;;  %vm2892_vm4 = vc.u32 %v9266_v21, %v9245_v3 }
 0x363   : > { %v2946_v53 = vand.u32 8388607, %v12303_v13  ;;  %v3047_v45 = vshrl.u32 %v3046_v54, 23  ;;  %v12304_v51 = vsub.s32 4, %v9040_v35  ;;  %v2605_v37 = vcvt.s32.f32 %v2598_v27 }
 0x364   : > { %v2792_v25 = vadd.s32 536870912, %v2791_v60  ;;  %v2890_v26 = vmul.u32 %v9074_v52, %v9187_v32  ;;  %v2894_v19 = vsel %vm2892_vm4, %v2893_v29, %v9246_v41  ;;  %v12126_v33 = vand.u32 2147483647, %v9251_v50 }
 0x365   : > { %v2506_v12 = vsel %vm2421_vm1, %v12304_v51, %v9040_v35  ;;  %v6304_v38 = vadd.s32 4294967169, %v3047_v45  ;;  %vm2950_vm12 = vcmp.gt.s32.totalorder %v2949_v7, 0  ;;  %v2504_v11 = vsel %vm2421_vm1, %v2503_v0, %v2502_v62 }
 0x366   : > { %v2703_v40 = vsub.s32 4294967266, %v2698_v34  ;;  %vm2525_vm5 = vcmp.lt.s32.totalorder %v8960_v9, 0  ;;  %v9290_v16 = vshrl.u32 %v2792_v25, 30  ;;  %v2895_v35 = vadd.s32 %v2894_v19, %v2890_v26 }
 0x367   : > { %v2699_v44 = vsub.s32 32, %v2698_v34  ;;  %v2606_v56 = vmul.f32 %v2605_v37, %v2603_v5  ;;  %v3053_v28 = vadd.s32 1, %v6304_v38  ;;  %v2947_v61 = vor.u32 8388608, %v2946_v53  ;;  %v9323_v37 = vpop.f32.mrb[6].mxu0 }
 0x368   : > { %12305 = vst [vmem:[#allocation5_spill] sm:$0xff] %v9290_v16  ;;  %v2508_v52 = vsel %vm9259_vm3, 0, %v2506_v12  ;;  %v2794_v32 = vshll.u32 %v9290_v16, 30  ;;  %v2896_v41 = vadd.s32 536870912, %v2895_v35  ;;  %v2951_v43 = vsel %vm2950_vm12, %v2949_v7, 0 }
 0x369   : > { %v2507_v62 = vsel %vm9259_vm3, %v8957_v22, %v2504_v11  ;;  %v2683_v48 = vadd.s32 %v9157_v1, %v9163_v55  ;;  %v3050_v30 = vand.u32 8388607, %v12126_v33  ;;  %vm3054_vm9 = vcmp.gt.s32.totalorder %v3053_v28, 0 }
 0x36a   : > { %v2704_v27 = vadd.s32 127, %v2703_v40  ;;  %v9304_v49 = vsub.s32 %v2791_v60, %v2794_v32  ;;  %v9306_v57 = vshrl.u32 %v2896_v41, 30  ;;  %v9310_v29 = vadd.f32 %v8999_v10, %v9295_v14 }
 0x36b   : > { %v2701_v54 = vshrl.u32 %v2683_v48, %v2699_v44  ;;  %v2607_v7 = vxor.u32 2147483648, %v2606_v56  ;;  %v3055_v24 = vsel %vm3054_vm9, %v3053_v28, 0  ;;  %v9312_v0 = vand.u32 31, %v2951_v43 }
 0x36c   : > { %12306 = vst [vmem:[#allocation15_spill] sm:$0xff] %v9310_v29  ;;  %6784 = vcosq.f32 %v2507_v62  ;;  %v9314_v1 = vadd.s32 3, %v2508_v52  ;;  %v2797_v55 = vsub.s32 0, %v9304_v49  ;;  %v2898_v13 = vshll.u32 %v9306_v57, 30 }
 0x36d   : > { %6786 = vsinq.f32 %v2507_v62  ;;  %v2700_v60 = vshll.u32 %v9220_v15, %v2698_v34  ;;  %v3051_v53 = vor.u32 8388608, %v3050_v30  ;;  %v3057_v5 = vand.u32 31, %v3055_v24 }
 0x36e   : > { %12307 = vst [vmem:[#allocation12_spill] sm:$0xff] %v9314_v1  ;;  %v2705_v45 = vshll.u32 %v2704_v27, 23  ;;  %v6293_v51 = vmin.u32 %v2797_v55, %v9304_v49  ;;  %v9321_v12 = vsub.s32 %v2895_v35, %v2898_v13  ;;  %v9329_v26 = vsel %vm2525_vm5, %v2607_v7, %v2606_v56 }
 0x36f   : > { %v9325_v25 = vor.u32 %v2701_v54, %v2700_v60  ;;  %v3058_v19 = vsub.s32 32, %v3057_v5  ;;  %v9332_v15 = vsub.s32 32, %v9312_v0  ;;  %v2787_v34 = vadd.s32 %v9232_v46, %v9239_v58 }
 0x370   : > { %v2799_v38 = vclz %v6293_v51  ;;  %v2901_v11 = vsub.s32 0, %v9321_v12  ;;  %v9337_v40 = vshll.u32 %v2947_v61, 8  ;;  %v9341_v35 = vadd.s32 %v9245_v3, %v9266_v21 }
 0x371   : > { %v9343_v44 = vshll.u32 %v3051_v53, 8  ;;  %v9345_v56 = vshrl.u32 %v2951_v43, 5  ;;  %v9349_v28 = vshll.u32 %v12238_v4, %v9312_v0  ;;  %v9351_v52 = vor.u32 4788187, %v2705_v45 }
 0x372   : > { %v6294_v46 = vadd.s32 4294967294, %v2799_v38  ;;  %v6297_v58 = vmin.u32 %v2901_v11, %v9321_v12  ;;  %v9356_v61 = vshll.u32 %v12243_v8, %v9312_v0  ;;  %v2709_v3 = vcvt.s32.f32 %v9325_v25 }
 0x373   : > { %v3061_v21 = vshrl.u32 %v12243_v8, %v3058_v19  ;;  %v3064_v32 = vshrl.u32 %v12235_v42, %v3058_v19  ;;  %v9363_v41 = vshrl.u32 %v12238_v4, %v9332_v15  ;;  %v3060_v62 = vshll.u32 %v12238_v4, %v3057_v5 }
 0x374   : > { %vm6295_vm10 = vcmp.lt.s32.totalorder %v6294_v46, 0  ;;  %v2903_v43 = vclz %v6297_v58  ;;  %v3067_v48 = vshrl.u32 %v12236_v47, %v3058_v19  ;;  %v3063_v27 = vshll.u32 %v12243_v8, %v3057_v5 }
 0x375   : > { %v2802_v30 = vsel %vm6295_vm10, 0, %v6294_v46  ;;  %v3069_v54 = vshll.u32 %v12236_v47, %v3057_v5  ;;  %v3070_v7 = vshrl.u32 %v12237_v59, %v3058_v19  ;;  %v3056_v53 = vshrl.u32 %v3055_v24, 5 }
 0x376   : > { %v9370_v55 = vpop.eup %6784  ;;  %v2807_v13 = vsub.s32 4294967266, %v2802_v30  ;;  %v6298_v60 = vadd.s32 4294967294, %v2903_v43  ;;  %v3066_v45 = vshll.u32 %v12235_v42, %v3057_v5  ;;  %v3062_v25 = vor.u32 %v3061_v21, %v3060_v62  ;;  %v9384_v62 = vpop.f32.mrb[6].mxu1 }
 0x377   : > { %12308 = vst [vmem:[#allocation14_spill] sm:$0xff] %v9370_v55  ;;  %v9373_v51 = vpop.eup %6786  ;;  %v3065_v38 = vor.u32 %v3064_v32, %v3063_v27  ;;  %v3071_v11 = vor.u32 %v3070_v7, %v3069_v54  ;;  %v3073_v46 = vshrl.u32 %v12247_v17, %v3058_v19  ;;  %v3072_v10 = vshll.u32 %v12237_v59, %v3057_v5 }
 0x378   : > { %12309 = vst [vmem:[#allocation8_spill] sm:$0xff] %v9373_v51  ;;  %v2808_v58 = vadd.s32 127, %v2807_v13  ;;  %vm6299_vm15 = vcmp.lt.s32.totalorder %v6298_v60, 0  ;;  %v3068_v33 = vor.u32 %v3067_v48, %v3066_v45  ;;  %v2803_v22 = vsub.s32 32, %v2802_v30  ;;  %12310 = vst [vmem:[#allocation10_spill] sm:$0xff] %v9384_v62 }
 0x379   : > { %v9377_v1 = vsel %vm6299_vm15, 0, %v6298_v60  ;;  %v2957_v24 = vshrl.u32 %v12243_v8, %v9332_v15  ;;  %v2960_v43 = vshrl.u32 %v12235_v42, %v9332_v15  ;;  %v2707_v21 = vand.u32 2147483647, %v9351_v52 }
 0x37a   : > { %v3074_v32 = vor.u32 %v3073_v46, %v3072_v10  ;;  %vm3075_vm0 = vcmp.lt.s32.totalorder %v3056_v53, 1  ;;  %vm3078_vm2 = vcmp.lt.s32.totalorder %v3056_v53, 4  ;;  %v2911_v48 = vsub.s32 4294967266, %v9377_v1 }
 0x37b   : > { %v3059_v5 = vshrl.u32 %v12238_v4, %v3058_v19  ;;  %v3083_v27 = vsel %vm3075_vm0, %v3062_v25, %v3065_v38  ;;  %v3084_v54 = vsel %vm3078_vm2, %v3071_v11, 920167782  ;;  %v2804_v7 = vshll.u32 %v9304_v49, %v2802_v30 }
 0x37c   : > { %v2809_v13 = vshll.u32 %v2808_v58, 23  ;;  %vm3077_vm8 = vcmp.lt.s32.totalorder %v3056_v53, 3  ;;  %v3080_v60 = vsel %vm3078_vm2, %v3068_v33, 2102212464  ;;  %v2805_v52 = vshrl.u32 %v2787_v34, %v2803_v22 }
 0x37d   : > { %vm3076_vm11 = vcmp.lt.s32.totalorder %v3056_v53, 2  ;;  %v3085_v10 = vsel %vm3077_vm8, %v3068_v33, %v3084_v54  ;;  %v3087_v45 = vsel %vm3075_vm0, %v3065_v38, %v3068_v33  ;;  %v2912_v46 = vadd.s32 127, %v2911_v48 }
 0x37e   : > { %v3079_v55 = vsel %vm3075_vm0, %v3059_v5, %v3062_v25  ;;  %v3086_v19 = vsel %vm3076_vm11, %v3083_v27, %v3085_v10  ;;  %v3088_v51 = vsel %vm3078_vm2, %v3074_v32, 1326507024  ;;  %v3081_v16 = vsel %vm3077_vm8, %v3065_v38, %v3080_v60 }
 0x37f   : > { %v3089_v62 = vsel %vm3077_vm8, %v3071_v11, %v3088_v51  ;;  %v9397_v49 = vmul.u32.u64.low %v9343_v44, %v3086_v19  ;;  %v9398_v30 = vmul.u32.u64.high %v9343_v44, %v3086_v19, %v9397_v49  ;;  %v2810_v58 = vor.u32 4788187, %v2809_v13 }
 0x380   : > { %v2907_v22 = vsub.s32 32, %v9377_v1  ;;  %v3090_v34 = vsel %vm3076_vm11, %v3087_v45, %v3089_v62  ;;  %v2958_v33 = vor.u32 %v2957_v24, %v9349_v28  ;;  %v2710_v48 = vmul.f32 %v2709_v3, %v2707_v21 }
 0x381   : > { %v2806_v25 = vor.u32 %v2805_v52, %v2804_v7  ;;  %v9405_v5 = vmul.u32.u64.low %v9343_v44, %v3090_v34  ;;  %v9406_v27 = vmul.u32.u64.high %v9343_v44, %v3090_v34, %v9405_v5  ;;  %v2913_v38 = vshll.u32 %v2912_v46, 23 }
 0x382   : > { %v3082_v51 = vsel %vm3076_vm11, %v3079_v55, %v3081_v16  ;;  %v2963_v11 = vshrl.u32 %v12236_v47, %v9332_v15  ;;  %v2966_v32 = vshrl.u32 %v12237_v59, %v9332_v15  ;;  %v3101_v54 = vadd.s32 1, %v9398_v30 }
 0x383   : > { %v2962_v28 = vshll.u32 %v12235_v42, %v9312_v0  ;;  %v2965_v3 = vshll.u32 %v12236_v47, %v9312_v0  ;;  %v2969_v24 = vshrl.u32 %v12247_v17, %v9332_v15  ;;  %vm2629_vm14 = vcmp.lt.s32.totalorder %v9062_v2, 0 }
 0x384   : > { %v12311_v16 = vand.u32 2147483647, %v8960_v9  ;;  %v2811_v53 = vand.u32 2147483647, %v2810_v58  ;;  %v2909_v21 = vshrl.u32 %v9341_v35, %v2907_v22  ;;  %v2961_v62 = vor.u32 %v2960_v43, %v9356_v61 }
 0x385   : > { %v2968_v7 = vshll.u32 %v12237_v59, %v9312_v0  ;;  %v3098_v13 = vmul.u32 %v9343_v44, %v3082_v51  ;;  %vm3100_vm3 = vc.u32 %v9406_v27, %v9397_v49  ;;  %v2964_v15 = vor.u32 %v2963_v11, %v2962_v28 }
 0x386   : > { %vm9423_vm1 = vcmp.le.f32.partialorder %v12311_v16, 0.7853982  ;;  %v2967_v60 = vor.u32 %v2966_v32, %v2965_v3  ;;  %v2813_v52 = vcvt.s32.f32 %v2806_v25  ;;  %v2908_v10 = vshll.u32 %v9321_v12, %v9377_v1 }
 0x387   : > { %v3102_v45 = vsel %vm3100_vm3, %v3101_v54, %v9398_v30  ;;  %v2970_v46 = vor.u32 %v2969_v24, %v2968_v7  ;;  %v2711_v35 = vxor.u32 2147483648, %v2710_v48  ;;  %v2914_v19 = vor.u32 4788187, %v2913_v38 }
 0x388   : > { %v3103_v61 = vadd.s32 %v3102_v45, %v3098_v13  ;;  %vm2971_vm13 = vcmp.lt.s32.totalorder %v9345_v56, 1  ;;  %v12314_v0 = vand.u32 2147483647, %v9062_v2  ;;  %v2814_v43 = vmul.f32 %v2813_v52, %v2811_v53 }
 0x389   : > { %v2910_v58 = vor.u32 %v2909_v21, %v2908_v10  ;;  %vm2974_vm4 = vcmp.lt.s32.totalorder %v9345_v56, 4  ;;  %v2979_v1 = vsel %vm2971_vm13, %v2958_v33, %v2961_v62  ;;  %vm2973_vm12 = vcmp.lt.s32.totalorder %v9345_v56, 3 }
 0x38a   : > { %vm9440_vm7 = vcmp.le.f32.partialorder %v12314_v0, 0.7853982  ;;  %v3104_v12 = vadd.s32 536870912, %v3103_v61  ;;  %v2976_v30 = vsel %vm2974_vm4, %v2964_v15, 2102212464  ;;  %vm2972_vm9 = vcmp.lt.s32.totalorder %v9345_v56, 2 }
 0x38b   : > { %v2980_v22 = vsel %vm2974_vm4, %v2967_v60, 920167782  ;;  %v2983_v25 = vsel %vm2971_vm13, %v2961_v62, %v2964_v15  ;;  %v2984_v5 = vsel %vm2974_vm4, %v2970_v46, 1326507024  ;;  %vm12168_vm10 = vcmp.lt.s32.totalorder %v9066_v6, 0 }
 0x38c   : > { %v2981_v34 = vsel %vm2973_vm12, %v2964_v15, %v2980_v22  ;;  %v2915_v38 = vand.u32 2147483647, %v2914_v19  ;;  %v9452_v51 = vshrl.u32 %v3104_v12, 30  ;;  %v2975_v11 = vsel %vm2971_vm13, %v9363_v41, %v2958_v33 }
 0x38d   : > { %v2982_v32 = vsel %vm2972_vm9, %v2979_v1, %v2981_v34  ;;  %v2977_v54 = vsel %vm2973_vm12, %v2961_v62, %v2976_v30  ;;  %v2985_v28 = vsel %vm2973_vm12, %v2967_v60, %v2984_v5  ;;  %v2712_v16 = vsel %vm2629_vm14, %v2711_v35, %v2710_v48 }
 0x38e   : > { %v9460_v3 = vmul.u32.u64.low %v9337_v40, %v2982_v32  ;;  %v9461_v24 = vmul.u32.u64.high %v9337_v40, %v2982_v32, %v9460_v3  ;;  %v2611_v53 = vsel %vm9423_vm1, %v8960_v9, %v9329_v26  ;;  %vm2837_vm15 = vcmp.lt.s32.totalorder %v8969_v20, 0 }
 0x38f   : > { %v3106_v41 = vshll.u32 %v9452_v51, 30  ;;  %v2986_v33 = vsel %vm2972_vm9, %v2983_v25, %v2985_v28  ;;  %v12317_v21 = vand.u32 2147483647, %v9066_v6  ;;  %v2917_v7 = vcvt.s32.f32 %v2910_v58  ;;  %v9523_v28 = vpop.f32.mrb[7].mxu0 }
 0x390   : > { %v9481_v48 = vmul.u32.u64.low %v9337_v40, %v2986_v33  ;;  %v9482_v13 = vmul.u32.u64.high %v9337_v40, %v2986_v33, %v9481_v48  ;;  %v9486_v26 = vadd.f32 %v9092_v31, %v8964_v39  ;;  %v12321_v15 = vsub.s32 4, %v9213_v63 }
 0x391   : > { %vm9476_vm0 = vcmp.le.f32.partialorder %v12317_v21, 0.7853982  ;;  %v9495_v52 = vsub.s32 %v3103_v61, %v3106_v41  ;;  %v2978_v10 = vsel %vm2972_vm9, %v2975_v11, %v2977_v54  ;;  %v3254_v45 = vand.u32 2139095040, %v9310_v29 }
 0x392   : > { %12320 = vst [vmem:[#allocation7_spill] sm:$0xff] %v9486_v26  ;;  %v9493_v60 = vsel %vm2629_vm14, %v12321_v15, %v9213_v63  ;;  %6788 = vcosq.f32 %v2611_v53  ;;  %v2815_v46 = vxor.u32 2147483648, %v2814_v43  ;;  %v2918_v35 = vmul.f32 %v2917_v7, %v2915_v38 }
 0x393   : > { %v2997_v39 = vadd.s32 1, %v9461_v24  ;;  %v2715_v31 = vsel %vm9440_vm7, %v9062_v2, %v2712_v16  ;;  %v3109_v19 = vsub.s32 0, %v9495_v52  ;;  %v12134_v63 = vand.u32 2147483647, %v9486_v26 }
 0x394   : > { %v3150_v61 = vand.u32 2139095040, %v9486_v26  ;;  %6790 = vsinq.f32 %v2611_v53  ;;  %v2921_v56 = vsub.s32 4, %v9306_v57  ;;  %v2994_v0 = vmul.u32 %v9337_v40, %v2978_v10 }
 0x395   : > { %vm2996_vm2 = vc.u32 %v9482_v13, %v9460_v3  ;;  %v12322_v58 = vand.u32 2147483647, %v8969_v20  ;;  %v6305_v12 = vmin.u32 %v3109_v19, %v9495_v52  ;;  %v3255_v34 = vshrl.u32 %v3254_v45, 23 }
 0x396   : > { %v2998_v30 = vsel %vm2996_vm2, %v2997_v39, %v9461_v24  ;;  %v3151_v22 = vshrl.u32 %v3150_v61, 23  ;;  %6792 = vcosq.f32 %v2715_v31  ;;  %v2816_v25 = vsel %vm12168_vm10, %v2815_v46, %v2814_v43 }
 0x397   : > { %vm9513_vm8 = vcmp.le.f32.partialorder %v12322_v58, 0.7853982  ;;  %v2919_v40 = vxor.u32 2147483648, %v2918_v35  ;;  %v2999_v5 = vadd.s32 %v2998_v30, %v2994_v0  ;;  %v3111_v38 = vclz %v6305_v12 }
 0x398   : > { %v6308_v11 = vadd.s32 4294967169, %v3151_v22  ;;  %v3154_v32 = vand.u32 8388607, %v12134_v63  ;;  %v6312_v54 = vadd.s32 4294967169, %v3255_v34  ;;  %6794 = vsinq.f32 %v2715_v31 }
 0x399   : > { %v9531_v16 = vsel %vm2837_vm15, %v2921_v56, %v9306_v57  ;;  %v3000_v43 = vadd.s32 536870912, %v2999_v5  ;;  %v9536_v53 = vsel %vm9476_vm0, %v9066_v6, %v2816_v25  ;;  %v6306_v41 = vadd.s32 4294967294, %v3111_v38 }
 0x39a   : > { %v3157_v33 = vadd.s32 1, %v6308_v11  ;;  %v3261_v21 = vadd.s32 1, %v6312_v54  ;;  %v2920_v7 = vsel %vm2837_vm15, %v2919_v40, %v2918_v35  ;;  %v3099_v48 = vadd.s32 %v9397_v49, %v9406_v27 }
 0x39b   : > { %v9542_v15 = vshrl.u32 %v3000_v43, 30  ;;  %v12133_v57 = vand.u32 2147483647, %v9310_v29  ;;  %vm6307_vm11 = vcmp.lt.s32.totalorder %v6306_v41, 0  ;;  %v3155_v10 = vor.u32 8388608, %v3154_v32 }
 0x39c   : > { %vm3158_vm14 = vcmp.gt.s32.totalorder %v3157_v33, 0  ;;  %vm3262_vm3 = vcmp.gt.s32.totalorder %v3261_v21, 0  ;;  %v9545_v45 = vpop.eup %6788  ;;  %6796 = vcosq.f32 %v9536_v53  ;;  %v3114_v46 = vsel %vm6307_vm11, 0, %v6306_v41 }
 0x39d   : > { %v3002_v39 = vshll.u32 %v9542_v15, 30  ;;  %v3159_v31 = vsel %vm3158_vm14, %v3157_v33, 0  ;;  %v3115_v35 = vsub.s32 32, %v3114_v46  ;;  %v3119_v19 = vsub.s32 4294967266, %v3114_v46 }
 0x39e   : > { %v9549_v61 = vshrl.u32 %v3159_v31, 5  ;;  %v9551_v49 = vsel %vm3262_vm3, %v3261_v21, 0  ;;  %v9553_v27 = vpop.eup %6790  ;;  %v9558_v56 = vsel %vm9513_vm8, %v8969_v20, %v2920_v7  ;;  %v3161_v12 = vand.u32 31, %v3159_v31 }
 0x39f   : > { %v9561_v58 = vsub.s32 %v2999_v5, %v3002_v39  ;;  %v3120_v30 = vadd.s32 127, %v3119_v19  ;;  %v2995_v22 = vadd.s32 %v9460_v3, %v9482_v13  ;;  %v9565_v34 = vshll.u32 %v3155_v10, 8 }
 0x3a0   : > { %v9569_v25 = vand.u32 8388607, %v12133_v57  ;;  %v9571_v40 = vpop.eup %6792  ;;  %v3116_v38 = vshll.u32 %v9495_v52, %v3114_v46  ;;  %v3162_v32 = vsub.s32 32, %v3161_v12  ;;  %v9576_v5 = vand.u32 31, %v9551_v49 }
 0x3a1   : > { %12325 = vst [vmem:[#allocation9_spill] sm:$0xff] %v9571_v40  ;;  %v3005_v11 = vsub.s32 0, %v9561_v58  ;;  %v3117_v54 = vshrl.u32 %v3099_v48, %v3115_v35  ;;  %v3121_v43 = vshll.u32 %v3120_v30, 23  ;;  %v3164_v3 = vshll.u32 %v12238_v4, %v3161_v12 }
 0x3a2   : > { %vm3179_vm13 = vcmp.lt.s32.totalorder %v9549_v61, 1  ;;  %v9580_v13 = vpop.eup %6794  ;;  %v3165_v33 = vshrl.u32 %v12243_v8, %v3162_v32  ;;  %v3167_v52 = vshll.u32 %v12243_v8, %v3161_v12  ;;  %v3168_v21 = vshrl.u32 %v12235_v42, %v3162_v32 }
 0x3a3   : > { %12326 = vst [vmem:[#allocation19_spill] sm:$0xff] %v9580_v13  ;;  %v6301_v41 = vmin.u32 %v3005_v11, %v9561_v58  ;;  %v3170_v7 = vshll.u32 %v12235_v42, %v3161_v12  ;;  %v3171_v10 = vshrl.u32 %v12236_v47, %v3162_v32  ;;  %v3173_v48 = vshll.u32 %v12236_v47, %v3161_v12 }
 0x3a4   : > { %v3174_v46 = vshrl.u32 %v12237_v59, %v3162_v32  ;;  %v3122_v39 = vor.u32 4788187, %v3121_v43  ;;  %v3166_v35 = vor.u32 %v3165_v33, %v3164_v3  ;;  %v3169_v19 = vor.u32 %v3168_v21, %v3167_v52  ;;  %v9602_v3 = vpop.f32.mrb[7].mxu1 }
 0x3a5   : > { %v3007_v31 = vclz %v6301_v41  ;;  %v3172_v30 = vor.u32 %v3171_v10, %v3170_v7  ;;  %v3176_v57 = vshll.u32 %v12237_v59, %v3161_v12  ;;  %v3177_v63 = vshrl.u32 %v12247_v17, %v3162_v32 }
 0x3a6   : > { %v3175_v11 = vor.u32 %v3174_v46, %v3173_v48  ;;  %v9592_v24 = vpop.eup %6796  ;;  %v3163_v2 = vshrl.u32 %v12238_v4, %v3162_v32  ;;  %vm3180_vm4 = vcmp.lt.s32.totalorder %v9549_v61, 2  ;;  %vm3182_vm12 = vcmp.lt.s32.totalorder %v9549_v61, 4 }
 0x3a7   : > { %12327 = vst [vmem:[#allocation20_spill] sm:$0xff] %v9592_v24  ;;  %v6302_v0 = vadd.s32 4294967294, %v3007_v31  ;;  %v3178_v40 = vor.u32 %v3177_v63, %v3176_v57  ;;  %vm3181_vm9 = vcmp.lt.s32.totalorder %v9549_v61, 3  ;;  %v3184_v43 = vsel %vm3182_vm12, %v3172_v30, 2102212464 }
 0x3a8   : > { %v3187_v12 = vsel %vm3179_vm13, %v3166_v35, %v3169_v19  ;;  %v3183_v41 = vsel %vm3179_vm13, %v3163_v2, %v3166_v35  ;;  %v3185_v32 = vsel %vm3181_vm9, %v3169_v19, %v3184_v43  ;;  %v3188_v63 = vsel %vm3182_vm12, %v3175_v11, 920167782 }
 0x3a9   : > { %vm6303_vm15 = vcmp.lt.s32.totalorder %v6302_v0, 0  ;;  %v3118_v57 = vor.u32 %v3117_v54, %v3116_v38  ;;  %v3123_v33 = vand.u32 2147483647, %v3122_v39  ;;  %v3189_v21 = vsel %vm3181_vm9, %v3172_v30, %v3188_v63 }
 0x3aa   : > { %v3010_v52 = vsel %vm6303_vm15, 0, %v6302_v0  ;;  %v3190_v48 = vsel %vm3180_vm4, %v3187_v12, %v3189_v21  ;;  %v3191_v2 = vsel %vm3179_vm13, %v3169_v19, %v3172_v30  ;;  %v3186_v46 = vsel %vm3180_vm4, %v3183_v41, %v3185_v32 }
 0x3ab   : > { %v3011_v7 = vsub.s32 32, %v3010_v52  ;;  %v3015_v10 = vsub.s32 4294967266, %v3010_v52  ;;  %v3192_v31 = vsel %vm3182_vm12, %v3178_v40, 1326507024  ;;  %v3012_v54 = vshll.u32 %v9561_v58, %v3010_v52 }
 0x3ac   : > { %v9621_v38 = vmul.u32.u64.low %v9565_v34, %v3190_v48  ;;  %v9622_v0 = vmul.u32.u64.high %v9565_v34, %v3190_v48, %v9621_v38  ;;  %v3193_v43 = vsel %vm3181_vm9, %v3175_v11, %v3192_v31  ;;  %v3125_v12 = vcvt.s32.f32 %v3118_v57 }
 0x3ad   : > { %v3013_v39 = vshrl.u32 %v2995_v22, %v3011_v7  ;;  %v3016_v35 = vadd.s32 127, %v3015_v10  ;;  %v3194_v19 = vsel %vm3180_vm4, %v3191_v2, %v3193_v43  ;;  %v3266_v30 = vsub.s32 32, %v9576_v5 }
 0x3ae   : > { %v9633_v40 = vadd.f32 %v9102_v23, %v9295_v14  ;;  %v3259_v63 = vor.u32 8388608, %v9569_v25  ;;  %v9637_v58 = vshrl.u32 %v9551_v49, 5  ;;  %v9639_v22 = vmul.f32 %v3125_v12, %v3123_v33 }
 0x3af   : > { %v3014_v41 = vor.u32 %v3013_v39, %v3012_v54  ;;  %v3017_v32 = vshll.u32 %v3016_v35, 23  ;;  %v9642_v11 = vmul.u32.u64.low %v9565_v34, %v3194_v19  ;;  %v9643_v57 = vmul.u32.u64.high %v9565_v34, %v3194_v19, %v9642_v11 }
 0x3b0   : > { %12328 = vst [vmem:[#allocation21_spill] sm:$0xff] %v9633_v40  ;;  %v3202_v61 = vmul.u32 %v9565_v34, %v3186_v46  ;;  %v3205_v21 = vadd.s32 1, %v9622_v0  ;;  %v3268_v23 = vshll.u32 %v12238_v4, %v9576_v5  ;;  %v3269_v7 = vshrl.u32 %v12243_v8, %v3266_v30 }
 0x3b1   : > { %v3018_v52 = vor.u32 4788187, %v3017_v32  ;;  %v3021_v25 = vcvt.s32.f32 %v3014_v41  ;;  %v3271_v49 = vshll.u32 %v12243_v8, %v9576_v5  ;;  %v3272_v33 = vshrl.u32 %v12235_v42, %v3266_v30 }
 0x3b2   : > { %v3275_v10 = vshrl.u32 %v12236_v47, %v3266_v30  ;;  %v3274_v34 = vshll.u32 %v12235_v42, %v9576_v5  ;;  %v3277_v2 = vshll.u32 %v12236_v47, %v9576_v5  ;;  %v3278_v46 = vshrl.u32 %v12237_v59, %v3266_v30 }
 0x3b3   : > { %v3019_v48 = vand.u32 2147483647, %v3018_v52  ;;  %vm3204_vm2 = vc.u32 %v9643_v57, %v9621_v38  ;;  %v3270_v31 = vor.u32 %v3269_v7, %v3268_v23  ;;  %v3273_v54 = vor.u32 %v3272_v33, %v3271_v49 }
 0x3b4   : > { %v3280_v39 = vshll.u32 %v12237_v59, %v9576_v5  ;;  %v3206_v35 = vsel %vm3204_vm2, %v3205_v21, %v9622_v0  ;;  %v3276_v43 = vor.u32 %v3275_v10, %v3274_v34  ;;  %v3279_v12 = vor.u32 %v3278_v46, %v3277_v2 }
 0x3b5   : > { %v3281_v19 = vshrl.u32 %v12247_v17, %v3266_v30  ;;  %vm3045_vm11 = vcmp.lt.s32.totalorder %v9251_v50, 0  ;;  %v3207_v41 = vadd.s32 %v3206_v35, %v3202_v61  ;;  %v3299_v32 = vshll.u32 %v3259_v63, 8 }
 0x3b6   : > { %v3462_v52 = vand.u32 2139095040, %v9633_v40  ;;  %vm2941_vm14 = vcmp.lt.s32.totalorder %v9049_v18, 0  ;;  %v3022_v23 = vmul.f32 %v3021_v25, %v3019_v48  ;;  %vm3283_vm3 = vcmp.lt.s32.totalorder %v9637_v58, 1 }
 0x3b7   : > { %v3282_v7 = vor.u32 %v3281_v19, %v3280_v39  ;;  %vm3286_vm13 = vcmp.lt.s32.totalorder %v9637_v58, 4  ;;  %v3208_v5 = vadd.s32 536870912, %v3207_v41  ;;  %vm3285_vm4 = vcmp.lt.s32.totalorder %v9637_v58, 3 }
 0x3b8   : > { %v3291_v0 = vsel %vm3283_vm3, %v3270_v31, %v3273_v54  ;;  %v3292_v63 = vsel %vm3286_vm13, %v3279_v12, 920167782  ;;  %v12329_v61 = vand.u32 2147483647, %v9251_v50  ;;  %v3127_v25 = vxor.u32 2147483648, %v9639_v22 }
 0x3b9   : > { %vm3284_vm9 = vcmp.lt.s32.totalorder %v9637_v58, 2  ;;  %v3288_v49 = vsel %vm3286_vm13, %v3276_v43, 2102212464  ;;  %v3293_v33 = vsel %vm3285_vm4, %v3276_v43, %v3292_v63  ;;  %v12332_v10 = vand.u32 2147483647, %v9049_v18 }
 0x3ba   : > { %vm9678_vm12 = vcmp.le.f32.partialorder %v12329_v61, 0.7853982  ;;  %v9694_v34 = vshrl.u32 %v3208_v5, 30  ;;  %v3267_v2 = vshrl.u32 %v12238_v4, %v3266_v30  ;;  %v3294_v46 = vsel %vm3284_vm9, %v3291_v0, %v3293_v33  ;;  %v12336_v33 = vld [vmem:[#allocation17_spill] sm:$0xff] }
 0x3bb   : > { %vm9690_vm15 = vcmp.le.f32.partialorder %v12332_v10, 0.7853982  ;;  %v3295_v39 = vsel %vm3283_vm3, %v3273_v54, %v3276_v43  ;;  %v3023_v35 = vxor.u32 2147483648, %v3022_v23  ;;  %v3296_v19 = vsel %vm3286_vm13, %v3282_v7, 1326507024 }
 0x3bc   : > { %12335 = vst [vmem:[#allocation22_spill] sm:$0xff] %v9694_v34  ;;  %v9703_v63 = vmul.u32.u64.low %v3299_v32, %v3294_v46  ;;  %v9704_v61 = vmul.u32.u64.high %v3299_v32, %v3294_v46, %v9703_v63  ;;  %v3210_v10 = vshll.u32 %v9694_v34, 30  ;;  %v3287_v5 = vsel %vm3283_vm3, %v3267_v2, %v3270_v31 }
 0x3bd   : > { %v3289_v30 = vsel %vm3285_vm4, %v3273_v54, %v3288_v49  ;;  %v3297_v0 = vsel %vm3285_vm4, %v3279_v12, %v3296_v19  ;;  %6798 = vsinq.f32 %v9536_v53  ;;  %v3463_v7 = vshrl.u32 %v3462_v52, 23 }
 0x3be   : > { %v3298_v43 = vsel %vm3284_vm9, %v3295_v39, %v3297_v0  ;;  %v9719_v46 = vadd.f32 %v12336_v33, %v9295_v14  ;;  %6800 = vcosq.f32 %v9558_v56  ;;  %v9722_v11 = vsub.s32 %v3207_v41, %v3210_v10 }
 0x3bf   : > { %v9724_v31 = vmul.u32.u64.low %v3299_v32, %v3298_v43  ;;  %v9725_v2 = vmul.u32.u64.high %v3299_v32, %v3298_v43, %v9724_v31  ;;  %v3128_v54 = vsel %vm3045_vm11, %v3127_v25, %v9639_v22  ;;  %v3290_v53 = vsel %vm3284_vm9, %v3287_v5, %v3289_v30 }
 0x3c0   : > { %v3309_v12 = vadd.s32 1, %v9704_v61  ;;  %v6320_v52 = vadd.s32 4294967169, %v3463_v7  ;;  %v12337_v49 = vsub.s32 4, %v9452_v51  ;;  %v3024_v39 = vsel %vm2941_vm14, %v3023_v35, %v3022_v23 }
 0x3c1   : > { %v3213_v19 = vsub.s32 0, %v9722_v11  ;;  %v12338_v10 = vand.u32 2147483647, %v9633_v40  ;;  %v2924_v58 = vsel %vm9513_vm8, 0, %v9531_v16  ;;  %6802 = vsinq.f32 %v9558_v56 }
 0x3c2   : > { %v3130_v41 = vsel %vm3045_vm11, %v12337_v49, %v9452_v51  ;;  %v3469_v25 = vadd.s32 1, %v6320_v52  ;;  %v3358_v5 = vand.u32 2139095040, %v9719_v46  ;;  %v3131_v51 = vsel %vm9678_vm12, %v9251_v50, %v3128_v54 }
 0x3c3   : > { %v3466_v22 = vand.u32 8388607, %v12338_v10  ;;  %v6309_v23 = vmin.u32 %v3213_v19, %v9722_v11  ;;  %v3306_v35 = vmul.u32 %v3299_v32, %v3290_v53  ;;  %vm3308_vm2 = vc.u32 %v9725_v2, %v9703_v63 }
 0x3c4   : > { %v3132_v30 = vsel %vm9678_vm12, 0, %v3130_v41  ;;  %v9759_v1 = vsel %vm9690_vm15, %v9049_v18, %v3024_v39  ;;  %v3310_v16 = vsel %vm3308_vm2, %v3309_v12, %v9704_v61  ;;  %vm3470_vm8 = vcmp.gt.s32.totalorder %v3469_v25, 0 }
 0x3c5   : > { %v3215_v56 = vclz %v6309_v23  ;;  %v3311_v0 = vadd.s32 %v3310_v16, %v3306_v35  ;;  %v3467_v43 = vor.u32 8388608, %v3466_v22  ;;  %v3471_v7 = vsel %vm3470_vm8, %v3469_v25, 0 }
 0x3c6   : > { %v12339_v32 = vsel %vm9440_vm7, 0, %v9493_v60  ;;  %6804 = vcosq.f32 %v3131_v51  ;;  %v3473_v21 = vand.u32 31, %v3471_v7  ;;  %v3359_v31 = vshrl.u32 %v3358_v5, 23 }
 0x3c7   : > { %v9766_v33 = vadd.s32 3, %v12339_v32  ;;  %v9768_v54 = vadd.s32 3, %v2924_v58  ;;  %6806 = vsinq.f32 %v3131_v51  ;;  %v6310_v53 = vadd.s32 4294967294, %v3215_v56  ;;  %v9770_v61 = vpop.eup %6798 }
 0x3c8   : > { %v3312_v52 = vadd.s32 536870912, %v3311_v0  ;;  %12342 = vst [vmem:[#allocation24_spill] sm:$0xff] %v9770_v61  ;;  %v9772_v12 = vadd.s32 3, %v3132_v30  ;;  %6808 = vcosq.f32 %v9759_v1  ;;  %v3203_v44 = vadd.s32 %v9621_v38, %v9643_v57  ;;  %v9777_v49 = vpop.eup %6800 }
 0x3c9   : > { %12340 = vst [vmem:[#allocation17_spill] sm:$0xff] %v9766_v33  ;;  %12341 = vst [vmem:[#allocation23_spill] sm:$0xff] %v9768_v54  ;;  %v3474_v60 = vsub.s32 32, %v3473_v21  ;;  %vm6311_vm7 = vcmp.lt.s32.totalorder %v6310_v53, 0  ;;  %v9781_v39 = vshll.u32 %v3467_v43, 8  ;;  %v6316_v25 = vadd.s32 4294967169, %v3359_v31 }
 0x3ca   : > { %12343 = vst [vmem:[#allocation25_spill] sm:$0xff] %v9772_v12  ;;  %12344 = vst [vmem:[#allocation26_spill] sm:$0xff] %v9777_v49  ;;  %v9779_v41 = vshrl.u32 %v3312_v52, 30  ;;  %v3218_v10 = vsel %vm6311_vm7, 0, %v6310_v53  ;;  %v3472_v38 = vshrl.u32 %v3471_v7, 5  ;;  %v3476_v57 = vshll.u32 %v12238_v4, %v3473_v21 }
 0x3cb   : > { %v3477_v22 = vshrl.u32 %v12243_v8, %v3474_v60  ;;  %v3480_v58 = vshrl.u32 %v12235_v42, %v3474_v60  ;;  %v3223_v5 = vsub.s32 4294967266, %v3218_v10  ;;  %v9788_v23 = vpop.eup %6802  ;;  %v3479_v35 = vshll.u32 %v12243_v8, %v3473_v21 }
 0x3cc   : > { %v3314_v51 = vshll.u32 %v9779_v41, 30  ;;  %12345 = vst [vmem:[#allocation27_spill] sm:$0xff] %v9788_v23  ;;  %v3482_v30 = vshll.u32 %v12235_v42, %v3473_v21  ;;  %v3483_v16 = vshrl.u32 %v12236_v47, %v3474_v60  ;;  %v3485_v56 = vshll.u32 %v12236_v47, %v3473_v21 }
 0x3cd   : > { %v3224_v43 = vadd.s32 127, %v3223_v5  ;;  %v3486_v31 = vshrl.u32 %v12237_v59, %v3474_v60  ;;  %v3488_v53 = vshll.u32 %v12237_v59, %v3473_v21  ;;  %v3219_v7 = vsub.s32 32, %v3218_v10 }
 0x3ce   : > { %v9794_v32 = vsub.s32 %v3311_v0, %v3314_v51  ;;  %v3478_v52 = vor.u32 %v3477_v22, %v3476_v57  ;;  %v3481_v19 = vor.u32 %v3480_v58, %v3479_v35  ;;  %v3489_v50 = vshrl.u32 %v12247_v17, %v3474_v60 }
 0x3cf   : > { %v3484_v13 = vor.u32 %v3483_v16, %v3482_v30  ;;  %v12346_v33 = vand.u32 2147483647, %v9719_v46  ;;  %v9804_v5 = vadd.f32 %v9202_v36, %v9295_v14  ;;  %v3475_v51 = vshrl.u32 %v12238_v4, %v3474_v60 }
 0x3d0   : > { %v3317_v12 = vsub.s32 0, %v9794_v32  ;;  %v9806_v0 = vpop.eup %6804  ;;  %v3487_v21 = vor.u32 %v3486_v31, %v3485_v56  ;;  %v3490_v20 = vor.u32 %v3489_v50, %v3488_v53  ;;  %v3365_v22 = vadd.s32 1, %v6316_v25 }
 0x3d1   : > { %v3362_v49 = vand.u32 8388607, %v12346_v33  ;;  %12347 = vst [vmem:[#allocation28_spill] sm:$0xff] %v9806_v0  ;;  %v9809_v58 = vpop.eup %6806  ;;  %v3220_v57 = vshll.u32 %v9722_v11, %v3218_v10  ;;  %v3225_v35 = vshll.u32 %v3224_v43, 23  ;;  %vm3491_vm11 = vcmp.lt.s32.totalorder %v3472_v38, 1 }
 0x3d2   : > { %12348 = vst [vmem:[#allocation29_spill] sm:$0xff] %v9809_v58  ;;  %v6313_v30 = vmin.u32 %v3317_v12, %v9794_v32  ;;  %v9813_v33 = vpop.eup %6808  ;;  %v3221_v16 = vshrl.u32 %v3203_v44, %v3219_v7  ;;  %vm3492_vm3 = vcmp.lt.s32.totalorder %v3472_v38, 2  ;;  %vm3494_vm13 = vcmp.lt.s32.totalorder %v3472_v38, 4 }
 0x3d3   : > { %v3499_v36 = vsel %vm3491_vm11, %v3478_v52, %v3481_v19  ;;  %vm3493_vm4 = vcmp.lt.s32.totalorder %v3472_v38, 3  ;;  %v3496_v60 = vsel %vm3494_vm13, %v3484_v13, 2102212464  ;;  %v3500_v50 = vsel %vm3494_vm13, %v3487_v21, 920167782 }
 0x3d4   : > { %v3319_v14 = vclz %v6313_v30  ;;  %v3501_v25 = vsel %vm3493_vm4, %v3484_v13, %v3500_v50  ;;  %v3503_v56 = vsel %vm3491_vm11, %v3481_v19, %v3484_v13  ;;  %v3504_v31 = vsel %vm3494_vm13, %v3490_v20, 1326507024 }
 0x3d5   : > { %vm3366_vm12 = vcmp.gt.s32.totalorder %v3365_v22, 0  ;;  %v3226_v11 = vor.u32 4788187, %v3225_v35  ;;  %v3495_v12 = vsel %vm3491_vm11, %v3475_v51, %v3478_v52  ;;  %v3502_v43 = vsel %vm3492_vm3, %v3499_v36, %v3501_v25  ;;  %v9830_v51 = vpop.permute.xlu1 %2225 }
 0x3d6   : > { %v6314_v10 = vadd.s32 4294967294, %v3319_v14  ;;  %v3497_v44 = vsel %vm3493_vm4, %v3481_v19, %v3496_v60  ;;  %v3505_v53 = vsel %vm3493_vm4, %v3487_v21, %v3504_v31  ;;  %v3222_v30 = vor.u32 %v3221_v16, %v3220_v57 }
 0x3d7   : > { %v9820_v7 = vmul.u32.u64.low %v9781_v39, %v3502_v43  ;;  %v9821_v0 = vmul.u32.u64.high %v9781_v39, %v3502_v43, %v9820_v7  ;;  %v3506_v50 = vsel %vm3492_vm3, %v3503_v56, %v3505_v53  ;;  %v3367_v13 = vsel %vm3366_vm12, %v3365_v22, 0 }
 0x3d8   : > { %vm6315_vm9 = vcmp.lt.s32.totalorder %v6314_v10, 0  ;;  %6810 = vsinq.f32 %v9759_v1  ;;  %v9827_v35 = vmul.u32.u64.low %v9781_v39, %v3506_v50  ;;  %v9828_v52 = vmul.u32.u64.high %v9781_v39, %v3506_v50, %v9827_v35  ;;  %v12350_v1 = vld [vmem:[#allocation10_spill] sm:$0xff] }
 0x3d9   : > { %v3322_v20 = vsel %vm6315_vm9, 0, %v6314_v10  ;;  %v3227_v19 = vand.u32 2147483647, %v3226_v11  ;;  %v3498_v36 = vsel %vm3492_vm3, %v3495_v12, %v3497_v44  ;;  %v3363_v14 = vor.u32 8388608, %v3362_v49 }
 0x3da   : > { %v3327_v21 = vsub.s32 4294967266, %v3322_v20  ;;  %v3517_v57 = vadd.s32 1, %v9821_v0  ;;  %v3369_v16 = vand.u32 31, %v3367_v13  ;;  %v9836_v22 = vadd.f32 %v9323_v37, %v9830_v51 }
 0x3db   : > { %v9840_v60 = vadd.f32 %v12350_v1, %v9830_v51  ;;  %v3229_v25 = vcvt.s32.f32 %v3222_v30  ;;  %v3307_v56 = vadd.s32 %v9703_v63, %v9725_v2  ;;  %v3323_v11 = vsub.s32 32, %v3322_v20 }
 0x3dc   : > { %12349 = vst [vmem:[#allocation30_spill] sm:$0xff] %v9836_v22  ;;  %v3328_v31 = vadd.s32 127, %v3327_v21  ;;  %v3514_v49 = vmul.u32 %v9781_v39, %v3498_v36  ;;  %vm3516_vm2 = vc.u32 %v9828_v52, %v9820_v7  ;;  %v3370_v10 = vsub.s32 32, %v3369_v16 }
 0x3dd   : > { %v3230_v37 = vmul.f32 %v3229_v25, %v3227_v19  ;;  %v3518_v43 = vsel %vm3516_vm2, %v3517_v57, %v9821_v0  ;;  %v9850_v44 = vshll.u32 %v3363_v14, 8  ;;  %vm12167_vm8 = vcmp.lt.s32.totalorder %v9486_v26, 0 }
 0x3de   : > { %v3324_v63 = vshll.u32 %v9794_v32, %v3322_v20  ;;  %v3519_v2 = vadd.s32 %v3518_v43, %v3514_v49  ;;  %v3368_v53 = vshrl.u32 %v3367_v13, 5  ;;  %v3373_v30 = vshrl.u32 %v12243_v8, %v3370_v10 }
 0x3df   : > { %v3329_v39 = vshll.u32 %v3328_v31, 23  ;;  %v3372_v50 = vshll.u32 %v12238_v4, %v3369_v16  ;;  %v3375_v35 = vshll.u32 %v12243_v8, %v3369_v16  ;;  %v3376_v19 = vshrl.u32 %v12235_v42, %v3370_v10 }
 0x3e0   : > { %v3325_v21 = vshrl.u32 %v3307_v56, %v3323_v11  ;;  %v3520_v36 = vadd.s32 536870912, %v3519_v2  ;;  %v3378_v0 = vshll.u32 %v12235_v42, %v3369_v16  ;;  %v3379_v14 = vshrl.u32 %v12236_v47, %v3370_v10 }
 0x3e1   : > { %v12351_v57 = vand.u32 2147483647, %v9486_v26  ;;  %v12352_v32 = vmov 0  ;;  %v3374_v13 = vor.u32 %v3373_v30, %v3372_v50  ;;  %v3377_v20 = vor.u32 %v3376_v19, %v3375_v35 }
 0x3e2   : > { %v3381_v1 = vshll.u32 %v12236_v47, %v3369_v16  ;;  %v3382_v25 = vshrl.u32 %v12237_v59, %v3370_v10  ;;  %v9868_v31 = vpop.eup %6810  ;;  %v9870_v56 = vshrl.u32 %v3520_v36, 30  ;;  %v3380_v11 = vor.u32 %v3379_v14, %v3378_v0 }
 0x3e3   : > { %vm9862_vm7 = vcmp.le.f32.partialorder %v12351_v57, 0.7853982  ;;  %v3384_v49 = vshll.u32 %v12237_v59, %v3369_v16  ;;  %v3385_v43 = vshrl.u32 %v12247_v17, %v3370_v10  ;;  %v3231_v38 = vxor.u32 2147483648, %v3230_v37 }
 0x3e4   : > { %v12353_v32 = vsel %vm9862_vm7, 4294967295, %v12352_v32  ;;  %vm3253_vm11 = vcmp.lt.s32.totalorder %v9310_v29, 0  ;;  %v3330_v57 = vor.u32 4788187, %v3329_v39  ;;  %v3383_v12 = vor.u32 %v3382_v25, %v3381_v1 }
 0x3e5   : > { %12354 = vst [vmem:[#allocation10_spill] sm:$0xff] %v12353_v32  ;;  %vm3387_vm3 = vcmp.lt.s32.totalorder %v3368_v53, 1  ;;  %v3326_v30 = vor.u32 %v3325_v21, %v3324_v63  ;;  %v3522_v50 = vshll.u32 %v9870_v56, 30  ;;  %v3386_v35 = vor.u32 %v3385_v43, %v3384_v49 }
 0x3e6   : > { %vm3390_vm13 = vcmp.lt.s32.totalorder %v3368_v53, 4  ;;  %vm3388_vm4 = vcmp.lt.s32.totalorder %v3368_v53, 2  ;;  %vm3389_vm12 = vcmp.lt.s32.totalorder %v3368_v53, 3  ;;  %v3395_v19 = vsel %vm3387_vm3, %v3374_v13, %v3377_v20 }
 0x3e7   : > { %v3396_v36 = vsel %vm3390_vm13, %v3383_v12, 920167782  ;;  %v9878_v16 = vsub.s32 %v3519_v2, %v3522_v50  ;;  %v3371_v0 = vshrl.u32 %v12238_v4, %v3370_v10  ;;  %v3392_v14 = vsel %vm3390_vm13, %v3380_v11, 2102212464 }
 0x3e8   : > { %v3397_v39 = vsel %vm3389_vm12, %v3380_v11, %v3396_v36  ;;  %v3232_v63 = vsel %vm12167_vm8, %v3231_v38, %v3230_v37  ;;  %v3331_v21 = vand.u32 2147483647, %v3330_v57  ;;  %v3399_v25 = vsel %vm3387_vm3, %v3377_v20, %v3380_v11 }
 0x3e9   : > { %v3398_v1 = vsel %vm3388_vm4, %v3395_v19, %v3397_v39  ;;  %v3333_v49 = vcvt.s32.f32 %v3326_v30  ;;  %v3525_v43 = vsub.s32 0, %v9878_v16  ;;  %v3391_v2 = vsel %vm3387_vm3, %v3371_v0, %v3374_v13 }
 0x3ea   : > { %v3400_v50 = vsel %vm3390_vm13, %v3386_v35, 1326507024  ;;  %v3393_v10 = vsel %vm3389_vm12, %v3377_v20, %v3392_v14  ;;  %v9893_v36 = vmul.u32.u64.low %v9850_v44, %v3398_v1  ;;  %v9894_v23 = vmul.u32.u64.high %v9850_v44, %v3398_v1, %v9893_v36 }
 0x3eb   : > { %v3401_v58 = vsel %vm3389_vm12, %v3383_v12, %v3400_v50  ;;  %v9900_v38 = vsel %vm9862_vm7, %v9486_v26, %v3232_v63  ;;  %vm3461_vm9 = vcmp.lt.s32.totalorder %v9633_v40, 0  ;;  %v6321_v37 = vmin.u32 %v3525_v43, %v9878_v16 }
 0x3ec   : > { %v3402_v13 = vsel %vm3388_vm4, %v3399_v25, %v3401_v58  ;;  %v9907_v20 = vadd.f32 %v9523_v28, %v9830_v51  ;;  %v3334_v12 = vmul.f32 %v3333_v49, %v3331_v21  ;;  %v3566_v30 = vand.u32 2139095040, %v9804_v5 }
 0x3ed   : > { %v9910_v11 = vmul.u32.u64.low %v9850_v44, %v3402_v13  ;;  %v9911_v57 = vmul.u32.u64.high %v9850_v44, %v3402_v13, %v9910_v11  ;;  %v12355_v35 = vsub.s32 4, %v9779_v41  ;;  %v3527_v0 = vclz %v6321_v37 }
 0x3ee   : > { %v3394_v58 = vsel %vm3388_vm4, %v3391_v2, %v3393_v10  ;;  %v3670_v28 = vand.u32 2139095040, %v9836_v22  ;;  %6812 = vcosq.f32 %v9900_v38  ;;  %v3413_v14 = vadd.s32 1, %v9894_v23 }
 0x3ef   : > { %v9919_v19 = vsel %vm3253_vm11, %v12355_v35, %v9779_v41  ;;  %v3567_v39 = vshrl.u32 %v3566_v30, 23  ;;  %v12356_v63 = vand.u32 2147483647, %v9804_v5  ;;  %v6322_v1 = vadd.s32 4294967294, %v3527_v0 }
 0x3f0   : > { %v3545_v25 = vsub.s32 4, %v9870_v56  ;;  %v12146_v49 = vand.u32 2147483647, %v9836_v22  ;;  %v3671_v41 = vshrl.u32 %v3670_v28, 23  ;;  %v3335_v43 = vxor.u32 2147483648, %v3334_v12 }
 0x3f1   : > { %v3570_v21 = vand.u32 8388607, %v12356_v63  ;;  %v3410_v53 = vmul.u32 %v9850_v44, %v3394_v58  ;;  %vm3412_vm2 = vc.u32 %v9911_v57, %v9893_v36  ;;  %v6324_v2 = vadd.s32 4294967169, %v3567_v39 }
 0x3f2   : > { %v3515_v50 = vadd.s32 %v9820_v7, %v9828_v52  ;;  %vm6323_vm3 = vcmp.lt.s32.totalorder %v6322_v1, 0  ;;  %v3414_v10 = vsel %vm3412_vm2, %v3413_v14, %v9894_v23  ;;  %v6328_v37 = vadd.s32 4294967169, %v3671_v41 }
 0x3f3   : > { %v3530_v13 = vsel %vm6323_vm3, 0, %v6322_v1  ;;  %v3415_v11 = vadd.s32 %v3414_v10, %v3410_v53  ;;  %v3571_v30 = vor.u32 8388608, %v3570_v21  ;;  %v3573_v35 = vadd.s32 1, %v6324_v2 }
 0x3f4   : > { %v3531_v0 = vsub.s32 32, %v3530_v13  ;;  %v3535_v28 = vsub.s32 4294967266, %v3530_v13  ;;  %v9937_v44 = vand.u32 8388607, %v12146_v49  ;;  %v3677_v58 = vadd.s32 1, %v6328_v37 }
 0x3f5   : > { %v9941_v39 = vsel %vm3253_vm11, %v3335_v43, %v3334_v12  ;;  %v9946_v23 = vsel %vm3461_vm9, %v3545_v25, %v9870_v56  ;;  %v3416_v7 = vadd.s32 536870912, %v3415_v11  ;;  %vm3574_vm13 = vcmp.gt.s32.totalorder %v3573_v35, 0 }
 0x3f6   : > { %v3533_v52 = vshrl.u32 %v3515_v50, %v3531_v0  ;;  %v3536_v14 = vadd.s32 127, %v3535_v28  ;;  %v3575_v63 = vsel %vm3574_vm13, %v3573_v35, 0  ;;  %vm3678_vm4 = vcmp.gt.s32.totalorder %v3677_v58, 0 }
 0x3f7   : > { %v3532_v21 = vshll.u32 %v9878_v16, %v3530_v13  ;;  %v9949_v1 = vshrl.u32 %v3416_v7, 30  ;;  %v3577_v41 = vand.u32 31, %v3575_v63  ;;  %v3679_v53 = vsel %vm3678_vm4, %v3677_v58, 0 }
 0x3f8   : > { %v3537_v2 = vshll.u32 %v3536_v14, 23  ;;  %v9951_v12 = vshll.u32 %v3571_v30, 8  ;;  %v3675_v43 = vor.u32 8388608, %v9937_v44  ;;  %v9955_v25 = vpop.eup %6812  ;;  %v3576_v37 = vshrl.u32 %v3575_v63, 5 }
 0x3f9   : > { %12357 = vst [vmem:[#allocation31_spill] sm:$0xff] %v9949_v1  ;;  %12358 = vst [vmem:[#allocation32_spill] sm:$0xff] %v9955_v25  ;;  %v3534_v10 = vor.u32 %v3533_v52, %v3532_v21  ;;  %v3418_v50 = vshll.u32 %v9949_v1, 30  ;;  %v3578_v35 = vsub.s32 32, %v3577_v41  ;;  %v3580_v16 = vshll.u32 %v12238_v4, %v3577_v41 }
 0x3fa   : > { %v3538_v0 = vor.u32 4788187, %v3537_v2  ;;  %v3583_v13 = vshll.u32 %v12243_v8, %v3577_v41  ;;  %v9960_v28 = vand.u32 31, %v3679_v53  ;;  %v3586_v7 = vshll.u32 %v12235_v42, %v3577_v41 }
 0x3fb   : > { %v9962_v30 = vsub.s32 %v3415_v11, %v3418_v50  ;;  %v3581_v44 = vshrl.u32 %v12243_v8, %v3578_v35  ;;  %v3584_v58 = vshrl.u32 %v12235_v42, %v3578_v35  ;;  %v3587_v52 = vshrl.u32 %v12236_v47, %v3578_v35 }
 0x3fc   : > { %v3589_v14 = vshll.u32 %v12236_v47, %v3577_v41  ;;  %v3590_v63 = vshrl.u32 %v12237_v59, %v3578_v35  ;;  %v3592_v21 = vshll.u32 %v12237_v59, %v3577_v41  ;;  %v3593_v11 = vshrl.u32 %v12247_v17, %v3578_v35 }
 0x3fd   : > { %v3421_v2 = vsub.s32 0, %v9962_v30  ;;  %v3582_v49 = vor.u32 %v3581_v44, %v3580_v16  ;;  %v3585_v56 = vor.u32 %v3584_v58, %v3583_v13  ;;  %v3541_v50 = vcvt.s32.f32 %v3534_v10 }
 0x3fe   : > { %v3579_v1 = vshrl.u32 %v12238_v4, %v3578_v35  ;;  %v3588_v54 = vor.u32 %v3587_v52, %v3586_v7  ;;  %v3591_v25 = vor.u32 %v3590_v63, %v3589_v14  ;;  %v3539_v32 = vand.u32 2147483647, %v3538_v0 }
 0x3ff   : > { %v6317_v26 = vmin.u32 %v3421_v2, %v9962_v30  ;;  %v3594_v24 = vor.u32 %v3593_v11, %v3592_v21  ;;  %vm3595_vm11 = vcmp.lt.s32.totalorder %v3576_v37, 1  ;;  %vm3596_vm12 = vcmp.lt.s32.totalorder %v3576_v37, 2 }
 0x400   : > { %vm3597_vm2 = vcmp.lt.s32.totalorder %v3576_v37, 3  ;;  %vm3598_vm3 = vcmp.lt.s32.totalorder %v3576_v37, 4  ;;  %v3603_v41 = vsel %vm3595_vm11, %v3582_v49, %v3585_v56  ;;  %v3599_v61 = vsel %vm3595_vm11, %v3579_v1, %v3582_v49 }
 0x401   : > { %v3423_v34 = vclz %v6317_v26  ;;  %v3600_v16 = vsel %vm3598_vm3, %v3588_v54, 2102212464  ;;  %v3604_v13 = vsel %vm3598_vm3, %v3591_v25, 920167782  ;;  %v3607_v35 = vsel %vm3595_vm11, %v3585_v56, %v3588_v54 }
 0x402   : > { %v3601_v44 = vsel %vm3597_vm2, %v3585_v56, %v3600_v16  ;;  %v3605_v10 = vsel %vm3597_vm2, %v3588_v54, %v3604_v13  ;;  %v3608_v58 = vsel %vm3598_vm3, %v3594_v24, 1326507024  ;;  %v9977_v7 = vmul.f32 %v3541_v50, %v3539_v32 }
 0x403   : > { %v3411_v0 = vadd.s32 %v9893_v36, %v9911_v57  ;;  %v6318_v52 = vadd.s32 4294967294, %v3423_v34  ;;  %v3606_v14 = vsel %vm3596_vm12, %v3603_v41, %v3605_v10  ;;  %v3602_v63 = vsel %vm3596_vm12, %v3599_v61, %v3601_v44 }
 0x404   : > { %v3609_v26 = vsel %vm3597_vm2, %v3591_v25, %v3608_v58  ;;  %v9985_v49 = vmul.u32.u64.low %v9951_v12, %v3606_v14  ;;  %v9986_v1 = vmul.u32.u64.high %v9951_v12, %v3606_v14, %v9985_v49  ;;  %v9990_v54 = vshrl.u32 %v3679_v53, 5 }
 0x405   : > { %vm6319_vm13 = vcmp.lt.s32.totalorder %v6318_v52, 0  ;;  %v3610_v24 = vsel %vm3596_vm12, %v3607_v35, %v3609_v26  ;;  %v9992_v32 = vshll.u32 %v3675_v43, 8  ;;  %v3682_v61 = vsub.s32 32, %v9960_v28 }
 0x406   : > { %v3426_v36 = vsel %vm6319_vm13, 0, %v6318_v52  ;;  %v9995_v34 = vmul.u32.u64.low %v9951_v12, %v3610_v24  ;;  %v9996_v57 = vmul.u32.u64.high %v9951_v12, %v3610_v24, %v9995_v34  ;;  %v3543_v56 = vxor.u32 2147483648, %v9977_v7 }
 0x407   : > { %v3427_v25 = vsub.s32 32, %v3426_v36  ;;  %v3431_v21 = vsub.s32 4294967266, %v3426_v36  ;;  %v3618_v2 = vmul.u32 %v9951_v12, %v3602_v63  ;;  %v3428_v37 = vshll.u32 %v9962_v30, %v3426_v36 }
 0x408   : > { %v3621_v53 = vadd.s32 1, %v9986_v1  ;;  %v3684_v43 = vshll.u32 %v12238_v4, %v9960_v28  ;;  %v3685_v11 = vshrl.u32 %v12243_v8, %v3682_v61  ;;  %v3687_v16 = vshll.u32 %v12243_v8, %v9960_v28 }
 0x409   : > { %v3429_v50 = vshrl.u32 %v3411_v0, %v3427_v25  ;;  %v3432_v41 = vadd.s32 127, %v3431_v21  ;;  %v3688_v13 = vshrl.u32 %v12235_v42, %v3682_v61  ;;  %vm3620_vm4 = vc.u32 %v9996_v57, %v9985_v49 }
 0x40a   : > { %v3686_v12 = vor.u32 %v3685_v11, %v3684_v43  ;;  %v3690_v30 = vshll.u32 %v12235_v42, %v9960_v28  ;;  %v3691_v44 = vshrl.u32 %v12236_v47, %v3682_v61  ;;  %v3622_v58 = vsel %vm3620_vm4, %v3621_v53, %v9986_v1 }
 0x40b   : > { %v3430_v10 = vor.u32 %v3429_v50, %v3428_v37  ;;  %v3433_v35 = vshll.u32 %v3432_v41, 23  ;;  %v3689_v0 = vor.u32 %v3688_v13, %v3687_v16  ;;  %v3623_v52 = vadd.s32 %v3622_v58, %v3618_v2 }
 0x40c   : > { %v3692_v14 = vor.u32 %v3691_v44, %v3690_v30  ;;  %v3693_v63 = vshll.u32 %v12236_v47, %v9960_v28  ;;  %v3694_v26 = vshrl.u32 %v12237_v59, %v3682_v61  ;;  %v12359_v24 = vand.u32 2147483647, %v9310_v29 }
 0x40d   : > { %v3434_v34 = vor.u32 4788187, %v3433_v35  ;;  %v3683_v25 = vshrl.u32 %v12238_v4, %v3682_v61  ;;  %v3696_v1 = vshll.u32 %v12237_v59, %v9960_v28  ;;  %v3697_v21 = vshrl.u32 %v12247_v17, %v3682_v61 }
 0x40e   : > { %vm10020_vm11 = vcmp.le.f32.partialorder %v12359_v24, 0.7853982  ;;  %v12362_v2 = vand.u32 2147483647, %v9633_v40  ;;  %v3437_v53 = vcvt.s32.f32 %v3430_v10  ;;  %v3624_v43 = vadd.s32 536870912, %v3623_v52 }
 0x40f   : > { %v3695_v11 = vor.u32 %v3694_v26, %v3693_v63  ;;  %vm3699_vm2 = vcmp.lt.s32.totalorder %v9990_v54, 1  ;;  %v3435_v50 = vand.u32 2147483647, %v3434_v34  ;;  %v3698_v41 = vor.u32 %v3697_v21, %v3696_v1 }
 0x410   : > { %vm10030_vm12 = vcmp.le.f32.partialorder %v12362_v2, 0.7853982  ;;  %vm3701_vm3 = vcmp.lt.s32.totalorder %v9990_v54, 3  ;;  %vm3702_vm13 = vcmp.lt.s32.totalorder %v9990_v54, 4  ;;  %vm12160_vm4 = vcmp.lt.s32.totalorder %v9719_v46, 0 }
 0x411   : > { %v10038_v28 = vshrl.u32 %v3624_v43, 30  ;;  %v3703_v61 = vsel %vm3699_vm2, %v3683_v25, %v3686_v12  ;;  %v3704_v16 = vsel %vm3702_vm13, %v3692_v14, 2102212464  ;;  %v3707_v13 = vsel %vm3699_vm2, %v3686_v12, %v3689_v0 }
 0x412   : > { %v3438_v30 = vmul.f32 %v3437_v53, %v3435_v50  ;;  %v3705_v44 = vsel %vm3701_vm3, %v3689_v0, %v3704_v16  ;;  %v3708_v10 = vsel %vm3702_vm13, %v3695_v11, 920167782  ;;  %v3711_v35 = vsel %vm3699_vm2, %v3689_v0, %v3692_v14 }
 0x413   : > { %v3626_v58 = vshll.u32 %v10038_v28, 30  ;;  %vm3700_vm6 = vcmp.lt.s32.totalorder %v9990_v54, 2  ;;  %v3709_v63 = vsel %vm3701_vm3, %v3692_v14, %v3708_v10  ;;  %v3712_v26 = vsel %vm3702_vm13, %v3698_v41, 1326507024 }
 0x414   : > { %v3544_v24 = vsel %vm3461_vm9, %v3543_v56, %v9977_v7  ;;  %v3706_v34 = vsel %vm3700_vm6, %v3703_v61, %v3705_v44  ;;  %v3710_v12 = vsel %vm3700_vm6, %v3707_v13, %v3709_v63  ;;  %v3713_v25 = vsel %vm3701_vm3, %v3695_v11, %v3712_v26 }
 0x415   : > { %v10051_v1 = vsub.s32 %v3623_v52, %v3626_v58  ;;  %v3714_v0 = vsel %vm3700_vm6, %v3711_v35, %v3713_v25  ;;  %v10054_v21 = vmul.u32.u64.low %v9992_v32, %v3710_v12  ;;  %v10055_v2 = vmul.u32.u64.high %v9992_v32, %v3710_v12, %v10054_v21 }
 0x416   : > { %v3439_v53 = vxor.u32 2147483648, %v3438_v30  ;;  %v10058_v14 = vmul.u32.u64.low %v9992_v32, %v3714_v0  ;;  %v10059_v43 = vmul.u32.u64.high %v9992_v32, %v3714_v0, %v10058_v14  ;;  %v3878_v50 = vand.u32 2139095040, %v9840_v60 }
 0x417   : > { %6814 = vsinq.f32 %v9900_v38  ;;  %v3340_v7 = vsel %vm10020_vm11, 0, %v9919_v19  ;;  %v12365_v54 = vand.u32 2147483647, %v9719_v46  ;;  %v3629_v52 = vsub.s32 0, %v10051_v1 }
 0x418   : > { %v3339_v11 = vsel %vm10020_vm11, %v9310_v29, %v9941_v39  ;;  %v3548_v38 = vsel %vm10030_vm12, 0, %v9946_v23  ;;  %v3879_v41 = vshrl.u32 %v3878_v50, 23  ;;  %v3774_v19 = vand.u32 2139095040, %v9907_v20 }
 0x419   : > { %vm10068_vm6 = vcmp.le.f32.partialorder %v12365_v54, 0.7853982  ;;  %v3547_v61 = vsel %vm10030_vm12, %v9633_v40, %v3544_v24  ;;  %v6325_v16 = vmin.u32 %v3629_v52, %v10051_v1  ;;  %v3722_v13 = vmul.u32 %v9992_v32, %v3706_v34 }
 0x41a   : > { %v3725_v44 = vadd.s32 1, %v10055_v2  ;;  %v3440_v39 = vsel %vm12160_vm4, %v3439_v53, %v3438_v30  ;;  %vm3724_vm9 = vc.u32 %v10059_v43, %v10054_v21  ;;  %v6336_v36 = vadd.s32 4294967169, %v3879_v41 }
 0x41b   : > { %v12368_v23 = vand.u32 2147483647, %v9840_v60  ;;  %6816 = vcosq.f32 %v3339_v11  ;;  %v3631_v35 = vclz %v6325_v16  ;;  %v3775_v58 = vshrl.u32 %v3774_v19, 23 }
 0x41c   : > { %v3726_v37 = vsel %vm3724_vm9, %v3725_v44, %v10055_v2  ;;  %6818 = vsinq.f32 %v3339_v11  ;;  %v10093_v63 = vadd.s32 3, %v3340_v7  ;;  %v3885_v26 = vadd.s32 1, %v6336_v36 }
 0x41d   : > { %v3882_v10 = vand.u32 8388607, %v12368_v23  ;;  %v3727_v32 = vadd.s32 %v3726_v37, %v3722_v13  ;;  %6820 = vcosq.f32 %v3547_v61  ;;  %v10095_v24 = vadd.s32 3, %v3548_v38 }
 0x41e   : > { %v3443_v30 = vsel %vm10068_vm6, %v9719_v46, %v3440_v39  ;;  %v6326_v34 = vadd.s32 4294967294, %v3631_v35  ;;  %6822 = vsinq.f32 %v3547_v61  ;;  %vm3886_vm11 = vcmp.gt.s32.totalorder %v3885_v26, 0 }
 0x41f   : > { %12369 = vst [vmem:[#allocation33_spill] sm:$0xff] %v10095_v24  ;;  %v3728_v12 = vadd.s32 536870912, %v3727_v32  ;;  %v3883_v25 = vor.u32 8388608, %v3882_v10  ;;  %v3887_v0 = vsel %vm3886_vm11, %v3885_v26, 0  ;;  %v12158_v2 = vand.u32 2147483647, %v9907_v20 }
 0x420   : > { %vm6327_vm12 = vcmp.lt.s32.totalorder %v6326_v34, 0  ;;  %v6332_v53 = vadd.s32 4294967169, %v3775_v58  ;;  %6824 = vcosq.f32 %v3443_v30  ;;  %v3889_v7 = vand.u32 31, %v3887_v0 }
 0x421   : > { %v3634_v14 = vsel %vm6327_vm12, 0, %v6326_v34  ;;  %v10101_v50 = vshrl.u32 %v3728_v12, 30  ;;  %v10103_v54 = vpop.eup %6814  ;;  %6826 = vsinq.f32 %v3443_v30  ;;  %v3619_v52 = vadd.s32 %v9985_v49, %v9996_v57 }
 0x422   : > { %v3635_v11 = vsub.s32 32, %v3634_v14  ;;  %v3639_v38 = vsub.s32 4294967266, %v3634_v14  ;;  %v10108_v41 = vadd.s32 %v10054_v21, %v10059_v43  ;;  %v3890_v61 = vsub.s32 32, %v3889_v7 }
 0x423   : > { %v3730_v19 = vshll.u32 %v10101_v50, 30  ;;  %v10111_v16 = vshll.u32 %v3883_v25, 8  ;;  %v10115_v39 = vand.u32 8388607, %v12158_v2  ;;  %v3781_v36 = vadd.s32 1, %v6332_v53 }
 0x424   : > { %v3637_v13 = vshrl.u32 %v3619_v52, %v3635_v11  ;;  %v3640_v44 = vadd.s32 127, %v3639_v38  ;;  %v3636_v23 = vshll.u32 %v10051_v1, %v3634_v14  ;;  %v3888_v57 = vshrl.u32 %v3887_v0, 5 }
 0x425   : > { %v10118_v49 = vsub.s32 %v3727_v32, %v3730_v19  ;;  %v3893_v21 = vshrl.u32 %v12243_v8, %v3890_v61  ;;  %v10121_v43 = vpop.eup %6816  ;;  %v3892_v35 = vshll.u32 %v12238_v4, %v3889_v7  ;;  %v3895_v37 = vshll.u32 %v12243_v8, %v3889_v7 }
 0x426   : > { %12370 = vst [vmem:[#allocation34_spill] sm:$0xff] %v10121_v43  ;;  %v3641_v10 = vshll.u32 %v3640_v44, 23  ;;  %v3896_v58 = vshrl.u32 %v12235_v42, %v3890_v61  ;;  %v10126_v26 = vpop.eup %6818  ;;  %v3638_v30 = vor.u32 %v3637_v13, %v3636_v23  ;;  %v3898_v1 = vshll.u32 %v12235_v42, %v3889_v7 }
 0x427   : > { %v3733_v34 = vsub.s32 0, %v10118_v49  ;;  %v3899_v32 = vshrl.u32 %v12236_v47, %v3890_v61  ;;  %v10131_v12 = vpop.eup %6820  ;;  %v3894_v0 = vor.u32 %v3893_v21, %v3892_v35  ;;  %vm3782_vm2 = vcmp.gt.s32.totalorder %v3781_v36, 0 }
 0x428   : > { %12371 = vst [vmem:[#allocation35_spill] sm:$0xff] %v10131_v12  ;;  %v3642_v25 = vor.u32 4788187, %v3641_v10  ;;  %v3897_v53 = vor.u32 %v3896_v58, %v3895_v37  ;;  %v10133_v14 = vpop.eup %6822  ;;  %v3901_v38 = vshll.u32 %v12236_v47, %v3889_v7  ;;  %v3902_v19 = vshrl.u32 %v12237_v59, %v3890_v61 }
 0x429   : > { %12372 = vst [vmem:[#allocation36_spill] sm:$0xff] %v10133_v14  ;;  %v6329_v52 = vmin.u32 %v3733_v34, %v10118_v49  ;;  %v3900_v11 = vor.u32 %v3899_v32, %v3898_v1  ;;  %v3891_v44 = vshrl.u32 %v12238_v4, %v3890_v61  ;;  %v3904_v23 = vshll.u32 %v12237_v59, %v3889_v7 }
 0x42a   : > { %v3643_v13 = vand.u32 2147483647, %v3642_v25  ;;  %v3905_v2 = vshrl.u32 %v12247_v17, %v3890_v61  ;;  %v10141_v10 = vpop.eup %6824  ;;  %v3645_v21 = vcvt.s32.f32 %v3638_v30  ;;  %v3903_v37 = vor.u32 %v3902_v19, %v3901_v38 }
 0x42b   : > { %v3735_v35 = vclz %v6329_v52  ;;  %vm3910_vm3 = vcmp.lt.s32.totalorder %v3888_v57, 4  ;;  %v10143_v58 = vpop.eup %6826  ;;  %vm3907_vm13 = vcmp.lt.s32.totalorder %v3888_v57, 1  ;;  %vm3909_vm9 = vcmp.lt.s32.totalorder %v3888_v57, 3 }
 0x42c   : > { %v3906_v34 = vor.u32 %v3905_v2, %v3904_v23  ;;  %v3912_v1 = vsel %vm3910_vm3, %v3900_v11, 2102212464  ;;  %vm12166_vm11 = vcmp.lt.s32.totalorder %v9804_v5, 0  ;;  %v3646_v32 = vmul.f32 %v3645_v21, %v3643_v13  ;;  %v12373_v21 = vld [vmem:[#allocation6_spill] sm:$0xff] }
 0x42d   : > { %v6330_v25 = vadd.s32 4294967294, %v3735_v35  ;;  %v3915_v7 = vsel %vm3907_vm13, %v3894_v0, %v3897_v53  ;;  %v3916_v61 = vsel %vm3910_vm3, %v3903_v37, 920167782  ;;  %vm3908_vm12 = vcmp.lt.s32.totalorder %v3888_v57, 2 }
 0x42e   : > { %v3911_v40 = vsel %vm3907_vm13, %v3891_v44, %v3894_v0  ;;  %v3913_v30 = vsel %vm3909_vm9, %v3897_v53, %v3912_v1  ;;  %v3917_v52 = vsel %vm3909_vm9, %v3900_v11, %v3916_v61  ;;  %v3919_v38 = vsel %vm3907_vm13, %v3897_v53, %v3900_v11 }
 0x42f   : > { %vm6331_vm4 = vcmp.lt.s32.totalorder %v6330_v25, 0  ;;  %v3918_v2 = vsel %vm3908_vm12, %v3915_v7, %v3917_v52  ;;  %v3920_v19 = vsel %vm3910_vm3, %v3906_v34, 1326507024  ;;  %v10155_v13 = vadd.f32 %v9602_v3, %v9830_v51 }
 0x430   : > { %v3738_v23 = vsel %vm6331_vm4, 0, %v6330_v25  ;;  %v3921_v12 = vsel %vm3909_vm9, %v3903_v37, %v3920_v19  ;;  %v3647_v0 = vxor.u32 2147483648, %v3646_v32  ;;  %v3783_v61 = vsel %vm3782_vm2, %v3781_v36, 0 }
 0x431   : > { %v3739_v44 = vsub.s32 32, %v3738_v23  ;;  %v3743_v1 = vsub.s32 4294967266, %v3738_v23  ;;  %v3914_v14 = vsel %vm3908_vm12, %v3911_v40, %v3913_v30  ;;  %v3922_v53 = vsel %vm3908_vm12, %v3919_v38, %v3921_v12 }
 0x432   : > { %v10162_v11 = vmul.u32.u64.low %v10111_v16, %v3918_v2  ;;  %v10163_v34 = vmul.u32.u64.high %v10111_v16, %v3918_v2, %v10162_v11  ;;  %v12374_v37 = vand.u32 2147483647, %v9804_v5  ;;  %vm3669_vm3 = vcmp.lt.s32.totalorder %v9836_v22, 0 }
 0x433   : > { %v3740_v51 = vshll.u32 %v10118_v49, %v3738_v23  ;;  %v3741_v36 = vshrl.u32 %v10108_v41, %v3739_v44  ;;  %v3744_v40 = vadd.s32 127, %v3743_v1  ;;  %v3779_v57 = vor.u32 8388608, %v10115_v39 }
 0x434   : > { %vm10168_vm4 = vcmp.le.f32.partialorder %v12374_v37, 0.7853982  ;;  %v10177_v12 = vmul.u32.u64.low %v10111_v16, %v3922_v53  ;;  %v10178_v25 = vmul.u32.u64.high %v10111_v16, %v3922_v53, %v10177_v12  ;;  %v3785_v7 = vand.u32 31, %v3783_v61 }
 0x435   : > { %v3742_v52 = vor.u32 %v3741_v36, %v3740_v51  ;;  %v3745_v2 = vshll.u32 %v3744_v40, 23  ;;  %v3753_v38 = vsub.s32 4, %v10101_v50  ;;  %v3930_v19 = vmul.u32 %v10111_v16, %v3914_v14 }
 0x436   : > { %v3648_v49 = vsel %vm12166_vm11, %v3647_v0, %v3646_v32  ;;  %v3933_v41 = vadd.s32 1, %v10163_v34  ;;  %v3784_v23 = vshrl.u32 %v3783_v61, 5  ;;  %v3786_v39 = vsub.s32 32, %v3785_v7 }
 0x437   : > { %v3746_v44 = vor.u32 4788187, %v3745_v2  ;;  %v3749_v1 = vcvt.s32.f32 %v3742_v52  ;;  %v3788_v53 = vshll.u32 %v12238_v4, %v3785_v7  ;;  %v3791_v37 = vshll.u32 %v12243_v8, %v3785_v7 }
 0x438   : > { %v12377_v51 = vand.u32 2147483647, %v9836_v22  ;;  %vm3932_vm13 = vc.u32 %v10178_v25, %v10162_v11  ;;  %v3789_v16 = vshrl.u32 %v12243_v8, %v3786_v39  ;;  %v3794_v14 = vshll.u32 %v12235_v42, %v3785_v7 }
 0x439   : > { %v3797_v32 = vshll.u32 %v12236_v47, %v3785_v7  ;;  %v3747_v0 = vand.u32 2147483647, %v3746_v44  ;;  %v3934_v61 = vsel %vm3932_vm13, %v3933_v41, %v10163_v34  ;;  %v3792_v40 = vshrl.u32 %v12235_v42, %v3786_v39 }
 0x43a   : > { %vm10190_vm2 = vcmp.le.f32.partialorder %v12377_v51, 0.7853982  ;;  %v3795_v12 = vshrl.u32 %v12236_v47, %v3786_v39  ;;  %v3935_v52 = vadd.s32 %v3934_v61, %v3930_v19  ;;  %v3790_v2 = vor.u32 %v3789_v16, %v3788_v53 }
 0x43b   : > { %v3798_v51 = vshrl.u32 %v12237_v59, %v3786_v39  ;;  %v3800_v30 = vshll.u32 %v12237_v59, %v3785_v7  ;;  %v3750_v35 = vmul.f32 %v3749_v1, %v3747_v0  ;;  %v3793_v24 = vor.u32 %v3792_v40, %v3791_v37 }
 0x43c   : > { %v3796_v29 = vor.u32 %v3795_v12, %v3794_v14  ;;  %v3801_v43 = vshrl.u32 %v12247_v17, %v3786_v39  ;;  %v3651_v44 = vsel %vm10168_vm4, %v9804_v5, %v3648_v49  ;;  %v10211_v34 = vsel %vm3669_vm3, %v3753_v38, %v10101_v50 }
 0x43d   : > { %v3936_v19 = vadd.s32 536870912, %v3935_v52  ;;  %v3799_v41 = vor.u32 %v3798_v51, %v3797_v32  ;;  %vm3803_vm9 = vcmp.lt.s32.totalorder %v3784_v23, 1  ;;  %vm3806_vm12 = vcmp.lt.s32.totalorder %v3784_v23, 4 }
 0x43e   : > { %v3802_v53 = vor.u32 %v3801_v43, %v3800_v30  ;;  %v3819_v7 = vshll.u32 %v3779_v57, 8  ;;  %vm3877_vm13 = vcmp.lt.s32.totalorder %v9840_v60, 0  ;;  %vm3805_vm11 = vcmp.lt.s32.totalorder %v3784_v23, 3 }
 0x43f   : > { %v3937_v1 = vshrl.u32 %v3936_v19, 30  ;;  %v3811_v37 = vsel %vm3803_vm9, %v3790_v2, %v3793_v24  ;;  %v3812_v16 = vsel %vm3806_vm12, %v3799_v41, 920167782  ;;  %v3751_v49 = vxor.u32 2147483648, %v3750_v35 }
 0x440   : > { %vm3804_vm8 = vcmp.lt.s32.totalorder %v3784_v23, 2  ;;  %v3808_v14 = vsel %vm3806_vm12, %v3796_v29, 2102212464  ;;  %v3813_v50 = vsel %vm3805_vm11, %v3796_v29, %v3812_v16  ;;  %v3787_v43 = vshrl.u32 %v12238_v4, %v3786_v39 }
 0x441   : > { %v3938_v38 = vshll.u32 %v3937_v1, 30  ;;  %v3814_v30 = vsel %vm3804_vm8, %v3811_v37, %v3813_v50  ;;  %v3815_v57 = vsel %vm3803_vm9, %v3793_v24, %v3796_v29  ;;  %v3816_v0 = vsel %vm3806_vm12, %v3802_v53, 1326507024 }
 0x442   : > { %v10225_v61 = vmul.u32.u64.low %v3819_v7, %v3814_v30  ;;  %v10226_v40 = vmul.u32.u64.high %v3819_v7, %v3814_v30, %v10225_v61  ;;  %v12380_v12 = vand.u32 2147483647, %v9840_v60  ;;  %v3807_v19 = vsel %vm3803_vm9, %v3787_v43, %v3790_v2 }
 0x443   : > { %v10234_v39 = vsub.s32 %v3935_v52, %v3938_v38  ;;  %v3809_v29 = vsel %vm3805_vm11, %v3793_v24, %v3808_v14  ;;  %v3817_v37 = vsel %vm3805_vm11, %v3799_v41, %v3816_v0  ;;  %6828 = vcosq.f32 %v3651_v44 }
 0x444   : > { %vm10230_vm10 = vcmp.le.f32.partialorder %v12380_v12, 0.7853982  ;;  %v3752_v53 = vsel %vm3669_vm3, %v3751_v49, %v3750_v35  ;;  %v3961_v16 = vsub.s32 4, %v3937_v1  ;;  %v3818_v50 = vsel %vm3804_vm8, %v3815_v57, %v3817_v37 }
 0x445   : > { %6830 = vsinq.f32 %v3651_v44  ;;  %v3941_v30 = vsub.s32 0, %v10234_v39  ;;  %v10243_v12 = vmul.u32.u64.low %v3819_v7, %v3818_v50  ;;  %v10244_v32 = vmul.u32.u64.high %v3819_v7, %v3818_v50, %v10243_v12 }
 0x446   : > { %v3810_v52 = vsel %vm3804_vm8, %v3807_v19, %v3809_v29  ;;  %v3829_v2 = vadd.s32 1, %v10226_v40  ;;  %v3982_v24 = vand.u32 2139095040, %v10155_v13  ;;  %v12383_v41 = vsub.s32 4, %v12373_v21 }
 0x447   : > { %v3755_v44 = vsel %vm10190_vm2, %v9836_v22, %v3752_v53  ;;  %v3931_v49 = vadd.s32 %v10162_v11, %v10178_v25  ;;  %v6337_v23 = vmin.u32 %v3941_v30, %v10234_v39  ;;  %v10264_v38 = vsel %vm3877_vm13, %v3961_v16, %v3937_v1 }
 0x448   : > { %v2610_v35 = vsel %vm2525_vm5, %v12383_v41, %v12373_v21  ;;  %v3983_v43 = vshrl.u32 %v3982_v24, 23  ;;  %v12384_v57 = vand.u32 2147483647, %v10155_v13  ;;  %v3826_v29 = vmul.u32 %v3819_v7, %v3810_v52 }
 0x449   : > { %v2612_v14 = vsel %vm9423_vm1, 0, %v2610_v35  ;;  %v3943_v19 = vclz %v6337_v23  ;;  %vm3828_vm5 = vc.u32 %v10244_v32, %v10225_v61  ;;  %v3025_v11 = vsub.s32 4, %v9542_v15 }
 0x44a   : > { %v3986_v21 = vand.u32 8388607, %v12384_v57  ;;  %v2616_v0 = vadd.s32 3, %v2612_v14  ;;  %v3830_v25 = vsel %vm3828_vm5, %v3829_v2, %v10226_v40  ;;  %v6340_v37 = vadd.s32 4294967169, %v3983_v43 }
 0x44b   : > { %v2620_v53 = vxor.u32 2147483648, %v9553_v27  ;;  %6832 = vcosq.f32 %v3755_v44  ;;  %v6338_v1 = vadd.s32 4294967294, %v3943_v19  ;;  %v3831_v16 = vadd.s32 %v3830_v25, %v3826_v29 }
 0x44c   : > { %v2617_v55 = vand.u32 3, %v2616_v0  ;;  %v2623_v50 = vxor.u32 2147483648, %v9545_v45  ;;  %6834 = vsinq.f32 %v3755_v44  ;;  %v3987_v30 = vor.u32 8388608, %v3986_v21 }
 0x44d   : > { %v3989_v12 = vadd.s32 1, %v6340_v37  ;;  %vm6339_vm1 = vcmp.lt.s32.totalorder %v6338_v1, 0  ;;  %v3832_v52 = vadd.s32 536870912, %v3831_v16  ;;  %v3026_v40 = vsel %vm2941_vm14, %v3025_v11, %v9542_v15  ;;  %v10279_v2 = vpop.eup %6828 }
 0x44e   : > { %vm2619_vm8 = vcmp.eq.s32.totalorder %v2617_v55, 0  ;;  %v3946_v24 = vsel %vm6339_vm1, 0, %v6338_v1  ;;  %vm2622_vm3 = vcmp.eq.s32.totalorder %v2617_v55, 2  ;;  %v10288_v57 = vadd.s32 %v10225_v61, %v10244_v32 }
 0x44f   : > { %vm3990_vm11 = vcmp.gt.s32.totalorder %v3989_v12, 0  ;;  %v2621_v41 = vsel %vm2619_vm8, %v9545_v45, %v2620_v53  ;;  %v10282_v35 = vpop.eup %6830  ;;  %v3947_v44 = vsub.s32 32, %v3946_v24  ;;  %v3951_v23 = vsub.s32 4294967266, %v3946_v24 }
 0x450   : > { %v10284_v14 = vshrl.u32 %v3832_v52, 30  ;;  %v2624_v43 = vsel %vm2622_vm3, %v2623_v50, %v9553_v27  ;;  %v3991_v21 = vsel %vm3990_vm11, %v3989_v12, 0  ;;  %vm2618_vm14 = vcmp.lt.s32.totalorder %v2617_v55, 2 }
 0x451   : > { %v3028_v15 = vsel %vm9690_vm15, 0, %v3026_v40  ;;  %v3948_v0 = vshll.u32 %v10234_v39, %v3946_v24  ;;  %v3949_v45 = vshrl.u32 %v3931_v49, %v3947_v44  ;;  %v3952_v19 = vadd.s32 127, %v3951_v23 }
 0x452   : > { %v3834_v29 = vshll.u32 %v10284_v14, 30  ;;  %v3993_v11 = vand.u32 31, %v3991_v21  ;;  %v10294_v25 = vshll.u32 %v3987_v30, 8  ;;  %v10296_v37 = vsel %vm2618_vm14, %v2621_v41, %v2624_v43 }
 0x453   : > { %v3950_v32 = vor.u32 %v3949_v45, %v3948_v0  ;;  %v3953_v61 = vshll.u32 %v3952_v19, 23  ;;  %v3032_v55 = vadd.s32 3, %v3028_v15  ;;  %v3992_v48 = vshrl.u32 %v3991_v21, 5 }
 0x454   : > { %v10299_v53 = vsub.s32 %v3831_v16, %v3834_v29  ;;  %v3994_v1 = vsub.s32 32, %v3993_v11  ;;  %v3996_v39 = vshll.u32 %v12238_v4, %v3993_v11  ;;  %v3999_v49 = vshll.u32 %v12243_v8, %v3993_v11 }
 0x455   : > { %v10303_v50 = vpop.eup %6832  ;;  %v3954_v12 = vor.u32 4788187, %v3953_v61  ;;  %v3957_v30 = vcvt.s32.f32 %v3950_v32  ;;  %v4002_v40 = vshll.u32 %v12235_v42, %v3993_v11  ;;  %v4005_v23 = vshll.u32 %v12236_v47, %v3993_v11 }
 0x456   : > { %v3837_v52 = vsub.s32 0, %v10299_v53  ;;  %v10307_v24 = vpop.eup %6834  ;;  %v3997_v16 = vshrl.u32 %v12243_v8, %v3994_v1  ;;  %v4000_v41 = vshrl.u32 %v12235_v42, %v3994_v1  ;;  %v4003_v44 = vshrl.u32 %v12236_v47, %v3994_v1 }
 0x457   : > { %v3955_v43 = vand.u32 2147483647, %v3954_v12  ;;  %v4006_v15 = vshrl.u32 %v12237_v59, %v3994_v1  ;;  %v4008_v0 = vshll.u32 %v12237_v59, %v3993_v11  ;;  %v4009_v32 = vshrl.u32 %v12247_v17, %v3994_v1  ;;  %v12385_v12 = vld [vmem:[#allocation5_spill] sm:$0xff] }
 0x458   : > { %v6333_v21 = vmin.u32 %v3837_v52, %v10299_v53  ;;  %v3998_v45 = vor.u32 %v3997_v16, %v3996_v39  ;;  %v4001_v19 = vor.u32 %v4000_v41, %v3999_v49  ;;  %v4004_v29 = vor.u32 %v4003_v44, %v4002_v40 }
 0x459   : > { %v4007_v7 = vor.u32 %v4006_v15, %v4005_v23  ;;  %v3033_v27 = vand.u32 3, %v3032_v55  ;;  %v3039_v42 = vxor.u32 2147483648, %v9813_v33  ;;  %v3958_v8 = vmul.f32 %v3957_v30, %v3955_v43 }
 0x45a   : > { %v3839_v61 = vclz %v6333_v21  ;;  %v4010_v22 = vor.u32 %v4009_v32, %v4008_v0  ;;  %vm4011_vm15 = vcmp.lt.s32.totalorder %v3992_v48, 1  ;;  %v2817_v47 = vsub.s32 4, %v12385_v12 }
 0x45b   : > { %vm4013_vm9 = vcmp.lt.s32.totalorder %v3992_v48, 3  ;;  %vm4014_vm12 = vcmp.lt.s32.totalorder %v3992_v48, 4  ;;  %v4019_v11 = vsel %vm4011_vm15, %v3998_v45, %v4001_v19  ;;  %vm2615_vm5 = vweird.f32 %v8960_v9 }
 0x45c   : > { %v6334_v52 = vadd.s32 4294967294, %v3839_v61  ;;  %v3995_v39 = vshrl.u32 %v12238_v4, %v3994_v1  ;;  %v4016_v49 = vsel %vm4014_vm12, %v4004_v29, 2102212464  ;;  %v4020_v40 = vsel %vm4014_vm12, %v4007_v7, 920167782 }
 0x45d   : > { %v4024_v16 = vsel %vm4014_vm12, %v4010_v22, 1326507024  ;;  %vm4012_vm8 = vcmp.lt.s32.totalorder %v3992_v48, 2  ;;  %v4021_v55 = vsel %vm4013_vm9, %v4004_v29, %v4020_v40  ;;  %v4023_v30 = vsel %vm4011_vm15, %v4001_v19, %v4004_v29 }
 0x45e   : > { %vm6335_vm1 = vcmp.lt.s32.totalorder %v6334_v52, 0  ;;  %vm3031_vm11 = vweird.f32 %v9049_v18  ;;  %v4015_v44 = vsel %vm4011_vm15, %v3995_v39, %v3998_v45  ;;  %v4022_v23 = vsel %vm4012_vm8, %v4019_v11, %v4021_v55 }
 0x45f   : > { %v3842_v41 = vsel %vm6335_vm1, 0, %v6334_v52  ;;  %v4025_v43 = vsel %vm4013_vm9, %v4007_v7, %v4024_v16  ;;  %v3959_v21 = vxor.u32 2147483648, %v3958_v8  ;;  %v4017_v22 = vsel %vm4013_vm9, %v4001_v19, %v4016_v49 }
 0x460   : > { %v3843_v1 = vsub.s32 32, %v3842_v41  ;;  %v3847_v15 = vsub.s32 4294967266, %v3842_v41  ;;  %v3844_v0 = vshll.u32 %v10299_v53, %v3842_v41  ;;  %v4026_v32 = vsel %vm4012_vm8, %v4023_v30, %v4025_v43 }
 0x461   : > { %v10332_v29 = vmul.u32.u64.low %v10294_v25, %v4022_v23  ;;  %v10333_v61 = vmul.u32.u64.high %v10294_v25, %v4022_v23, %v10332_v29  ;;  %v10338_v11 = vmul.u32.u64.low %v10294_v25, %v4026_v32  ;;  %v10339_v7 = vmul.u32.u64.high %v10294_v25, %v4026_v32, %v10338_v11  ;;  %v12393_v32 = vld [vmem:[#allocation20_spill] sm:$0xff] }
 0x462   : > { %v3845_v45 = vshrl.u32 %v10288_v57, %v3843_v1  ;;  %v3848_v52 = vadd.s32 127, %v3847_v15  ;;  %v4018_v39 = vsel %vm4012_vm8, %v4015_v44, %v4017_v22  ;;  %vm3034_vm3 = vcmp.lt.s32.totalorder %v3033_v27, 2  ;;  %v12392_v15 = vld [vmem:[#allocation22_spill] sm:$0xff] }
 0x463   : > { %vm3035_vm14 = vcmp.eq.s32.totalorder %v3033_v27, 0  ;;  %vm3038_vm15 = vcmp.eq.s32.totalorder %v3033_v27, 2  ;;  %v12386_v49 = vxor.u32 2147483648, %v9868_v31  ;;  %vm3773_vm9 = vcmp.lt.s32.totalorder %v9907_v20, 0 }
 0x464   : > { %v3846_v53 = vor.u32 %v3845_v45, %v3844_v0  ;;  %v3849_v19 = vshll.u32 %v3848_v52, 23  ;;  %v3040_v16 = vsel %vm3038_vm15, %v3039_v42, %v9868_v31  ;;  %v4037_v57 = vadd.s32 1, %v10333_v61  ;;  %v12394_v45 = vld [vmem:[#allocation7_spill] sm:$0xff] }
 0x465   : > { %v3037_v40 = vsel %vm3035_vm14, %v9813_v33, %v12386_v49  ;;  %v2626_v48 = vsel %vm2615_vm5, nan, %v10296_v37  ;;  %vm12387_vm12 = vcmp.lt.s32.totalorder %v9066_v6, 0  ;;  %v3960_v30 = vsel %vm3877_vm13, %v3959_v21, %v3958_v8  ;;  %v12391_v21 = vld [vmem:[#allocation24_spill] sm:$0xff] }
 0x466   : > { %v3041_v55 = vsel %vm3034_vm3, %v3037_v40, %v3040_v16  ;;  %v2818_v27 = vsel %vm12387_vm12, %v2817_v47, %v12385_v12  ;;  %v12388_v33 = vand.u32 2147483647, %v9907_v20  ;;  %v3850_v31 = vor.u32 4788187, %v3849_v19  ;;  %v12397_v19 = vld [vmem:[#allocation8_spill] sm:$0xff] }
 0x467   : > { %v4034_v41 = vmul.u32 %v10294_v25, %v4018_v39  ;;  %vm4036_vm5 = vc.u32 %v10339_v7, %v10332_v29  ;;  %v3853_v9 = vcvt.s32.f32 %v3846_v53  ;;  %v3042_v47 = vsel %vm3031_vm11, nan, %v3041_v55  ;;  %v12396_v39 = vld [vmem:[#allocation12_spill] sm:$0xff] }
 0x468   : > { %vm10358_vm1 = vcmp.le.f32.partialorder %v12388_v33, 0.7853982  ;;  %v4038_v37 = vsel %vm4036_vm5, %v4037_v57, %v10333_v61  ;;  %v2820_v8 = vsel %vm9476_vm0, 0, %v2818_v27  ;;  %v3851_v12 = vand.u32 2147483647, %v3850_v31  ;;  %v12398_v57 = vld [vmem:[#allocation14_spill] sm:$0xff] }
 0x469   : > { %v4039_v44 = vadd.s32 %v4038_v37, %v4034_v41  ;;  %v6440_v23 = vpack.c.bf16 %v3042_v47, %v2626_v48  ;;  %v2824_v43 = vadd.s32 3, %v2820_v8  ;;  %v10373_v25 = vsel %vm10230_vm10, %v9840_v60, %v3960_v30  ;;  %v12400_v8 = vld [vmem:[#allocation32_spill] sm:$0xff]  ;;  %v12406_v27 = vld [vmem:[#allocation17_spill] sm:$0xff] }
 0x46a   : > { %vm2823_vm13 = vweird.f32 %v9066_v6  ;;  %v2828_v1 = vxor.u32 2147483648, %v12391_v21  ;;  %v3233_v22 = vsub.s32 4, %v12392_v15  ;;  %v3854_v18 = vmul.f32 %v3853_v9, %v3851_v12 }
 0x46b   : > { %v4040_v0 = vadd.s32 536870912, %v4039_v44  ;;  %6441 = vmatprep.subr.bf16.mxu0 %v6440_v23  ;;  %v2825_v62 = vand.u32 3, %v2824_v43  ;;  %v2831_v61 = vxor.u32 2147483648, %v12393_v32  ;;  %vm12395_vm0 = vcmp.lt.s32.totalorder %v12394_v45, 0  ;;  %v12401_v23 = vld [vmem:[#allocation11_spill] sm:$0xff] }
 0x46c   : > { %v3234_v52 = vsel %vm12395_vm0, %v3233_v22, %v12392_v15  ;;  %v3244_v11 = vxor.u32 2147483648, %v10103_v54  ;;  %v2513_v53 = vand.u32 3, %v12396_v39  ;;  %v2516_v49 = vxor.u32 2147483648, %v12397_v19 }
 0x46d   : > { %v3855_v40 = vxor.u32 2147483648, %v3854_v18  ;;  %v10385_v16 = vshrl.u32 %v4040_v0, 30  ;;  %vm2827_vm8 = vcmp.eq.s32.totalorder %v2825_v62, 0  ;;  %vm3239_vm11 = vweird.f32 %v12394_v45 }
 0x46e   : > { %v2519_v48 = vxor.u32 2147483648, %v12398_v57  ;;  %vm2826_vm3 = vcmp.lt.s32.totalorder %v2825_v62, 2  ;;  %v2829_v55 = vsel %vm2827_vm8, %v12393_v32, %v2828_v1  ;;  %vm2830_vm14 = vcmp.eq.s32.totalorder %v2825_v62, 2  ;;  %v12402_v62 = vld [vmem:[#allocation23_spill] sm:$0xff] }
 0x46f   : > { %v3236_v30 = vsel %vm9862_vm7, 0, %v3234_v52  ;;  %v3856_v33 = vsel %vm3773_vm9, %v3855_v40, %v3854_v18  ;;  %v4042_v31 = vshll.u32 %v10385_v16, 30  ;;  %v2832_v41 = vsel %vm2830_vm14, %v2831_v61, %v12391_v21  ;;  %v12403_v52 = vld [vmem:[#allocation27_spill] sm:$0xff] }
 0x470   : > { %v3240_v9 = vadd.s32 3, %v3236_v30  ;;  %v3859_v37 = vsel %vm10358_vm1, %v9907_v20, %v3856_v33  ;;  %v2833_v47 = vsel %vm2826_vm3, %v2829_v55, %v2832_v41  ;;  %v3247_v12 = vxor.u32 2147483648, %v12400_v8  ;;  %v12407_v33 = vld [vmem:[#allocation19_spill] sm:$0xff]  ;;  %v12408_v41 = vld [vmem:[#allocation9_spill] sm:$0xff] }
 0x471   : > { %vm2511_vm15 = vweird.f32 %v12401_v23  ;;  %v10401_v43 = vsub.s32 %v4039_v44, %v4042_v31  ;;  %vm2514_vm7 = vcmp.lt.s32.totalorder %v2513_v53, 2  ;;  %vm2515_vm12 = vcmp.eq.s32.totalorder %v2513_v53, 0 }
 0x472   : > { %v3241_v1 = vand.u32 3, %v3240_v9  ;;  %6836 = vcosq.f32 %v3859_v37  ;;  %v2834_v15 = vsel %vm2823_vm13, nan, %v2833_v47  ;;  %v2517_v21 = vsel %vm2515_vm12, %v12398_v57, %v2516_v49  ;;  %v12404_v57 = vld [vmem:[#allocation13_spill] sm:$0xff] }
 0x473   : > { %vm2518_vm5 = vcmp.eq.s32.totalorder %v2513_v53, 2  ;;  %v4045_v22 = vsub.s32 0, %v10401_v43  ;;  %v2929_v32 = vand.u32 3, %v12402_v62  ;;  %6838 = vsinq.f32 %v3859_v37 }
 0x474   : > { %vm3243_vm0 = vcmp.eq.s32.totalorder %v3241_v1, 0  ;;  %vm3246_vm8 = vcmp.eq.s32.totalorder %v3241_v1, 2  ;;  %v2520_v18 = vsel %vm2518_vm5, %v2519_v48, %v12397_v19  ;;  %vm3242_vm3 = vcmp.lt.s32.totalorder %v3241_v1, 2  ;;  %v12405_v48 = vld [vmem:[#allocation26_spill] sm:$0xff] }
 0x475   : > { %v3245_v44 = vsel %vm3243_vm0, %v12400_v8, %v3244_v11  ;;  %v3248_v0 = vsel %vm3246_vm8, %v3247_v12, %v10103_v54  ;;  %v6341_v6 = vmin.u32 %v4045_v22, %v10401_v43  ;;  %v2932_v39 = vxor.u32 2147483648, %v12403_v52  ;;  %v12409_v8 = vld [vmem:[#allocation25_spill] sm:$0xff] }
 0x476   : > { %v3249_v61 = vsel %vm3242_vm3, %v3245_v44, %v3248_v0  ;;  %v2521_v40 = vsel %vm2514_vm7, %v2517_v21, %v2520_v18  ;;  %vm2927_vm13 = vweird.f32 %v12404_v57  ;;  %vm2931_vm14 = vcmp.eq.s32.totalorder %v2929_v32, 0 }
 0x477   : > { %v3250_v49 = vsel %vm3239_vm11, nan, %v3249_v61  ;;  %v4047_v19 = vclz %v6341_v6  ;;  %v2933_v54 = vsel %vm2931_vm14, %v12405_v48, %v2932_v39  ;;  %v2935_v55 = vxor.u32 2147483648, %v12405_v48  ;;  %v12414_v48 = vld [vmem:[#allocation16_spill] sm:$0xff] }
 0x478   : > { %v6448_v11 = vpack.c.bf16 %v3250_v49, %v2834_v15  ;;  %vm2934_vm12 = vcmp.eq.s32.totalorder %v2929_v32, 2  ;;  %v2721_v30 = vand.u32 3, %v12406_v27  ;;  %v2724_v31 = vxor.u32 2147483648, %v12407_v33  ;;  %v12412_v49 = vld [vmem:[#allocation28_spill] sm:$0xff] }
 0x479   : > { %v2727_v9 = vxor.u32 2147483648, %v12408_v41  ;;  %v6342_v45 = vadd.s32 4294967294, %v4047_v19  ;;  %v2522_v53 = vsel %vm2511_vm15, nan, %v2521_v40  ;;  %vm2930_vm11 = vcmp.lt.s32.totalorder %v2929_v32, 2  ;;  %v12410_v32 = vld [vmem:[#allocation18_spill] sm:$0xff] }
 0x47a   : > { %6449 = vmatprep.subr.bf16.mxu1 %v6448_v11  ;;  %v2936_v37 = vsel %vm2934_vm12, %v2935_v55, %v12403_v52  ;;  %vm2723_vm7 = vcmp.eq.s32.totalorder %v2721_v30, 0  ;;  %vm2726_vm5 = vcmp.eq.s32.totalorder %v2721_v30, 2  ;;  %v3137_v12 = vand.u32 3, %v12409_v8  ;;  %v12411_v52 = vld [vmem:[#allocation29_spill] sm:$0xff] }
 0x47b   : > { %v2937_v47 = vsel %vm2930_vm11, %v2933_v54, %v2936_v37  ;;  %vm6343_vm0 = vcmp.lt.s32.totalorder %v6342_v45, 0  ;;  %v2725_v15 = vsel %vm2723_vm7, %v12408_v41, %v2724_v31  ;;  %v2728_v21 = vsel %vm2726_vm5, %v2727_v9, %v12407_v33 }
 0x47c   : > { %v2938_v1 = vsel %vm2927_vm13, nan, %v2937_v47  ;;  %v10430_v22 = vpop.eup %6836  ;;  %v4035_v23 = vadd.s32 %v10332_v29, %v10339_v7  ;;  %v4050_v18 = vsel %vm6343_vm0, 0, %v6342_v45  ;;  %vm2722_vm15 = vcmp.lt.s32.totalorder %v2721_v30, 2  ;;  %v12413_v29 = vld [vmem:[#allocation31_spill] sm:$0xff] }
 0x47d   : > { %v6442_v44 = vpack.c.bf16 %v2938_v1, %v2522_v53  ;;  %v4051_v0 = vsub.s32 32, %v4050_v18  ;;  %v4055_v62 = vsub.s32 4294967266, %v4050_v18  ;;  %vm2719_vm8 = vweird.f32 %v12410_v32  ;;  %v6839_v57 = vpop.eup %6838 }
 0x47e   : > { %v2729_v6 = vsel %vm2722_vm15, %v2725_v15, %v2728_v21  ;;  %v4052_v61 = vshll.u32 %v10401_v43, %v4050_v18  ;;  %vm3139_vm3 = vcmp.eq.s32.totalorder %v3137_v12, 0  ;;  %v3140_v39 = vxor.u32 2147483648, %v12411_v52 }
 0x47f   : > { %6443 = vmatpush1.bf16.msra.mxu0 %v6442_v44  ;;  %v3143_v40 = vxor.u32 2147483648, %v12412_v49  ;;  %v4053_v19 = vshrl.u32 %v4035_v23, %v4051_v0  ;;  %v4056_v11 = vadd.s32 127, %v4055_v62  ;;  %vm3142_vm13 = vcmp.eq.s32.totalorder %v3137_v12, 2 }
 0x480   : > { %v3441_v7 = vsub.s32 4, %v12413_v29  ;;  %vm3135_vm14 = vweird.f32 %v12414_v48  ;;  %vm3138_vm12 = vcmp.lt.s32.totalorder %v3137_v12, 2  ;;  %v3141_v54 = vsel %vm3139_vm3, %v12412_v49, %v3140_v39 }
 0x481   : > { %v3144_v55 = vsel %vm3142_vm13, %v3143_v40, %v12411_v52  ;;  %v4054_v43 = vor.u32 %v4053_v19, %v4052_v61  ;;  %v4057_v27 = vshll.u32 %v4056_v11, 23  ;;  %vm12415_vm11 = vcmp.lt.s32.totalorder %v9719_v46, 0 }
 0x482   : > { %v3145_v30 = vsel %vm3138_vm12, %v3141_v54, %v3144_v55  ;;  %v3442_v33 = vsel %vm12415_vm11, %v3441_v7, %v12413_v29  ;;  %vm3981_vm7 = vcmp.lt.s32.totalorder %v10155_v13, 0  ;;  %v2730_v31 = vsel %vm2719_vm8, nan, %v2729_v6 }
 0x483   : > { %v3146_v41 = vsel %vm3135_vm14, nan, %v3145_v30  ;;  %v3444_v9 = vsel %vm10068_vm6, 0, %v3442_v33  ;;  %v3857_v45 = vsub.s32 4, %v10284_v14  ;;  %6840 = vsinq.f32 %v10373_v25 }
 0x484   : > { %v12416_v53 = vand.u32 2147483647, %v10155_v13  ;;  %v4058_v47 = vor.u32 4788187, %v4057_v27  ;;  %v6450_v8 = vpack.c.bf16 %v3146_v41, %v2730_v31  ;;  %v3448_v12 = vadd.s32 3, %v3444_v9  ;;  %v12422_v9 = vld [vmem:[#allocation34_spill] sm:$0xff] }
 0x485   : > { %vm3447_vm0 = vweird.f32 %v9719_v46  ;;  %v3452_v1 = vxor.u32 2147483648, %v10143_v58  ;;  %v3455_v56 = vxor.u32 2147483648, %v10141_v10  ;;  %v3858_v15 = vsel %vm3773_vm9, %v3857_v45, %v10284_v14 }
 0x486   : > { %vm10454_vm5 = vcmp.le.f32.partialorder %v12416_v53, 0.7853982  ;;  %v3649_v21 = vsub.s32 4, %v10038_v28  ;;  %v4059_v23 = vand.u32 2147483647, %v4058_v47  ;;  %v4061_v18 = vcvt.s32.f32 %v4054_v43  ;;  %6451 = vmatpush1.bf16.msra.mxu1 %v6450_v8 }
 0x487   : > { %v3449_v44 = vand.u32 3, %v3448_v12  ;;  %v3860_v0 = vsel %vm10358_vm1, 0, %v3858_v15  ;;  %vm3863_vm6 = vweird.f32 %v9907_v20  ;;  %v3868_v32 = vxor.u32 2147483648, %v6839_v57 }
 0x488   : > { %v3864_v62 = vadd.s32 3, %v3860_v0  ;;  %vm12419_vm15 = vcmp.lt.s32.totalorder %v9804_v5, 0  ;;  %v4062_v61 = vmul.f32 %v4061_v18, %v4059_v23  ;;  %v3871_v14 = vxor.u32 2147483648, %v10430_v22 }
 0x489   : > { %v3650_v6 = vsel %vm12419_vm15, %v3649_v21, %v10038_v28  ;;  %vm3451_vm8 = vcmp.eq.s32.totalorder %v3449_v44, 0  ;;  %vm3454_vm9 = vcmp.eq.s32.totalorder %v3449_v44, 2  ;;  %vm3450_vm1 = vcmp.lt.s32.totalorder %v3449_v44, 2  ;;  %v12425_v21 = vld [vmem:[#allocation36_spill] sm:$0xff]  ;;  %v12426_v44 = vld [vmem:[#allocation30_spill] sm:$0xff] }
 0x48a   : > { %v3453_v52 = vsel %vm3451_vm8, %v10141_v10, %v3452_v1  ;;  %v3456_v39 = vsel %vm3454_vm9, %v3455_v56, %v10143_v58  ;;  %v3865_v49 = vand.u32 3, %v3864_v62  ;;  %v3652_v42 = vsel %vm10168_vm4, 0, %v3650_v6  ;;  %v12424_v56 = vld [vmem:[#allocation33_spill] sm:$0xff]  ;;  %v12427_v62 = vld [vmem:[#allocation35_spill] sm:$0xff] }
 0x48b   : > { %v4063_v40 = vxor.u32 2147483648, %v4062_v61  ;;  %v3656_v19 = vadd.s32 3, %v3652_v42  ;;  %v4065_v11 = vsub.s32 4, %v10385_v16  ;;  %v3457_v29 = vsel %vm3450_vm1, %v3453_v52, %v3456_v39 }
 0x48c   : > { %vm3866_vm3 = vcmp.lt.s32.totalorder %v3865_v49, 2  ;;  %vm3867_vm13 = vcmp.eq.s32.totalorder %v3865_v49, 0  ;;  %vm3870_vm14 = vcmp.eq.s32.totalorder %v3865_v49, 2  ;;  %v3660_v54 = vxor.u32 2147483648, %v10282_v35 }
 0x48d   : > { %v4064_v28 = vsel %vm3981_vm7, %v4063_v40, %v4062_v61  ;;  %v3869_v10 = vsel %vm3867_vm13, %v10430_v22, %v3868_v32  ;;  %v3872_v7 = vsel %vm3870_vm14, %v3871_v14, %v6839_v57  ;;  %v3657_v58 = vand.u32 3, %v3656_v19  ;;  %v10487_v43 = vpop.eup %6840 }
 0x48e   : > { %v4067_v3 = vsel %vm10454_vm5, %v10155_v13, %v4064_v28  ;;  %v3873_v48 = vsel %vm3866_vm3, %v3869_v10, %v3872_v7  ;;  %v4066_v55 = vsel %vm3981_vm7, %v4065_v11, %v10385_v16  ;;  %v3458_v27 = vsel %vm3447_vm0, nan, %v3457_v29  ;;  %v4083_v10 = vld [vmem:[%s12073_s5] sm:$0xff] }
 0x48f   : > { %6842 = vcosq.f32 %v4067_v3  ;;  %v3874_v22 = vsel %vm3863_vm6, nan, %v3873_v48  ;;  %v3663_v57 = vxor.u32 2147483648, %v10279_v2  ;;  %v12420_v30 = vsel %vm10190_vm2, 0, %v10211_v34 }
 0x490   : > { %v3760_v33 = vadd.s32 3, %v12420_v30  ;;  %v12421_v16 = vsel %vm10230_vm10, 0, %v10264_v38  ;;  %6844 = vsinq.f32 %v4067_v3  ;;  %v6444_v41 = vpack.c.bf16 %v3874_v22, %v3458_v27  ;;  %v12429_v27 = vld [vmem:[#allocation21_spill] sm:$0xff] }
 0x491   : > { %v3968_v31 = vadd.s32 3, %v12421_v16  ;;  %6846 = vcosq.f32 %v10373_v25  ;;  %vm3659_vm4 = vcmp.eq.s32.totalorder %v3657_v58, 0  ;;  %v4068_v46 = vsel %vm10454_vm5, 0, %v4066_v55 }
 0x492   : > { %v3345_v20 = vand.u32 3, %v10093_v63  ;;  %6445 = vmatprep.subr.bf16.mxu0 %v6444_v41  ;;  %vm3662_vm12 = vcmp.eq.s32.totalorder %v3657_v58, 2  ;;  %v4072_v36 = vadd.s32 3, %v4068_v46  ;;  %v3348_v34 = vxor.u32 2147483648, %v10126_v26 }
 0x493   : > { %v3351_v51 = vxor.u32 2147483648, %v12422_v9  ;;  %v3661_v38 = vsel %vm3659_vm4, %v10279_v2, %v3660_v54  ;;  %v3664_v45 = vsel %vm3662_vm12, %v3663_v57, %v10282_v35  ;;  %vm3655_vm11 = vweird.f32 %v9804_v5  ;;  %v12423_v2 = vld [vmem:[#allocation15_spill] sm:$0xff] }
 0x494   : > { %vm3347_vm10 = vcmp.eq.s32.totalorder %v3345_v20, 0  ;;  %vm3350_vm2 = vcmp.eq.s32.totalorder %v3345_v20, 2  ;;  %vm3658_vm7 = vcmp.lt.s32.totalorder %v3657_v58, 2  ;;  %v4073_v53 = vand.u32 3, %v4072_v36 }
 0x495   : > { %v3349_v25 = vsel %vm3347_vm10, %v12422_v9, %v3348_v34  ;;  %v3352_v63 = vsel %vm3350_vm2, %v3351_v51, %v10126_v26  ;;  %v3761_v37 = vand.u32 3, %v3760_v33  ;;  %v3764_v47 = vxor.u32 2147483648, %v10307_v24 }
 0x496   : > { %v3767_v8 = vxor.u32 2147483648, %v10303_v50  ;;  %v3665_v12 = vsel %vm3658_vm7, %v3661_v38, %v3664_v45  ;;  %vm4071_vm5 = vweird.f32 %v10155_v13  ;;  %vm3343_vm0 = vweird.f32 %v12423_v2  ;;  %v4084_v13 = vld [vmem:[%s12073_s5 + $0x8] sm:$0xff] }
 0x497   : > { %vm3346_vm6 = vcmp.lt.s32.totalorder %v3345_v20, 2  ;;  %vm3762_vm15 = vcmp.lt.s32.totalorder %v3761_v37, 2  ;;  %vm3763_vm8 = vcmp.eq.s32.totalorder %v3761_v37, 0  ;;  %vm3766_vm9 = vcmp.eq.s32.totalorder %v3761_v37, 2 }
 0x498   : > { %v3353_v35 = vsel %vm3346_vm6, %v3349_v25, %v3352_v63  ;;  %v3765_v1 = vsel %vm3763_vm8, %v10303_v50, %v3764_v47  ;;  %v3768_v26 = vsel %vm3766_vm9, %v3767_v8, %v10307_v24  ;;  %v3553_v15 = vand.u32 3, %v12424_v56 }
 0x499   : > { %v3556_v23 = vxor.u32 2147483648, %v12425_v21  ;;  %v6843_v18 = vpop.eup %6842  ;;  %vm4078_vm1 = vcmp.eq.s32.totalorder %v4073_v53, 2  ;;  %vm3759_vm3 = vweird.f32 %v12426_v44  ;;  %v3769_v0 = vsel %vm3762_vm15, %v3765_v1, %v3768_v26 }
 0x49a   : > { %v3559_v32 = vxor.u32 2147483648, %v12427_v62  ;;  %v6845_v6 = vpop.eup %6844  ;;  %v4079_v61 = vxor.u32 2147483648, %v6843_v18  ;;  %v3354_v14 = vsel %vm3343_vm0, nan, %v3353_v35  ;;  %v3770_v52 = vsel %vm3759_vm3, nan, %v3769_v0 }
 0x49b   : > { %v3969_v50 = vand.u32 3, %v3968_v31  ;;  %v6847_v39 = vpop.eup %6846  ;;  %v4076_v24 = vxor.u32 2147483648, %v6845_v6  ;;  %v6446_v49 = vpack.c.bf16 %v3770_v52, %v3354_v14  ;;  %vm3555_vm13 = vcmp.eq.s32.totalorder %v3553_v15, 0  ;;  %v10563_v31 = vpop.permute.xlu0 %4093 }
 0x49c   : > { %vm3558_vm14 = vcmp.eq.s32.totalorder %v3553_v15, 2  ;;  %vm4075_vm4 = vcmp.eq.s32.totalorder %v4073_v53, 0  ;;  %v4080_v42 = vsel %vm4078_vm1, %v4079_v61, %v6845_v6  ;;  %v3557_v40 = vsel %vm3555_vm13, %v12427_v62, %v3556_v23 }
 0x49d   : > { %v3560_v19 = vsel %vm3558_vm14, %v3559_v32, %v12425_v21  ;;  %v3666_v11 = vsel %vm3655_vm11, nan, %v3665_v12  ;;  %vm4074_vm12 = vcmp.lt.s32.totalorder %v4073_v53, 2  ;;  %v4077_v29 = vsel %vm4075_vm4, %v6843_v18, %v4076_v24  ;;  %6447 = vmatpush1.bf16.msra.mxu0 %v6446_v49 }
 0x49e   : > { %v3972_v28 = vxor.u32 2147483648, %v10487_v43  ;;  %v4081_v7 = vsel %vm4074_vm12, %v4077_v29, %v4080_v42  ;;  %vm3554_vm10 = vcmp.lt.s32.totalorder %v3553_v15, 2  ;;  %vm3971_vm2 = vcmp.eq.s32.totalorder %v3969_v50, 0 }
 0x49f   : > { %v3975_v58 = vxor.u32 2147483648, %v6847_v39  ;;  %v4082_v3 = vsel %vm4071_vm5, nan, %v4081_v7  ;;  %v3561_v48 = vsel %vm3554_vm10, %v3557_v40, %v3560_v19  ;;  %vm3974_vm7 = vcmp.eq.s32.totalorder %v3969_v50, 2 }
 0x4a0   : > { %v3973_v54 = vsel %vm3971_vm2, %v6847_v39, %v3972_v28  ;;  %v6452_v5 = vpack.c.bf16 %v4082_v3, %v3666_v11  ;;  %vm3970_vm11 = vcmp.lt.s32.totalorder %v3969_v50, 2  ;;  %vm12428_vm0 = vcmask 261120  }
 0x4a1   : > { %v3976_v55 = vsel %vm3974_vm7, %v3975_v58, %v10487_v43  ;;  %6344 = vmatmul.mubr.msk.f32.vlgmr.msra.gmra.mrb[8].mxu0 %vm12428_vm0, %v4083_v10  ;;  %vm3551_vm6 = vweird.f32 %v12429_v27  ;;  %vm3967_vm15 = vweird.f32 %v9840_v60  ;;  %v12430_v57 = vmov 0.0   ;;  %vm12431_vm5 = vmmov %vm12428_vm0  ;;  %v4085_v60 = vld [vmem:[%s12073_s5 + $0x10] sm:$0xff]  ;;  %v4086_v43 = vld [vmem:[%s12073_s5 + $0x18] sm:$0xff] }
 0x4a2   : > { %v3977_v22 = vsel %vm3970_vm11, %v3973_v54, %v3976_v55  ;;  %4193 = vmatprep.mubr.f32.mxu0 %v12430_v57  ;;  %6453 = vmatprep.subr.bf16.mxu1 %v6452_v5  ;;  %v3562_v30 = vsel %vm3551_vm6, nan, %v3561_v48  ;;  %vm12432_vm8 = vmmov %vm12428_vm0  ;;  %v12440_v49 = vmov 2475754826   ;;  %v12441_v40 = vmov 2131351028  }
 0x4a3   : > { %v3978_v33 = vsel %vm3967_vm15, nan, %v3977_v22  ;;  %vm12433_vm9 = vmmov %vm12428_vm0  ;;  %v12442_v11 = vmov 2102212464  }
 0x4a4   : > { %v6454_v16 = vpack.c.bf16 %v3978_v33, %v3562_v30  ;;  %vm12434_vm1 = vmmov %vm12428_vm0 }
 0x4a5   : > { %6345 = vmatmul.mubr.msk.f32.gmra.mrb[10].mxu0 %vm12431_vm5, %v4084_v13  ;;  %vm12435_vm3 = vmmov %vm12428_vm0 }
 0x4a6   : > { %6455 = vmatpush1.bf16.msra.mxu1 %v6454_v16  ;;  %4199 = vmatprep.mubr.f32.mxu0 %v12430_v57  ;;  %vm12436_vm13 = vmmov %vm12428_vm0 }
 0x4a7   : > { %vm12437_vm14 = vmmov %vm12428_vm0 }
 0x4a9   : > { %6348 = vmatmul.mubr.msk.f32.vlgmr.msra.gmra.mrb[8].mxu1 %vm12432_vm8, %v4083_v10  ;;  %6346 = vmatmul.mubr.msk.f32.gmra.mrb[12].mxu0 %vm12433_vm9, %v4085_v60 }
 0x4aa   : > { %4282 = vmatprep.mubr.f32.mxu1 %v12430_v57  ;;  %4205 = vmatprep.mubr.f32.mxu0 %v12430_v57 }
 0x4ad   : > { %6349 = vmatmul.mubr.msk.f32.gmra.mrb[10].mxu1 %vm12434_vm1, %v4084_v13  ;;  %6347 = vmatmul.mubr.msk.f32.gmra.mrb[14].mxu0 %vm12435_vm3, %v4086_v43 }
 0x4ae   : > { %4288 = vmatprep.mubr.f32.mxu1 %v12430_v57  ;;  %6039 = vmatprep.mubr.f32.mxu0 %v12430_v57 }
 0x4b1   : > { %6350 = vmatmul.mubr.msk.f32.gmra.mrb[12].mxu1 %vm12436_vm13, %v4085_v60 }
 0x4b2   : > { %4294 = vmatprep.mubr.f32.mxu1 %v12430_v57 }
 0x4b5   : > { %6351 = vmatmul.mubr.msk.f32.gmra.mrb[14].mxu1 %vm12437_vm14, %v4086_v43 }
 0x4b6   : > { %6110 = vmatprep.mubr.f32.mxu1 %v12430_v57 }
 0x574   : > { %v4189_v41 = vpop.f32.mrb[8].mxu0 }
 0x575   : > { %v10566_v46 = vadd.f32 %v4189_v41, %v10563_v31  ;;  %v4191_v20 = vpop.f32.mrb[9].mxu0 }
 0x576   : > { %v10569_v36 = vadd.f32 %v4191_v20, %v10563_v31 }
 0x577   : > { %12438 = vst [vmem:[#allocation6_spill] sm:$0xff] %v10566_v46  ;;  %v4301_v34 = vand.u32 2147483647, %v10566_v46  ;;  %v4304_v9 = vand.u32 2139095040, %v10566_v46 }
 0x578   : > { %v4408_v51 = vand.u32 2139095040, %v10569_v36  ;;  %v10574_v38 = vpop.f32.mrb[10].mxu0  ;;  %v4405_v53 = vand.u32 2147483647, %v10569_v36 }
 0x579   : > { %v4305_v45 = vshrl.u32 %v4304_v9, 23  ;;  %v10576_v25 = vpop.f32.mrb[11].mxu0  ;;  %v4308_v63 = vand.u32 8388607, %v4301_v34 }
 0x57a   : > { %v4409_v37 = vshrl.u32 %v4408_v51, 23  ;;  %v4412_v56 = vand.u32 8388607, %v4405_v53 }
 0x57b   : > { %v6352_v47 = vadd.s32 4294967169, %v4305_v45  ;;  %v4309_v26 = vor.u32 8388608, %v4308_v63 }
 0x57c   : > { %v4278_v8 = vpop.f32.mrb[8].mxu1  ;;  %v6356_v12 = vadd.s32 4294967169, %v4409_v37  ;;  %v4413_v61 = vor.u32 8388608, %v4412_v56  ;;  %v10609_v5 = vpop.f32.mrb[12].mxu0 }
 0x57d   : > { %v4311_v2 = vadd.s32 1, %v6352_v47  ;;  %v10582_v35 = vadd.f32 %v4278_v8, %v10563_v31  ;;  %v10584_v1 = vpop.f32.mrb[9].mxu1  ;;  %v10594_v6 = vshll.u32 %v4309_v26, 8 }
 0x57e   : > { %v4415_v15 = vadd.s32 1, %v6356_v12 }
 0x57f   : > { %12439 = vst [vmem:[#allocation5_spill] sm:$0xff] %v10582_v35  ;;  %vm4312_vm4 = vcmp.gt.s32.totalorder %v4311_v2, 0  ;;  %v4509_v21 = vand.u32 2147483647, %v10582_v35  ;;  %v4512_v23 = vand.u32 2139095040, %v10582_v35 }
 0x580   : > { %v4313_v18 = vsel %vm4312_vm4, %v4311_v2, 0  ;;  %vm4416_vm12 = vcmp.gt.s32.totalorder %v4415_v15, 0  ;;  %v10590_v44 = vpop.f32.mrb[10].mxu1 }
 0x581   : > { %v4315_v0 = vand.u32 31, %v4313_v18  ;;  %v10592_v62 = vpop.f32.mrb[11].mxu1  ;;  %v4314_v32 = vshrl.u32 %v4313_v18, 5  ;;  %v4513_v52 = vshrl.u32 %v4512_v23, 23  ;;  %v4516_v50 = vand.u32 8388607, %v4509_v21  ;;  %v10620_v23 = vpop.permute.xlu1 %4098 }
 0x582   : > { %v4417_v39 = vsel %vm4416_vm12, %v4415_v15, 0 }
 0x583   : > { %v4316_v14 = vsub.s32 32, %v4315_v0  ;;  %v4318_v24 = vshll.u32 %v12238_v4, %v4315_v0  ;;  %v4321_v42 = vshll.u32 %v12440_v49, %v4315_v0  ;;  %v4324_v19 = vshll.u32 %v12441_v40, %v4315_v0 }
 0x584   : > { %v4327_v29 = vshll.u32 %v12442_v11, %v4315_v0  ;;  %v4330_v58 = vshll.u32 %v12237_v59, %v4315_v0  ;;  %vm4333_vm10 = vcmp.lt.s32.totalorder %v4314_v32, 1  ;;  %v6360_v57 = vadd.s32 4294967169, %v4513_v52 }
 0x585   : > { %v4319_v28 = vshrl.u32 %v12440_v49, %v4316_v14  ;;  %v4322_v10 = vshrl.u32 %v12441_v40, %v4316_v14  ;;  %v4325_v7 = vshrl.u32 %v12442_v11, %v4316_v14  ;;  %v4317_v3 = vshrl.u32 %v12238_v4, %v4316_v14 }
 0x586   : > { %v4328_v48 = vshrl.u32 %v12237_v59, %v4316_v14  ;;  %v4331_v54 = vshrl.u32 %v12247_v17, %v4316_v14  ;;  %vm4335_vm2 = vcmp.lt.s32.totalorder %v4314_v32, 3  ;;  %vm4336_vm7 = vcmp.lt.s32.totalorder %v4314_v32, 4 }
 0x587   : > { %v4320_v55 = vor.u32 %v4319_v28, %v4318_v24  ;;  %v4323_v27 = vor.u32 %v4322_v10, %v4321_v42  ;;  %v4326_v22 = vor.u32 %v4325_v7, %v4324_v19  ;;  %v4519_v51 = vadd.s32 1, %v6360_v57 }
 0x588   : > { %v4329_v13 = vor.u32 %v4328_v48, %v4327_v29  ;;  %v4332_v30 = vor.u32 %v4331_v54, %v4330_v58  ;;  %vm4334_vm11 = vcmp.lt.s32.totalorder %v4314_v32, 2  ;;  %v4517_v37 = vor.u32 8388608, %v4516_v50 }
 0x589   : > { %v4337_v33 = vsel %vm4333_vm10, %v4317_v3, %v4320_v55  ;;  %v4338_v16 = vsel %vm4336_vm7, %v4326_v22, 2102212464  ;;  %v4341_v60 = vsel %vm4333_vm10, %v4320_v55, %v4323_v27  ;;  %v4345_v43 = vsel %vm4333_vm10, %v4323_v27, %v4326_v22 }
 0x58a   : > { %v4339_v41 = vsel %vm4335_vm2, %v4323_v27, %v4338_v16  ;;  %v4342_v20 = vsel %vm4336_vm7, %v4329_v13, 920167782  ;;  %v4346_v9 = vsel %vm4336_vm7, %v4332_v30, 1326507024  ;;  %vm4520_vm0 = vcmp.gt.s32.totalorder %v4519_v51, 0 }
 0x58b   : > { %v4343_v45 = vsel %vm4335_vm2, %v4326_v22, %v4342_v20  ;;  %v4347_v63 = vsel %vm4335_vm2, %v4329_v13, %v4346_v9  ;;  %v4340_v47 = vsel %vm4334_vm11, %v4337_v33, %v4339_v41  ;;  %v4521_v18 = vsel %vm4520_vm0, %v4519_v51, 0 }
 0x58c   : > { %v4344_v8 = vsel %vm4334_vm11, %v4341_v60, %v4343_v45  ;;  %v4348_v12 = vsel %vm4334_vm11, %v4345_v43, %v4347_v63  ;;  %v10622_v0 = vand.u32 31, %v4417_v39  ;;  %v4523_v32 = vand.u32 31, %v4521_v18  ;;  %v10657_v60 = vpop.f32.mrb[12].mxu1 }
 0x58d   : > { %v10612_v2 = vmul.u32.u64.low %v10594_v6, %v4348_v12  ;;  %v10613_v26 = vmul.u32.u64.high %v10594_v6, %v4348_v12, %v10612_v2  ;;  %v10616_v56 = vmul.u32.u64.low %v10594_v6, %v4344_v8  ;;  %v10617_v15 = vmul.u32.u64.high %v10594_v6, %v4344_v8, %v10616_v56 }
 0x58e   : > { %v10624_v14 = vshll.u32 %v4413_v61, 8  ;;  %v10628_v52 = vadd.f32 %v10584_v1, %v10563_v31  ;;  %v10632_v50 = vadd.f32 %v10574_v38, %v10620_v23  ;;  %v4356_v24 = vmul.u32 %v10594_v6, %v4340_v47 }
 0x58f   : > { %v4522_v42 = vshrl.u32 %v4521_v18, 5  ;;  %v10635_v19 = vshll.u32 %v4517_v37, 8  ;;  %v10637_v29 = vshrl.u32 %v4417_v39, 5  ;;  %vm4358_vm6 = vc.u32 %v10613_v26, %v10616_v56 }
 0x590   : > { %12443 = vst [vmem:[#allocation24_spill] sm:$0xff] %v10628_v52  ;;  %12444 = vst [vmem:[#allocation22_spill] sm:$0xff] %v10632_v50  ;;  %v4359_v61 = vadd.s32 1, %v10617_v15  ;;  %v4524_v28 = vsub.s32 32, %v4523_v32  ;;  %v10643_v31 = vsub.s32 32, %v10622_v0  ;;  %v4526_v1 = vshll.u32 %v12238_v4, %v4523_v32 }
 0x591   : > { %v4529_v38 = vshll.u32 %v12440_v49, %v4523_v32  ;;  %v4532_v6 = vshll.u32 %v12441_v40, %v4523_v32  ;;  %v4535_v10 = vshll.u32 %v12442_v11, %v4523_v32  ;;  %v4538_v27 = vshll.u32 %v12237_v59, %v4523_v32 }
 0x592   : > { %v4360_v39 = vsel %vm4358_vm6, %v4359_v61, %v10617_v15  ;;  %v4525_v7 = vshrl.u32 %v12238_v4, %v4524_v28  ;;  %v4527_v58 = vshrl.u32 %v12440_v49, %v4524_v28  ;;  %v4530_v3 = vshrl.u32 %v12441_v40, %v4524_v28 }
 0x593   : > { %v4361_v48 = vadd.s32 %v4360_v39, %v4356_v24  ;;  %v4533_v54 = vshrl.u32 %v12442_v11, %v4524_v28  ;;  %v4536_v55 = vshrl.u32 %v12237_v59, %v4524_v28  ;;  %v4539_v13 = vshrl.u32 %v12247_v17, %v4524_v28 }
 0x594   : > { %v4528_v22 = vor.u32 %v4527_v58, %v4526_v1  ;;  %v4531_v57 = vor.u32 %v4530_v3, %v4529_v38  ;;  %vm4541_vm15 = vcmp.lt.s32.totalorder %v4522_v42, 1  ;;  %vm4542_vm5 = vcmp.lt.s32.totalorder %v4522_v42, 2 }
 0x595   : > { %v4362_v30 = vadd.s32 536870912, %v4361_v48  ;;  %v4534_v33 = vor.u32 %v4533_v54, %v4532_v6  ;;  %v4537_v16 = vor.u32 %v4536_v55, %v4535_v10  ;;  %v4540_v43 = vor.u32 %v4539_v13, %v4538_v27 }
 0x596   : > { %vm4543_vm8 = vcmp.lt.s32.totalorder %v4522_v42, 3  ;;  %vm4544_vm9 = vcmp.lt.s32.totalorder %v4522_v42, 4  ;;  %v4545_v41 = vsel %vm4541_vm15, %v4525_v7, %v4528_v22  ;;  %v4549_v51 = vsel %vm4541_vm15, %v4528_v22, %v4531_v57 }
 0x597   : > { %v10660_v20 = vshrl.u32 %v4362_v30, 30  ;;  %v4546_v9 = vsel %vm4544_vm9, %v4534_v33, 2102212464  ;;  %v4550_v45 = vsel %vm4544_vm9, %v4537_v16, 920167782  ;;  %v4553_v47 = vsel %vm4541_vm15, %v4531_v57, %v4534_v33 }
 0x598   : > { %v4547_v63 = vsel %vm4543_vm8, %v4531_v57, %v4546_v9  ;;  %v4551_v37 = vsel %vm4543_vm8, %v4534_v33, %v4550_v45  ;;  %v4554_v8 = vsel %vm4544_vm9, %v4540_v43, 1326507024  ;;  %v12175_v15 = vand.u32 2147483647, %v10628_v52 }
 0x599   : > { %v4364_v12 = vshll.u32 %v10660_v20, 30  ;;  %v4552_v2 = vsel %vm4542_vm5, %v4549_v51, %v4551_v37  ;;  %v4616_v18 = vand.u32 2139095040, %v10628_v52  ;;  %v4555_v32 = vsel %vm4543_vm8, %v4537_v16, %v4554_v8 }
 0x59a   : > { %v10669_v24 = vmul.u32.u64.low %v10635_v19, %v4552_v2  ;;  %v10670_v61 = vmul.u32.u64.high %v10635_v19, %v4552_v2, %v10669_v24  ;;  %vm4437_vm1 = vcmp.lt.s32.totalorder %v10637_v29, 1  ;;  %v4548_v1 = vsel %vm4542_vm5, %v4545_v41, %v4547_v63 }
 0x59b   : > { %v10674_v28 = vsub.s32 %v4361_v48, %v4364_v12  ;;  %v4556_v38 = vsel %vm4542_vm5, %v4553_v47, %v4555_v32  ;;  %v4422_v6 = vshll.u32 %v12238_v4, %v10622_v0  ;;  %v4423_v7 = vshrl.u32 %v12440_v49, %v10643_v31 }
 0x59c   : > { %v10681_v10 = vmul.u32.u64.low %v10635_v19, %v4556_v38  ;;  %v10682_v39 = vmul.u32.u64.high %v10635_v19, %v4556_v38, %v10681_v10  ;;  %v4425_v58 = vshll.u32 %v12440_v49, %v10622_v0  ;;  %v4426_v48 = vshrl.u32 %v12441_v40, %v10643_v31 }
 0x59d   : > { %v4367_v3 = vsub.s32 0, %v10674_v28  ;;  %v4428_v42 = vshll.u32 %v12441_v40, %v10622_v0  ;;  %v4429_v54 = vshrl.u32 %v12442_v11, %v10643_v31  ;;  %v4564_v55 = vmul.u32 %v10635_v19, %v4548_v1 }
 0x59e   : > { %v4567_v27 = vadd.s32 1, %v10670_v61  ;;  %v4431_v22 = vshll.u32 %v12442_v11, %v10622_v0  ;;  %v4432_v57 = vshrl.u32 %v12237_v59, %v10643_v31  ;;  %v4424_v30 = vor.u32 %v4423_v7, %v4422_v6 }
 0x59f   : > { %v6353_v13 = vmin.u32 %v4367_v3, %v10674_v28  ;;  %v4427_v33 = vor.u32 %v4426_v48, %v4425_v58  ;;  %v4430_v16 = vor.u32 %v4429_v54, %v4428_v42  ;;  %vm4566_vm3 = vc.u32 %v10682_v39, %v10669_v24 }
 0x5a0   : > { %v4433_v43 = vor.u32 %v4432_v57, %v4431_v22  ;;  %v4434_v19 = vshll.u32 %v12237_v59, %v10622_v0  ;;  %v4435_v41 = vshrl.u32 %v12247_v17, %v10643_v31  ;;  %v4568_v51 = vsel %vm4566_vm3, %v4567_v27, %v10670_v61 }
 0x5a1   : > { %v4369_v9 = vclz %v6353_v13  ;;  %vm4438_vm13 = vcmp.lt.s32.totalorder %v10637_v29, 2  ;;  %vm4439_vm14 = vcmp.lt.s32.totalorder %v10637_v29, 3  ;;  %v4357_v45 = vadd.s32 %v10616_v56, %v10613_v26 }
 0x5a2   : > { %v4569_v63 = vadd.s32 %v4568_v51, %v4564_v55  ;;  %v4436_v37 = vor.u32 %v4435_v41, %v4434_v19  ;;  %vm4440_vm4 = vcmp.lt.s32.totalorder %v10637_v29, 4  ;;  %v4445_v0 = vsel %vm4437_vm1, %v4424_v30, %v4427_v33 }
 0x5a3   : > { %v6354_v47 = vadd.s32 4294967294, %v4369_v9  ;;  %v4446_v8 = vsel %vm4440_vm4, %v4433_v43, 920167782  ;;  %v4449_v12 = vsel %vm4437_vm1, %v4427_v33, %v4430_v16  ;;  %v4421_v32 = vshrl.u32 %v12238_v4, %v10643_v31 }
 0x5a4   : > { %v4570_v2 = vadd.s32 536870912, %v4569_v63  ;;  %v4447_v61 = vsel %vm4439_vm14, %v4430_v16, %v4446_v8  ;;  %v4450_v26 = vsel %vm4440_vm4, %v4436_v37, 1326507024  ;;  %v4442_v56 = vsel %vm4440_vm4, %v4430_v16, 2102212464 }
 0x5a5   : > { %vm6355_vm12 = vcmp.lt.s32.totalorder %v6354_v47, 0  ;;  %v4451_v1 = vsel %vm4439_vm14, %v4433_v43, %v4450_v26  ;;  %v4617_v38 = vshrl.u32 %v4616_v18, 23  ;;  %v4448_v7 = vsel %vm4438_vm13, %v4445_v0, %v4447_v61 }
 0x5a6   : > { %v4372_v6 = vsel %vm6355_vm12, 0, %v6354_v47  ;;  %v10724_v10 = vshrl.u32 %v4570_v2, 30  ;;  %v4452_v58 = vsel %vm4438_vm13, %v4449_v12, %v4451_v1  ;;  %v4441_v48 = vsel %vm4437_vm1, %v4421_v32, %v4424_v30  ;;  %v10759_v2 = vpop.f32.mrb[13].mxu0 }
 0x5a7   : > { %v4373_v31 = vsub.s32 32, %v4372_v6  ;;  %v4377_v3 = vsub.s32 4294967266, %v4372_v6  ;;  %v6364_v42 = vadd.s32 4294967169, %v4617_v38  ;;  %v4443_v18 = vsel %vm4439_vm14, %v4427_v33, %v4442_v56 }
 0x5a8   : > { %v4572_v54 = vshll.u32 %v10724_v10, 30  ;;  %v10736_v55 = vmul.u32.u64.low %v10624_v14, %v4452_v58  ;;  %v10737_v27 = vmul.u32.u64.high %v10624_v14, %v4452_v58, %v10736_v55  ;;  %v4720_v16 = vand.u32 2139095040, %v10632_v50 }
 0x5a9   : > { %v4378_v22 = vadd.s32 127, %v4377_v3  ;;  %v10740_v57 = vmul.u32.u64.low %v10624_v14, %v4448_v7  ;;  %v10741_v13 = vmul.u32.u64.high %v10624_v14, %v4448_v7, %v10740_v57  ;;  %v4375_v43 = vshrl.u32 %v4357_v45, %v4373_v31 }
 0x5aa   : > { %v10745_v30 = vsub.s32 %v4569_v63, %v4572_v54  ;;  %v4623_v19 = vadd.s32 1, %v6364_v42  ;;  %v4444_v33 = vsel %vm4438_vm13, %v4441_v48, %v4443_v18  ;;  %v4620_v9 = vand.u32 8388607, %v12175_v15 }
 0x5ab   : > { %v4379_v41 = vshll.u32 %v4378_v22, 23  ;;  %v4374_v51 = vshll.u32 %v10674_v28, %v4372_v6  ;;  %vm4462_vm10 = vc.u32 %v10737_v27, %v10740_v57  ;;  %v4463_v47 = vadd.s32 1, %v10741_v13 }
 0x5ac   : > { %v4575_v37 = vsub.s32 0, %v10745_v30  ;;  %vm4624_vm2 = vcmp.gt.s32.totalorder %v4623_v19, 0  ;;  %v4717_v45 = vand.u32 2147483647, %v10632_v50  ;;  %v4721_v63 = vshrl.u32 %v4720_v16, 23 }
 0x5ad   : > { %v4376_v0 = vor.u32 %v4375_v43, %v4374_v51  ;;  %v4460_v8 = vmul.u32 %v10624_v14, %v4444_v33  ;;  %v4625_v12 = vsel %vm4624_vm2, %v4623_v19, 0  ;;  %v4380_v28 = vor.u32 4788187, %v4379_v41 }
 0x5ae   : > { %v6361_v29 = vmin.u32 %v4575_v37, %v10745_v30  ;;  %v4464_v32 = vsel %vm4462_vm10, %v4463_v47, %v10741_v13  ;;  %v4621_v61 = vor.u32 8388608, %v4620_v9  ;;  %v4627_v26 = vand.u32 31, %v4625_v12 }
 0x5af   : > { %v4465_v1 = vadd.s32 %v4464_v32, %v4460_v8  ;;  %v4565_v38 = vadd.s32 %v10669_v24, %v10682_v39  ;;  %v4383_v7 = vcvt.s32.f32 %v4376_v0  ;;  %v6368_v3 = vadd.s32 4294967169, %v4721_v63 }
 0x5b0   : > { %v4577_v56 = vclz %v6361_v29  ;;  %v4628_v6 = vsub.s32 32, %v4627_v26  ;;  %v4381_v48 = vand.u32 2147483647, %v4380_v28  ;;  %v10765_v42 = vshll.u32 %v4621_v61, 8 }
 0x5b1   : > { %v4466_v31 = vadd.s32 536870912, %v4465_v1  ;;  %v10769_v54 = vand.u32 8388607, %v4717_v45  ;;  %v4626_v22 = vshrl.u32 %v4625_v12, 5  ;;  %v4630_v13 = vshll.u32 %v12238_v4, %v4627_v26 }
 0x5b2   : > { %v6362_v58 = vadd.s32 4294967294, %v4577_v56  ;;  %v4631_v14 = vshrl.u32 %v12440_v49, %v4628_v6  ;;  %v4634_v55 = vshrl.u32 %v12441_v40, %v4628_v6  ;;  %v4637_v24 = vshrl.u32 %v12442_v11, %v4628_v6 }
 0x5b3   : > { %v10771_v18 = vshrl.u32 %v4466_v31, 30  ;;  %v4640_v16 = vshrl.u32 %v12237_v59, %v4628_v6  ;;  %v4633_v41 = vshll.u32 %v12440_v49, %v4627_v26  ;;  %v4636_v33 = vshll.u32 %v12441_v40, %v4627_v26 }
 0x5b4   : > { %vm6363_vm7 = vcmp.lt.s32.totalorder %v6362_v58, 0  ;;  %v4632_v51 = vor.u32 %v4631_v14, %v4630_v13  ;;  %v4639_v37 = vshll.u32 %v12442_v11, %v4627_v26  ;;  %v4727_v47 = vadd.s32 1, %v6368_v3 }
 0x5b5   : > { %v4580_v39 = vsel %vm6363_vm7, 0, %v6362_v58  ;;  %v4468_v9 = vshll.u32 %v10771_v18, 30  ;;  %v4635_v29 = vor.u32 %v4634_v55, %v4633_v41  ;;  %v4638_v8 = vor.u32 %v4637_v24, %v4636_v33 }
 0x5b6   : > { %v4581_v43 = vsub.s32 32, %v4580_v39  ;;  %v4585_v19 = vsub.s32 4294967266, %v4580_v39  ;;  %v4641_v28 = vor.u32 %v4640_v16, %v4639_v37  ;;  %v4642_v32 = vshll.u32 %v12237_v59, %v4627_v26 }
 0x5b7   : > { %v10781_v12 = vsub.s32 %v4465_v1, %v4468_v9  ;;  %v4643_v61 = vshrl.u32 %v12247_v17, %v4628_v6  ;;  %v4384_v56 = vmul.f32 %v4383_v7, %v4381_v48  ;;  %v4582_v58 = vshll.u32 %v10745_v30, %v4580_v39 }
 0x5b8   : > { %v4583_v63 = vshrl.u32 %v4565_v38, %v4581_v43  ;;  %v4586_v0 = vadd.s32 127, %v4585_v19  ;;  %v4629_v14 = vshrl.u32 %v12238_v4, %v4628_v6  ;;  %vm4645_vm11 = vcmp.lt.s32.totalorder %v4626_v22, 1 }
 0x5b9   : > { %v4471_v13 = vsub.s32 0, %v10781_v12  ;;  %v4644_v3 = vor.u32 %v4643_v61, %v4642_v32  ;;  %vm4646_vm0 = vcmp.lt.s32.totalorder %v4626_v22, 2  ;;  %vm4647_vm6 = vcmp.lt.s32.totalorder %v4626_v22, 3 }
 0x5ba   : > { %v4587_v31 = vshll.u32 %v4586_v0, 23  ;;  %v4584_v38 = vor.u32 %v4583_v63, %v4582_v58  ;;  %vm4648_vm15 = vcmp.lt.s32.totalorder %v4626_v22, 4  ;;  %v4653_v1 = vsel %vm4645_vm11, %v4632_v51, %v4635_v29 }
 0x5bb   : > { %v6357_v55 = vmin.u32 %v4471_v13, %v10781_v12  ;;  %v4650_v26 = vsel %vm4648_vm15, %v4638_v8, 2102212464  ;;  %v4654_v24 = vsel %vm4648_vm15, %v4641_v28, 920167782  ;;  %v4657_v16 = vsel %vm4645_vm11, %v4635_v29, %v4638_v8 }
 0x5bc   : > { %v4588_v7 = vor.u32 4788187, %v4587_v31  ;;  %v4649_v48 = vsel %vm4645_vm11, %v4629_v14, %v4632_v51  ;;  %v4655_v30 = vsel %vm4647_vm6, %v4638_v8, %v4654_v24  ;;  %v4658_v39 = vsel %vm4648_vm15, %v4644_v3, 1326507024 }
 0x5bd   : > { %v4473_v43 = vclz %v6357_v55  ;;  %v4656_v6 = vsel %vm4646_vm0, %v4653_v1, %v4655_v30  ;;  %v4659_v19 = vsel %vm4647_vm6, %v4641_v28, %v4658_v39  ;;  %vm4728_vm5 = vcmp.gt.s32.totalorder %v4727_v47, 0 }
 0x5be   : > { %v4651_v41 = vsel %vm4647_vm6, %v4635_v29, %v4650_v26  ;;  %v4660_v33 = vsel %vm4646_vm0, %v4657_v16, %v4659_v19  ;;  %v10792_v9 = vmul.u32.u64.low %v10765_v42, %v4656_v6  ;;  %v10793_v37 = vmul.u32.u64.high %v10765_v42, %v4656_v6, %v10792_v9  ;;  %v10801_v29 = vpop.f32.mrb[13].mxu1 }
 0x5bf   : > { %v6358_v63 = vadd.s32 4294967294, %v4473_v43  ;;  %v10797_v0 = vmul.u32.u64.low %v10765_v42, %v4660_v33  ;;  %v10798_v32 = vmul.u32.u64.high %v10765_v42, %v4660_v33, %v10797_v0  ;;  %v4729_v51 = vsel %vm4728_vm5, %v4727_v47, 0 }
 0x5c0   : > { %v4731_v8 = vand.u32 31, %v4729_v51  ;;  %v4385_v61 = vxor.u32 2147483648, %v4384_v56  ;;  %v4589_v58 = vand.u32 2147483647, %v4588_v7  ;;  %v4652_v28 = vsel %vm4646_vm0, %v4649_v48, %v4651_v41 }
 0x5c1   : > { %vm6359_vm8 = vcmp.lt.s32.totalorder %v6358_v63, 0  ;;  %v4671_v14 = vadd.s32 1, %v10793_v37  ;;  %v4725_v13 = vor.u32 8388608, %v10769_v54  ;;  %vm4303_vm9 = vcmp.lt.s32.totalorder %v10566_v46, 0 }
 0x5c2   : > { %v4476_v31 = vsel %vm6359_vm8, 0, %v6358_v63  ;;  %v4732_v3 = vsub.s32 32, %v4731_v8  ;;  %v4591_v1 = vcvt.s32.f32 %v4584_v38  ;;  %v10808_v47 = vadd.f32 %v10576_v25, %v10620_v23 }
 0x5c3   : > { %v4481_v55 = vsub.s32 4294967266, %v4476_v31  ;;  %v4387_v26 = vsub.s32 4, %v10660_v20  ;;  %v4461_v22 = vadd.s32 %v10740_v57, %v10737_v27  ;;  %v4668_v24 = vmul.u32 %v10765_v42, %v4652_v28 }
 0x5c4   : > { %vm4670_vm1 = vc.u32 %v10798_v32, %v10792_v9  ;;  %v10818_v54 = vsel %vm4303_vm9, %v4385_v61, %v4384_v56  ;;  %v10820_v38 = vmul.f32 %v4591_v1, %v4589_v58  ;;  %v4730_v48 = vshrl.u32 %v4729_v51, 5 }
 0x5c5   : > { %v4482_v16 = vadd.s32 127, %v4481_v55  ;;  %v4672_v25 = vsel %vm4670_vm1, %v4671_v14, %v10793_v37  ;;  %v4735_v30 = vshrl.u32 %v12440_v49, %v4732_v3  ;;  %v10824_v39 = vshll.u32 %v4725_v13, 8 }
 0x5c6   : > { %v4673_v7 = vadd.s32 %v4672_v25, %v4668_v24  ;;  %v4477_v27 = vsub.s32 32, %v4476_v31  ;;  %v4734_v57 = vshll.u32 %v12238_v4, %v4731_v8  ;;  %v4737_v42 = vshll.u32 %v12440_v49, %v4731_v8 }
 0x5c7   : > { %v4738_v43 = vshrl.u32 %v12441_v40, %v4732_v3  ;;  %v4483_v56 = vshll.u32 %v4482_v16, 23  ;;  %v4740_v19 = vshll.u32 %v12441_v40, %v4731_v8  ;;  %v4741_v41 = vshrl.u32 %v12442_v11, %v4732_v3 }
 0x5c8   : > { %v4674_v6 = vadd.s32 536870912, %v4673_v7  ;;  %v4736_v33 = vor.u32 %v4735_v30, %v4734_v57  ;;  %v4743_v63 = vshll.u32 %v12442_v11, %v4731_v8  ;;  %v4744_v0 = vshrl.u32 %v12237_v59, %v4732_v3 }
 0x5c9   : > { %v4739_v37 = vor.u32 %v4738_v43, %v4737_v42  ;;  %v4742_v61 = vor.u32 %v4741_v41, %v4740_v19  ;;  %v4746_v58 = vshll.u32 %v12237_v59, %v4731_v8  ;;  %v4747_v28 = vshrl.u32 %v12247_v17, %v4732_v3 }
 0x5ca   : > { %v10833_v51 = vshrl.u32 %v4674_v6, 30  ;;  %v4478_v14 = vshll.u32 %v10781_v12, %v4476_v31  ;;  %v4733_v13 = vshrl.u32 %v12238_v4, %v4732_v3  ;;  %v4745_v1 = vor.u32 %v4744_v0, %v4743_v63 }
 0x5cb   : > { %v10841_v55 = vadd.f32 %v10590_v44, %v10620_v23  ;;  %vm10845_vm3 = vcmp.le.f32.partialorder %v4301_v34, 0.7853982  ;;  %v4748_v8 = vor.u32 %v4747_v28, %v4746_v58  ;;  %vm4749_vm13 = vcmp.lt.s32.totalorder %v4730_v48, 1 }
 0x5cc   : > { %12445 = vst [vmem:[#allocation20_spill] sm:$0xff] %v10833_v51  ;;  %v4676_v16 = vshll.u32 %v10833_v51, 30  ;;  %vm4752_vm14 = vcmp.lt.s32.totalorder %v4730_v48, 4  ;;  %v4479_v25 = vshrl.u32 %v4461_v22, %v4477_v27  ;;  %v4484_v12 = vor.u32 4788187, %v4483_v56 }
 0x5cd   : > { %12446 = vst [vmem:[#allocation7_spill] sm:$0xff] %v10841_v55  ;;  %v4754_v31 = vsel %vm4752_vm14, %v4742_v61, 2102212464  ;;  %v4757_v3 = vsel %vm4749_vm13, %v4736_v33, %v4739_v37  ;;  %vm4751_vm4 = vcmp.lt.s32.totalorder %v4730_v48, 3  ;;  %v4758_v44 = vsel %vm4752_vm14, %v4745_v1, 920167782 }
 0x5ce   : > { %v10850_v30 = vsub.s32 %v4673_v7, %v4676_v16  ;;  %v4761_v57 = vsel %vm4749_vm13, %v4739_v37, %v4742_v61  ;;  %vm4750_vm12 = vcmp.lt.s32.totalorder %v4730_v48, 2  ;;  %v4753_v42 = vsel %vm4749_vm13, %v4733_v13, %v4736_v33 }
 0x5cf   : > { %v4759_v34 = vsel %vm4751_vm4, %v4742_v61, %v4758_v44  ;;  %v4762_v43 = vsel %vm4752_vm14, %v4748_v8, 1326507024  ;;  %v4755_v19 = vsel %vm4751_vm4, %v4739_v37, %v4754_v31  ;;  %v4480_v0 = vor.u32 %v4479_v25, %v4478_v14 }
 0x5d0   : > { %v4679_v6 = vsub.s32 0, %v10850_v30  ;;  %v4760_v41 = vsel %vm4750_vm12, %v4757_v3, %v4759_v34  ;;  %v4763_v63 = vsel %vm4751_vm4, %v4745_v1, %v4762_v43  ;;  %v4593_v7 = vxor.u32 2147483648, %v10820_v38 }
 0x5d1   : > { %v4764_v58 = vsel %vm4750_vm12, %v4761_v57, %v4763_v63  ;;  %v10854_v22 = vmul.u32.u64.low %v10824_v39, %v4760_v41  ;;  %v10855_v27 = vmul.u32.u64.high %v10824_v39, %v4760_v41, %v10854_v22  ;;  %v4485_v61 = vand.u32 2147483647, %v4484_v12 }
 0x5d2   : > { %v6365_v56 = vmin.u32 %v4679_v6, %v10850_v30  ;;  %v10861_v48 = vmul.u32.u64.low %v10824_v39, %v4764_v58  ;;  %v10862_v33 = vmul.u32.u64.high %v10824_v39, %v4764_v58, %v10861_v48  ;;  %v4756_v28 = vsel %vm4750_vm12, %v4753_v42, %v4755_v19 }
 0x5d3   : > { %v4928_v37 = vand.u32 2139095040, %v10841_v55  ;;  %v12173_v14 = vand.u32 2147483647, %v10808_v47  ;;  %v4388_v13 = vsel %vm4303_vm9, %v4387_v26, %v10660_v20  ;;  %vm4511_vm10 = vcmp.lt.s32.totalorder %v10582_v35, 0 }
 0x5d4   : > { %v4595_v1 = vsub.s32 4, %v10724_v10  ;;  %v4681_v16 = vclz %v6365_v56  ;;  %v4389_v8 = vsel %vm10845_vm3, %v10566_v46, %v10818_v54  ;;  %v4487_v25 = vcvt.s32.f32 %v4480_v0  ;;  %v10907_v0 = vpop.f32.mrb[14].mxu0 }
 0x5d5   : > { %v4775_v12 = vadd.s32 1, %v10855_v27  ;;  %v4929_v31 = vshrl.u32 %v4928_v37, 23  ;;  %v4594_v3 = vsel %vm4511_vm10, %v4593_v7, %v10820_v38  ;;  %v4772_v20 = vmul.u32 %v10824_v39, %v4756_v28 }
 0x5d6   : > { %v6366_v44 = vadd.s32 4294967294, %v4681_v16  ;;  %vm4774_vm2 = vc.u32 %v10862_v33, %v10854_v22  ;;  %v4488_v26 = vmul.f32 %v4487_v25, %v4485_v61  ;;  %v12174_v42 = vand.u32 2147483647, %v10841_v55 }
 0x5d7   : > { %v4776_v57 = vsel %vm4774_vm2, %v4775_v12, %v10855_v27  ;;  %v6376_v54 = vadd.s32 4294967169, %v4929_v31  ;;  %v4824_v43 = vand.u32 2139095040, %v10808_v47  ;;  %v4390_v6 = vsel %vm10845_vm3, 0, %v4388_v13 }
 0x5d8   : > { %vm6367_vm7 = vcmp.lt.s32.totalorder %v6366_v44, 0  ;;  %v4777_v34 = vadd.s32 %v4776_v57, %v4772_v20  ;;  %vm10891_vm11 = vcmp.le.f32.partialorder %v4509_v21, 0.7853982  ;;  %6848 = vcosq.f32 %v4389_v8 }
 0x5d9   : > { %v10895_v39 = vsel %vm6367_vm7, 0, %v6366_v44  ;;  %v4935_v19 = vadd.s32 1, %v6376_v54  ;;  %v10900_v41 = vsel %vm4511_vm10, %v4595_v1, %v10724_v10  ;;  %v10905_v24 = vsel %vm10891_vm11, %v10582_v35, %v4594_v3 }
 0x5da   : > { %v4778_v63 = vadd.s32 536870912, %v4777_v34  ;;  %v4489_v21 = vxor.u32 2147483648, %v4488_v26  ;;  %v4932_v58 = vand.u32 8388607, %v12174_v42  ;;  %v10913_v27 = vand.u32 8388607, %v12173_v14 }
 0x5db   : > { %vm4936_vm0 = vcmp.gt.s32.totalorder %v4935_v19, 0  ;;  %v4689_v10 = vsub.s32 4294967266, %v10895_v39  ;;  %v4825_v48 = vshrl.u32 %v4824_v43, 23  ;;  %6850 = vsinq.f32 %v4389_v8 }
 0x5dc   : > { %v10916_v7 = vshrl.u32 %v4778_v63, 30  ;;  %v4937_v56 = vsel %vm4936_vm0, %v4935_v19, 0  ;;  %v10918_v61 = vadd.s32 3, %v4390_v6  ;;  %vm4407_vm6 = vcmp.lt.s32.totalorder %v10569_v36, 0 }
 0x5dd   : > { %v4939_v28 = vand.u32 31, %v4937_v56  ;;  %v4598_v37 = vsel %vm10891_vm11, 0, %v10900_v41  ;;  %6852 = vcosq.f32 %v10905_v24  ;;  %v4669_v13 = vadd.s32 %v10792_v9, %v10798_v32 }
 0x5de   : > { %12451 = vst [vmem:[#allocation12_spill] sm:$0xff] %v10918_v61  ;;  %v4780_v1 = vshll.u32 %v10916_v7, 30  ;;  %v10930_v16 = vsel %vm4407_vm6, %v4489_v21, %v4488_v26  ;;  %v4933_v8 = vor.u32 8388608, %v4932_v58  ;;  %v4685_v31 = vsub.s32 32, %v10895_v39 }
 0x5df   : > { %v4940_v25 = vsub.s32 32, %v4939_v28  ;;  %v4690_v3 = vadd.s32 127, %v4689_v10  ;;  %v6372_v20 = vadd.s32 4294967169, %v4825_v48  ;;  %v4942_v57 = vshll.u32 %v12238_v4, %v4939_v28 }
 0x5e0   : > { %v10934_v44 = vsub.s32 %v4777_v34, %v4780_v1  ;;  %v4945_v32 = vshll.u32 %v12440_v49, %v4939_v28  ;;  %v4938_v43 = vshrl.u32 %v4937_v56, 5  ;;  %v4948_v6 = vshll.u32 %v12441_v40, %v4939_v28 }
 0x5e1   : > { %v4943_v9 = vshrl.u32 %v12440_v49, %v4940_v25  ;;  %v4946_v54 = vshrl.u32 %v12441_v40, %v4940_v25  ;;  %v4949_v19 = vshrl.u32 %v12442_v11, %v4940_v25  ;;  %v4951_v34 = vshll.u32 %v12442_v11, %v4939_v28 }
 0x5e2   : > { %v4783_v26 = vsub.s32 0, %v10934_v44  ;;  %v4952_v58 = vshrl.u32 %v12237_v59, %v4940_v25  ;;  %v10945_v10 = vpop.eup %6848  ;;  %v4691_v48 = vshll.u32 %v4690_v3, 23  ;;  %v10948_v14 = vshll.u32 %v4933_v8, 8 }
 0x5e3   : > { %v4944_v63 = vor.u32 %v4943_v9, %v4942_v57  ;;  %v4947_v21 = vor.u32 %v4946_v54, %v4945_v32  ;;  %12452 = vst [vmem:[#allocation8_spill] sm:$0xff] %v10945_v10  ;;  %v10952_v56 = vadd.f32 %v10592_v62, %v10620_v23  ;;  %v4950_v42 = vor.u32 %v4949_v19, %v4948_v6 }
 0x5e4   : > { %v6369_v1 = vmin.u32 %v4783_v26, %v10934_v44  ;;  %v4953_v15 = vor.u32 %v4952_v58, %v4951_v34  ;;  %v4954_v57 = vshll.u32 %v12237_v59, %v4939_v28  ;;  %v4955_v9 = vshrl.u32 %v12247_v17, %v4940_v25 }
 0x5e5   : > { %v4686_v32 = vshll.u32 %v10850_v30, %v10895_v39  ;;  %vm4719_vm15 = vcmp.lt.s32.totalorder %v10632_v50, 0  ;;  %vm4957_vm5 = vcmp.lt.s32.totalorder %v4938_v43, 1  ;;  %v4831_v54 = vadd.s32 1, %v6372_v20  ;;  %v10959_v8 = vpop.eup %6850 }
 0x5e6   : > { %v4785_v3 = vclz %v6369_v1  ;;  %12453 = vst [vmem:[#allocation14_spill] sm:$0xff] %v10959_v8  ;;  %vm10963_vm8 = vcmp.le.f32.partialorder %v4405_v53, 0.7853982  ;;  %v4687_v23 = vshrl.u32 %v4669_v13, %v4685_v31  ;;  %v4956_v28 = vor.u32 %v4955_v9, %v4954_v57  ;;  %v10980_v1 = vpop.f32.mrb[14].mxu1 }
 0x5e7   : > { %vm4960_vm9 = vcmp.lt.s32.totalorder %v4938_v43, 4  ;;  %v4965_v26 = vsel %vm4957_vm5, %v4944_v63, %v4947_v21  ;;  %v10968_v6 = vpop.eup %6852  ;;  %v4692_v30 = vor.u32 4788187, %v4691_v48  ;;  %vm4959_vm1 = vcmp.lt.s32.totalorder %v4938_v43, 3  ;;  %v11141_v8 = vpop.f32.mrb[15].mxu1 }
 0x5e8   : > { %12456 = vst [vmem:[#allocation10_spill] sm:$0xff] %v10968_v6  ;;  %v6370_v39 = vadd.s32 4294967294, %v4785_v3  ;;  %v4966_v19 = vsel %vm4960_vm9, %v4953_v15, 920167782  ;;  %vm10972_vm3 = vcmp.le.f32.partialorder %v4717_v45, 0.7853982  ;;  %v4969_v31 = vsel %vm4957_vm5, %v4947_v21, %v4950_v42 }
 0x5e9   : > { %vm4958_vm13 = vcmp.lt.s32.totalorder %v4938_v43, 2  ;;  %v4962_v53 = vsel %vm4960_vm9, %v4950_v42, 2102212464  ;;  %v4967_v13 = vsel %vm4959_vm1, %v4950_v42, %v4966_v19  ;;  %v4941_v34 = vshrl.u32 %v12238_v4, %v4940_v25 }
 0x5ea   : > { %vm6371_vm14 = vcmp.lt.s32.totalorder %v6370_v39, 0  ;;  %v4968_v58 = vsel %vm4958_vm13, %v4965_v26, %v4967_v13  ;;  %v4970_v48 = vsel %vm4960_vm9, %v4956_v28, 1326507024  ;;  %v4688_v57 = vor.u32 %v4687_v23, %v4686_v32 }
 0x5eb   : > { %v4803_v45 = vsub.s32 4, %v10916_v7  ;;  %v4971_v9 = vsel %vm4959_vm1, %v4953_v15, %v4970_v48  ;;  %vm4832_vm4 = vcmp.gt.s32.totalorder %v4831_v54, 0  ;;  %v10984_v3 = vsel %vm6371_vm14, 0, %v6370_v39 }
 0x5ec   : > { %v4961_v19 = vsel %vm4957_vm5, %v4941_v34, %v4944_v63  ;;  %v4963_v42 = vsel %vm4959_vm1, %v4947_v21, %v4962_v53  ;;  %v4972_v12 = vsel %vm4958_vm13, %v4969_v31, %v4971_v9  ;;  %6854 = vsinq.f32 %v10905_v24 }
 0x5ed   : > { %v10990_v25 = vmul.u32.u64.low %v10948_v14, %v4972_v12  ;;  %v10991_v26 = vmul.u32.u64.high %v10948_v14, %v4972_v12, %v10990_v25  ;;  %v10994_v28 = vmul.u32.u64.low %v10948_v14, %v4968_v58  ;;  %v10995_v32 = vmul.u32.u64.high %v10948_v14, %v4968_v58, %v10994_v28 }
 0x5ee   : > { %v11003_v15 = vadd.s32 3, %v4598_v37  ;;  %v4693_v63 = vand.u32 2147483647, %v4692_v30  ;;  %v4833_v21 = vsel %vm4832_vm4, %v4831_v54, 0  ;;  %v4793_v23 = vsub.s32 4294967266, %v10984_v3 }
 0x5ef   : > { %v11009_v12 = vsel %vm4719_vm15, %v4803_v45, %v10916_v7  ;;  %v4964_v39 = vsel %vm4958_vm13, %v4961_v19, %v4963_v42  ;;  %v4835_v53 = vand.u32 31, %v4833_v21  ;;  %v11016_v38 = vsel %vm10963_vm8, %v10569_v36, %v10930_v16 }
 0x5f0   : > { %12459 = vst [vmem:[#allocation32_spill] sm:$0xff] %v11003_v15  ;;  %v4695_v41 = vcvt.s32.f32 %v4688_v57  ;;  %v4773_v24 = vadd.s32 %v10854_v22, %v10862_v33  ;;  %v12460_v37 = vor.u32 8388608, %v10913_v27  ;;  %vm4982_vm12 = vc.u32 %v10991_v26, %v10994_v28 }
 0x5f1   : > { %v4983_v7 = vadd.s32 1, %v10995_v32  ;;  %v4836_v43 = vsub.s32 32, %v4835_v53  ;;  %v4789_v16 = vsub.s32 32, %v10984_v3  ;;  %v4806_v22 = vsel %vm10972_vm3, 0, %v11009_v12 }
 0x5f2   : > { %v11022_v54 = vshll.u32 %v12460_v37, 8  ;;  %v11028_v13 = vmul.f32 %v4695_v41, %v4693_v63  ;;  %v4980_v33 = vmul.u32 %v10948_v14, %v4964_v39  ;;  %v4794_v27 = vadd.s32 127, %v4793_v23 }
 0x5f3   : > { %v4984_v31 = vsel %vm4982_vm12, %v4983_v7, %v10995_v32  ;;  %v4839_v34 = vshrl.u32 %v12440_v49, %v4836_v43  ;;  %v4842_v58 = vshrl.u32 %v12441_v40, %v4836_v43  ;;  %v4838_v57 = vshll.u32 %v12238_v4, %v4835_v53 }
 0x5f4   : > { %v4985_v48 = vadd.s32 %v4984_v31, %v4980_v33  ;;  %v4841_v45 = vshll.u32 %v12440_v49, %v4835_v53  ;;  %v4845_v9 = vshrl.u32 %v12442_v11, %v4836_v43  ;;  %v4834_v19 = vshrl.u32 %v4833_v21, 5  ;;  %v11049_v21 = vpop.permute.xlu0 %4103 }
 0x5f5   : > { %v4844_v42 = vshll.u32 %v12441_v40, %v4835_v53  ;;  %v4847_v25 = vshll.u32 %v12442_v11, %v4835_v53  ;;  %v4848_v14 = vshrl.u32 %v12237_v59, %v4836_v43  ;;  %v4840_v32 = vor.u32 %v4839_v34, %v4838_v57 }
 0x5f6   : > { %v4986_v63 = vadd.s32 536870912, %v4985_v48  ;;  %v4843_v23 = vor.u32 %v4842_v58, %v4841_v45  ;;  %v5032_v12 = vand.u32 2139095040, %v10952_v56  ;;  %v4850_v37 = vshll.u32 %v12237_v59, %v4835_v53  ;;  %v11047_v33 = vpop.eup %6854 }
 0x5f7   : > { %v4846_v39 = vor.u32 %v4845_v9, %v4844_v42  ;;  %v4849_v41 = vor.u32 %v4848_v14, %v4847_v25  ;;  %v4851_v7 = vshrl.u32 %v12247_v17, %v4836_v43  ;;  %12461 = vst [vmem:[#allocation11_spill] sm:$0xff] %v11047_v33  ;;  %v4697_v31 = vxor.u32 2147483648, %v11028_v13 }
 0x5f8   : > { %v4790_v30 = vshll.u32 %v10934_v44, %v10984_v3  ;;  %v4791_v35 = vshrl.u32 %v4773_v24, %v4789_v16  ;;  %v11054_v34 = vshrl.u32 %v4986_v63, 30  ;;  %vm12217_vm10 = vcmp.lt.s32.totalorder %v10628_v52, 0 }
 0x5f9   : > { %v4795_v58 = vshll.u32 %v4794_v27, 23  ;;  %v4852_v57 = vor.u32 %v4851_v7, %v4850_v37  ;;  %vm4853_vm2 = vcmp.lt.s32.totalorder %v4834_v19, 1  ;;  %v11059_v53 = vadd.f32 %v10609_v5, %v11049_v21 }
 0x5fa   : > { %v4988_v45 = vshll.u32 %v11054_v34, 30  ;;  %vm4856_vm7 = vcmp.lt.s32.totalorder %v4834_v19, 4  ;;  %v4861_v9 = vsel %vm4853_vm2, %v4840_v32, %v4843_v23  ;;  %v5033_v42 = vshrl.u32 %v5032_v12, 23 }
 0x5fb   : > { %12462 = vst [vmem:[#allocation23_spill] sm:$0xff] %v11059_v53  ;;  %v4837_v44 = vshrl.u32 %v12238_v4, %v4836_v43  ;;  %vm4855_vm11 = vcmp.lt.s32.totalorder %v4834_v19, 3  ;;  %v4858_v3 = vsel %vm4856_vm7, %v4846_v39, 2102212464  ;;  %v4862_v24 = vsel %vm4856_vm7, %v4849_v41, 920167782 }
 0x5fc   : > { %v11064_v16 = vsub.s32 %v4985_v48, %v4988_v45  ;;  %vm4854_vm0 = vcmp.lt.s32.totalorder %v4834_v19, 2  ;;  %v4863_v27 = vsel %vm4855_vm11, %v4846_v39, %v4862_v24  ;;  %v4865_v25 = vsel %vm4853_vm2, %v4843_v23, %v4846_v39 }
 0x5fd   : > { %v4792_v14 = vor.u32 %v4791_v35, %v4790_v30  ;;  %v4796_v5 = vor.u32 4788187, %v4795_v58  ;;  %v4864_v63 = vsel %vm4854_vm0, %v4861_v9, %v4863_v27  ;;  %v4866_v37 = vsel %vm4856_vm7, %v4852_v57, 1326507024  ;;  %v11082_v58 = vpop.f32.mrb[15].mxu0 }
 0x5fe   : > { %v4991_v7 = vsub.s32 0, %v11064_v16  ;;  %v4857_v12 = vsel %vm4853_vm2, %v4837_v44, %v4840_v32  ;;  %v4859_v6 = vsel %vm4855_vm11, %v4843_v23, %v4858_v3  ;;  %v4867_v43 = vsel %vm4855_vm11, %v4849_v41, %v4866_v37 }
 0x5ff   : > { %v4868_v33 = vsel %vm4854_vm0, %v4865_v25, %v4867_v43  ;;  %v11072_v48 = vmul.u32.u64.low %v11022_v54, %v4864_v63  ;;  %v11073_v45 = vmul.u32.u64.high %v11022_v54, %v4864_v63, %v11072_v48  ;;  %v6380_v24 = vadd.s32 4294967169, %v5033_v42 }
 0x600   : > { %6856 = vcosq.f32 %v11016_v38  ;;  %v6377_v35 = vmin.u32 %v4991_v7, %v11064_v16  ;;  %v11079_v30 = vmul.u32.u64.low %v11022_v54, %v4868_v33  ;;  %v11080_v39 = vmul.u32.u64.high %v11022_v54, %v4868_v33, %v11079_v30 }
 0x601   : > { %6858 = vsinq.f32 %v11016_v38  ;;  %v11085_v32 = vadd.s32 3, %v4806_v22  ;;  %v4860_v23 = vsel %vm4854_vm0, %v4857_v12, %v4859_v6  ;;  %v5039_v41 = vadd.s32 1, %v6380_v24 }
 0x602   : > { %v11091_v57 = vsel %vm12217_vm10, %v4697_v31, %v11028_v13  ;;  %v4797_v9 = vand.u32 2147483647, %v4796_v5  ;;  %v4993_v42 = vclz %v6377_v35  ;;  %v12464_v44 = vand.u32 2147483647, %v10952_v56 }
 0x603   : > { %12463 = vst [vmem:[#allocation27_spill] sm:$0xff] %v11085_v32  ;;  %v4799_v3 = vcvt.s32.f32 %v4792_v14  ;;  %v4879_v27 = vadd.s32 1, %v11073_v45  ;;  %vm5040_vm5 = vcmp.gt.s32.totalorder %v5039_v41, 0  ;;  %v5136_v38 = vand.u32 2139095040, %v11059_v53 }
 0x604   : > { %v5036_v33 = vand.u32 8388607, %v12464_v44  ;;  %v6378_v22 = vadd.s32 4294967294, %v4993_v42  ;;  %v4876_v6 = vmul.u32 %v11022_v54, %v4860_v23  ;;  %vm4878_vm9 = vc.u32 %v11080_v39, %v11072_v48 }
 0x605   : > { %v5041_v19 = vsel %vm5040_vm5, %v5039_v41, 0  ;;  %v4981_v13 = vadd.s32 %v10994_v28, %v10991_v26  ;;  %v4880_v31 = vsel %vm4878_vm9, %v4879_v27, %v11073_v45  ;;  %v11105_v14 = vadd.f32 %v10657_v60, %v11049_v21 }
 0x606   : > { %v5043_v25 = vand.u32 31, %v5041_v19  ;;  %v11107_v5 = vmul.f32 %v4799_v3, %v4797_v9  ;;  %vm6379_vm1 = vcmp.lt.s32.totalorder %v6378_v22, 0  ;;  %v4881_v63 = vadd.s32 %v4880_v31, %v4876_v6 }
 0x607   : > { %12465 = vst [vmem:[#allocation13_spill] sm:$0xff] %v11105_v14  ;;  %v5037_v37 = vor.u32 8388608, %v5036_v33  ;;  %v4996_v54 = vsel %vm6379_vm1, 0, %v6378_v22  ;;  %v5137_v43 = vshrl.u32 %v5136_v38, 23  ;;  %v5042_v28 = vshrl.u32 %v5041_v19, 5 }
 0x608   : > { %v5044_v7 = vsub.s32 32, %v5043_v25  ;;  %v4997_v24 = vsub.s32 32, %v4996_v54  ;;  %v5001_v35 = vsub.s32 4294967266, %v4996_v54  ;;  %v4882_v26 = vadd.s32 536870912, %v4881_v63 }
 0x609   : > { %v5046_v45 = vshll.u32 %v12238_v4, %v5043_v25  ;;  %v5049_v60 = vshll.u32 %v12440_v49, %v5043_v25  ;;  %v5052_v44 = vshll.u32 %v12441_v40, %v5043_v25  ;;  %v5055_v22 = vshll.u32 %v12442_v11, %v5043_v25 }
 0x60a   : > { %v5047_v30 = vshrl.u32 %v12440_v49, %v5044_v7  ;;  %v5050_v23 = vshrl.u32 %v12441_v40, %v5044_v7  ;;  %v11114_v41 = vpop.eup %6856  ;;  %v5002_v9 = vadd.s32 127, %v5001_v35  ;;  %v11116_v42 = vshrl.u32 %v4882_v26, 30 }
 0x60b   : > { %v5053_v33 = vshrl.u32 %v12442_v11, %v5044_v7  ;;  %v11120_v3 = vpop.eup %6858  ;;  %v4999_v27 = vshrl.u32 %v4981_v13, %v4997_v24  ;;  %v5056_v6 = vshrl.u32 %v12237_v59, %v5044_v7  ;;  %v5058_v26 = vshll.u32 %v12237_v59, %v5043_v25 }
 0x60c   : > { %v5048_v38 = vor.u32 %v5047_v30, %v5046_v45  ;;  %v5003_v19 = vshll.u32 %v5002_v9, 23  ;;  %v4884_v31 = vshll.u32 %v11116_v42, 30  ;;  %v5051_v12 = vor.u32 %v5050_v23, %v5049_v60 }
 0x60d   : > { %v5054_v15 = vor.u32 %v5053_v33, %v5052_v44  ;;  %v5057_v35 = vor.u32 %v5056_v6, %v5055_v22  ;;  %v5059_v32 = vshrl.u32 %v12247_v17, %v5044_v7  ;;  %v11127_v10 = vshll.u32 %v5037_v37, 8 }
 0x60e   : > { %v12466_v46 = vand.u32 2147483647, %v10628_v52  ;;  %v12467_v13 = vmov 0  ;;  %v4998_v24 = vshll.u32 %v11064_v16, %v4996_v54  ;;  %v11136_v45 = vsub.s32 %v4881_v63, %v4884_v31 }
 0x60f   : > { %v5045_v30 = vshrl.u32 %v12238_v4, %v5044_v7  ;;  %v6384_v60 = vadd.s32 4294967169, %v5137_v43  ;;  %v5004_v23 = vor.u32 4788187, %v5003_v19  ;;  %v5060_v9 = vor.u32 %v5059_v32, %v5058_v26 }
 0x610   : > { %vm11131_vm13 = vcmp.le.f32.partialorder %v12466_v46, 0.7853982  ;;  %vm5061_vm14 = vcmp.lt.s32.totalorder %v5042_v28, 1  ;;  %vm5064_vm4 = vcmp.lt.s32.totalorder %v5042_v28, 4  ;;  %v5000_v25 = vor.u32 %v4999_v27, %v4998_v24 }
 0x611   : > { %v12468_v13 = vsel %vm11131_vm13, 4294967295, %v12467_v13  ;;  %v4887_v37 = vsub.s32 0, %v11136_v45  ;;  %v5066_v44 = vsel %vm5064_vm4, %v5054_v15, 2102212464  ;;  %v5069_v33 = vsel %vm5061_vm14, %v5048_v38, %v5051_v12 }
 0x612   : > { %12469 = vst [vmem:[#allocation26_spill] sm:$0xff] %v12468_v13  ;;  %vm5063_vm12 = vcmp.lt.s32.totalorder %v5042_v28, 3  ;;  %v5070_v46 = vsel %vm5064_vm4, %v5057_v35, 920167782  ;;  %v5073_v22 = vsel %vm5061_vm14, %v5051_v12, %v5054_v15  ;;  %v5074_v6 = vsel %vm5064_vm4, %v5060_v9, 1326507024 }
 0x613   : > { %v6373_v16 = vmin.u32 %v4887_v37, %v11136_v45  ;;  %vm5062_vm2 = vcmp.lt.s32.totalorder %v5042_v28, 2  ;;  %v5065_v63 = vsel %vm5061_vm14, %v5045_v30, %v5048_v38  ;;  %v5071_v54 = vsel %vm5063_vm12, %v5054_v15, %v5070_v46 }
 0x614   : > { %v5005_v7 = vand.u32 2147483647, %v5004_v23  ;;  %v5067_v43 = vsel %vm5063_vm12, %v5051_v12, %v5066_v44  ;;  %v5072_v19 = vsel %vm5062_vm2, %v5069_v33, %v5071_v54  ;;  %v5075_v32 = vsel %vm5063_vm12, %v5057_v35, %v5074_v6 }
 0x615   : > { %v5007_v31 = vcvt.s32.f32 %v5000_v25  ;;  %v4889_v26 = vclz %v6373_v16  ;;  %v5076_v27 = vsel %vm5062_vm2, %v5073_v22, %v5075_v32  ;;  %v5143_v24 = vadd.s32 1, %v6384_v60 }
 0x616   : > { %v11144_v61 = vmul.u32.u64.low %v11127_v10, %v5076_v27  ;;  %v11145_v51 = vmul.u32.u64.high %v11127_v10, %v5076_v27, %v11144_v61  ;;  %v11148_v9 = vmul.u32.u64.low %v11127_v10, %v5072_v19  ;;  %v11149_v37 = vmul.u32.u64.high %v11127_v10, %v5072_v19, %v11148_v9 }
 0x617   : > { %v6374_v15 = vadd.s32 4294967294, %v4889_v26  ;;  %v5068_v28 = vsel %vm5062_vm2, %v5065_v63, %v5067_v43  ;;  %v12470_v12 = vand.u32 2147483647, %v11059_v53  ;;  %vm5144_vm7 = vcmp.gt.s32.totalorder %v5143_v24, 0 }
 0x618   : > { %v11158_v35 = vsel %vm11131_vm13, %v10628_v52, %v11091_v57  ;;  %v11161_v61 = vmul.f32 %v5007_v31, %v5005_v7  ;;  %v5145_v60 = vsel %vm5144_vm7, %v5143_v24, 0  ;;  %v4877_v33 = vadd.s32 %v11072_v48, %v11080_v39 }
 0x619   : > { %v5140_v38 = vand.u32 8388607, %v12470_v12  ;;  %vm6375_vm11 = vcmp.lt.s32.totalorder %v6374_v15, 0  ;;  %v5147_v25 = vand.u32 31, %v5145_v60  ;;  %v5084_v22 = vmul.u32 %v11127_v10, %v5068_v28 }
 0x61a   : > { %v4892_v46 = vsel %vm6375_vm11, 0, %v6374_v15  ;;  %vm5086_vm0 = vc.u32 %v11145_v51, %v11148_v9  ;;  %v5087_v16 = vadd.s32 1, %v11149_v37  ;;  %v5009_v54 = vxor.u32 2147483648, %v11161_v61 }
 0x61b   : > { %v4893_v57 = vsub.s32 32, %v4892_v46  ;;  %v4897_v6 = vsub.s32 4294967266, %v4892_v46  ;;  %v5141_v63 = vor.u32 8388608, %v5140_v38  ;;  %v5146_v7 = vshrl.u32 %v5145_v60, 5 }
 0x61c   : > { %v5148_v43 = vsub.s32 32, %v5147_v25  ;;  %v5150_v19 = vshll.u32 %v12238_v4, %v5147_v25  ;;  %v5088_v48 = vsel %vm5086_vm0, %v5087_v16, %v11149_v37  ;;  %v5153_v39 = vshll.u32 %v12440_v49, %v5147_v25 }
 0x61d   : > { %v4898_v32 = vadd.s32 127, %v4897_v6  ;;  %v5156_v10 = vshll.u32 %v12441_v40, %v5147_v25  ;;  %v4895_v31 = vshrl.u32 %v4877_v33, %v4893_v57  ;;  %v5089_v26 = vadd.s32 %v5088_v48, %v5084_v22 }
 0x61e   : > { %v5151_v27 = vshrl.u32 %v12440_v49, %v5148_v43  ;;  %v5154_v24 = vshrl.u32 %v12441_v40, %v5148_v43  ;;  %v5157_v28 = vshrl.u32 %v12442_v11, %v5148_v43  ;;  %v5159_v12 = vshll.u32 %v12442_v11, %v5147_v25 }
 0x61f   : > { %v4899_v15 = vshll.u32 %v4898_v32, 23  ;;  %v5160_v38 = vshrl.u32 %v12237_v59, %v5148_v43  ;;  %v5090_v60 = vadd.s32 536870912, %v5089_v26  ;;  %v11181_v16 = vshll.u32 %v5141_v63, 8 }
 0x620   : > { %v5152_v6 = vor.u32 %v5151_v27, %v5150_v19  ;;  %v5155_v37 = vor.u32 %v5154_v24, %v5153_v39  ;;  %v4894_v44 = vshll.u32 %v11136_v45, %v4892_v46  ;;  %v5158_v33 = vor.u32 %v5157_v28, %v5156_v10 }
 0x621   : > { %v5161_v22 = vor.u32 %v5160_v38, %v5159_v12  ;;  %v5344_v57 = vand.u32 2139095040, %v11105_v14  ;;  %vm4927_vm5 = vcmp.lt.s32.totalorder %v10841_v55, 0  ;;  %v4900_v32 = vor.u32 4788187, %v4899_v15 }
 0x622   : > { %v11186_v48 = vshrl.u32 %v5090_v60, 30  ;;  %v5162_v23 = vshll.u32 %v12237_v59, %v5147_v25  ;;  %v5163_v30 = vshrl.u32 %v12247_v17, %v5148_v43  ;;  %v4896_v13 = vor.u32 %v4895_v31, %v4894_v44 }
 0x623   : > { %v5149_v19 = vshrl.u32 %v12238_v4, %v5148_v43  ;;  %vm5165_vm9 = vcmp.lt.s32.totalorder %v5146_v7, 1  ;;  %vm5168_vm1 = vcmp.lt.s32.totalorder %v5146_v7, 4  ;;  %v12472_v10 = vand.u32 2147483647, %v10841_v55 }
 0x624   : > { %12471 = vst [vmem:[#allocation17_spill] sm:$0xff] %v11186_v48  ;;  %v5092_v45 = vshll.u32 %v11186_v48, 30  ;;  %v5164_v46 = vor.u32 %v5163_v30, %v5162_v23  ;;  %v5170_v63 = vsel %vm5168_vm1, %v5158_v33, 2102212464  ;;  %v5173_v39 = vsel %vm5165_vm9, %v5152_v6, %v5155_v37 }
 0x625   : > { %vm11194_vm14 = vcmp.le.f32.partialorder %v12472_v10, 0.7853982  ;;  %vm5166_vm4 = vcmp.lt.s32.totalorder %v5146_v7, 2  ;;  %vm5167_vm12 = vcmp.lt.s32.totalorder %v5146_v7, 3  ;;  %v5174_v25 = vsel %vm5168_vm1, %v5161_v22, 920167782 }
 0x626   : > { %v5177_v24 = vsel %vm5165_vm9, %v5155_v37, %v5158_v33  ;;  %v4901_v44 = vand.u32 2147483647, %v4900_v32  ;;  %v11198_v31 = vsub.s32 %v5089_v26, %v5092_v45  ;;  %v5175_v43 = vsel %vm5167_vm12, %v5158_v33, %v5174_v25 }
 0x627   : > { %v5178_v15 = vsel %vm5168_vm1, %v5164_v46, 1326507024  ;;  %v5169_v28 = vsel %vm5165_vm9, %v5149_v19, %v5152_v6  ;;  %v5171_v12 = vsel %vm5167_vm12, %v5155_v37, %v5170_v63  ;;  %v5176_v30 = vsel %vm5166_vm4, %v5173_v39, %v5175_v43 }
 0x628   : > { %v5179_v23 = vsel %vm5167_vm12, %v5161_v22, %v5178_v15  ;;  %v5095_v38 = vsub.s32 0, %v11198_v31  ;;  %v11204_v10 = vmul.u32.u64.low %v11181_v16, %v5176_v30  ;;  %v11205_v48 = vmul.u32.u64.high %v11181_v16, %v5176_v30, %v11204_v10 }
 0x629   : > { %v5180_v60 = vsel %vm5166_vm4, %v5177_v24, %v5179_v23  ;;  %v4903_v52 = vcvt.s32.f32 %v4896_v13  ;;  %v5345_v33 = vshrl.u32 %v5344_v57, 23  ;;  %6860 = vcosq.f32 %v11158_v35 }
 0x62a   : > { %v11209_v26 = vmul.u32.u64.low %v11181_v16, %v5180_v60  ;;  %v11210_v32 = vmul.u32.u64.high %v11181_v16, %v5180_v60, %v11209_v26  ;;  %v12475_v6 = vxor.u32 2147483648, %v11107_v5  ;;  %v6381_v22 = vmin.u32 %v5095_v38, %v11198_v31 }
 0x62b   : > { %v5172_v19 = vsel %vm5166_vm4, %v5169_v28, %v5171_v12  ;;  %v5010_v13 = vsel %vm4927_vm5, %v5009_v54, %v11161_v61  ;;  %v12476_v45 = vsub.s32 4, %v11054_v34  ;;  %vm4823_vm2 = vcmp.lt.s32.totalorder %v10808_v47, 0 }
 0x62c   : > { %v4802_v37 = vsel %vm4719_vm15, %v12475_v6, %v11107_v5  ;;  %v4904_v46 = vmul.f32 %v4903_v52, %v4901_v44  ;;  %v6392_v63 = vadd.s32 4294967169, %v5345_v33  ;;  %v5097_v39 = vclz %v6381_v22 }
 0x62d   : > { %v5012_v57 = vsel %vm4927_vm5, %v12476_v45, %v11054_v34  ;;  %v5191_v5 = vadd.s32 1, %v11205_v48  ;;  %v12477_v7 = vand.u32 2147483647, %v11105_v14  ;;  %v11234_v24 = vadd.f32 %v10759_v2, %v11049_v21 }
 0x62e   : > { %6862 = vsinq.f32 %v11158_v35  ;;  %v5188_v61 = vmul.u32 %v11181_v16, %v5172_v19  ;;  %vm5190_vm15 = vc.u32 %v11210_v32, %v11204_v10  ;;  %v5351_v34 = vadd.s32 1, %v6392_v63 }
 0x62f   : > { %v5348_v25 = vand.u32 8388607, %v12477_v7  ;;  %v4805_v52 = vsel %vm10972_vm3, %v10632_v50, %v4802_v37  ;;  %v5014_v54 = vsel %vm11194_vm14, 0, %v5012_v57  ;;  %v6382_v44 = vadd.s32 4294967294, %v5097_v39 }
 0x630   : > { %v5192_v43 = vsel %vm5190_vm15, %v5191_v5, %v11205_v48  ;;  %v11249_v2 = vsel %vm11194_vm14, %v10841_v55, %v5010_v13  ;;  %v4905_v35 = vxor.u32 2147483648, %v4904_v46  ;;  %vm5352_vm7 = vcmp.gt.s32.totalorder %v5351_v34, 0 }
 0x631   : > { %v5193_v16 = vadd.s32 %v5192_v43, %v5188_v61  ;;  %vm6383_vm11 = vcmp.lt.s32.totalorder %v6382_v44, 0  ;;  %v5349_v15 = vor.u32 8388608, %v5348_v25  ;;  %v5353_v28 = vsel %vm5352_vm7, %v5351_v34, 0 }
 0x632   : > { %v5240_v20 = vand.u32 2139095040, %v11234_v24  ;;  %6864 = vcosq.f32 %v4805_v52  ;;  %v5100_v12 = vsel %vm6383_vm11, 0, %v6382_v44  ;;  %v5355_v23 = vand.u32 31, %v5353_v28 }
 0x633   : > { %v5194_v30 = vadd.s32 536870912, %v5193_v16  ;;  %6866 = vsinq.f32 %v4805_v52  ;;  %v11252_v38 = vadd.s32 3, %v5014_v54  ;;  %v5101_v48 = vsub.s32 32, %v5100_v12  ;;  %v11259_v6 = vpop.eup %6860 }
 0x634   : > { %v5105_v60 = vsub.s32 4294967266, %v5100_v12  ;;  %6868 = vcosq.f32 %v11249_v2  ;;  %v5085_v27 = vadd.s32 %v11148_v9, %v11145_v51  ;;  %v5356_v33 = vsub.s32 32, %v5355_v23 }
 0x635   : > { %12478 = vst [vmem:[#allocation19_spill] sm:$0xff] %v11252_v38  ;;  %v11257_v26 = vshrl.u32 %v5194_v30, 30  ;;  %v11263_v37 = vsel %vm4823_vm2, %v4905_v35, %v4904_v46  ;;  %v11265_v19 = vshll.u32 %v5349_v15, 8  ;;  %v5241_v13 = vshrl.u32 %v5240_v20, 23 }
 0x636   : > { %v5106_v22 = vadd.s32 127, %v5105_v60  ;;  %v5358_v57 = vshll.u32 %v12238_v4, %v5355_v23  ;;  %v5359_v63 = vshrl.u32 %v12440_v49, %v5356_v33  ;;  %v5361_v51 = vshll.u32 %v12440_v49, %v5355_v23 }
 0x637   : > { %v5196_v45 = vshll.u32 %v11257_v26, 30  ;;  %v5103_v9 = vshrl.u32 %v5085_v27, %v5101_v48  ;;  %v5362_v5 = vshrl.u32 %v12441_v40, %v5356_v33  ;;  %v5365_v7 = vshrl.u32 %v12442_v11, %v5356_v33 }
 0x638   : > { %v5107_v39 = vshll.u32 %v5106_v22, 23  ;;  %v11273_v46 = vpop.eup %6862  ;;  %v5364_v61 = vshll.u32 %v12441_v40, %v5355_v23  ;;  %v5367_v34 = vshll.u32 %v12442_v11, %v5355_v23  ;;  %v5368_v52 = vshrl.u32 %v12237_v59, %v5356_v33 }
 0x639   : > { %v11275_v25 = vsub.s32 %v5193_v16, %v5196_v45  ;;  %v5102_v54 = vshll.u32 %v11198_v31, %v5100_v12  ;;  %v5354_v43 = vshrl.u32 %v5353_v28, 5  ;;  %v5360_v35 = vor.u32 %v5359_v63, %v5358_v57 }
 0x63a   : > { %v5108_v44 = vor.u32 4788187, %v5107_v39  ;;  %vm5135_vm3 = vcmp.lt.s32.totalorder %v11059_v53, 0  ;;  %v5363_v20 = vor.u32 %v5362_v5, %v5361_v51  ;;  %v5366_v30 = vor.u32 %v5365_v7, %v5364_v61 }
 0x63b   : > { %v5199_v15 = vsub.s32 0, %v11275_v25  ;;  %v5369_v48 = vor.u32 %v5368_v52, %v5367_v34  ;;  %v5104_v16 = vor.u32 %v5103_v9, %v5102_v54  ;;  %v5370_v60 = vshll.u32 %v12237_v59, %v5355_v23 }
 0x63c   : > { %v5371_v27 = vshrl.u32 %v12247_v17, %v5356_v33  ;;  %v6388_v22 = vadd.s32 4294967169, %v5241_v13  ;;  %v11285_v45 = vpop.eup %6864  ;;  %v12480_v31 = vand.u32 2147483647, %v10808_v47  ;;  %v5109_v12 = vand.u32 2147483647, %v5108_v44 }
 0x63d   : > { %12479 = vst [vmem:[#allocation9_spill] sm:$0xff] %v11285_v45  ;;  %v6385_v57 = vmin.u32 %v5199_v15, %v11275_v25  ;;  %v5219_v63 = vsub.s32 4, %v11257_v26  ;;  %v5357_v51 = vshrl.u32 %v12238_v4, %v5356_v33  ;;  %v11296_v9 = vpop.eup %6866  ;;  %vm5373_vm5 = vcmp.lt.s32.totalorder %v5354_v43, 1 }
 0x63e   : > { %vm11289_vm0 = vcmp.le.f32.partialorder %v12480_v31, 0.7853982  ;;  %12483 = vst [vmem:[#allocation25_spill] sm:$0xff] %v11296_v9  ;;  %v5372_v23 = vor.u32 %v5371_v27, %v5370_v60  ;;  %vm5375_vm9 = vcmp.lt.s32.totalorder %v5354_v43, 3  ;;  %vm5376_vm1 = vcmp.lt.s32.totalorder %v5354_v43, 4  ;;  %v11298_v13 = vpop.eup %6868 }
 0x63f   : > { %12484 = vst [vmem:[#allocation18_spill] sm:$0xff] %v11298_v13  ;;  %v5201_v39 = vclz %v6385_v57  ;;  %v5378_v5 = vsel %vm5376_vm1, %v5366_v30, 2102212464  ;;  %v5381_v7 = vsel %vm5373_vm5, %v5360_v35, %v5363_v20  ;;  %v5382_v61 = vsel %vm5376_vm1, %v5369_v48, 920167782 }
 0x640   : > { %v5111_v34 = vcvt.s32.f32 %v5104_v16  ;;  %vm5374_vm14 = vcmp.lt.s32.totalorder %v5354_v43, 2  ;;  %v5383_v52 = vsel %vm5375_vm9, %v5366_v30, %v5382_v61  ;;  %v5385_v54 = vsel %vm5373_vm5, %v5363_v20, %v5366_v30 }
 0x641   : > { %v6386_v44 = vadd.s32 4294967294, %v5201_v39  ;;  %v5377_v15 = vsel %vm5373_vm5, %v5357_v51, %v5360_v35  ;;  %v5384_v33 = vsel %vm5374_vm14, %v5381_v7, %v5383_v52  ;;  %v5386_v31 = vsel %vm5376_vm1, %v5372_v23, 1326507024 }
 0x642   : > { %vm12215_vm4 = vcmp.lt.s32.totalorder %v10952_v56, 0  ;;  %v5379_v60 = vsel %vm5375_vm9, %v5363_v20, %v5378_v5  ;;  %v5387_v27 = vsel %vm5375_vm9, %v5369_v48, %v5386_v31  ;;  %v5112_v16 = vmul.f32 %v5111_v34, %v5109_v12 }
 0x643   : > { %v11306_v57 = vmul.u32.u64.low %v11265_v19, %v5384_v33  ;;  %v11307_v55 = vmul.u32.u64.high %v11265_v19, %v5384_v33, %v11306_v57  ;;  %vm6387_vm12 = vcmp.lt.s32.totalorder %v6386_v44, 0  ;;  %v5388_v30 = vsel %vm5374_vm14, %v5385_v54, %v5387_v27 }
 0x644   : > { %v12192_v35 = vand.u32 2147483647, %v11234_v24  ;;  %v5204_v51 = vsel %vm6387_vm12, 0, %v6386_v44  ;;  %v5220_v23 = vsel %vm5135_vm3, %v5219_v63, %v11257_v26  ;;  %6870 = vsinq.f32 %v11249_v2 }
 0x645   : > { %v11316_v20 = vmul.u32.u64.low %v11265_v19, %v5388_v30  ;;  %v11317_v39 = vmul.u32.u64.high %v11265_v19, %v5388_v30, %v11316_v20  ;;  %v12485_v48 = vand.u32 2147483647, %v11059_v53  ;;  %v5209_v5 = vsub.s32 4294967266, %v5204_v51 }
 0x646   : > { %v5380_v7 = vsel %vm5374_vm14, %v5377_v15, %v5379_v60  ;;  %v4909_v26 = vsel %vm11289_vm0, %v10808_v47, %v11263_v37  ;;  %v5399_v63 = vadd.s32 1, %v11307_v55  ;;  %v5247_v61 = vadd.s32 1, %v6388_v22  ;;  %v11343_v37 = vpop.permute.xlu1 %4108 }
 0x647   : > { %vm11322_vm15 = vcmp.le.f32.partialorder %v12485_v48, 0.7853982  ;;  %v11334_v2 = vadd.f32 %v10801_v29, %v11049_v21  ;;  %v5113_v34 = vxor.u32 2147483648, %v5112_v16  ;;  %v5210_v52 = vadd.s32 127, %v5209_v5  ;;  %v12538_v21 = vld [vmem:[#allocation8_spill] sm:$0xff] }
 0x648   : > { %v5222_v54 = vsel %vm11322_vm15, 0, %v5220_v23  ;;  %v5244_v43 = vand.u32 8388607, %v12192_v35  ;;  %v5205_v44 = vsub.s32 32, %v5204_v51  ;;  %v5396_v15 = vmul.u32 %v11265_v19, %v5380_v7 }
 0x649   : > { %vm5398_vm7 = vc.u32 %v11317_v39, %v11306_v57  ;;  %vm5248_vm11 = vcmp.gt.s32.totalorder %v5247_v61, 0  ;;  %6872 = vcosq.f32 %v4909_v26  ;;  %v12488_v29 = vand.u32 2147483647, %v10952_v56 }
 0x64a   : > { %v5211_v22 = vshll.u32 %v5210_v52, 23  ;;  %v5400_v33 = vsel %vm5398_vm7, %v5399_v63, %v11307_v55  ;;  %v5249_v31 = vsel %vm5248_vm11, %v5247_v61, 0  ;;  %v5189_v19 = vadd.s32 %v11204_v10, %v11210_v32 }
 0x64b   : > { %vm11347_vm5 = vcmp.le.f32.partialorder %v12488_v29, 0.7853982  ;;  %v5401_v60 = vadd.s32 %v5400_v33, %v5396_v15  ;;  %v5251_v27 = vand.u32 31, %v5249_v31  ;;  %v11356_v30 = vadd.f32 %v10907_v0, %v11343_v37 }
 0x64c   : > { %6874 = vsinq.f32 %v4909_v26  ;;  %v5114_v23 = vsel %vm12215_vm4, %v5113_v34, %v5112_v16  ;;  %v11360_v20 = vadd.s32 3, %v5222_v54  ;;  %v5207_v5 = vshrl.u32 %v5189_v19, %v5205_v44 }
 0x64d   : > { %v5402_v55 = vadd.s32 536870912, %v5401_v60  ;;  %v5245_v7 = vor.u32 8388608, %v5244_v43  ;;  %v5252_v63 = vsub.s32 32, %v5251_v27  ;;  %v5206_v10 = vshll.u32 %v11275_v25, %v5204_v51 }
 0x64e   : > { %12491 = vst [vmem:[#allocation29_spill] sm:$0xff] %v11360_v20  ;;  %v5212_v32 = vor.u32 4788187, %v5211_v22  ;;  %v5254_v61 = vshll.u32 %v12238_v4, %v5251_v27  ;;  %v5448_v0 = vand.u32 2139095040, %v11334_v2  ;;  %v5257_v16 = vshll.u32 %v12440_v49, %v5251_v27  ;;  %v11371_v54 = vpop.eup %6870 }
 0x64f   : > { %v11366_v52 = vshrl.u32 %v5402_v55, 30  ;;  %v5255_v26 = vshrl.u32 %v12440_v49, %v5252_v63  ;;  %v5258_v34 = vshrl.u32 %v12441_v40, %v5252_v63  ;;  %12492 = vst [vmem:[#allocation28_spill] sm:$0xff] %v11371_v54  ;;  %v5261_v43 = vshrl.u32 %v12442_v11, %v5252_v63 }
 0x650   : > { %v5263_v44 = vshll.u32 %v12442_v11, %v5251_v27  ;;  %v5264_v25 = vshrl.u32 %v12237_v59, %v5252_v63  ;;  %v5267_v51 = vshrl.u32 %v12247_v17, %v5252_v63  ;;  %v5208_v15 = vor.u32 %v5207_v5, %v5206_v10 }
 0x651   : > { %v5404_v29 = vshll.u32 %v11366_v52, 30  ;;  %v5250_v22 = vshrl.u32 %v5249_v31, 5  ;;  %v5260_v33 = vshll.u32 %v12441_v40, %v5251_v27  ;;  %v5256_v19 = vor.u32 %v5255_v26, %v5254_v61 }
 0x652   : > { %v5259_v55 = vor.u32 %v5258_v34, %v5257_v16  ;;  %v5265_v35 = vor.u32 %v5264_v25, %v5263_v44  ;;  %v5266_v48 = vshll.u32 %v12237_v59, %v5251_v27  ;;  %v5117_v20 = vsel %vm11347_vm5, %v10952_v56, %v5114_v23 }
 0x653   : > { %v11383_v13 = vsub.s32 %v5401_v60, %v5404_v29  ;;  %v5262_v54 = vor.u32 %v5261_v43, %v5260_v33  ;;  %v11385_v38 = vshll.u32 %v5245_v7, 8  ;;  %v11387_v5 = vpop.eup %6872  ;;  %v5213_v10 = vand.u32 2147483647, %v5212_v32 }
 0x654   : > { %v5268_v31 = vor.u32 %v5267_v51, %v5266_v48  ;;  %v5449_v45 = vshrl.u32 %v5448_v0, 23  ;;  %v12493_v61 = vand.u32 2147483647, %v11334_v2  ;;  %v5215_v16 = vcvt.s32.f32 %v5208_v15 }
 0x655   : > { %v5407_v27 = vsub.s32 0, %v11383_v13  ;;  %vm5269_vm9 = vcmp.lt.s32.totalorder %v5250_v22, 1  ;;  %vm5272_vm1 = vcmp.lt.s32.totalorder %v5250_v22, 4  ;;  %v5253_v60 = vshrl.u32 %v12238_v4, %v5252_v63 }
 0x656   : > { %v5452_v26 = vand.u32 8388607, %v12493_v61  ;;  %v11392_v34 = vpop.eup %6874  ;;  %vm5271_vm14 = vcmp.lt.s32.totalorder %v5250_v22, 3  ;;  %v5277_v23 = vsel %vm5269_vm9, %v5256_v19, %v5259_v55  ;;  %v5278_v7 = vsel %vm5272_vm1, %v5265_v35, 920167782 }
 0x657   : > { %vm5343_vm12 = vcmp.lt.s32.totalorder %v11105_v14, 0  ;;  %v6393_v48 = vmin.u32 %v5407_v27, %v11383_v13  ;;  %vm5270_vm7 = vcmp.lt.s32.totalorder %v5250_v22, 2  ;;  %v5274_v32 = vsel %vm5272_vm1, %v5262_v54, 2102212464 }
 0x658   : > { %v5279_v0 = vsel %vm5271_vm14, %v5262_v54, %v5278_v7  ;;  %v5216_v43 = vmul.f32 %v5215_v16, %v5213_v10  ;;  %v5281_v25 = vsel %vm5269_vm9, %v5259_v55, %v5262_v54  ;;  %v5282_v51 = vsel %vm5272_vm1, %v5268_v31, 1326507024 }
 0x659   : > { %v5280_v44 = vsel %vm5270_vm7, %v5277_v23, %v5279_v0  ;;  %v5409_v15 = vclz %v6393_v48  ;;  %v5283_v63 = vsel %vm5271_vm14, %v5265_v35, %v5282_v51  ;;  %v5273_v61 = vsel %vm5269_vm9, %v5253_v60, %v5256_v19 }
 0x65a   : > { %v11403_v29 = vmul.u32.u64.low %v11385_v38, %v5280_v44  ;;  %v11404_v33 = vmul.u32.u64.high %v11385_v38, %v5280_v44, %v11403_v29  ;;  %v5275_v27 = vsel %vm5271_vm14, %v5259_v55, %v5274_v32  ;;  %v5284_v7 = vsel %vm5270_vm7, %v5281_v25, %v5283_v63 }
 0x65b   : > { %v6396_v10 = vadd.s32 4294967169, %v5449_v45  ;;  %6876 = vcosq.f32 %v5117_v20  ;;  %v6394_v16 = vadd.s32 4294967294, %v5409_v15  ;;  %v5427_v35 = vsub.s32 4, %v11366_v52 }
 0x65c   : > { %v11411_v54 = vmul.u32.u64.low %v11385_v38, %v5284_v7  ;;  %v11412_v31 = vmul.u32.u64.high %v11385_v38, %v5284_v7, %v11411_v54  ;;  %6878 = vsinq.f32 %v5117_v20  ;;  %v5552_v48 = vand.u32 2139095040, %v11356_v30 }
 0x65d   : > { %v5455_v23 = vadd.s32 1, %v6396_v10  ;;  %v5397_v19 = vadd.s32 %v11306_v57, %v11317_v39  ;;  %vm6395_vm11 = vcmp.lt.s32.totalorder %v6394_v16, 0  ;;  %v5276_v55 = vsel %vm5270_vm7, %v5273_v61, %v5275_v27 }
 0x65e   : > { %v5295_v45 = vadd.s32 1, %v11404_v33  ;;  %v5217_v60 = vxor.u32 2147483648, %v5216_v43  ;;  %v5412_v32 = vsel %vm6395_vm11, 0, %v6394_v16  ;;  %v5453_v0 = vor.u32 8388608, %v5452_v26 }
 0x65f   : > { %vm5456_vm9 = vcmp.gt.s32.totalorder %v5455_v23, 0  ;;  %v5413_v44 = vsub.s32 32, %v5412_v32  ;;  %v5417_v25 = vsub.s32 4294967266, %v5412_v32  ;;  %v12196_v20 = vand.u32 2147483647, %v11356_v30 }
 0x660   : > { %v5553_v51 = vshrl.u32 %v5552_v48, 23  ;;  %v11424_v15 = vsel %vm5343_vm12, %v5427_v35, %v11366_v52  ;;  %v5292_v57 = vmul.u32 %v11385_v38, %v5276_v55  ;;  %vm5294_vm1 = vc.u32 %v11412_v31, %v11403_v29 }
 0x661   : > { %v5457_v39 = vsel %vm5456_vm9, %v5455_v23, 0  ;;  %v5415_v22 = vshrl.u32 %v5397_v19, %v5413_v44  ;;  %v5418_v63 = vadd.s32 127, %v5417_v25  ;;  %v5296_v26 = vsel %vm5294_vm1, %v5295_v45, %v11404_v33 }
 0x662   : > { %v11430_v61 = vshrl.u32 %v5457_v39, 5  ;;  %v5218_v27 = vsel %vm5135_vm3, %v5217_v60, %v5216_v43  ;;  %v5414_v7 = vshll.u32 %v11383_v13, %v5412_v32  ;;  %v5297_v10 = vadd.s32 %v5296_v26, %v5292_v57 }
 0x663   : > { %v5459_v52 = vand.u32 31, %v5457_v39  ;;  %v5419_v16 = vshll.u32 %v5418_v63, 23  ;;  %v11435_v54 = vshll.u32 %v5453_v0, 8  ;;  %v6400_v38 = vadd.s32 4294967169, %v5553_v51 }
 0x664   : > { %v11439_v35 = vand.u32 8388607, %v12196_v20  ;;  %v5416_v23 = vor.u32 %v5415_v22, %v5414_v7  ;;  %v5298_v48 = vadd.s32 536870912, %v5297_v10  ;;  %vm5477_vm14 = vcmp.lt.s32.totalorder %v11430_v61, 1 }
 0x665   : > { %v5460_v33 = vsub.s32 32, %v5459_v52  ;;  %v11442_v19 = vpop.eup %6876  ;;  %v5420_v43 = vor.u32 4788187, %v5419_v16  ;;  %v5462_v13 = vshll.u32 %v12238_v4, %v5459_v52  ;;  %v5465_v55 = vshll.u32 %v12440_v49, %v5459_v52 }
 0x666   : > { %12494 = vst [vmem:[#allocation31_spill] sm:$0xff] %v11442_v19  ;;  %v5468_v45 = vshll.u32 %v12441_v40, %v5459_v52  ;;  %v11447_v60 = vpop.eup %6878  ;;  %v11449_v32 = vshrl.u32 %v5298_v48, 30  ;;  %v5471_v25 = vshll.u32 %v12442_v11, %v5459_v52  ;;  %v5474_v22 = vshll.u32 %v12237_v59, %v5459_v52 }
 0x667   : > { %12495 = vst [vmem:[#allocation16_spill] sm:$0xff] %v11447_v60  ;;  %v5463_v0 = vshrl.u32 %v12440_v49, %v5460_v33  ;;  %v5466_v44 = vshrl.u32 %v12441_v40, %v5460_v33  ;;  %v5421_v51 = vand.u32 2147483647, %v5420_v43  ;;  %v5469_v57 = vshrl.u32 %v12442_v11, %v5460_v33 }
 0x668   : > { %12496 = vst [vmem:[#allocation34_spill] sm:$0xff] %v11449_v32  ;;  %v5472_v39 = vshrl.u32 %v12237_v59, %v5460_v33  ;;  %v12497_v63 = vand.u32 2147483647, %v11105_v14  ;;  %v5300_v7 = vshll.u32 %v11449_v32, 30  ;;  %v5475_v20 = vshrl.u32 %v12247_v17, %v5460_v33 }
 0x669   : > { %v5464_v16 = vor.u32 %v5463_v0, %v5462_v13  ;;  %v5467_v48 = vor.u32 %v5466_v44, %v5465_v55  ;;  %v5423_v50 = vcvt.s32.f32 %v5416_v23  ;;  %v5470_v43 = vor.u32 %v5469_v57, %v5468_v45 }
 0x66a   : > { %vm11459_vm3 = vcmp.le.f32.partialorder %v12497_v63, 0.7853982  ;;  %v5473_v9 = vor.u32 %v5472_v39, %v5471_v25  ;;  %vm5478_vm7 = vcmp.lt.s32.totalorder %v11430_v61, 2  ;;  %v11466_v19 = vsub.s32 %v5297_v10, %v5300_v7 }
 0x66b   : > { %v5461_v52 = vshrl.u32 %v12238_v4, %v5460_v33  ;;  %v5476_v60 = vor.u32 %v5475_v20, %v5474_v22  ;;  %vm5480_vm11 = vcmp.lt.s32.totalorder %v11430_v61, 4  ;;  %vm5479_vm9 = vcmp.lt.s32.totalorder %v11430_v61, 3 }
 0x66c   : > { %v5482_v63 = vsel %vm5480_vm11, %v5470_v43, 2102212464  ;;  %v5485_v13 = vsel %vm5477_vm14, %v5464_v16, %v5467_v48  ;;  %v5486_v55 = vsel %vm5480_vm11, %v5473_v9, 920167782  ;;  %v5424_v0 = vmul.f32 %v5423_v50, %v5421_v51 }
 0x66d   : > { %v5303_v23 = vsub.s32 0, %v11466_v19  ;;  %v5487_v45 = vsel %vm5479_vm9, %v5470_v43, %v5486_v55  ;;  %v5489_v10 = vsel %vm5477_vm14, %v5467_v48, %v5470_v43  ;;  %v5490_v20 = vsel %vm5480_vm11, %v5476_v60, 1326507024 }
 0x66e   : > { %v5488_v33 = vsel %vm5478_vm7, %v5485_v13, %v5487_v45  ;;  %v5559_v44 = vadd.s32 1, %v6400_v38  ;;  %v11480_v25 = vadd.f32 %v10980_v1, %v11343_v37  ;;  %v5481_v50 = vsel %vm5477_vm14, %v5461_v52, %v5464_v16 }
 0x66f   : > { %v6389_v57 = vmin.u32 %v5303_v23, %v11466_v19  ;;  %v5483_v51 = vsel %vm5479_vm9, %v5467_v48, %v5482_v63  ;;  %v5491_v39 = vsel %vm5479_vm9, %v5473_v9, %v5490_v20  ;;  %v5557_v38 = vor.u32 8388608, %v11439_v35 }
 0x670   : > { %v5492_v22 = vsel %vm5478_vm7, %v5489_v10, %v5491_v39  ;;  %v11488_v7 = vmul.u32.u64.low %v11435_v54, %v5488_v33  ;;  %v11489_v43 = vmul.u32.u64.high %v11435_v54, %v5488_v33, %v11488_v7  ;;  %v5425_v60 = vxor.u32 2147483648, %v5424_v0 }
 0x671   : > { %v5305_v1 = vclz %v6389_v57  ;;  %v11494_v13 = vmul.u32.u64.low %v11435_v54, %v5492_v22  ;;  %v11495_v55 = vmul.u32.u64.high %v11435_v54, %v5492_v22, %v11494_v13  ;;  %v11500_v9 = vsel %vm11322_vm15, %v11059_v53, %v5218_v27 }
 0x672   : > { %v5484_v48 = vsel %vm5478_vm7, %v5481_v50, %v5483_v51  ;;  %vm5560_vm1 = vcmp.gt.s32.totalorder %v5559_v44, 0  ;;  %v5293_v35 = vadd.s32 %v11403_v29, %v11412_v31  ;;  %v11511_v23 = vadd.f32 %v11082_v58, %v11343_v37 }
 0x673   : > { %v6390_v52 = vadd.s32 4294967294, %v5305_v1  ;;  %v5561_v63 = vsel %vm5560_vm1, %v5559_v44, 0  ;;  %v5503_v12 = vadd.s32 1, %v11489_v43  ;;  %v11514_v45 = vshll.u32 %v5557_v38, 8 }
 0x674   : > { %v5563_v27 = vand.u32 31, %v5561_v63  ;;  %v12206_v10 = vand.u32 2147483647, %v11480_v25  ;;  %v11519_v61 = vsel %vm5343_vm12, %v5425_v60, %v5424_v0  ;;  %v5500_v29 = vmul.u32 %v11435_v54, %v5484_v48 }
 0x675   : > { %vm6391_vm15 = vcmp.lt.s32.totalorder %v6390_v52, 0  ;;  %vm5502_vm14 = vc.u32 %v11495_v55, %v11488_v7  ;;  %v5760_v20 = vand.u32 2139095040, %v11480_v25  ;;  %v5562_v51 = vshrl.u32 %v5561_v63, 5 }
 0x676   : > { %v5308_v31 = vsel %vm6391_vm15, 0, %v6390_v52  ;;  %v5504_v58 = vsel %vm5502_vm14, %v5503_v12, %v11489_v43  ;;  %v5564_v33 = vsub.s32 32, %v5563_v27  ;;  %v5566_v0 = vshll.u32 %v12238_v4, %v5563_v27 }
 0x677   : > { %v5309_v44 = vsub.s32 32, %v5308_v31  ;;  %v5313_v57 = vsub.s32 4294967266, %v5308_v31  ;;  %v5505_v50 = vadd.s32 %v5504_v58, %v5500_v29  ;;  %v5310_v39 = vshll.u32 %v11466_v19, %v5308_v31 }
 0x678   : > { %v5567_v22 = vshrl.u32 %v12440_v49, %v5564_v33  ;;  %v5570_v54 = vshrl.u32 %v12441_v40, %v5564_v33  ;;  %v5569_v43 = vshll.u32 %v12440_v49, %v5563_v27  ;;  %v5572_v48 = vshll.u32 %v12441_v40, %v5563_v27 }
 0x679   : > { %v5311_v38 = vshrl.u32 %v5293_v35, %v5309_v44  ;;  %v5314_v60 = vadd.s32 127, %v5313_v57  ;;  %v5506_v1 = vadd.s32 536870912, %v5505_v50  ;;  %v5573_v52 = vshrl.u32 %v12442_v11, %v5564_v33 }
 0x67a   : > { %v5568_v13 = vor.u32 %v5567_v22, %v5566_v0  ;;  %v5575_v63 = vshll.u32 %v12442_v11, %v5563_v27  ;;  %v5576_v31 = vshrl.u32 %v12237_v59, %v5564_v33  ;;  %v5571_v58 = vor.u32 %v5570_v54, %v5569_v43 }
 0x67b   : > { %v5312_v12 = vor.u32 %v5311_v38, %v5310_v39  ;;  %v5315_v19 = vshll.u32 %v5314_v60, 23  ;;  %v11534_v29 = vshrl.u32 %v5506_v1, 30  ;;  %v5574_v16 = vor.u32 %v5573_v52, %v5572_v48 }
 0x67c   : > { %v5578_v35 = vshll.u32 %v12237_v59, %v5563_v27  ;;  %v5579_v44 = vshrl.u32 %v12247_v17, %v5564_v33  ;;  %v5577_v22 = vor.u32 %v5576_v31, %v5575_v63  ;;  %v5764_v53 = vand.u32 8388607, %v12206_v10 }
 0x67d   : > { %12500 = vst [vmem:[#allocation15_spill] sm:$0xff] %v11534_v29  ;;  %v5316_v57 = vor.u32 4788187, %v5315_v19  ;;  %v5508_v0 = vshll.u32 %v11534_v29, 30  ;;  %v5565_v39 = vshrl.u32 %v12238_v4, %v5564_v33  ;;  %vm5581_vm12 = vcmp.lt.s32.totalorder %v5562_v51, 1 }
 0x67e   : > { %v5580_v38 = vor.u32 %v5579_v44, %v5578_v35  ;;  %v5761_v60 = vshrl.u32 %v5760_v20, 23  ;;  %v5319_v32 = vcvt.s32.f32 %v5312_v12  ;;  %vm5584_vm7 = vcmp.lt.s32.totalorder %v5562_v51, 4 }
 0x67f   : > { %v5317_v1 = vand.u32 2147483647, %v5316_v57  ;;  %v11543_v54 = vsub.s32 %v5505_v50, %v5508_v0  ;;  %vm5583_vm11 = vcmp.lt.s32.totalorder %v5562_v51, 3  ;;  %v5586_v27 = vsel %vm5584_vm7, %v5574_v16, 2102212464 }
 0x680   : > { %v5589_v43 = vsel %vm5581_vm12, %v5568_v13, %v5571_v58  ;;  %v5590_v48 = vsel %vm5584_vm7, %v5577_v22, 920167782  ;;  %vm5582_vm9 = vcmp.lt.s32.totalorder %v5562_v51, 2  ;;  %v5593_v19 = vsel %vm5581_vm12, %v5571_v58, %v5574_v16 }
 0x681   : > { %v5511_v52 = vsub.s32 0, %v11543_v54  ;;  %v5591_v63 = vsel %vm5583_vm11, %v5574_v16, %v5590_v48  ;;  %vm12212_vm1 = vcmp.lt.s32.totalorder %v11234_v24, 0  ;;  %v5585_v33 = vsel %vm5581_vm12, %v5565_v39, %v5568_v13 }
 0x682   : > { %v5592_v20 = vsel %vm5582_vm9, %v5589_v43, %v5591_v63  ;;  %v5594_v31 = vsel %vm5584_vm7, %v5580_v38, 1326507024  ;;  %v6408_v12 = vadd.s32 4294967169, %v5761_v60  ;;  %v5320_v50 = vmul.f32 %v5319_v32, %v5317_v1 }
 0x683   : > { %v6397_v35 = vmin.u32 %v5511_v52, %v11543_v54  ;;  %v5587_v44 = vsel %vm5583_vm11, %v5571_v58, %v5586_v27  ;;  %v5595_v57 = vsel %vm5583_vm11, %v5577_v22, %v5594_v31  ;;  %v11562_v13 = vsel %vm11459_vm3, %v11105_v14, %v11519_v61 }
 0x684   : > { %v5596_v0 = vsel %vm5582_vm9, %v5593_v19, %v5595_v57  ;;  %v11554_v10 = vmul.u32.u64.low %v11514_v45, %v5592_v20  ;;  %v11555_v48 = vmul.u32.u64.high %v11514_v45, %v5592_v20, %v11554_v10  ;;  %v5767_v16 = vadd.s32 1, %v6408_v12  ;;  %v12556_v19 = vld [vmem:[#allocation15_spill] sm:$0xff] }
 0x685   : > { %v5513_v32 = vclz %v6397_v35  ;;  %v11565_v39 = vmul.u32.u64.low %v11514_v45, %v5596_v0  ;;  %v11566_v58 = vmul.u32.u64.high %v11514_v45, %v5596_v0, %v11565_v39  ;;  %6880 = vcosq.f32 %v11500_v9 }
 0x686   : > { %v5588_v22 = vsel %vm5582_vm9, %v5585_v33, %v5587_v44  ;;  %v5765_v38 = vor.u32 8388608, %v5764_v53  ;;  %vm5768_vm15 = vcmp.gt.s32.totalorder %v5767_v16, 0  ;;  %6882 = vsinq.f32 %v11500_v9 }
 0x687   : > { %v5321_v60 = vxor.u32 2147483648, %v5320_v50  ;;  %v6398_v1 = vadd.s32 4294967294, %v5513_v32  ;;  %v5769_v27 = vsel %vm5768_vm15, %v5767_v16, 0  ;;  %6884 = vcosq.f32 %v11562_v13 }
 0x688   : > { %v5607_v61 = vadd.s32 1, %v11555_v48  ;;  %v5771_v43 = vand.u32 31, %v5769_v27  ;;  %v12501_v63 = vand.u32 2147483647, %v11234_v24  ;;  %v5501_v53 = vadd.s32 %v11488_v7, %v11495_v55 }
 0x689   : > { %vm6399_vm12 = vcmp.lt.s32.totalorder %v6398_v1, 0  ;;  %v5604_v9 = vmul.u32 %v11514_v45, %v5588_v22  ;;  %vm5606_vm7 = vc.u32 %v11566_v58, %v11554_v10  ;;  %v11586_v31 = vshll.u32 %v5765_v38, 8 }
 0x68a   : > { %vm11576_vm14 = vcmp.le.f32.partialorder %v12501_v63, 0.7853982  ;;  %v5516_v51 = vsel %vm6399_vm12, 0, %v6398_v1  ;;  %v5608_v33 = vsel %vm5606_vm7, %v5607_v61, %v11555_v48  ;;  %v5772_v20 = vsub.s32 32, %v5771_v43 }
 0x68b   : > { %v5322_v12 = vsel %vm12212_vm1, %v5321_v60, %v5320_v50  ;;  %v5517_v35 = vsub.s32 32, %v5516_v51  ;;  %v5521_v44 = vsub.s32 4294967266, %v5516_v51  ;;  %v5609_v57 = vadd.s32 %v5608_v33, %v5604_v9 }
 0x68c   : > { %v5518_v7 = vshll.u32 %v11543_v54, %v5516_v51  ;;  %v11591_v55 = vshrl.u32 %v5769_v27, 5  ;;  %v5775_v45 = vshrl.u32 %v12440_v49, %v5772_v20  ;;  %v5656_v0 = vand.u32 2139095040, %v11511_v23 }
 0x68d   : > { %v5519_v16 = vshrl.u32 %v5501_v53, %v5517_v35  ;;  %v5522_v32 = vadd.s32 127, %v5521_v44  ;;  %v5610_v48 = vadd.s32 536870912, %v5609_v57  ;;  %v5778_v39 = vshrl.u32 %v12441_v40, %v5772_v20 }
 0x68e   : > { %v5774_v22 = vshll.u32 %v12238_v4, %v5771_v43  ;;  %v5777_v50 = vshll.u32 %v12440_v49, %v5771_v43  ;;  %v5780_v38 = vshll.u32 %v12441_v40, %v5771_v43  ;;  %v5781_v60 = vshrl.u32 %v12442_v11, %v5772_v20 }
 0x68f   : > { %v5520_v54 = vor.u32 %v5519_v16, %v5518_v7  ;;  %v5523_v1 = vshll.u32 %v5522_v32, 23  ;;  %v11600_v27 = vshrl.u32 %v5610_v48, 30  ;;  %v5784_v61 = vshrl.u32 %v12237_v59, %v5772_v20  ;;  %v11603_v63 = vpop.eup %6880 }
 0x690   : > { %12504 = vst [vmem:[#allocation33_spill] sm:$0xff] %v11603_v63  ;;  %vm12214_vm11 = vcmp.lt.s32.totalorder %v11334_v2, 0  ;;  %v5776_v53 = vor.u32 %v5775_v45, %v5774_v22  ;;  %v5783_v9 = vshll.u32 %v12442_v11, %v5771_v43  ;;  %v5786_v51 = vshll.u32 %v12237_v59, %v5771_v43  ;;  %v11609_v35 = vpop.eup %6882 }
 0x691   : > { %v5787_v33 = vshrl.u32 %v12247_v17, %v5772_v20  ;;  %12505 = vst [vmem:[#allocation36_spill] sm:$0xff] %v11609_v35  ;;  %v5524_v44 = vor.u32 4788187, %v5523_v1  ;;  %v5612_v7 = vshll.u32 %v11600_v27, 30  ;;  %v5779_v16 = vor.u32 %v5778_v39, %v5777_v50  ;;  %v11612_v48 = vpop.eup %6884 }
 0x692   : > { %v5782_v32 = vor.u32 %v5781_v60, %v5780_v38  ;;  %12506 = vst [vmem:[#allocation30_spill] sm:$0xff] %v11612_v48  ;;  %v5325_v52 = vsel %vm11576_vm14, %v11234_v24, %v5322_v12  ;;  %v5785_v45 = vor.u32 %v5784_v61, %v5783_v9  ;;  %v5657_v14 = vshrl.u32 %v5656_v0, 23 }
 0x693   : > { %v5788_v22 = vor.u32 %v5787_v33, %v5786_v51  ;;  %v12507_v43 = vand.u32 2147483647, %v11334_v2  ;;  %v12508_v63 = vmov 0  ;;  %v5525_v1 = vand.u32 2147483647, %v5524_v44 }
 0x694   : > { %v5527_v35 = vcvt.s32.f32 %v5520_v54  ;;  %v11623_v29 = vsub.s32 %v5609_v57, %v5612_v7  ;;  %v5773_v39 = vshrl.u32 %v12238_v4, %v5772_v20  ;;  %vm5789_vm15 = vcmp.lt.s32.totalorder %v11591_v55, 1 }
 0x695   : > { %vm11619_vm9 = vcmp.le.f32.partialorder %v12507_v43, 0.7853982  ;;  %vm5790_vm12 = vcmp.lt.s32.totalorder %v11591_v55, 2  ;;  %vm5791_vm7 = vcmp.lt.s32.totalorder %v11591_v55, 3  ;;  %vm5792_vm1 = vcmp.lt.s32.totalorder %v11591_v55, 4 }
 0x696   : > { %v12509_v63 = vsel %vm11619_vm9, 4294967295, %v12508_v63  ;;  %v5528_v12 = vmul.f32 %v5527_v35, %v5525_v1  ;;  %v5615_v0 = vsub.s32 0, %v11623_v29  ;;  %v5794_v50 = vsel %vm5792_vm1, %v5782_v32, 2102212464 }
 0x697   : > { %12510 = vst [vmem:[#allocation35_spill] sm:$0xff] %v12509_v63  ;;  %v5797_v38 = vsel %vm5789_vm15, %v5776_v53, %v5779_v16  ;;  %v5793_v60 = vsel %vm5789_vm15, %v5773_v39, %v5776_v53  ;;  %v5798_v61 = vsel %vm5792_vm1, %v5785_v45, 920167782  ;;  %v5801_v54 = vsel %vm5789_vm15, %v5779_v16, %v5782_v32 }
 0x698   : > { %v5802_v57 = vsel %vm5792_vm1, %v5788_v22, 1326507024  ;;  %v5529_v9 = vxor.u32 2147483648, %v5528_v12  ;;  %v6401_v20 = vmin.u32 %v5615_v0, %v11623_v29  ;;  %v5799_v51 = vsel %vm5791_vm7, %v5782_v32, %v5798_v61 }
 0x699   : > { %v5803_v33 = vsel %vm5791_vm7, %v5785_v45, %v5802_v57  ;;  %v5795_v44 = vsel %vm5791_vm7, %v5779_v16, %v5794_v50  ;;  %v5800_v7 = vsel %vm5790_vm12, %v5797_v38, %v5799_v51  ;;  %v6404_v43 = vadd.s32 4294967169, %v5657_v14 }
 0x69a   : > { %v5804_v35 = vsel %vm5790_vm12, %v5801_v54, %v5803_v33  ;;  %v5530_v1 = vsel %vm12214_vm11, %v5529_v9, %v5528_v12  ;;  %v5617_v53 = vclz %v6401_v20  ;;  %6886 = vsinq.f32 %v11562_v13 }
 0x69b   : > { %v11639_v39 = vmul.u32.u64.low %v11586_v31, %v5804_v35  ;;  %v11640_v22 = vmul.u32.u64.high %v11586_v31, %v5804_v35, %v11639_v39  ;;  %v12511_v16 = vsel %vm11459_vm3, 0, %v11424_v15  ;;  %6888 = vcosq.f32 %v5325_v52 }
 0x69c   : > { %v11647_v32 = vadd.s32 3, %v12511_v16  ;;  %v11650_v45 = vmul.u32.u64.low %v11586_v31, %v5800_v7  ;;  %v11651_v0 = vmul.u32.u64.high %v11586_v31, %v5800_v7, %v11650_v45  ;;  %v6402_v14 = vadd.s32 4294967294, %v5617_v53 }
 0x69d   : > { %v5635_v12 = vsub.s32 4, %v11600_v27  ;;  %v5663_v50 = vadd.s32 1, %v6404_v43  ;;  %6890 = vsinq.f32 %v5325_v52  ;;  %v11658_v13 = vsel %vm11619_vm9, %v11334_v2, %v5530_v1 }
 0x69e   : > { %12512 = vst [vmem:[#allocation21_spill] sm:$0xff] %v11647_v32  ;;  %vm5551_vm3 = vcmp.lt.s32.totalorder %v11356_v30, 0  ;;  %v5796_v15 = vsel %vm5790_vm12, %v5793_v60, %v5795_v44  ;;  %vm6403_vm1 = vcmp.lt.s32.totalorder %v6402_v14, 0  ;;  %vm5814_vm15 = vc.u32 %v11640_v22, %v11650_v45 }
 0x69f   : > { %v12513_v26 = vand.u32 2147483647, %v11511_v23  ;;  %vm5664_vm7 = vcmp.gt.s32.totalorder %v5663_v50, 0  ;;  %v5605_v52 = vadd.s32 %v11554_v10, %v11566_v58  ;;  %v5620_v61 = vsel %vm6403_vm1, 0, %v6402_v14 }
 0x6a0   : > { %v5815_v54 = vadd.s32 1, %v11651_v0  ;;  %v5665_v57 = vsel %vm5664_vm7, %v5663_v50, 0  ;;  %v5621_v9 = vsub.s32 32, %v5620_v61  ;;  %v5625_v20 = vsub.s32 4294967266, %v5620_v61 }
 0x6a1   : > { %v5660_v38 = vand.u32 8388607, %v12513_v26  ;;  %v11673_v55 = vsel %vm5551_vm3, %v5635_v12, %v11600_v27  ;;  %v5812_v60 = vmul.u32 %v11586_v31, %v5796_v15  ;;  %6892 = vcosq.f32 %v11658_v13 }
 0x6a2   : > { %v5816_v51 = vsel %vm5814_vm15, %v5815_v54, %v11651_v0  ;;  %v5667_v33 = vand.u32 31, %v5665_v57  ;;  %v11680_v10 = vadd.f32 %v11141_v8, %v11343_v37  ;;  %v5623_v58 = vshrl.u32 %v5605_v52, %v5621_v9 }
 0x6a3   : > { %v5626_v44 = vadd.s32 127, %v5625_v20  ;;  %v5817_v7 = vadd.s32 %v5816_v51, %v5812_v60  ;;  %v5661_v35 = vor.u32 8388608, %v5660_v38  ;;  %v5622_v43 = vshll.u32 %v11623_v29, %v5620_v61  ;;  %v12562_v20 = vld [vmem:[#allocation33_spill] sm:$0xff] }
 0x6a4   : > { %v5666_v1 = vshrl.u32 %v5665_v57, 5  ;;  %v5668_v27 = vsub.s32 32, %v5667_v33  ;;  %v5670_v16 = vshll.u32 %v12238_v4, %v5667_v33  ;;  %v5676_v0 = vshll.u32 %v12441_v40, %v5667_v33  ;;  %v11686_v14 = vpop.eup %6886 }
 0x6a5   : > { %v5627_v31 = vshll.u32 %v5626_v44, 23  ;;  %v5818_v39 = vadd.s32 536870912, %v5817_v7  ;;  %12514 = vst [vmem:[#allocation37_spill] sm:$0xff] %v11686_v14  ;;  %v5624_v8 = vor.u32 %v5623_v58, %v5622_v43  ;;  %v11691_v29 = vpop.eup %6888  ;;  %vm5759_vm12 = vcmp.lt.s32.totalorder %v11480_v25, 0 }
 0x6a6   : > { %v5671_v37 = vshrl.u32 %v12440_v49, %v5668_v27  ;;  %v5674_v12 = vshrl.u32 %v12441_v40, %v5668_v27  ;;  %v5677_v50 = vshrl.u32 %v12442_v11, %v5668_v27  ;;  %v5673_v38 = vshll.u32 %v12440_v49, %v5667_v33 }
 0x6a7   : > { %v5628_v15 = vor.u32 4788187, %v5627_v31  ;;  %v5819_v26 = vshrl.u32 %v5818_v39, 30  ;;  %v5680_v52 = vshrl.u32 %v12237_v59, %v5668_v27  ;;  %v11696_v61 = vpop.eup %6890  ;;  %v5679_v57 = vshll.u32 %v12442_v11, %v5667_v33 }
 0x6a8   : > { %v5678_v54 = vor.u32 %v5677_v50, %v5676_v0  ;;  %v11699_v9 = vshll.u32 %v5661_v35, 8  ;;  %v12515_v60 = vand.u32 2147483647, %v11356_v30  ;;  %v5672_v43 = vor.u32 %v5671_v37, %v5670_v16 }
 0x6a9   : > { %v5629_v58 = vand.u32 2147483647, %v5628_v15  ;;  %v5820_v44 = vshll.u32 %v5819_v26, 30  ;;  %v5675_v31 = vor.u32 %v5674_v12, %v5673_v38  ;;  %v5631_v39 = vcvt.s32.f32 %v5624_v8 }
 0x6aa   : > { %vm11704_vm1 = vcmp.le.f32.partialorder %v12515_v60, 0.7853982  ;;  %v5681_v53 = vor.u32 %v5680_v52, %v5679_v57  ;;  %v5682_v0 = vshll.u32 %v12237_v59, %v5667_v33  ;;  %v5683_v50 = vshrl.u32 %v12247_v17, %v5668_v27 }
 0x6ab   : > { %v12518_v35 = vand.u32 2147483647, %v11480_v25  ;;  %v11716_v60 = vsub.s32 %v5817_v7, %v5820_v44  ;;  %v5669_v48 = vshrl.u32 %v12238_v4, %v5668_v27  ;;  %vm5685_vm7 = vcmp.lt.s32.totalorder %v5666_v1, 1  ;;  %v11719_v16 = vpop.eup %6892 }
 0x6ac   : > { %vm5688_vm11 = vcmp.lt.s32.totalorder %v5666_v1, 4  ;;  %12521 = vst [vmem:[#allocation38_spill] sm:$0xff] %v11719_v16  ;;  %v5632_v8 = vmul.f32 %v5631_v39, %v5629_v58  ;;  %v5843_v37 = vsub.s32 4, %v5819_v26  ;;  %v5684_v12 = vor.u32 %v5683_v50, %v5682_v0 }
 0x6ad   : > { %vm11712_vm15 = vcmp.le.f32.partialorder %v12518_v35, 0.7853982  ;;  %v5690_v33 = vsel %vm5688_vm11, %v5678_v54, 2102212464  ;;  %v5823_v15 = vsub.s32 0, %v11716_v60  ;;  %vm5687_vm4 = vcmp.lt.s32.totalorder %v5666_v1, 3 }
 0x6ae   : > { %v5689_v38 = vsel %vm5685_vm7, %v5669_v48, %v5672_v43  ;;  %v5693_v52 = vsel %vm5685_vm7, %v5672_v43, %v5675_v31  ;;  %v5691_v57 = vsel %vm5687_vm4, %v5675_v31, %v5690_v33  ;;  %v5694_v35 = vsel %vm5688_vm11, %v5681_v53, 920167782 }
 0x6af   : > { %v5697_v14 = vsel %vm5685_vm7, %v5675_v31, %v5678_v54  ;;  %v5698_v7 = vsel %vm5688_vm11, %v5684_v12, 1326507024  ;;  %v6409_v44 = vmin.u32 %v5823_v15, %v11716_v60  ;;  %vm5686_vm10 = vcmp.lt.s32.totalorder %v5666_v1, 2 }
 0x6b0   : > { %v5695_v27 = vsel %vm5687_vm4, %v5678_v54, %v5694_v35  ;;  %v5699_v32 = vsel %vm5687_vm4, %v5681_v53, %v5698_v7  ;;  %v5633_v63 = vxor.u32 2147483648, %v5632_v8  ;;  %v11725_v58 = vsel %vm5759_vm12, %v5843_v37, %v5819_v26 }
 0x6b1   : > { %v5696_v39 = vsel %vm5686_vm10, %v5693_v52, %v5695_v27  ;;  %v5700_v0 = vsel %vm5686_vm10, %v5697_v14, %v5699_v32  ;;  %v5825_v50 = vclz %v6409_v44  ;;  %v5692_v16 = vsel %vm5686_vm10, %v5689_v38, %v5691_v57 }
 0x6b2   : > { %v11728_v48 = vmul.u32.u64.low %v11699_v9, %v5700_v0  ;;  %v11729_v43 = vmul.u32.u64.high %v11699_v9, %v5700_v0, %v11728_v48  ;;  %6894 = vsinq.f32 %v11658_v13  ;;  %v5638_v1 = vsel %vm11704_vm1, 0, %v11673_v55 }
 0x6b3   : > { %v11736_v53 = vmul.u32.u64.low %v11699_v9, %v5696_v39  ;;  %v11737_v54 = vmul.u32.u64.high %v11699_v9, %v5696_v39, %v11736_v53  ;;  %v5813_v26 = vadd.s32 %v11650_v45, %v11640_v22  ;;  %v6410_v32 = vadd.s32 4294967294, %v5825_v50 }
 0x6b4   : > { %v5864_v14 = vand.u32 2139095040, %v11680_v10  ;;  %v12522_v31 = vsub.s32 4, %v10771_v18  ;;  %v5634_v37 = vsel %vm5551_vm3, %v5633_v63, %v5632_v8  ;;  %v5846_v12 = vsel %vm11712_vm15, 0, %v11725_v58 }
 0x6b5   : > { %v5708_v33 = vmul.u32 %v11699_v9, %v5692_v16  ;;  %vm6411_vm10 = vcmp.lt.s32.totalorder %v6410_v32, 0  ;;  %vm5710_vm4 = vc.u32 %v11729_v43, %v11736_v53  ;;  %v12523_v15 = vand.u32 2147483647, %v11680_v10 }
 0x6b6   : > { %v4492_v13 = vsel %vm4407_vm6, %v12522_v31, %v10771_v18  ;;  %v5865_v45 = vshrl.u32 %v5864_v14, 23  ;;  %v5828_v18 = vsel %vm6411_vm10, 0, %v6410_v32  ;;  %v5711_v52 = vadd.s32 1, %v11737_v54 }
 0x6b7   : > { %v4494_v22 = vsel %vm10963_vm8, 0, %v4492_v13  ;;  %v5868_v38 = vand.u32 8388607, %v12523_v15  ;;  %v4907_v8 = vsub.s32 4, %v11116_v42  ;;  %v5829_v57 = vsub.s32 32, %v5828_v18 }
 0x6b8   : > { %v4498_v63 = vadd.s32 3, %v4494_v22  ;;  %v5833_v35 = vsub.s32 4294967266, %v5828_v18  ;;  %v6412_v7 = vadd.s32 4294967169, %v5865_v45  ;;  %v4502_v9 = vxor.u32 2147483648, %v11120_v3 }
 0x6b9   : > { %v5830_v62 = vshll.u32 %v11716_v60, %v5828_v18  ;;  %v5712_v16 = vsel %vm5710_vm4, %v5711_v52, %v11737_v54  ;;  %v4505_v27 = vxor.u32 2147483648, %v11114_v41  ;;  %v5831_v39 = vshrl.u32 %v5813_v26, %v5829_v57 }
 0x6ba   : > { %v4499_v44 = vand.u32 3, %v4498_v63  ;;  %v5834_v0 = vadd.s32 127, %v5833_v35  ;;  %v5713_v50 = vadd.s32 %v5712_v16, %v5708_v33  ;;  %v5871_v48 = vadd.s32 1, %v6412_v7 }
 0x6bb   : > { %v5869_v32 = vor.u32 8388608, %v5868_v38  ;;  %v4908_v14 = vsel %vm4823_vm2, %v4907_v8, %v11116_v42  ;;  %v5832_v31 = vor.u32 %v5831_v39, %v5830_v62  ;;  %v11772_v54 = vsel %vm11704_vm1, %v11356_v30, %v5634_v37 }
 0x6bc   : > { %vm4501_vm6 = vcmp.eq.s32.totalorder %v4499_v44, 0  ;;  %vm4504_vm8 = vcmp.eq.s32.totalorder %v4499_v44, 2  ;;  %v5835_v13 = vshll.u32 %v5834_v0, 23  ;;  %v5714_v22 = vadd.s32 536870912, %v5713_v50  ;;  %v11767_v60 = vpop.eup %6894 }
 0x6bd   : > { %vm5872_vm11 = vcmp.gt.s32.totalorder %v5871_v48, 0  ;;  %v4503_v33 = vsel %vm4501_vm6, %v11114_v41, %v4502_v9  ;;  %v4506_v45 = vsel %vm4504_vm8, %v4505_v27, %v11120_v3  ;;  %v11777_v38 = vadd.s32 %v11736_v53, %v11729_v43 }
 0x6be   : > { %v5873_v26 = vsel %vm5872_vm11, %v5871_v48, 0  ;;  %v5836_v15 = vor.u32 4788187, %v5835_v13  ;;  %v11779_v42 = vshrl.u32 %v5714_v22, 30  ;;  %v4910_v18 = vsel %vm11289_vm0, 0, %v4908_v14 }
 0x6bf   : > { %v5839_v52 = vcvt.s32.f32 %v5832_v31  ;;  %v5875_v63 = vand.u32 31, %v5873_v26  ;;  %v11783_v8 = vshll.u32 %v5869_v32, 8  ;;  %vm4500_vm2 = vcmp.lt.s32.totalorder %v4499_v44, 2 }
 0x6c0   : > { %v5837_v37 = vand.u32 2147483647, %v5836_v15  ;;  %v5716_v57 = vshll.u32 %v11779_v42, 30  ;;  %v5874_v41 = vshrl.u32 %v5873_v26, 5  ;;  %v11786_v35 = vsel %vm4500_vm2, %v4503_v33, %v4506_v45 }
 0x6c1   : > { %v5876_v3 = vsub.s32 32, %v5875_v63  ;;  %v5878_v43 = vshll.u32 %v12238_v4, %v5875_v63  ;;  %v4914_v53 = vadd.s32 3, %v4910_v18  ;;  %v4918_v7 = vxor.u32 2147483648, %v11392_v34 }
 0x6c2   : > { %v5840_v9 = vmul.f32 %v5839_v52, %v5837_v37  ;;  %v11790_v28 = vsub.s32 %v5713_v50, %v5716_v57  ;;  %v5881_v62 = vshll.u32 %v12440_v49, %v5875_v63  ;;  %v5884_v16 = vshll.u32 %v12441_v40, %v5875_v63 }
 0x6c3   : > { %v5879_v44 = vshrl.u32 %v12440_v49, %v5876_v3  ;;  %v5882_v27 = vshrl.u32 %v12441_v40, %v5876_v3  ;;  %v5885_v39 = vshrl.u32 %v12442_v11, %v5876_v3  ;;  %v5887_v0 = vshll.u32 %v12442_v11, %v5875_v63 }
 0x6c4   : > { %v5719_v48 = vsub.s32 0, %v11790_v28  ;;  %v5888_v32 = vshrl.u32 %v12237_v59, %v5876_v3  ;;  %v5890_v14 = vshll.u32 %v12237_v59, %v5875_v63  ;;  %v5891_v50 = vshrl.u32 %v12247_v17, %v5876_v3 }
 0x6c5   : > { %v5877_v31 = vshrl.u32 %v12238_v4, %v5876_v3  ;;  %v5880_v13 = vor.u32 %v5879_v44, %v5878_v43  ;;  %v5883_v22 = vor.u32 %v5882_v27, %v5881_v62  ;;  %v5886_v26 = vor.u32 %v5885_v39, %v5884_v16 }
 0x6c6   : > { %v6405_v49 = vmin.u32 %v5719_v48, %v11790_v28  ;;  %v5889_v40 = vor.u32 %v5888_v32, %v5887_v0  ;;  %v5892_v33 = vor.u32 %v5891_v50, %v5890_v14  ;;  %vm5893_vm0 = vcmp.lt.s32.totalorder %v5874_v41, 1 }
 0x6c7   : > { %v5841_v45 = vxor.u32 2147483648, %v5840_v9  ;;  %vm5896_vm3 = vcmp.lt.s32.totalorder %v5874_v41, 4  ;;  %v5897_v11 = vsel %vm5893_vm0, %v5877_v31, %v5880_v13  ;;  %v5901_v15 = vsel %vm5893_vm0, %v5880_v13, %v5883_v22 }
 0x6c8   : > { %v5721_v18 = vclz %v6405_v49  ;;  %vm5895_vm7 = vcmp.lt.s32.totalorder %v5874_v41, 3  ;;  %v5898_v59 = vsel %vm5896_vm3, %v5886_v26, 2102212464  ;;  %v5902_v17 = vsel %vm5896_vm3, %v5889_v40, 920167782 }
 0x6c9   : > { %vm4497_vm10 = vweird.f32 %v10569_v36  ;;  %vm5894_vm4 = vcmp.lt.s32.totalorder %v5874_v41, 2  ;;  %v5899_v4 = vsel %vm5895_vm7, %v5883_v22, %v5898_v59  ;;  %v5903_v52 = vsel %vm5895_vm7, %v5886_v26, %v5902_v17 }
 0x6ca   : > { %v5905_v63 = vsel %vm5893_vm0, %v5883_v22, %v5886_v26  ;;  %vm4913_vm6 = vweird.f32 %v10808_v47  ;;  %v6406_v37 = vadd.s32 4294967294, %v5721_v18  ;;  %v5900_v57 = vsel %vm5894_vm4, %v5897_v11, %v5899_v4  ;;  %v12524_v26 = vld [vmem:[#allocation20_spill] sm:$0xff] }
 0x6cb   : > { %v5904_v3 = vsel %vm5894_vm4, %v5901_v15, %v5903_v52  ;;  %v5906_v43 = vsel %vm5896_vm3, %v5892_v33, 1326507024  ;;  %v5842_v62 = vsel %vm5759_vm12, %v5841_v45, %v5840_v9  ;;  %v5916_v0 = vmul.u32 %v11783_v8, %v5900_v57  ;;  %v12525_v11 = vld [vmem:[#allocation24_spill] sm:$0xff] }
 0x6cc   : > { %v5907_v16 = vsel %vm5895_vm7, %v5889_v40, %v5906_v43  ;;  %v11812_v44 = vmul.u32.u64.low %v11783_v8, %v5904_v3  ;;  %v11813_v27 = vmul.u32.u64.high %v11783_v8, %v5904_v3, %v11812_v44  ;;  %vm6407_vm8 = vcmp.lt.s32.totalorder %v6406_v37, 0 }
 0x6cd   : > { %v5908_v39 = vsel %vm5894_vm4, %v5905_v63, %v5907_v16  ;;  %v4915_v48 = vand.u32 3, %v4914_v53  ;;  %v5724_v32 = vsel %vm6407_vm8, 0, %v6406_v37  ;;  %v4921_v41 = vxor.u32 2147483648, %v11387_v5 }
 0x6ce   : > { %v11817_v14 = vmul.u32.u64.low %v11783_v8, %v5908_v39  ;;  %v11818_v50 = vmul.u32.u64.high %v11783_v8, %v5908_v39, %v11817_v14  ;;  %v5725_v31 = vsub.s32 32, %v5724_v32  ;;  %v5726_v9 = vshll.u32 %v11790_v28, %v5724_v32 }
 0x6cf   : > { %v5729_v13 = vsub.s32 4294967266, %v5724_v32  ;;  %vm4916_vm12 = vcmp.lt.s32.totalorder %v4915_v48, 2  ;;  %v5919_v22 = vadd.s32 1, %v11813_v27  ;;  %vm4917_vm11 = vcmp.eq.s32.totalorder %v4915_v48, 0  ;;  %v12533_v32 = vld [vmem:[#allocation12_spill] sm:$0xff] }
 0x6d0   : > { %vm4920_vm2 = vcmp.eq.s32.totalorder %v4915_v48, 2  ;;  %v4699_v49 = vsub.s32 4, %v12524_v26  ;;  %v5727_v53 = vshrl.u32 %v11777_v38, %v5725_v31  ;;  %v4919_v33 = vsel %vm4917_vm11, %v11387_v5, %v4918_v7 }
 0x6d1   : > { %v5730_v40 = vadd.s32 127, %v5729_v13  ;;  %v4922_v8 = vsel %vm4920_vm2, %v4921_v41, %v11392_v34  ;;  %vm5918_vm0 = vc.u32 %v11818_v50, %v11812_v44  ;;  %v4508_v28 = vsel %vm4497_vm10, nan, %v11786_v35 }
 0x6d2   : > { %v4923_v45 = vsel %vm4916_vm12, %v4919_v33, %v4922_v8  ;;  %vm12526_vm3 = vcmp.lt.s32.totalorder %v12525_v11, 0  ;;  %v5728_v18 = vor.u32 %v5727_v53, %v5726_v9  ;;  %v5920_v38 = vsel %vm5918_vm0, %v5919_v22, %v11813_v27  ;;  %v12534_v53 = vld [vmem:[#allocation16_spill] sm:$0xff]  ;;  %v12535_v33 = vld [vmem:[#allocation31_spill] sm:$0xff] }
 0x6d3   : > { %v4700_v15 = vsel %vm12526_vm3, %v4699_v49, %v12524_v26  ;;  %v5731_v59 = vshll.u32 %v5730_v40, 23  ;;  %v4924_v5 = vsel %vm4913_vm6, nan, %v4923_v45  ;;  %6896 = vcosq.f32 %v11772_v54 }
 0x6d4   : > { %vm5655_vm7 = vcmp.lt.s32.totalorder %v11511_v23, 0  ;;  %v5921_v34 = vadd.s32 %v5920_v38, %v5916_v0  ;;  %v6456_v7 = vpack.c.bf16 %v4924_v5, %v4508_v28  ;;  %v4702_v35 = vsel %vm11131_vm13, 0, %v4700_v15  ;;  %v12536_v28 = vld [vmem:[#allocation14_spill] sm:$0xff] }
 0x6d5   : > { %6898 = vsinq.f32 %v11772_v54  ;;  %v11845_v17 = vsel %vm11712_vm15, %v11480_v25, %v5842_v62  ;;  %v5732_v4 = vor.u32 4788187, %v5731_v59  ;;  %v4706_v52 = vadd.s32 3, %v4702_v35  ;;  %v12531_v54 = vld [vmem:[#allocation17_spill] sm:$0xff]  ;;  %v12537_v15 = vld [vmem:[#allocation6_spill] sm:$0xff] }
 0x6d6   : > { %v12528_v47 = vand.u32 2147483647, %v11511_v23  ;;  %v5922_v37 = vadd.s32 536870912, %v5921_v34  ;;  %6457 = vmatprep.subr.bf16.mxu0 %v6456_v7  ;;  %v4710_v57 = vxor.u32 2147483648, %v11273_v46  ;;  %v4713_v3 = vxor.u32 2147483648, %v11259_v6 }
 0x6d7   : > { %v5115_v43 = vsub.s32 4, %v12531_v54  ;;  %v5733_v16 = vand.u32 2147483647, %v5732_v4  ;;  %v5735_v27 = vcvt.s32.f32 %v5728_v18  ;;  %v11857_v62 = vadd.s32 %v11812_v44, %v11818_v50 }
 0x6d8   : > { %vm11849_vm10 = vcmp.le.f32.partialorder %v12528_v47, 0.7853982  ;;  %v4707_v39 = vand.u32 3, %v4706_v52  ;;  %v11859_v0 = vshrl.u32 %v5922_v37, 30  ;;  %vm4705_vm13 = vweird.f32 %v12525_v11  ;;  %v12539_v37 = vld [vmem:[#allocation27_spill] sm:$0xff] }
 0x6d9   : > { %vm12532_vm4 = vcmp.lt.s32.totalorder %v10952_v56, 0  ;;  %v4395_v14 = vand.u32 3, %v12533_v32  ;;  %v5736_v41 = vmul.f32 %v5735_v27, %v5733_v16  ;;  %vm5121_vm11 = vweird.f32 %v10952_v56  ;;  %v12541_v27 = vld [vmem:[#allocation22_spill] sm:$0xff]  ;;  %v12543_v56 = vld [vmem:[#allocation32_spill] sm:$0xff] }
 0x6da   : > { %v5116_v48 = vsel %vm12532_vm4, %v5115_v43, %v12531_v54  ;;  %vm4708_vm6 = vcmp.lt.s32.totalorder %v4707_v39, 2  ;;  %vm4709_vm8 = vcmp.eq.s32.totalorder %v4707_v39, 0  ;;  %vm4712_vm12 = vcmp.eq.s32.totalorder %v4707_v39, 2  ;;  %v12542_v39 = vld [vmem:[#allocation9_spill] sm:$0xff] }
 0x6db   : > { %v5924_v31 = vshll.u32 %v11859_v0, 30  ;;  %v4711_v44 = vsel %vm4709_vm8, %v11259_v6, %v4710_v57  ;;  %v4714_v50 = vsel %vm4712_vm12, %v4713_v3, %v11273_v46  ;;  %v5118_v9 = vsel %vm11347_vm5, 0, %v5116_v48  ;;  %v12540_v3 = vld [vmem:[#allocation25_spill] sm:$0xff] }
 0x6dc   : > { %v5737_v13 = vxor.u32 2147483648, %v5736_v41  ;;  %v4715_v22 = vsel %vm4708_vm6, %v4711_v44, %v4714_v50  ;;  %v5122_v26 = vadd.s32 3, %v5118_v9  ;;  %v5126_v40 = vxor.u32 2147483648, %v12534_v53 }
 0x6dd   : > { %v11872_v49 = vsub.s32 %v5921_v34, %v5924_v31  ;;  %v5129_v8 = vxor.u32 2147483648, %v12535_v33  ;;  %v4398_v45 = vxor.u32 2147483648, %v12536_v28  ;;  %vm4393_vm2 = vweird.f32 %v12537_v15  ;;  %v11881_v59 = vpop.eup %6896 }
 0x6de   : > { %v5738_v6 = vsel %vm5655_vm7, %v5737_v13, %v5736_v41  ;;  %v5123_v46 = vand.u32 3, %v5122_v26  ;;  %vm4396_vm5 = vcmp.lt.s32.totalorder %v4395_v14, 2  ;;  %v4401_v18 = vxor.u32 2147483648, %v12538_v21  ;;  %v12544_v13 = vld [vmem:[#allocation11_spill] sm:$0xff] }
 0x6df   : > { %v5927_v38 = vsub.s32 0, %v11872_v49  ;;  %v4716_v5 = vsel %vm4705_vm13, nan, %v4715_v22  ;;  %vm4397_vm0 = vcmp.eq.s32.totalorder %v4395_v14, 0  ;;  %vm4400_vm3 = vcmp.eq.s32.totalorder %v4395_v14, 2  ;;  %v11886_v34 = vpop.eup %6898 }
 0x6e0   : > { %v5741_v7 = vsel %vm11849_vm10, %v11511_v23, %v5738_v6  ;;  %vm5125_vm4 = vcmp.eq.s32.totalorder %v5123_v46, 0  ;;  %vm5128_vm6 = vcmp.eq.s32.totalorder %v5123_v46, 2  ;;  %v4399_v36 = vsel %vm4397_vm0, %v12538_v21, %v4398_v45  ;;  %v12547_v45 = vld [vmem:[#allocation19_spill] sm:$0xff] }
 0x6e1   : > { %v6413_v35 = vmin.u32 %v5927_v38, %v11872_v49  ;;  %vm5124_vm8 = vcmp.lt.s32.totalorder %v5123_v46, 2  ;;  %v5127_v4 = vsel %vm5125_vm4, %v12535_v33, %v5126_v40  ;;  %v5130_v11 = vsel %vm5128_vm6, %v5129_v8, %v12534_v53  ;;  %v12545_v53 = vld [vmem:[#allocation10_spill] sm:$0xff] }
 0x6e2   : > { %v5131_v52 = vsel %vm5124_vm8, %v5127_v4, %v5130_v11  ;;  %v4402_v47 = vsel %vm4400_vm3, %v4401_v18, %v12536_v28  ;;  %v4811_v57 = vand.u32 3, %v12539_v37  ;;  %v4814_v54 = vxor.u32 2147483648, %v12540_v3  ;;  %v12546_v28 = vld [vmem:[#allocation5_spill] sm:$0xff]  ;;  %v12550_v37 = vld [vmem:[#allocation34_spill] sm:$0xff] }
 0x6e3   : > { %v5929_v43 = vclz %v6413_v35  ;;  %v5132_v16 = vsel %vm5121_vm11, nan, %v5131_v52  ;;  %vm4809_vm13 = vweird.f32 %v12541_v27  ;;  %v4817_v48 = vxor.u32 2147483648, %v12542_v39  ;;  %v12548_v35 = vld [vmem:[#allocation28_spill] sm:$0xff]  ;;  %v12549_v52 = vld [vmem:[#allocation18_spill] sm:$0xff] }
 0x6e4   : > { %6900 = vcosq.f32 %v5741_v7  ;;  %v6464_v32 = vpack.c.bf16 %v5132_v16, %v4716_v5  ;;  %v4403_v41 = vsel %vm4396_vm5, %v4399_v36, %v4402_v47  ;;  %vm4813_vm12 = vcmp.eq.s32.totalorder %v4811_v57, 0 }
 0x6e5   : > { %6902 = vsinq.f32 %v5741_v7  ;;  %v6414_v31 = vadd.s32 4294967294, %v5929_v43  ;;  %v4815_v44 = vsel %vm4813_vm12, %v12542_v39, %v4814_v54  ;;  %vm4816_vm0 = vcmp.eq.s32.totalorder %v4811_v57, 2 }
 0x6e6   : > { %6465 = vmatprep.subr.bf16.mxu1 %v6464_v32  ;;  %vm4812_vm3 = vcmp.lt.s32.totalorder %v4811_v57, 2  ;;  %v4818_v50 = vsel %vm4816_vm0, %v4817_v48, %v12540_v3  ;;  %v4603_v9 = vand.u32 3, %v12543_v56  ;;  %v4606_v22 = vxor.u32 2147483648, %v12544_v13 }
 0x6e7   : > { %vm6415_vm11 = vcmp.lt.s32.totalorder %v6414_v31, 0  ;;  %v4404_v26 = vsel %vm4393_vm2, nan, %v4403_v41  ;;  %v4819_v14 = vsel %vm4812_vm3, %v4815_v44, %v4818_v50  ;;  %v4609_v40 = vxor.u32 2147483648, %v12545_v53 }
 0x6e8   : > { %v5932_v33 = vsel %vm6415_vm11, 0, %v6414_v31  ;;  %v4820_v8 = vsel %vm4809_vm13, nan, %v4819_v14  ;;  %vm4601_vm5 = vweird.f32 %v12546_v28  ;;  %v5019_v6 = vand.u32 3, %v12547_v45 }
 0x6e9   : > { %v5933_v46 = vsub.s32 32, %v5932_v33  ;;  %v5937_v21 = vsub.s32 4294967266, %v5932_v33  ;;  %v6458_v18 = vpack.c.bf16 %v4820_v8, %v4404_v26  ;;  %vm4605_vm4 = vcmp.eq.s32.totalorder %v4603_v9, 0 }
 0x6ea   : > { %v5934_v38 = vshll.u32 %v11872_v49, %v5932_v33  ;;  %vm4604_vm6 = vcmp.lt.s32.totalorder %v4603_v9, 2  ;;  %v4607_v15 = vsel %vm4605_vm4, %v12545_v53, %v4606_v22  ;;  %vm4608_vm2 = vcmp.eq.s32.totalorder %v4603_v9, 2 }
 0x6eb   : > { %v5935_v5 = vshrl.u32 %v11857_v62, %v5933_v46  ;;  %v5938_v7 = vadd.s32 127, %v5937_v21  ;;  %6459 = vmatpush1.bf16.msra.mxu0 %v6458_v18  ;;  %v4610_v36 = vsel %vm4608_vm2, %v4609_v40, %v12544_v13  ;;  %v5022_v4 = vxor.u32 2147483648, %v12548_v35  ;;  %v12551_v62 = vld [vmem:[#allocation7_spill] sm:$0xff] }
 0x6ec   : > { %v4611_v11 = vsel %vm4604_vm6, %v4607_v15, %v4610_v36  ;;  %vm5021_vm8 = vcmp.eq.s32.totalorder %v5019_v6, 0  ;;  %v5025_v47 = vxor.u32 2147483648, %v12549_v52  ;;  %v5323_v57 = vsub.s32 4, %v12550_v37 }
 0x6ed   : > { %v5936_v3 = vor.u32 %v5935_v5, %v5934_v38  ;;  %v5939_v49 = vshll.u32 %v5938_v7, 23  ;;  %v5023_v54 = vsel %vm5021_vm8, %v12549_v52, %v5022_v4  ;;  %vm5024_vm13 = vcmp.eq.s32.totalorder %v5019_v6, 2 }
 0x6ee   : > { %v6901_v43 = vpop.eup %6900  ;;  %vm5863_vm12 = vcmp.lt.s32.totalorder %v11680_v10, 0  ;;  %vm5017_vm0 = vweird.f32 %v12551_v62  ;;  %vm5020_vm3 = vcmp.lt.s32.totalorder %v5019_v6, 2  ;;  %v5026_v16 = vsel %vm5024_vm13, %v5025_v47, %v12548_v35 }
 0x6ef   : > { %vm12552_vm11 = vcmp.lt.s32.totalorder %v11234_v24, 0  ;;  %v6903_v39 = vpop.eup %6902  ;;  %v12553_v48 = vand.u32 2147483647, %v11680_v10  ;;  %v5940_v41 = vor.u32 4788187, %v5939_v49  ;;  %v4612_v31 = vsel %vm4601_vm5, nan, %v4611_v11 }
 0x6f0   : > { %v5324_v27 = vsel %vm12552_vm11, %v5323_v57, %v12550_v37  ;;  %v5027_v44 = vsel %vm5020_vm3, %v5023_v54, %v5026_v16  ;;  %v5334_v13 = vxor.u32 2147483648, %v11696_v61  ;;  %v5739_v22 = vsub.s32 4, %v11779_v42  ;;  %v12559_v49 = vld [vmem:[#allocation38_spill] sm:$0xff] }
 0x6f1   : > { %vm11930_vm4 = vcmp.le.f32.partialorder %v12553_v48, 0.7853982  ;;  %v5326_v50 = vsel %vm11576_vm14, 0, %v5324_v27  ;;  %v5028_v56 = vsel %vm5017_vm0, nan, %v5027_v44  ;;  %v5941_v26 = vand.u32 2147483647, %v5940_v41 }
 0x6f2   : > { %v5330_v9 = vadd.s32 3, %v5326_v50  ;;  %v5943_v14 = vcvt.s32.f32 %v5936_v3  ;;  %v6466_v53 = vpack.c.bf16 %v5028_v56, %v4612_v31  ;;  %v5337_v40 = vxor.u32 2147483648, %v11691_v29  ;;  %v12563_v56 = vld [vmem:[#allocation23_spill] sm:$0xff] }
 0x6f3   : > { %vm5329_vm6 = vweird.f32 %v11234_v24  ;;  %v5740_v8 = vsel %vm5655_vm7, %v5739_v22, %v11779_v42  ;;  %v5531_v28 = vsub.s32 4, %v12556_v19  ;;  %vm5745_vm14 = vweird.f32 %v11511_v23 }
 0x6f4   : > { %v5331_v33 = vand.u32 3, %v5330_v9  ;;  %v5944_v45 = vmul.f32 %v5943_v14, %v5941_v26  ;;  %6467 = vmatpush1.bf16.msra.mxu1 %v6466_v53  ;;  %v5742_v6 = vsel %vm11849_vm10, 0, %v5740_v8  ;;  %v5750_v46 = vxor.u32 2147483648, %v6903_v39  ;;  %v12564_v14 = vld [vmem:[#allocation21_spill] sm:$0xff] }
 0x6f5   : > { %v5746_v21 = vadd.s32 3, %v5742_v6  ;;  %v5753_v18 = vxor.u32 2147483648, %v6901_v43  ;;  %vm12557_vm7 = vcmp.lt.s32.totalorder %v11334_v2, 0  ;;  %v5542_v35 = vxor.u32 2147483648, %v11767_v60  ;;  %v12565_v8 = vld [vmem:[#allocation37_spill] sm:$0xff] }
 0x6f6   : > { %vm5333_vm5 = vcmp.eq.s32.totalorder %v5331_v33, 0  ;;  %vm5336_vm2 = vcmp.eq.s32.totalorder %v5331_v33, 2  ;;  %v5945_v38 = vxor.u32 2147483648, %v5944_v45  ;;  %v5532_v42 = vsel %vm12557_vm7, %v5531_v28, %v12556_v19  ;;  %v12566_v28 = vld [vmem:[#allocation30_spill] sm:$0xff] }
 0x6f7   : > { %v5335_v15 = vsel %vm5333_vm5, %v11691_v29, %v5334_v13  ;;  %v5338_v5 = vsel %vm5336_vm2, %v5337_v40, %v11696_v61  ;;  %vm5332_vm8 = vcmp.lt.s32.totalorder %v5331_v33, 2  ;;  %v5747_v7 = vand.u32 3, %v5746_v21 }
 0x6f8   : > { %v5534_v36 = vsel %vm11619_vm9, 0, %v5532_v42  ;;  %v5946_v4 = vsel %vm5863_vm12, %v5945_v38, %v5944_v45  ;;  %v5339_v11 = vsel %vm5332_vm8, %v5335_v15, %v5338_v5  ;;  %v5947_v29 = vsub.s32 4, %v11859_v0 }
 0x6f9   : > { %v5538_v52 = vadd.s32 3, %v5534_v36  ;;  %v5949_v61 = vsel %vm11930_vm4, %v11680_v10, %v5946_v4  ;;  %vm5748_vm10 = vcmp.lt.s32.totalorder %v5747_v7, 2  ;;  %vm5749_vm13 = vcmp.eq.s32.totalorder %v5747_v7, 0 }
 0x6fa   : > { %vm5752_vm0 = vcmp.eq.s32.totalorder %v5747_v7, 2  ;;  %6904 = vcosq.f32 %v5949_v61  ;;  %v5751_v47 = vsel %vm5749_vm13, %v6901_v43, %v5750_v46  ;;  %v5545_v54 = vxor.u32 2147483648, %v12559_v49 }
 0x6fb   : > { %v5754_v37 = vsel %vm5752_vm0, %v5753_v18, %v6903_v39  ;;  %v5539_v57 = vand.u32 3, %v5538_v52  ;;  %6906 = vsinq.f32 %v5949_v61  ;;  %v5948_v62 = vsel %vm5863_vm12, %v5947_v29, %v11859_v0 }
 0x6fc   : > { %v5755_v3 = vsel %vm5748_vm10, %v5751_v47, %v5754_v37  ;;  %v5642_v16 = vadd.s32 3, %v5638_v1  ;;  %6908 = vsinq.f32 %v11845_v17  ;;  %v5340_v43 = vsel %vm5329_vm6, nan, %v5339_v11  ;;  %v12560_v1 = vld [vmem:[#allocation29_spill] sm:$0xff] }
 0x6fd   : > { %v5756_v27 = vsel %vm5745_vm14, nan, %v5755_v3  ;;  %6910 = vcosq.f32 %v11845_v17  ;;  %v5850_v0 = vadd.s32 3, %v5846_v12  ;;  %v5950_v55 = vsel %vm11930_vm4, 0, %v5948_v62  ;;  %v12561_v17 = vld [vmem:[#allocation36_spill] sm:$0xff]  ;;  %v5965_v47 = vld [vmem:[%s12075_s7] sm:$0x7]  ;;  %v5970_v62 = vpop.permute.xlu0 %5969 }
 0x6fe   : > { %v6460_v39 = vpack.c.bf16 %v5756_v27, %v5340_v43  ;;  %vm5541_vm9 = vcmp.eq.s32.totalorder %v5539_v57, 0  ;;  %vm5544_vm1 = vcmp.eq.s32.totalorder %v5539_v57, 2  ;;  %v5954_v51 = vadd.s32 3, %v5950_v55 }
 0x6ff   : > { %v5227_v24 = vand.u32 3, %v12560_v1  ;;  %v5543_v23 = vsel %vm5541_vm9, %v12559_v49, %v5542_v35  ;;  %v5546_v48 = vsel %vm5544_vm1, %v5545_v54, %v11767_v60  ;;  %v5230_v41 = vxor.u32 2147483648, %v12561_v17 }
 0x700   : > { %6461 = vmatprep.subr.bf16.mxu0 %v6460_v39  ;;  %v5233_v31 = vxor.u32 2147483648, %v12562_v20  ;;  %vm5540_vm15 = vcmp.lt.s32.totalorder %v5539_v57, 2  ;;  %v5955_v58 = vand.u32 3, %v5954_v51  ;;  %vm5537_vm11 = vweird.f32 %v11334_v2  ;;  %v12567_v57 = vld [vmem:[#allocation13_spill] sm:$0xff] }
 0x701   : > { %vm5229_vm12 = vcmp.eq.s32.totalorder %v5227_v24, 0  ;;  %vm5232_vm3 = vcmp.eq.s32.totalorder %v5227_v24, 2  ;;  %vm5953_vm4 = vweird.f32 %v11680_v10  ;;  %v5643_v44 = vand.u32 3, %v5642_v16 }
 0x702   : > { %v5231_v12 = vsel %vm5229_vm12, %v12562_v20, %v5230_v41  ;;  %v5234_v32 = vsel %vm5232_vm3, %v5233_v31, %v12561_v17  ;;  %v5646_v50 = vxor.u32 2147483648, %v11886_v34  ;;  %v5547_v60 = vsel %vm5540_vm15, %v5543_v23, %v5546_v48 }
 0x703   : > { %vm5225_vm6 = vweird.f32 %v12563_v56  ;;  %vm5228_vm14 = vcmp.lt.s32.totalorder %v5227_v24, 2  ;;  %vm5641_vm5 = vweird.f32 %v11356_v30  ;;  %vm5956_vm2 = vcmp.lt.s32.totalorder %v5955_v58, 2 }
 0x704   : > { %vm5957_vm7 = vcmp.eq.s32.totalorder %v5955_v58, 0  ;;  %vm5960_vm8 = vcmp.eq.s32.totalorder %v5955_v58, 2  ;;  %vm5645_vm10 = vcmp.eq.s32.totalorder %v5643_v44, 0  ;;  %v6905_v9 = vpop.eup %6904  ;;  %v5235_v13 = vsel %vm5228_vm14, %v5231_v12, %v5234_v32 }
 0x705   : > { %v5647_v22 = vsel %vm5645_vm10, %v11881_v59, %v5646_v50  ;;  %v5649_v26 = vxor.u32 2147483648, %v11881_v59  ;;  %v5435_v53 = vand.u32 3, %v12564_v14  ;;  %v6907_v40 = vpop.eup %6906  ;;  %v5961_v33 = vxor.u32 2147483648, %v6905_v9 }
 0x706   : > { %vm5648_vm13 = vcmp.eq.s32.totalorder %v5643_v44, 2  ;;  %v5438_v19 = vxor.u32 2147483648, %v12565_v8  ;;  %v5441_v45 = vxor.u32 2147483648, %v12566_v28  ;;  %v6909_v6 = vpop.eup %6908  ;;  %v5958_v46 = vxor.u32 2147483648, %v6907_v40 }
 0x707   : > { %vm5644_vm0 = vcmp.lt.s32.totalorder %v5643_v44, 2  ;;  %v5650_v21 = vsel %vm5648_vm13, %v5649_v26, %v11886_v34  ;;  %vm5437_vm9 = vcmp.eq.s32.totalorder %v5435_v53, 0  ;;  %v6911_v18 = vpop.eup %6910  ;;  %v5962_v38 = vsel %vm5960_vm8, %v5961_v33, %v6907_v40 }
 0x708   : > { %v5236_v59 = vsel %vm5225_vm6, nan, %v5235_v13  ;;  %v5651_v15 = vsel %vm5644_vm0, %v5647_v22, %v5650_v21  ;;  %v5439_v5 = vsel %vm5437_vm9, %v12566_v28, %v5438_v19  ;;  %v5959_v42 = vsel %vm5957_vm7, %v6905_v9, %v5958_v46 }
 0x709   : > { %v5652_v7 = vsel %vm5641_vm5, nan, %v5651_v15  ;;  %vm5440_vm1 = vcmp.eq.s32.totalorder %v5435_v53, 2  ;;  %v5851_v63 = vand.u32 3, %v5850_v0  ;;  %v5963_v36 = vsel %vm5956_vm2, %v5959_v42, %v5962_v38 }
 0x70a   : > { %v6462_v34 = vpack.c.bf16 %v5652_v7, %v5236_v59  ;;  %v5442_v35 = vsel %vm5440_vm1, %v5441_v45, %v12565_v8  ;;  %v5854_v4 = vxor.u32 2147483648, %v6909_v6  ;;  %v5548_v11 = vsel %vm5537_vm11, nan, %v5547_v60 }
 0x70b   : > { %v5964_v52 = vsel %vm5953_vm4, nan, %v5963_v36  ;;  %vm5853_vm15 = vcmp.eq.s32.totalorder %v5851_v63, 0  ;;  %vm5436_vm12 = vcmp.lt.s32.totalorder %v5435_v53, 2  ;;  %v5857_v61 = vxor.u32 2147483648, %v6911_v18 }
 0x70c   : > { %v6468_v29 = vpack.c.bf16 %v5964_v52, %v5548_v11  ;;  %6463 = vmatpush1.bf16.msra.mxu0 %v6462_v34  ;;  %v5855_v30 = vsel %vm5853_vm15, %v6911_v18, %v5854_v4  ;;  %v5443_v37 = vsel %vm5436_vm12, %v5439_v5, %v5442_v35  ;;  %vm5856_vm3 = vcmp.eq.s32.totalorder %v5851_v63, 2 }
 0x70d   : > { %vm5852_vm6 = vcmp.lt.s32.totalorder %v5851_v63, 2  ;;  %v5858_v2 = vsel %vm5856_vm3, %v5857_v61, %v6909_v6  ;;  %vm5433_vm11 = vweird.f32 %v12567_v57  ;;  %vm5849_vm4 = vweird.f32 %v11480_v25 }
 0x70e   : > { %6469 = vmatprep.subr.bf16.mxu1 %v6468_v29  ;;  %v5859_v10 = vsel %vm5852_vm6, %v5855_v30, %v5858_v2  ;;  %vm12568_vm14 = vcmask 261120   ;;  %v5444_v3 = vsel %vm5433_vm11, nan, %v5443_v37 }
 0x70f   : > { %6416 = vmatmul.mubr.msk.f32.vlgmr.msra.gmra.mrb[16].mxu0 %vm12568_vm14, %v5965_v47  ;;  %v5860_v49 = vsel %vm5849_vm4, nan, %v5859_v10  ;;  %vm12569_vm5 = vmmov %vm12568_vm14 }
 0x710   : > { %v6470_v54 = vpack.c.bf16 %v5860_v49, %v5444_v3 }
 0x712   : > { %6471 = vmatpush1.bf16.msra.mxu1 %v6470_v54 }
 0x715   : > { %6417 = vmatmul.mubr.msk.f32.vlgmr.msra.gmra.mrb[16].mxu1 %vm12569_vm5, %v5965_v47 }
 0x7e2   : > { %v6041_v16 = vpop.f32.mrb[16].mxu0 }
 0x7e3   : > { %v6042_v43 = vadd.f32 %v6041_v16, %v5970_v62  ;;  %v6043_v27 = vpop.f32.mrb[17].mxu0 }
 0x7e4   : > { %v6044_v0 = vadd.f32 %v6043_v27, %v5970_v62 }
 0x7e6   : > { %v6121_v39 = vcombine.low %v6042_v43, %v6044_v0 }
 0x7e8   : > { %6125 = vst [vmem:[%s326_s17] sm:$0x77] %v6121_v39  ;;  %v6112_v25 = vpop.f32.mrb[16].mxu1 }
 0x7e9   : > { %v6113_v55 = vadd.f32 %v6112_v25, %v5970_v62  ;;  %v6114_v51 = vpop.f32.mrb[17].mxu1 }
 0x7ea   : > { %v6115_v1 = vadd.f32 %v6114_v51, %v5970_v62 }
 0x7ec   : > { %v6122_v24 = vcombine.low %v6113_v55, %v6115_v1 }
 0x7ee   : > { %6126 = vst [vmem:[%s326_s17 + $0x8] sm:$0x77] %v6122_v24 }
 0x7ef   : > { %6925 = shalt.err (!%p6922_p3)
}
 0x7f0   : > { %s6926_s14 = scalar_lea.hbm %s12026_s25, 256  ;;  %s6930_s21 = scalar_lea.hbm %s12077_s9, 1024 }
 0x7f1   : > { %p6927_p4 = scmp.ne.s32.totalorder %s12026_s25, %s6926_s14  ;;  %p6931_p9 = scmp.lt.u32.totalorder %s12026_s25, %s12077_s9 }
 0x7f2   : > { %p6932_p10 = scmp.lt.u32.totalorder %s6930_s21, %s6926_s14  ;;  %p6934_p12 = scmp.lt.u32.totalorder %s6926_s14, %s12026_s25 }
 0x7f3   : > { %p6928_p7 = pnand %p6927_p4, %p7074_p5 }
 0x7f4   : > { %p6933_p11 = por %p6932_p10, %p6931_p9 }
 0x7f5   : > { %p6929_p8 = pneg %p6928_p7 }
 0x7f6   : > { %p6935_p13 = por %p6934_p12, %p6933_p11 }
 0x7f8   : > { %p6936_p0 = pnand %p6935_p13, %p6929_p8 }
 0x7fa   : > { %6939 = shalt.err (!%p6936_p0)
}
 0x7fb   : > { %6664 = dma.vmem_to_hbm [thread:$0]  (%p7074_p5), %s12028_s22, 256, %s12026_s25, %s6128_s26  }
 0x7fc PF: > { %p6670_p1 = scmp.ge.s32.totalorder %s6974_s12, 2  ;;  %s6154_s27 = sand.u32 1, %s6962_s30  }
 0x7fd   : > { %s6155_s13 = scalar_lea.sflag [#allocation3], %s6154_s27 }
 0x7fe   : > { %p6667_p2 = pnand %p6670_p1, %p7078_p6 }
 0x800   : > { %6957 = dma.done.wait (!%p6667_p2), %s6155_s13, 256  }
 0x801   : > { %6959 = vsyncadd (!%p6667_p2), %s6155_s13, 4294967040  ;;  %p19_p3 = scmp.ge.s32.totalorder %s7061_s15, 6   ;;  %s12570_s30 = smov %s6966_s10 }
 0x802   : > { %s12571_s10 = smov %s6970_s11  ;;  %s12572_s11 = smov %s7072_s18 }
 0x803   : > { %s12573_s12 = smov %s7061_s15  ;;  %21 = sbr.rel (!%p19_p3) target bundleno = 3 (0x3), region = 91 }
 0x80a   :  { %6160 = vsyncpa [#allocation3], 1 }
 0x80b   :  { %6162 = vsyncpa [#allocation3 + $0x1], 1 }

</bundles_post_ra>
